<compile_context>
chip_gen: v5e
topology: v5e:2x2
jax: 0.10.0
libtpu: 0.0.40
codegen_flags: <defaults>
</compile_context>

<pallas_src>
import functools
import math

import jax
import jax.numpy as jnp
from jax.experimental import pallas as pl
from jax.experimental.pallas import tpu as pltpu

LANE = 128


def _round_up(x, m):
    return ((x + m - 1) // m) * m


# ----------------------------------------------------------------------------
# Fused Pallas kernel: full RK4 integration of (y, logp) for one row tile.
# ----------------------------------------------------------------------------
def _make_rk4_kernel(n_layers, n_steps, t_final):
    h_step = float(t_final) / float(n_steps)
    half_h = 0.5 * h_step

    def kernel(*refs):
        y_ref, e_ref, cond_ref, logx_ref = refs[:4]
        p_refs = refs[4:4 + 7 * n_layers]
        y_out_ref = refs[4 + 7 * n_layers]
        logp_out_ref = refs[5 + 7 * n_layers]

        y = y_ref[...]
        e = e_ref[...]
        cond = cond_ref[...]
        e_bf = e.astype(jnp.bfloat16)

        # Load every weight once; hoist all y-independent work out of the
        # RK4 stage loop (context projections are constant across all stages
        # and steps of the integration).
        Ws, b_rows, wg_ts, wb_ts, cond_g, cond_b = [], [], [], [], [], []
        for l in range(n_layers):
            (w_r, b_r, wgt_r, wgc_r, bg_r, wbt_r, wbc_r) = p_refs[7 * l:7 * l + 7]
            Ws.append(w_r[...])                      # (d_in_p, d_out_p) bf16
            b_rows.append(b_r[...])                  # (1, d_out_p) f32
            wg_ts.append(wgt_r[...])                 # (1, d_out_p) f32
            wb_ts.append(wbt_r[...])                 # (1, d_out_p) f32
            cond_g.append(jnp.dot(cond, wgc_r[...],
                                  preferred_element_type=jnp.float32)
                          + bg_r[...])
            cond_b.append(jnp.dot(cond, wbc_r[...],
                                  preferred_element_type=jnp.float32))

        # Gate / effective-bias cache keyed by integer half-step index j
        # (t = j * half_h), so k2/k3 and adjacent-step boundaries share work.
        gate_cache = {}

        def gates_at(j):
            if j not in gate_cache:
                t = j * half_h
                gs, beffs = [], []
                for l in range(n_layers):
                    g = jax.nn.sigmoid(cond_g[l] + t * wg_ts[l])
                    # (h @ W + b)*g + hb  ==  (h @ W)*g + (b*g + hb)
                    beff = b_rows[l] * g + cond_b[l] + t * wb_ts[l]
                    gs.append(g)
                    beffs.append(beff)
                gate_cache[j] = (gs, beffs)
            return gate_cache[j]

        def odefunc(y_, j):
            gs, beffs = gates_at(j)
            h = y_          # value path
            dh = None       # tangent path (JVP w.r.t. y in direction e)
            for l in range(n_layers):
                w = Ws[l]
                h_lin = jnp.dot(h.astype(jnp.bfloat16), w,
                                preferred_element_type=jnp.float32)
                d_in = e_bf if dh is None else dh.astype(jnp.bfloat16)
                dh_lin = jnp.dot(d_in, w, preferred_element_type=jnp.float32)
                h_new = h_lin * gs[l] + beffs[l]     # ConcatSquashLinear
                dh_new = dh_lin * gs[l]              # its JVP (gate/bias ⟂ y)
                if l < n_layers - 1:
                    a = jnp.tanh(h_new)
                    dh = (1.0 - a * a) * dh_new
                    h = a
                else:
                    h, dh = h_new, dh_new
            # Hutchinson divergence estimate per row: sum_i e_i * (J e)_i
            div = jnp.sum(e * dh, axis=-1, keepdims=True)
            return h, div

        logp = logx_ref[...]
        for s in range(n_steps):                     # fully unrolled RK4
            j0 = 2 * s
            k1y, k1d = odefunc(y, j0)
            k2y, k2d = odefunc(y + half_h * k1y, j0 + 1)
            k3y, k3d = odefunc(y + half_h * k2y, j0 + 1)
            k4y, k4d = odefunc(y + h_step * k3y, j0 + 2)
            y = y + (h_step / 6.0) * (k1y + 2.0 * k2y + 2.0 * k3y + k4y)
            logp = logp - (h_step / 6.0) * (k1d + 2.0 * k2d + 2.0 * k3d + k4d)

        y_out_ref[...] = y
        logp_out_ref[...] = logp

    return kernel


# ----------------------------------------------------------------------------
# Wrapper: pad to lane/tile alignment, one pallas_call for the whole CNF.
# ----------------------------------------------------------------------------
def cnf_forward(embs, ref_zc, logx, e, flat_params, *, n_layers, d_pad,
                t_final=0.5, n_steps=4, tile_m=256):
    m, d = embs.shape
    c = ref_zc.shape[1]
    tile = min(tile_m, _round_up(m, 8))
    m_pad = _round_up(m, tile)

    def pad2(x, rows, cols):
        return jnp.pad(x.astype(jnp.float32),
                       ((0, rows - x.shape[0]), (0, cols - x.shape[1])))

    y_p = pad2(embs, m_pad, d_pad)
    e_p = pad2(e, m_pad, d_pad)
    cond_p = pad2(ref_zc, m_pad, c)
    logx_p = pad2(logx, m_pad, 1)

    kernel = _make_rk4_kernel(n_layers, n_steps, t_final)

    def row_spec(width):
        return pl.BlockSpec((tile, width), lambda i: (i, 0))

    # Constant index_map -> weights fetched once, resident across the M grid.
    w_specs = [pl.BlockSpec(p.shape, lambda i: (0, 0)) for p in flat_params]

    y_out, logp_out = pl.pallas_call(
        kernel,
        out_shape=(jax.ShapeDtypeStruct((m_pad, d_pad), jnp.float32),
                   jax.ShapeDtypeStruct((m_pad, 1), jnp.float32)),
        grid=(m_pad // tile,),
        in_specs=[row_spec(d_pad), row_spec(d_pad), row_spec(c), row_spec(1)]
                 + w_specs,
        out_specs=(row_spec(d_pad), row_spec(1)),
        compiler_params=pltpu.CompilerParams(
            dimension_semantics=("parallel",),
            vmem_limit_bytes=32 * 1024 * 1024),
    )(y_p, e_p, cond_p, logx_p, *flat_params)

    return y_out[:m, :d], logp_out[:m, :]


# ----------------------------------------------------------------------------
# Parameter construction (deterministic, nn.Linear-style uniform init)
# ----------------------------------------------------------------------------
def init_cnf_params(key, num_latent, dims, num_cond):
    hidden = [int(x) for x in dims.split('-')]
    layer_dims = list(zip([num_latent] + hidden, hidden + [num_latent]))
    ctx_dim = 1 + num_cond  # [t, cond]
    params = []
    for (d_in, d_out) in layer_dims:
        key, k1, k2, k3, k4, k5 = jax.random.split(key, 6)
        lim_x = 1.0 / math.sqrt(d_in)
        lim_c = 1.0 / math.sqrt(ctx_dim)
        w = jax.random.uniform(k1, (d_in, d_out), jnp.float32, -lim_x, lim_x)
        b = jax.random.uniform(k2, (1, d_out), jnp.float32, -lim_x, lim_x)
        wg = jax.random.uniform(k3, (ctx_dim, d_out), jnp.float32, -lim_c, lim_c)
        bg = jax.random.uniform(k4, (1, d_out), jnp.float32, -lim_c, lim_c)
        wb = jax.random.uniform(k5, (ctx_dim, d_out), jnp.float32, -lim_c, lim_c)
        params.append((w, b, wg, bg, wb))
    return params


def pack_params(params, lane=LANE):
    """Zero-pad feature dims to lane width, split ctx weights into the t row
    and the cond rows, and cast the main weight to bf16 for the MXU.  Zero
    padding keeps the math exact (padded features stay zero through layers)."""
    flat = []
    for (w, b, wg, bg, wb) in params:
        d_in, d_out = w.shape
        din_p, dout_p = _round_up(d_in, lane), _round_up(d_out, lane)

        def padc(x):
            return jnp.pad(x, ((0, 0), (0, dout_p - x.shape[1])))

        w_p = jnp.pad(w, ((0, din_p - d_in), (0, dout_p - d_out)))
        flat.extend([
            w_p.astype(jnp.bfloat16),     # w        (din_p, dout_p) bf16
            padc(b),                      # b        (1, dout_p)     f32
            padc(wg[0:1, :]),             # wg_t     (1, dout_p)     f32
            padc(wg[1:, :]),              # wg_cond  (num_cond, dout_p) f32
            padc(bg),                     # bg       (1, dout_p)     f32
            padc(wb[0:1, :]),             # wb_t     (1, dout_p)     f32
            padc(wb[1:, :]),              # wb_cond  (num_cond, dout_p) f32
        ])
    return flat


class GraphFlow:
    """JAX/Pallas port of the PyTorch GraphFlow module (forward pass)."""

    def __init__(self, num_latent, num_node, dims='64-64-64', num_cond=2,
                 key=jax.random.PRNGKey(0)):
        k_params, k_e = jax.random.split(key)
        self.num_latent = num_latent
        self.num_node = num_node
        raw_params = init_cnf_params(k_params, num_latent, dims, num_cond)
        self.n_layers = len(raw_params)
        self.d_pad = _round_up(num_latent, LANE)
        self.flat_params = pack_params(raw_params)
        # Fixed Rademacher probe key for the Hutchinson divergence estimator.
        self._e_key = k_e
        self._fwd = jax.jit(functools.partial(
            cnf_forward, n_layers=self.n_layers, d_pad=self.d_pad))

    def __call__(self, embs, ref_zc, logx):
        orig_ndim = embs.ndim
        if orig_ndim == 3:
            b, n, d = embs.shape
            embs2 = embs.reshape(b * n, d)
            cond2 = ref_zc.reshape(b * n, -1)
            logx2 = logx.reshape(b * n, 1)
        else:
            embs2 = embs
            cond2 = ref_zc
            logx2 = logx.reshape(-1, 1)
        e = (jax.random.bernoulli(self._e_key, 0.5, embs2.shape)
             .astype(jnp.float32) * 2.0 - 1.0)
        y, logp = self._fwd(embs2, cond2, logx2, e, self.flat_params)
        if orig_ndim == 3:
            y = y.reshape(b, n, d)
            logp = logp.reshape(b, n, 1)
        return y, logp


if __name__ == "__main__":
    key = jax.random.PRNGKey(0)
    k_x, k_c, k_m = jax.random.split(key, 3)

    # Small shapes consistent with the module: num_node rows of num_latent
    # features, num_cond conditioning dims per node, log-density column.
    num_node, num_latent, num_cond = 16, 32, 2
    embs = jax.random.normal(k_x, (num_node, num_latent), jnp.float32)
    ref_zc = jax.random.normal(k_c, (num_node, num_cond), jnp.float32)
    logx = jnp.zeros((num_node, 1), jnp.float32)

    model = GraphFlow(num_latent=num_latent, num_node=num_node,
                      dims='64-64-64', num_cond=num_cond, key=k_m)
    approx21, delta_log_p2 = model(embs, ref_zc, logx)
    jax.block_until_ready((approx21, delta_log_p2))

    assert approx21.shape == (num_node, num_latent)
    assert delta_log_p2.shape == (num_node, 1)
    assert bool(jnp.all(jnp.isfinite(approx21)))
    assert bool(jnp.all(jnp.isfinite(delta_log_p2)))
    print("KERNEL_OK")
</pallas_src>

<mosaic_0001>
module attributes {stable_mosaic.version = 11 : i64} {
  func.func @kernel(%arg0: i32, %arg1: memref<16x128xf32, #tpu.memory_space<vmem>>, %arg2: memref<16x128xf32, #tpu.memory_space<vmem>>, %arg3: memref<16x2xf32, #tpu.memory_space<vmem>>, %arg4: memref<16x1xf32, #tpu.memory_space<vmem>>, %arg5: memref<128x128xbf16, #tpu.memory_space<vmem>>, %arg6: memref<1x128xf32, #tpu.memory_space<vmem>>, %arg7: memref<1x128xf32, #tpu.memory_space<vmem>>, %arg8: memref<2x128xf32, #tpu.memory_space<vmem>>, %arg9: memref<1x128xf32, #tpu.memory_space<vmem>>, %arg10: memref<1x128xf32, #tpu.memory_space<vmem>>, %arg11: memref<2x128xf32, #tpu.memory_space<vmem>>, %arg12: memref<128x128xbf16, #tpu.memory_space<vmem>>, %arg13: memref<1x128xf32, #tpu.memory_space<vmem>>, %arg14: memref<1x128xf32, #tpu.memory_space<vmem>>, %arg15: memref<2x128xf32, #tpu.memory_space<vmem>>, %arg16: memref<1x128xf32, #tpu.memory_space<vmem>>, %arg17: memref<1x128xf32, #tpu.memory_space<vmem>>, %arg18: memref<2x128xf32, #tpu.memory_space<vmem>>, %arg19: memref<128x128xbf16, #tpu.memory_space<vmem>>, %arg20: memref<1x128xf32, #tpu.memory_space<vmem>>, %arg21: memref<1x128xf32, #tpu.memory_space<vmem>>, %arg22: memref<2x128xf32, #tpu.memory_space<vmem>>, %arg23: memref<1x128xf32, #tpu.memory_space<vmem>>, %arg24: memref<1x128xf32, #tpu.memory_space<vmem>>, %arg25: memref<2x128xf32, #tpu.memory_space<vmem>>, %arg26: memref<128x128xbf16, #tpu.memory_space<vmem>>, %arg27: memref<1x128xf32, #tpu.memory_space<vmem>>, %arg28: memref<1x128xf32, #tpu.memory_space<vmem>>, %arg29: memref<2x128xf32, #tpu.memory_space<vmem>>, %arg30: memref<1x128xf32, #tpu.memory_space<vmem>>, %arg31: memref<1x128xf32, #tpu.memory_space<vmem>>, %arg32: memref<2x128xf32, #tpu.memory_space<vmem>>, %arg33: memref<16x128xf32, #tpu.memory_space<vmem>>, %arg34: memref<16x1xf32, #tpu.memory_space<vmem>>) attributes {dimension_semantics = [#tpu.dimension_semantics<parallel>], iteration_bounds = array<i64: 1>, scalar_prefetch = 0 : i64, scratch_operands = 0 : i64, tpu.core_type = #tpu.core_type<tc>, window_params = [{transform_indices = @transform_0, window_bounds = array<i64: 16, 128>}, {transform_indices = @transform_1, window_bounds = array<i64: 16, 128>}, {transform_indices = @transform_2, window_bounds = array<i64: 16, 2>}, {transform_indices = @transform_3, window_bounds = array<i64: 16, 1>}, {pipeline_mode = #tpu.pipeline_mode<synchronous>, transform_indices = @transform_4, window_bounds = array<i64: 128, 128>}, {pipeline_mode = #tpu.pipeline_mode<synchronous>, transform_indices = @transform_5, window_bounds = array<i64: 1, 128>}, {pipeline_mode = #tpu.pipeline_mode<synchronous>, transform_indices = @transform_6, window_bounds = array<i64: 1, 128>}, {pipeline_mode = #tpu.pipeline_mode<synchronous>, transform_indices = @transform_7, window_bounds = array<i64: 2, 128>}, {pipeline_mode = #tpu.pipeline_mode<synchronous>, transform_indices = @transform_8, window_bounds = array<i64: 1, 128>}, {pipeline_mode = #tpu.pipeline_mode<synchronous>, transform_indices = @transform_9, window_bounds = array<i64: 1, 128>}, {pipeline_mode = #tpu.pipeline_mode<synchronous>, transform_indices = @transform_10, window_bounds = array<i64: 2, 128>}, {pipeline_mode = #tpu.pipeline_mode<synchronous>, transform_indices = @transform_11, window_bounds = array<i64: 128, 128>}, {pipeline_mode = #tpu.pipeline_mode<synchronous>, transform_indices = @transform_12, window_bounds = array<i64: 1, 128>}, {pipeline_mode = #tpu.pipeline_mode<synchronous>, transform_indices = @transform_13, window_bounds = array<i64: 1, 128>}, {pipeline_mode = #tpu.pipeline_mode<synchronous>, transform_indices = @transform_14, window_bounds = array<i64: 2, 128>}, {pipeline_mode = #tpu.pipeline_mode<synchronous>, transform_indices = @transform_15, window_bounds = array<i64: 1, 128>}, {pipeline_mode = #tpu.pipeline_mode<synchronous>, transform_indices = @transform_16, window_bounds = array<i64: 1, 128>}, {pipeline_mode = #tpu.pipeline_mode<synchronous>, transform_indices = @transform_17, window_bounds = array<i64: 2, 128>}, {pipeline_mode = #tpu.pipeline_mode<synchronous>, transform_indices = @transform_18, window_bounds = array<i64: 128, 128>}, {pipeline_mode = #tpu.pipeline_mode<synchronous>, transform_indices = @transform_19, window_bounds = array<i64: 1, 128>}, {pipeline_mode = #tpu.pipeline_mode<synchronous>, transform_indices = @transform_20, window_bounds = array<i64: 1, 128>}, {pipeline_mode = #tpu.pipeline_mode<synchronous>, transform_indices = @transform_21, window_bounds = array<i64: 2, 128>}, {pipeline_mode = #tpu.pipeline_mode<synchronous>, transform_indices = @transform_22, window_bounds = array<i64: 1, 128>}, {pipeline_mode = #tpu.pipeline_mode<synchronous>, transform_indices = @transform_23, window_bounds = array<i64: 1, 128>}, {pipeline_mode = #tpu.pipeline_mode<synchronous>, transform_indices = @transform_24, window_bounds = array<i64: 2, 128>}, {pipeline_mode = #tpu.pipeline_mode<synchronous>, transform_indices = @transform_25, window_bounds = array<i64: 128, 128>}, {pipeline_mode = #tpu.pipeline_mode<synchronous>, transform_indices = @transform_26, window_bounds = array<i64: 1, 128>}, {pipeline_mode = #tpu.pipeline_mode<synchronous>, transform_indices = @transform_27, window_bounds = array<i64: 1, 128>}, {pipeline_mode = #tpu.pipeline_mode<synchronous>, transform_indices = @transform_28, window_bounds = array<i64: 2, 128>}, {pipeline_mode = #tpu.pipeline_mode<synchronous>, transform_indices = @transform_29, window_bounds = array<i64: 1, 128>}, {pipeline_mode = #tpu.pipeline_mode<synchronous>, transform_indices = @transform_30, window_bounds = array<i64: 1, 128>}, {pipeline_mode = #tpu.pipeline_mode<synchronous>, transform_indices = @transform_31, window_bounds = array<i64: 2, 128>}, {transform_indices = @transform_32, window_bounds = array<i64: 16, 128>}, {transform_indices = @transform_33, window_bounds = array<i64: 16, 1>}]} {
    %c0 = arith.constant 0 : index
    %c0_0 = arith.constant 0 : index
    %0 = vector.load %arg1[%c0, %c0_0] : memref<16x128xf32, #tpu.memory_space<vmem>>, vector<16x128xf32>
    %c0_1 = arith.constant 0 : index
    %c0_2 = arith.constant 0 : index
    %1 = vector.load %arg2[%c0_1, %c0_2] : memref<16x128xf32, #tpu.memory_space<vmem>>, vector<16x128xf32>
    %c0_3 = arith.constant 0 : index
    %c0_4 = arith.constant 0 : index
    %2 = vector.load %arg3[%c0_3, %c0_4] : memref<16x2xf32, #tpu.memory_space<vmem>>, vector<16x2xf32>
    %3 = arith.truncf %1 : vector<16x128xf32> to vector<16x128xbf16>
    %c0_5 = arith.constant 0 : index
    %c0_6 = arith.constant 0 : index
    %4 = vector.load %arg5[%c0_5, %c0_6] : memref<128x128xbf16, #tpu.memory_space<vmem>>, vector<128x128xbf16>
    %c0_7 = arith.constant 0 : index
    %c0_8 = arith.constant 0 : index
    %5 = vector.load %arg6[%c0_7, %c0_8] : memref<1x128xf32, #tpu.memory_space<vmem>>, vector<1x128xf32>
    %c0_9 = arith.constant 0 : index
    %c0_10 = arith.constant 0 : index
    %6 = vector.load %arg7[%c0_9, %c0_10] : memref<1x128xf32, #tpu.memory_space<vmem>>, vector<1x128xf32>
    %c0_11 = arith.constant 0 : index
    %c0_12 = arith.constant 0 : index
    %7 = vector.load %arg10[%c0_11, %c0_12] : memref<1x128xf32, #tpu.memory_space<vmem>>, vector<1x128xf32>
    %c0_13 = arith.constant 0 : index
    %c0_14 = arith.constant 0 : index
    %8 = vector.load %arg8[%c0_13, %c0_14] : memref<2x128xf32, #tpu.memory_space<vmem>>, vector<2x128xf32>
    %cst = arith.constant dense<0.000000e+00> : vector<16x128xf32>
    %9 = tpu.matmul %2, %8, %cst {dimension_numbers = #tpu.dot_dimension_numbers<[1], [0], [0], [1], [0, 0, 1, 1], [], []>} : vector<16x2xf32>, vector<2x128xf32>, vector<16x128xf32> -> vector<16x128xf32>
    %c0_15 = arith.constant 0 : index
    %c0_16 = arith.constant 0 : index
    %10 = vector.load %arg9[%c0_15, %c0_16] : memref<1x128xf32, #tpu.memory_space<vmem>>, vector<1x128xf32>
    %11 = vector.broadcast %10 : vector<1x128xf32> to vector<16x128xf32>
    %12 = arith.addf %9, %11 : vector<16x128xf32>
    %c0_17 = arith.constant 0 : index
    %c0_18 = arith.constant 0 : index
    %13 = vector.load %arg11[%c0_17, %c0_18] : memref<2x128xf32, #tpu.memory_space<vmem>>, vector<2x128xf32>
    %cst_19 = arith.constant dense<0.000000e+00> : vector<16x128xf32>
    %14 = tpu.matmul %2, %13, %cst_19 {dimension_numbers = #tpu.dot_dimension_numbers<[1], [0], [0], [1], [0, 0, 1, 1], [], []>} : vector<16x2xf32>, vector<2x128xf32>, vector<16x128xf32> -> vector<16x128xf32>
    %c0_20 = arith.constant 0 : index
    %c0_21 = arith.constant 0 : index
    %15 = vector.load %arg12[%c0_20, %c0_21] : memref<128x128xbf16, #tpu.memory_space<vmem>>, vector<128x128xbf16>
    %c0_22 = arith.constant 0 : index
    %c0_23 = arith.constant 0 : index
    %16 = vector.load %arg13[%c0_22, %c0_23] : memref<1x128xf32, #tpu.memory_space<vmem>>, vector<1x128xf32>
    %c0_24 = arith.constant 0 : index
    %c0_25 = arith.constant 0 : index
    %17 = vector.load %arg14[%c0_24, %c0_25] : memref<1x128xf32, #tpu.memory_space<vmem>>, vector<1x128xf32>
    %c0_26 = arith.constant 0 : index
    %c0_27 = arith.constant 0 : index
    %18 = vector.load %arg17[%c0_26, %c0_27] : memref<1x128xf32, #tpu.memory_space<vmem>>, vector<1x128xf32>
    %c0_28 = arith.constant 0 : index
    %c0_29 = arith.constant 0 : index
    %19 = vector.load %arg15[%c0_28, %c0_29] : memref<2x128xf32, #tpu.memory_space<vmem>>, vector<2x128xf32>
    %cst_30 = arith.constant dense<0.000000e+00> : vector<16x128xf32>
    %20 = tpu.matmul %2, %19, %cst_30 {dimension_numbers = #tpu.dot_dimension_numbers<[1], [0], [0], [1], [0, 0, 1, 1], [], []>} : vector<16x2xf32>, vector<2x128xf32>, vector<16x128xf32> -> vector<16x128xf32>
    %c0_31 = arith.constant 0 : index
    %c0_32 = arith.constant 0 : index
    %21 = vector.load %arg16[%c0_31, %c0_32] : memref<1x128xf32, #tpu.memory_space<vmem>>, vector<1x128xf32>
    %22 = vector.broadcast %21 : vector<1x128xf32> to vector<16x128xf32>
    %23 = arith.addf %20, %22 : vector<16x128xf32>
    %c0_33 = arith.constant 0 : index
    %c0_34 = arith.constant 0 : index
    %24 = vector.load %arg18[%c0_33, %c0_34] : memref<2x128xf32, #tpu.memory_space<vmem>>, vector<2x128xf32>
    %cst_35 = arith.constant dense<0.000000e+00> : vector<16x128xf32>
    %25 = tpu.matmul %2, %24, %cst_35 {dimension_numbers = #tpu.dot_dimension_numbers<[1], [0], [0], [1], [0, 0, 1, 1], [], []>} : vector<16x2xf32>, vector<2x128xf32>, vector<16x128xf32> -> vector<16x128xf32>
    %c0_36 = arith.constant 0 : index
    %c0_37 = arith.constant 0 : index
    %26 = vector.load %arg19[%c0_36, %c0_37] : memref<128x128xbf16, #tpu.memory_space<vmem>>, vector<128x128xbf16>
    %c0_38 = arith.constant 0 : index
    %c0_39 = arith.constant 0 : index
    %27 = vector.load %arg20[%c0_38, %c0_39] : memref<1x128xf32, #tpu.memory_space<vmem>>, vector<1x128xf32>
    %c0_40 = arith.constant 0 : index
    %c0_41 = arith.constant 0 : index
    %28 = vector.load %arg21[%c0_40, %c0_41] : memref<1x128xf32, #tpu.memory_space<vmem>>, vector<1x128xf32>
    %c0_42 = arith.constant 0 : index
    %c0_43 = arith.constant 0 : index
    %29 = vector.load %arg24[%c0_42, %c0_43] : memref<1x128xf32, #tpu.memory_space<vmem>>, vector<1x128xf32>
    %c0_44 = arith.constant 0 : index
    %c0_45 = arith.constant 0 : index
    %30 = vector.load %arg22[%c0_44, %c0_45] : memref<2x128xf32, #tpu.memory_space<vmem>>, vector<2x128xf32>
    %cst_46 = arith.constant dense<0.000000e+00> : vector<16x128xf32>
    %31 = tpu.matmul %2, %30, %cst_46 {dimension_numbers = #tpu.dot_dimension_numbers<[1], [0], [0], [1], [0, 0, 1, 1], [], []>} : vector<16x2xf32>, vector<2x128xf32>, vector<16x128xf32> -> vector<16x128xf32>
    %c0_47 = arith.constant 0 : index
    %c0_48 = arith.constant 0 : index
    %32 = vector.load %arg23[%c0_47, %c0_48] : memref<1x128xf32, #tpu.memory_space<vmem>>, vector<1x128xf32>
    %33 = vector.broadcast %32 : vector<1x128xf32> to vector<16x128xf32>
    %34 = arith.addf %31, %33 : vector<16x128xf32>
    %c0_49 = arith.constant 0 : index
    %c0_50 = arith.constant 0 : index
    %35 = vector.load %arg25[%c0_49, %c0_50] : memref<2x128xf32, #tpu.memory_space<vmem>>, vector<2x128xf32>
    %cst_51 = arith.constant dense<0.000000e+00> : vector<16x128xf32>
    %36 = tpu.matmul %2, %35, %cst_51 {dimension_numbers = #tpu.dot_dimension_numbers<[1], [0], [0], [1], [0, 0, 1, 1], [], []>} : vector<16x2xf32>, vector<2x128xf32>, vector<16x128xf32> -> vector<16x128xf32>
    %c0_52 = arith.constant 0 : index
    %c0_53 = arith.constant 0 : index
    %37 = vector.load %arg26[%c0_52, %c0_53] : memref<128x128xbf16, #tpu.memory_space<vmem>>, vector<128x128xbf16>
    %c0_54 = arith.constant 0 : index
    %c0_55 = arith.constant 0 : index
    %38 = vector.load %arg27[%c0_54, %c0_55] : memref<1x128xf32, #tpu.memory_space<vmem>>, vector<1x128xf32>
    %c0_56 = arith.constant 0 : index
    %c0_57 = arith.constant 0 : index
    %39 = vector.load %arg28[%c0_56, %c0_57] : memref<1x128xf32, #tpu.memory_space<vmem>>, vector<1x128xf32>
    %c0_58 = arith.constant 0 : index
    %c0_59 = arith.constant 0 : index
    %40 = vector.load %arg31[%c0_58, %c0_59] : memref<1x128xf32, #tpu.memory_space<vmem>>, vector<1x128xf32>
    %c0_60 = arith.constant 0 : index
    %c0_61 = arith.constant 0 : index
    %41 = vector.load %arg29[%c0_60, %c0_61] : memref<2x128xf32, #tpu.memory_space<vmem>>, vector<2x128xf32>
    %cst_62 = arith.constant dense<0.000000e+00> : vector<16x128xf32>
    %42 = tpu.matmul %2, %41, %cst_62 {dimension_numbers = #tpu.dot_dimension_numbers<[1], [0], [0], [1], [0, 0, 1, 1], [], []>} : vector<16x2xf32>, vector<2x128xf32>, vector<16x128xf32> -> vector<16x128xf32>
    %c0_63 = arith.constant 0 : index
    %c0_64 = arith.constant 0 : index
    %43 = vector.load %arg30[%c0_63, %c0_64] : memref<1x128xf32, #tpu.memory_space<vmem>>, vector<1x128xf32>
    %44 = vector.broadcast %43 : vector<1x128xf32> to vector<16x128xf32>
    %45 = arith.addf %42, %44 : vector<16x128xf32>
    %c0_65 = arith.constant 0 : index
    %c0_66 = arith.constant 0 : index
    %46 = vector.load %arg32[%c0_65, %c0_66] : memref<2x128xf32, #tpu.memory_space<vmem>>, vector<2x128xf32>
    %cst_67 = arith.constant dense<0.000000e+00> : vector<16x128xf32>
    %47 = tpu.matmul %2, %46, %cst_67 {dimension_numbers = #tpu.dot_dimension_numbers<[1], [0], [0], [1], [0, 0, 1, 1], [], []>} : vector<16x2xf32>, vector<2x128xf32>, vector<16x128xf32> -> vector<16x128xf32>
    %c0_68 = arith.constant 0 : index
    %c0_69 = arith.constant 0 : index
    %48 = vector.load %arg4[%c0_68, %c0_69] : memref<16x1xf32, #tpu.memory_space<vmem>>, vector<16x1xf32>
    %cst_70 = arith.constant 0.000000e+00 : f32
    %49 = vector.broadcast %cst_70 : f32 to vector<1x128xf32>
    %50 = arith.mulf %49, %6 : vector<1x128xf32>
    %51 = vector.broadcast %50 : vector<1x128xf32> to vector<16x128xf32>
    %52 = arith.addf %12, %51 : vector<16x128xf32>
    %53 = arith.negf %52 : vector<16x128xf32>
    %54 = math.exp %53 : vector<16x128xf32>
    %cst_71 = arith.constant 1.000000e+00 : f32
    %55 = vector.broadcast %cst_71 : f32 to vector<16x128xf32>
    %56 = arith.addf %55, %54 : vector<16x128xf32>
    %57 = arith.divf %55, %56 : vector<16x128xf32>
    %58 = vector.broadcast %5 : vector<1x128xf32> to vector<16x128xf32>
    %59 = arith.mulf %58, %57 : vector<16x128xf32>
    %60 = arith.addf %59, %14 : vector<16x128xf32>
    %cst_72 = arith.constant 0.000000e+00 : f32
    %61 = vector.broadcast %cst_72 : f32 to vector<1x128xf32>
    %62 = arith.mulf %61, %7 : vector<1x128xf32>
    %63 = vector.broadcast %62 : vector<1x128xf32> to vector<16x128xf32>
    %64 = arith.addf %60, %63 : vector<16x128xf32>
    %cst_73 = arith.constant 0.000000e+00 : f32
    %65 = vector.broadcast %cst_73 : f32 to vector<1x128xf32>
    %66 = arith.mulf %65, %17 : vector<1x128xf32>
    %67 = vector.broadcast %66 : vector<1x128xf32> to vector<16x128xf32>
    %68 = arith.addf %23, %67 : vector<16x128xf32>
    %69 = arith.negf %68 : vector<16x128xf32>
    %70 = math.exp %69 : vector<16x128xf32>
    %cst_74 = arith.constant 1.000000e+00 : f32
    %71 = vector.broadcast %cst_74 : f32 to vector<16x128xf32>
    %72 = arith.addf %71, %70 : vector<16x128xf32>
    %73 = arith.divf %71, %72 : vector<16x128xf32>
    %74 = vector.broadcast %16 : vector<1x128xf32> to vector<16x128xf32>
    %75 = arith.mulf %74, %73 : vector<16x128xf32>
    %76 = arith.addf %75, %25 : vector<16x128xf32>
    %cst_75 = arith.constant 0.000000e+00 : f32
    %77 = vector.broadcast %cst_75 : f32 to vector<1x128xf32>
    %78 = arith.mulf %77, %18 : vector<1x128xf32>
    %79 = vector.broadcast %78 : vector<1x128xf32> to vector<16x128xf32>
    %80 = arith.addf %76, %79 : vector<16x128xf32>
    %cst_76 = arith.constant 0.000000e+00 : f32
    %81 = vector.broadcast %cst_76 : f32 to vector<1x128xf32>
    %82 = arith.mulf %81, %28 : vector<1x128xf32>
    %83 = vector.broadcast %82 : vector<1x128xf32> to vector<16x128xf32>
    %84 = arith.addf %34, %83 : vector<16x128xf32>
    %85 = arith.negf %84 : vector<16x128xf32>
    %86 = math.exp %85 : vector<16x128xf32>
    %cst_77 = arith.constant 1.000000e+00 : f32
    %87 = vector.broadcast %cst_77 : f32 to vector<16x128xf32>
    %88 = arith.addf %87, %86 : vector<16x128xf32>
    %89 = arith.divf %87, %88 : vector<16x128xf32>
    %90 = vector.broadcast %27 : vector<1x128xf32> to vector<16x128xf32>
    %91 = arith.mulf %90, %89 : vector<16x128xf32>
    %92 = arith.addf %91, %36 : vector<16x128xf32>
    %cst_78 = arith.constant 0.000000e+00 : f32
    %93 = vector.broadcast %cst_78 : f32 to vector<1x128xf32>
    %94 = arith.mulf %93, %29 : vector<1x128xf32>
    %95 = vector.broadcast %94 : vector<1x128xf32> to vector<16x128xf32>
    %96 = arith.addf %92, %95 : vector<16x128xf32>
    %cst_79 = arith.constant 0.000000e+00 : f32
    %97 = vector.broadcast %cst_79 : f32 to vector<1x128xf32>
    %98 = arith.mulf %97, %39 : vector<1x128xf32>
    %99 = vector.broadcast %98 : vector<1x128xf32> to vector<16x128xf32>
    %100 = arith.addf %45, %99 : vector<16x128xf32>
    %101 = arith.negf %100 : vector<16x128xf32>
    %102 = math.exp %101 : vector<16x128xf32>
    %cst_80 = arith.constant 1.000000e+00 : f32
    %103 = vector.broadcast %cst_80 : f32 to vector<16x128xf32>
    %104 = arith.addf %103, %102 : vector<16x128xf32>
    %105 = arith.divf %103, %104 : vector<16x128xf32>
    %106 = vector.broadcast %38 : vector<1x128xf32> to vector<16x128xf32>
    %107 = arith.mulf %106, %105 : vector<16x128xf32>
    %108 = arith.addf %107, %47 : vector<16x128xf32>
    %cst_81 = arith.constant 0.000000e+00 : f32
    %109 = vector.broadcast %cst_81 : f32 to vector<1x128xf32>
    %110 = arith.mulf %109, %40 : vector<1x128xf32>
    %111 = vector.broadcast %110 : vector<1x128xf32> to vector<16x128xf32>
    %112 = arith.addf %108, %111 : vector<16x128xf32>
    %113 = arith.truncf %0 : vector<16x128xf32> to vector<16x128xbf16>
    %cst_82 = arith.constant dense<0.000000e+00> : vector<16x128xf32>
    %114 = tpu.matmul %113, %4, %cst_82 {dimension_numbers = #tpu.dot_dimension_numbers<[1], [0], [0], [1], [0, 0, 1, 1], [], []>} : vector<16x128xbf16>, vector<128x128xbf16>, vector<16x128xf32> -> vector<16x128xf32>
    %cst_83 = arith.constant dense<0.000000e+00> : vector<16x128xf32>
    %115 = tpu.matmul %3, %4, %cst_83 {dimension_numbers = #tpu.dot_dimension_numbers<[1], [0], [0], [1], [0, 0, 1, 1], [], []>} : vector<16x128xbf16>, vector<128x128xbf16>, vector<16x128xf32> -> vector<16x128xf32>
    %116 = arith.mulf %114, %57 : vector<16x128xf32>
    %117 = arith.addf %116, %64 : vector<16x128xf32>
    %118 = arith.mulf %115, %57 : vector<16x128xf32>
    %119 = math.tanh %117 : vector<16x128xf32>
    %120 = arith.mulf %119, %119 : vector<16x128xf32>
    %cst_84 = arith.constant 1.000000e+00 : f32
    %121 = vector.broadcast %cst_84 : f32 to vector<16x128xf32>
    %122 = arith.subf %121, %120 : vector<16x128xf32>
    %123 = arith.mulf %122, %118 : vector<16x128xf32>
    %124 = arith.truncf %119 : vector<16x128xf32> to vector<16x128xbf16>
    %cst_85 = arith.constant dense<0.000000e+00> : vector<16x128xf32>
    %125 = tpu.matmul %124, %15, %cst_85 {dimension_numbers = #tpu.dot_dimension_numbers<[1], [0], [0], [1], [0, 0, 1, 1], [], []>} : vector<16x128xbf16>, vector<128x128xbf16>, vector<16x128xf32> -> vector<16x128xf32>
    %126 = arith.truncf %123 : vector<16x128xf32> to vector<16x128xbf16>
    %cst_86 = arith.constant dense<0.000000e+00> : vector<16x128xf32>
    %127 = tpu.matmul %126, %15, %cst_86 {dimension_numbers = #tpu.dot_dimension_numbers<[1], [0], [0], [1], [0, 0, 1, 1], [], []>} : vector<16x128xbf16>, vector<128x128xbf16>, vector<16x128xf32> -> vector<16x128xf32>
    %128 = arith.mulf %125, %73 : vector<16x128xf32>
    %129 = arith.addf %128, %80 : vector<16x128xf32>
    %130 = arith.mulf %127, %73 : vector<16x128xf32>
    %131 = math.tanh %129 : vector<16x128xf32>
    %132 = arith.mulf %131, %131 : vector<16x128xf32>
    %cst_87 = arith.constant 1.000000e+00 : f32
    %133 = vector.broadcast %cst_87 : f32 to vector<16x128xf32>
    %134 = arith.subf %133, %132 : vector<16x128xf32>
    %135 = arith.mulf %134, %130 : vector<16x128xf32>
    %136 = arith.truncf %131 : vector<16x128xf32> to vector<16x128xbf16>
    %cst_88 = arith.constant dense<0.000000e+00> : vector<16x128xf32>
    %137 = tpu.matmul %136, %26, %cst_88 {dimension_numbers = #tpu.dot_dimension_numbers<[1], [0], [0], [1], [0, 0, 1, 1], [], []>} : vector<16x128xbf16>, vector<128x128xbf16>, vector<16x128xf32> -> vector<16x128xf32>
    %138 = arith.truncf %135 : vector<16x128xf32> to vector<16x128xbf16>
    %cst_89 = arith.constant dense<0.000000e+00> : vector<16x128xf32>
    %139 = tpu.matmul %138, %26, %cst_89 {dimension_numbers = #tpu.dot_dimension_numbers<[1], [0], [0], [1], [0, 0, 1, 1], [], []>} : vector<16x128xbf16>, vector<128x128xbf16>, vector<16x128xf32> -> vector<16x128xf32>
    %140 = arith.mulf %137, %89 : vector<16x128xf32>
    %141 = arith.addf %140, %96 : vector<16x128xf32>
    %142 = arith.mulf %139, %89 : vector<16x128xf32>
    %143 = math.tanh %141 : vector<16x128xf32>
    %144 = arith.mulf %143, %143 : vector<16x128xf32>
    %cst_90 = arith.constant 1.000000e+00 : f32
    %145 = vector.broadcast %cst_90 : f32 to vector<16x128xf32>
    %146 = arith.subf %145, %144 : vector<16x128xf32>
    %147 = arith.mulf %146, %142 : vector<16x128xf32>
    %148 = arith.truncf %143 : vector<16x128xf32> to vector<16x128xbf16>
    %cst_91 = arith.constant dense<0.000000e+00> : vector<16x128xf32>
    %149 = tpu.matmul %148, %37, %cst_91 {dimension_numbers = #tpu.dot_dimension_numbers<[1], [0], [0], [1], [0, 0, 1, 1], [], []>} : vector<16x128xbf16>, vector<128x128xbf16>, vector<16x128xf32> -> vector<16x128xf32>
    %150 = arith.truncf %147 : vector<16x128xf32> to vector<16x128xbf16>
    %cst_92 = arith.constant dense<0.000000e+00> : vector<16x128xf32>
    %151 = tpu.matmul %150, %37, %cst_92 {dimension_numbers = #tpu.dot_dimension_numbers<[1], [0], [0], [1], [0, 0, 1, 1], [], []>} : vector<16x128xbf16>, vector<128x128xbf16>, vector<16x128xf32> -> vector<16x128xf32>
    %152 = arith.mulf %149, %105 : vector<16x128xf32>
    %153 = arith.addf %152, %112 : vector<16x128xf32>
    %154 = arith.mulf %151, %105 : vector<16x128xf32>
    %155 = arith.mulf %1, %154 : vector<16x128xf32>
    %cst_93 = arith.constant dense<0.000000e+00> : vector<16xf32>
    %156 = vector.multi_reduction <add>, %155, %cst_93 [1] : vector<16x128xf32> to vector<16xf32>
    %157 = vector.shape_cast %156 : vector<16xf32> to vector<16x1xf32>
    %cst_94 = arith.constant 6.250000e-02 : f32
    %158 = vector.broadcast %cst_94 : f32 to vector<16x128xf32>
    %159 = arith.mulf %158, %153 : vector<16x128xf32>
    %160 = arith.addf %0, %159 : vector<16x128xf32>
    %cst_95 = arith.constant 6.250000e-02 : f32
    %161 = vector.broadcast %cst_95 : f32 to vector<1x128xf32>
    %162 = arith.mulf %161, %6 : vector<1x128xf32>
    %163 = vector.broadcast %162 : vector<1x128xf32> to vector<16x128xf32>
    %164 = arith.addf %12, %163 : vector<16x128xf32>
    %165 = arith.negf %164 : vector<16x128xf32>
    %166 = math.exp %165 : vector<16x128xf32>
    %cst_96 = arith.constant 1.000000e+00 : f32
    %167 = vector.broadcast %cst_96 : f32 to vector<16x128xf32>
    %168 = arith.addf %167, %166 : vector<16x128xf32>
    %169 = arith.divf %167, %168 : vector<16x128xf32>
    %170 = vector.broadcast %5 : vector<1x128xf32> to vector<16x128xf32>
    %171 = arith.mulf %170, %169 : vector<16x128xf32>
    %172 = arith.addf %171, %14 : vector<16x128xf32>
    %cst_97 = arith.constant 6.250000e-02 : f32
    %173 = vector.broadcast %cst_97 : f32 to vector<1x128xf32>
    %174 = arith.mulf %173, %7 : vector<1x128xf32>
    %175 = vector.broadcast %174 : vector<1x128xf32> to vector<16x128xf32>
    %176 = arith.addf %172, %175 : vector<16x128xf32>
    %cst_98 = arith.constant 6.250000e-02 : f32
    %177 = vector.broadcast %cst_98 : f32 to vector<1x128xf32>
    %178 = arith.mulf %177, %17 : vector<1x128xf32>
    %179 = vector.broadcast %178 : vector<1x128xf32> to vector<16x128xf32>
    %180 = arith.addf %23, %179 : vector<16x128xf32>
    %181 = arith.negf %180 : vector<16x128xf32>
    %182 = math.exp %181 : vector<16x128xf32>
    %cst_99 = arith.constant 1.000000e+00 : f32
    %183 = vector.broadcast %cst_99 : f32 to vector<16x128xf32>
    %184 = arith.addf %183, %182 : vector<16x128xf32>
    %185 = arith.divf %183, %184 : vector<16x128xf32>
    %186 = vector.broadcast %16 : vector<1x128xf32> to vector<16x128xf32>
    %187 = arith.mulf %186, %185 : vector<16x128xf32>
    %188 = arith.addf %187, %25 : vector<16x128xf32>
    %cst_100 = arith.constant 6.250000e-02 : f32
    %189 = vector.broadcast %cst_100 : f32 to vector<1x128xf32>
    %190 = arith.mulf %189, %18 : vector<1x128xf32>
    %191 = vector.broadcast %190 : vector<1x128xf32> to vector<16x128xf32>
    %192 = arith.addf %188, %191 : vector<16x128xf32>
    %cst_101 = arith.constant 6.250000e-02 : f32
    %193 = vector.broadcast %cst_101 : f32 to vector<1x128xf32>
    %194 = arith.mulf %193, %28 : vector<1x128xf32>
    %195 = vector.broadcast %194 : vector<1x128xf32> to vector<16x128xf32>
    %196 = arith.addf %34, %195 : vector<16x128xf32>
    %197 = arith.negf %196 : vector<16x128xf32>
    %198 = math.exp %197 : vector<16x128xf32>
    %cst_102 = arith.constant 1.000000e+00 : f32
    %199 = vector.broadcast %cst_102 : f32 to vector<16x128xf32>
    %200 = arith.addf %199, %198 : vector<16x128xf32>
    %201 = arith.divf %199, %200 : vector<16x128xf32>
    %202 = vector.broadcast %27 : vector<1x128xf32> to vector<16x128xf32>
    %203 = arith.mulf %202, %201 : vector<16x128xf32>
    %204 = arith.addf %203, %36 : vector<16x128xf32>
    %cst_103 = arith.constant 6.250000e-02 : f32
    %205 = vector.broadcast %cst_103 : f32 to vector<1x128xf32>
    %206 = arith.mulf %205, %29 : vector<1x128xf32>
    %207 = vector.broadcast %206 : vector<1x128xf32> to vector<16x128xf32>
    %208 = arith.addf %204, %207 : vector<16x128xf32>
    %cst_104 = arith.constant 6.250000e-02 : f32
    %209 = vector.broadcast %cst_104 : f32 to vector<1x128xf32>
    %210 = arith.mulf %209, %39 : vector<1x128xf32>
    %211 = vector.broadcast %210 : vector<1x128xf32> to vector<16x128xf32>
    %212 = arith.addf %45, %211 : vector<16x128xf32>
    %213 = arith.negf %212 : vector<16x128xf32>
    %214 = math.exp %213 : vector<16x128xf32>
    %cst_105 = arith.constant 1.000000e+00 : f32
    %215 = vector.broadcast %cst_105 : f32 to vector<16x128xf32>
    %216 = arith.addf %215, %214 : vector<16x128xf32>
    %217 = arith.divf %215, %216 : vector<16x128xf32>
    %218 = vector.broadcast %38 : vector<1x128xf32> to vector<16x128xf32>
    %219 = arith.mulf %218, %217 : vector<16x128xf32>
    %220 = arith.addf %219, %47 : vector<16x128xf32>
    %cst_106 = arith.constant 6.250000e-02 : f32
    %221 = vector.broadcast %cst_106 : f32 to vector<1x128xf32>
    %222 = arith.mulf %221, %40 : vector<1x128xf32>
    %223 = vector.broadcast %222 : vector<1x128xf32> to vector<16x128xf32>
    %224 = arith.addf %220, %223 : vector<16x128xf32>
    %225 = arith.truncf %160 : vector<16x128xf32> to vector<16x128xbf16>
    %cst_107 = arith.constant dense<0.000000e+00> : vector<16x128xf32>
    %226 = tpu.matmul %225, %4, %cst_107 {dimension_numbers = #tpu.dot_dimension_numbers<[1], [0], [0], [1], [0, 0, 1, 1], [], []>} : vector<16x128xbf16>, vector<128x128xbf16>, vector<16x128xf32> -> vector<16x128xf32>
    %cst_108 = arith.constant dense<0.000000e+00> : vector<16x128xf32>
    %227 = tpu.matmul %3, %4, %cst_108 {dimension_numbers = #tpu.dot_dimension_numbers<[1], [0], [0], [1], [0, 0, 1, 1], [], []>} : vector<16x128xbf16>, vector<128x128xbf16>, vector<16x128xf32> -> vector<16x128xf32>
    %228 = arith.mulf %226, %169 : vector<16x128xf32>
    %229 = arith.addf %228, %176 : vector<16x128xf32>
    %230 = arith.mulf %227, %169 : vector<16x128xf32>
    %231 = math.tanh %229 : vector<16x128xf32>
    %232 = arith.mulf %231, %231 : vector<16x128xf32>
    %cst_109 = arith.constant 1.000000e+00 : f32
    %233 = vector.broadcast %cst_109 : f32 to vector<16x128xf32>
    %234 = arith.subf %233, %232 : vector<16x128xf32>
    %235 = arith.mulf %234, %230 : vector<16x128xf32>
    %236 = arith.truncf %231 : vector<16x128xf32> to vector<16x128xbf16>
    %cst_110 = arith.constant dense<0.000000e+00> : vector<16x128xf32>
    %237 = tpu.matmul %236, %15, %cst_110 {dimension_numbers = #tpu.dot_dimension_numbers<[1], [0], [0], [1], [0, 0, 1, 1], [], []>} : vector<16x128xbf16>, vector<128x128xbf16>, vector<16x128xf32> -> vector<16x128xf32>
    %238 = arith.truncf %235 : vector<16x128xf32> to vector<16x128xbf16>
    %cst_111 = arith.constant dense<0.000000e+00> : vector<16x128xf32>
    %239 = tpu.matmul %238, %15, %cst_111 {dimension_numbers = #tpu.dot_dimension_numbers<[1], [0], [0], [1], [0, 0, 1, 1], [], []>} : vector<16x128xbf16>, vector<128x128xbf16>, vector<16x128xf32> -> vector<16x128xf32>
    %240 = arith.mulf %237, %185 : vector<16x128xf32>
    %241 = arith.addf %240, %192 : vector<16x128xf32>
    %242 = arith.mulf %239, %185 : vector<16x128xf32>
    %243 = math.tanh %241 : vector<16x128xf32>
    %244 = arith.mulf %243, %243 : vector<16x128xf32>
    %cst_112 = arith.constant 1.000000e+00 : f32
    %245 = vector.broadcast %cst_112 : f32 to vector<16x128xf32>
    %246 = arith.subf %245, %244 : vector<16x128xf32>
    %247 = arith.mulf %246, %242 : vector<16x128xf32>
    %248 = arith.truncf %243 : vector<16x128xf32> to vector<16x128xbf16>
    %cst_113 = arith.constant dense<0.000000e+00> : vector<16x128xf32>
    %249 = tpu.matmul %248, %26, %cst_113 {dimension_numbers = #tpu.dot_dimension_numbers<[1], [0], [0], [1], [0, 0, 1, 1], [], []>} : vector<16x128xbf16>, vector<128x128xbf16>, vector<16x128xf32> -> vector<16x128xf32>
    %250 = arith.truncf %247 : vector<16x128xf32> to vector<16x128xbf16>
    %cst_114 = arith.constant dense<0.000000e+00> : vector<16x128xf32>
    %251 = tpu.matmul %250, %26, %cst_114 {dimension_numbers = #tpu.dot_dimension_numbers<[1], [0], [0], [1], [0, 0, 1, 1], [], []>} : vector<16x128xbf16>, vector<128x128xbf16>, vector<16x128xf32> -> vector<16x128xf32>
    %252 = arith.mulf %249, %201 : vector<16x128xf32>
    %253 = arith.addf %252, %208 : vector<16x128xf32>
    %254 = arith.mulf %251, %201 : vector<16x128xf32>
    %255 = math.tanh %253 : vector<16x128xf32>
    %256 = arith.mulf %255, %255 : vector<16x128xf32>
    %cst_115 = arith.constant 1.000000e+00 : f32
    %257 = vector.broadcast %cst_115 : f32 to vector<16x128xf32>
    %258 = arith.subf %257, %256 : vector<16x128xf32>
    %259 = arith.mulf %258, %254 : vector<16x128xf32>
    %260 = arith.truncf %255 : vector<16x128xf32> to vector<16x128xbf16>
    %cst_116 = arith.constant dense<0.000000e+00> : vector<16x128xf32>
    %261 = tpu.matmul %260, %37, %cst_116 {dimension_numbers = #tpu.dot_dimension_numbers<[1], [0], [0], [1], [0, 0, 1, 1], [], []>} : vector<16x128xbf16>, vector<128x128xbf16>, vector<16x128xf32> -> vector<16x128xf32>
    %262 = arith.truncf %259 : vector<16x128xf32> to vector<16x128xbf16>
    %cst_117 = arith.constant dense<0.000000e+00> : vector<16x128xf32>
    %263 = tpu.matmul %262, %37, %cst_117 {dimension_numbers = #tpu.dot_dimension_numbers<[1], [0], [0], [1], [0, 0, 1, 1], [], []>} : vector<16x128xbf16>, vector<128x128xbf16>, vector<16x128xf32> -> vector<16x128xf32>
    %264 = arith.mulf %261, %217 : vector<16x128xf32>
    %265 = arith.addf %264, %224 : vector<16x128xf32>
    %266 = arith.mulf %263, %217 : vector<16x128xf32>
    %267 = arith.mulf %1, %266 : vector<16x128xf32>
    %cst_118 = arith.constant dense<0.000000e+00> : vector<16xf32>
    %268 = vector.multi_reduction <add>, %267, %cst_118 [1] : vector<16x128xf32> to vector<16xf32>
    %269 = vector.shape_cast %268 : vector<16xf32> to vector<16x1xf32>
    %cst_119 = arith.constant 6.250000e-02 : f32
    %270 = vector.broadcast %cst_119 : f32 to vector<16x128xf32>
    %271 = arith.mulf %270, %265 : vector<16x128xf32>
    %272 = arith.addf %0, %271 : vector<16x128xf32>
    %273 = arith.truncf %272 : vector<16x128xf32> to vector<16x128xbf16>
    %cst_120 = arith.constant dense<0.000000e+00> : vector<16x128xf32>
    %274 = tpu.matmul %273, %4, %cst_120 {dimension_numbers = #tpu.dot_dimension_numbers<[1], [0], [0], [1], [0, 0, 1, 1], [], []>} : vector<16x128xbf16>, vector<128x128xbf16>, vector<16x128xf32> -> vector<16x128xf32>
    %cst_121 = arith.constant dense<0.000000e+00> : vector<16x128xf32>
    %275 = tpu.matmul %3, %4, %cst_121 {dimension_numbers = #tpu.dot_dimension_numbers<[1], [0], [0], [1], [0, 0, 1, 1], [], []>} : vector<16x128xbf16>, vector<128x128xbf16>, vector<16x128xf32> -> vector<16x128xf32>
    %276 = arith.mulf %274, %169 : vector<16x128xf32>
    %277 = arith.addf %276, %176 : vector<16x128xf32>
    %278 = arith.mulf %275, %169 : vector<16x128xf32>
    %279 = math.tanh %277 : vector<16x128xf32>
    %280 = arith.mulf %279, %279 : vector<16x128xf32>
    %cst_122 = arith.constant 1.000000e+00 : f32
    %281 = vector.broadcast %cst_122 : f32 to vector<16x128xf32>
    %282 = arith.subf %281, %280 : vector<16x128xf32>
    %283 = arith.mulf %282, %278 : vector<16x128xf32>
    %284 = arith.truncf %279 : vector<16x128xf32> to vector<16x128xbf16>
    %cst_123 = arith.constant dense<0.000000e+00> : vector<16x128xf32>
    %285 = tpu.matmul %284, %15, %cst_123 {dimension_numbers = #tpu.dot_dimension_numbers<[1], [0], [0], [1], [0, 0, 1, 1], [], []>} : vector<16x128xbf16>, vector<128x128xbf16>, vector<16x128xf32> -> vector<16x128xf32>
    %286 = arith.truncf %283 : vector<16x128xf32> to vector<16x128xbf16>
    %cst_124 = arith.constant dense<0.000000e+00> : vector<16x128xf32>
    %287 = tpu.matmul %286, %15, %cst_124 {dimension_numbers = #tpu.dot_dimension_numbers<[1], [0], [0], [1], [0, 0, 1, 1], [], []>} : vector<16x128xbf16>, vector<128x128xbf16>, vector<16x128xf32> -> vector<16x128xf32>
    %288 = arith.mulf %285, %185 : vector<16x128xf32>
    %289 = arith.addf %288, %192 : vector<16x128xf32>
    %290 = arith.mulf %287, %185 : vector<16x128xf32>
    %291 = math.tanh %289 : vector<16x128xf32>
    %292 = arith.mulf %291, %291 : vector<16x128xf32>
    %cst_125 = arith.constant 1.000000e+00 : f32
    %293 = vector.broadcast %cst_125 : f32 to vector<16x128xf32>
    %294 = arith.subf %293, %292 : vector<16x128xf32>
    %295 = arith.mulf %294, %290 : vector<16x128xf32>
    %296 = arith.truncf %291 : vector<16x128xf32> to vector<16x128xbf16>
    %cst_126 = arith.constant dense<0.000000e+00> : vector<16x128xf32>
    %297 = tpu.matmul %296, %26, %cst_126 {dimension_numbers = #tpu.dot_dimension_numbers<[1], [0], [0], [1], [0, 0, 1, 1], [], []>} : vector<16x128xbf16>, vector<128x128xbf16>, vector<16x128xf32> -> vector<16x128xf32>
    %298 = arith.truncf %295 : vector<16x128xf32> to vector<16x128xbf16>
    %cst_127 = arith.constant dense<0.000000e+00> : vector<16x128xf32>
    %299 = tpu.matmul %298, %26, %cst_127 {dimension_numbers = #tpu.dot_dimension_numbers<[1], [0], [0], [1], [0, 0, 1, 1], [], []>} : vector<16x128xbf16>, vector<128x128xbf16>, vector<16x128xf32> -> vector<16x128xf32>
    %300 = arith.mulf %297, %201 : vector<16x128xf32>
    %301 = arith.addf %300, %208 : vector<16x128xf32>
    %302 = arith.mulf %299, %201 : vector<16x128xf32>
    %303 = math.tanh %301 : vector<16x128xf32>
    %304 = arith.mulf %303, %303 : vector<16x128xf32>
    %cst_128 = arith.constant 1.000000e+00 : f32
    %305 = vector.broadcast %cst_128 : f32 to vector<16x128xf32>
    %306 = arith.subf %305, %304 : vector<16x128xf32>
    %307 = arith.mulf %306, %302 : vector<16x128xf32>
    %308 = arith.truncf %303 : vector<16x128xf32> to vector<16x128xbf16>
    %cst_129 = arith.constant dense<0.000000e+00> : vector<16x128xf32>
    %309 = tpu.matmul %308, %37, %cst_129 {dimension_numbers = #tpu.dot_dimension_numbers<[1], [0], [0], [1], [0, 0, 1, 1], [], []>} : vector<16x128xbf16>, vector<128x128xbf16>, vector<16x128xf32> -> vector<16x128xf32>
    %310 = arith.truncf %307 : vector<16x128xf32> to vector<16x128xbf16>
    %cst_130 = arith.constant dense<0.000000e+00> : vector<16x128xf32>
    %311 = tpu.matmul %310, %37, %cst_130 {dimension_numbers = #tpu.dot_dimension_numbers<[1], [0], [0], [1], [0, 0, 1, 1], [], []>} : vector<16x128xbf16>, vector<128x128xbf16>, vector<16x128xf32> -> vector<16x128xf32>
    %312 = arith.mulf %309, %217 : vector<16x128xf32>
    %313 = arith.addf %312, %224 : vector<16x128xf32>
    %314 = arith.mulf %311, %217 : vector<16x128xf32>
    %315 = arith.mulf %1, %314 : vector<16x128xf32>
    %cst_131 = arith.constant dense<0.000000e+00> : vector<16xf32>
    %316 = vector.multi_reduction <add>, %315, %cst_131 [1] : vector<16x128xf32> to vector<16xf32>
    %317 = vector.shape_cast %316 : vector<16xf32> to vector<16x1xf32>
    %cst_132 = arith.constant 1.250000e-01 : f32
    %318 = vector.broadcast %cst_132 : f32 to vector<16x128xf32>
    %319 = arith.mulf %318, %313 : vector<16x128xf32>
    %320 = arith.addf %0, %319 : vector<16x128xf32>
    %cst_133 = arith.constant 1.250000e-01 : f32
    %321 = vector.broadcast %cst_133 : f32 to vector<1x128xf32>
    %322 = arith.mulf %321, %6 : vector<1x128xf32>
    %323 = vector.broadcast %322 : vector<1x128xf32> to vector<16x128xf32>
    %324 = arith.addf %12, %323 : vector<16x128xf32>
    %325 = arith.negf %324 : vector<16x128xf32>
    %326 = math.exp %325 : vector<16x128xf32>
    %cst_134 = arith.constant 1.000000e+00 : f32
    %327 = vector.broadcast %cst_134 : f32 to vector<16x128xf32>
    %328 = arith.addf %327, %326 : vector<16x128xf32>
    %329 = arith.divf %327, %328 : vector<16x128xf32>
    %330 = vector.broadcast %5 : vector<1x128xf32> to vector<16x128xf32>
    %331 = arith.mulf %330, %329 : vector<16x128xf32>
    %332 = arith.addf %331, %14 : vector<16x128xf32>
    %cst_135 = arith.constant 1.250000e-01 : f32
    %333 = vector.broadcast %cst_135 : f32 to vector<1x128xf32>
    %334 = arith.mulf %333, %7 : vector<1x128xf32>
    %335 = vector.broadcast %334 : vector<1x128xf32> to vector<16x128xf32>
    %336 = arith.addf %332, %335 : vector<16x128xf32>
    %cst_136 = arith.constant 1.250000e-01 : f32
    %337 = vector.broadcast %cst_136 : f32 to vector<1x128xf32>
    %338 = arith.mulf %337, %17 : vector<1x128xf32>
    %339 = vector.broadcast %338 : vector<1x128xf32> to vector<16x128xf32>
    %340 = arith.addf %23, %339 : vector<16x128xf32>
    %341 = arith.negf %340 : vector<16x128xf32>
    %342 = math.exp %341 : vector<16x128xf32>
    %cst_137 = arith.constant 1.000000e+00 : f32
    %343 = vector.broadcast %cst_137 : f32 to vector<16x128xf32>
    %344 = arith.addf %343, %342 : vector<16x128xf32>
    %345 = arith.divf %343, %344 : vector<16x128xf32>
    %346 = vector.broadcast %16 : vector<1x128xf32> to vector<16x128xf32>
    %347 = arith.mulf %346, %345 : vector<16x128xf32>
    %348 = arith.addf %347, %25 : vector<16x128xf32>
    %cst_138 = arith.constant 1.250000e-01 : f32
    %349 = vector.broadcast %cst_138 : f32 to vector<1x128xf32>
    %350 = arith.mulf %349, %18 : vector<1x128xf32>
    %351 = vector.broadcast %350 : vector<1x128xf32> to vector<16x128xf32>
    %352 = arith.addf %348, %351 : vector<16x128xf32>
    %cst_139 = arith.constant 1.250000e-01 : f32
    %353 = vector.broadcast %cst_139 : f32 to vector<1x128xf32>
    %354 = arith.mulf %353, %28 : vector<1x128xf32>
    %355 = vector.broadcast %354 : vector<1x128xf32> to vector<16x128xf32>
    %356 = arith.addf %34, %355 : vector<16x128xf32>
    %357 = arith.negf %356 : vector<16x128xf32>
    %358 = math.exp %357 : vector<16x128xf32>
    %cst_140 = arith.constant 1.000000e+00 : f32
    %359 = vector.broadcast %cst_140 : f32 to vector<16x128xf32>
    %360 = arith.addf %359, %358 : vector<16x128xf32>
    %361 = arith.divf %359, %360 : vector<16x128xf32>
    %362 = vector.broadcast %27 : vector<1x128xf32> to vector<16x128xf32>
    %363 = arith.mulf %362, %361 : vector<16x128xf32>
    %364 = arith.addf %363, %36 : vector<16x128xf32>
    %cst_141 = arith.constant 1.250000e-01 : f32
    %365 = vector.broadcast %cst_141 : f32 to vector<1x128xf32>
    %366 = arith.mulf %365, %29 : vector<1x128xf32>
    %367 = vector.broadcast %366 : vector<1x128xf32> to vector<16x128xf32>
    %368 = arith.addf %364, %367 : vector<16x128xf32>
    %cst_142 = arith.constant 1.250000e-01 : f32
    %369 = vector.broadcast %cst_142 : f32 to vector<1x128xf32>
    %370 = arith.mulf %369, %39 : vector<1x128xf32>
    %371 = vector.broadcast %370 : vector<1x128xf32> to vector<16x128xf32>
    %372 = arith.addf %45, %371 : vector<16x128xf32>
    %373 = arith.negf %372 : vector<16x128xf32>
    %374 = math.exp %373 : vector<16x128xf32>
    %cst_143 = arith.constant 1.000000e+00 : f32
    %375 = vector.broadcast %cst_143 : f32 to vector<16x128xf32>
    %376 = arith.addf %375, %374 : vector<16x128xf32>
    %377 = arith.divf %375, %376 : vector<16x128xf32>
    %378 = vector.broadcast %38 : vector<1x128xf32> to vector<16x128xf32>
    %379 = arith.mulf %378, %377 : vector<16x128xf32>
    %380 = arith.addf %379, %47 : vector<16x128xf32>
    %cst_144 = arith.constant 1.250000e-01 : f32
    %381 = vector.broadcast %cst_144 : f32 to vector<1x128xf32>
    %382 = arith.mulf %381, %40 : vector<1x128xf32>
    %383 = vector.broadcast %382 : vector<1x128xf32> to vector<16x128xf32>
    %384 = arith.addf %380, %383 : vector<16x128xf32>
    %385 = arith.truncf %320 : vector<16x128xf32> to vector<16x128xbf16>
    %cst_145 = arith.constant dense<0.000000e+00> : vector<16x128xf32>
    %386 = tpu.matmul %385, %4, %cst_145 {dimension_numbers = #tpu.dot_dimension_numbers<[1], [0], [0], [1], [0, 0, 1, 1], [], []>} : vector<16x128xbf16>, vector<128x128xbf16>, vector<16x128xf32> -> vector<16x128xf32>
    %cst_146 = arith.constant dense<0.000000e+00> : vector<16x128xf32>
    %387 = tpu.matmul %3, %4, %cst_146 {dimension_numbers = #tpu.dot_dimension_numbers<[1], [0], [0], [1], [0, 0, 1, 1], [], []>} : vector<16x128xbf16>, vector<128x128xbf16>, vector<16x128xf32> -> vector<16x128xf32>
    %388 = arith.mulf %386, %329 : vector<16x128xf32>
    %389 = arith.addf %388, %336 : vector<16x128xf32>
    %390 = arith.mulf %387, %329 : vector<16x128xf32>
    %391 = math.tanh %389 : vector<16x128xf32>
    %392 = arith.mulf %391, %391 : vector<16x128xf32>
    %cst_147 = arith.constant 1.000000e+00 : f32
    %393 = vector.broadcast %cst_147 : f32 to vector<16x128xf32>
    %394 = arith.subf %393, %392 : vector<16x128xf32>
    %395 = arith.mulf %394, %390 : vector<16x128xf32>
    %396 = arith.truncf %391 : vector<16x128xf32> to vector<16x128xbf16>
    %cst_148 = arith.constant dense<0.000000e+00> : vector<16x128xf32>
    %397 = tpu.matmul %396, %15, %cst_148 {dimension_numbers = #tpu.dot_dimension_numbers<[1], [0], [0], [1], [0, 0, 1, 1], [], []>} : vector<16x128xbf16>, vector<128x128xbf16>, vector<16x128xf32> -> vector<16x128xf32>
    %398 = arith.truncf %395 : vector<16x128xf32> to vector<16x128xbf16>
    %cst_149 = arith.constant dense<0.000000e+00> : vector<16x128xf32>
    %399 = tpu.matmul %398, %15, %cst_149 {dimension_numbers = #tpu.dot_dimension_numbers<[1], [0], [0], [1], [0, 0, 1, 1], [], []>} : vector<16x128xbf16>, vector<128x128xbf16>, vector<16x128xf32> -> vector<16x128xf32>
    %400 = arith.mulf %397, %345 : vector<16x128xf32>
    %401 = arith.addf %400, %352 : vector<16x128xf32>
    %402 = arith.mulf %399, %345 : vector<16x128xf32>
    %403 = math.tanh %401 : vector<16x128xf32>
    %404 = arith.mulf %403, %403 : vector<16x128xf32>
    %cst_150 = arith.constant 1.000000e+00 : f32
    %405 = vector.broadcast %cst_150 : f32 to vector<16x128xf32>
    %406 = arith.subf %405, %404 : vector<16x128xf32>
    %407 = arith.mulf %406, %402 : vector<16x128xf32>
    %408 = arith.truncf %403 : vector<16x128xf32> to vector<16x128xbf16>
    %cst_151 = arith.constant dense<0.000000e+00> : vector<16x128xf32>
    %409 = tpu.matmul %408, %26, %cst_151 {dimension_numbers = #tpu.dot_dimension_numbers<[1], [0], [0], [1], [0, 0, 1, 1], [], []>} : vector<16x128xbf16>, vector<128x128xbf16>, vector<16x128xf32> -> vector<16x128xf32>
    %410 = arith.truncf %407 : vector<16x128xf32> to vector<16x128xbf16>
    %cst_152 = arith.constant dense<0.000000e+00> : vector<16x128xf32>
    %411 = tpu.matmul %410, %26, %cst_152 {dimension_numbers = #tpu.dot_dimension_numbers<[1], [0], [0], [1], [0, 0, 1, 1], [], []>} : vector<16x128xbf16>, vector<128x128xbf16>, vector<16x128xf32> -> vector<16x128xf32>
    %412 = arith.mulf %409, %361 : vector<16x128xf32>
    %413 = arith.addf %412, %368 : vector<16x128xf32>
    %414 = arith.mulf %411, %361 : vector<16x128xf32>
    %415 = math.tanh %413 : vector<16x128xf32>
    %416 = arith.mulf %415, %415 : vector<16x128xf32>
    %cst_153 = arith.constant 1.000000e+00 : f32
    %417 = vector.broadcast %cst_153 : f32 to vector<16x128xf32>
    %418 = arith.subf %417, %416 : vector<16x128xf32>
    %419 = arith.mulf %418, %414 : vector<16x128xf32>
    %420 = arith.truncf %415 : vector<16x128xf32> to vector<16x128xbf16>
    %cst_154 = arith.constant dense<0.000000e+00> : vector<16x128xf32>
    %421 = tpu.matmul %420, %37, %cst_154 {dimension_numbers = #tpu.dot_dimension_numbers<[1], [0], [0], [1], [0, 0, 1, 1], [], []>} : vector<16x128xbf16>, vector<128x128xbf16>, vector<16x128xf32> -> vector<16x128xf32>
    %422 = arith.truncf %419 : vector<16x128xf32> to vector<16x128xbf16>
    %cst_155 = arith.constant dense<0.000000e+00> : vector<16x128xf32>
    %423 = tpu.matmul %422, %37, %cst_155 {dimension_numbers = #tpu.dot_dimension_numbers<[1], [0], [0], [1], [0, 0, 1, 1], [], []>} : vector<16x128xbf16>, vector<128x128xbf16>, vector<16x128xf32> -> vector<16x128xf32>
    %424 = arith.mulf %421, %377 : vector<16x128xf32>
    %425 = arith.addf %424, %384 : vector<16x128xf32>
    %426 = arith.mulf %423, %377 : vector<16x128xf32>
    %427 = arith.mulf %1, %426 : vector<16x128xf32>
    %cst_156 = arith.constant dense<0.000000e+00> : vector<16xf32>
    %428 = vector.multi_reduction <add>, %427, %cst_156 [1] : vector<16x128xf32> to vector<16xf32>
    %429 = vector.shape_cast %428 : vector<16xf32> to vector<16x1xf32>
    %cst_157 = arith.constant 2.000000e+00 : f32
    %430 = vector.broadcast %cst_157 : f32 to vector<16x128xf32>
    %431 = arith.mulf %430, %265 : vector<16x128xf32>
    %432 = arith.addf %153, %431 : vector<16x128xf32>
    %cst_158 = arith.constant 2.000000e+00 : f32
    %433 = vector.broadcast %cst_158 : f32 to vector<16x128xf32>
    %434 = arith.mulf %433, %313 : vector<16x128xf32>
    %435 = arith.addf %432, %434 : vector<16x128xf32>
    %436 = arith.addf %435, %425 : vector<16x128xf32>
    %cst_159 = arith.constant 0.020833334 : f32
    %437 = vector.broadcast %cst_159 : f32 to vector<16x128xf32>
    %438 = arith.mulf %437, %436 : vector<16x128xf32>
    %439 = arith.addf %0, %438 : vector<16x128xf32>
    %cst_160 = arith.constant 2.000000e+00 : f32
    %440 = vector.broadcast %cst_160 : f32 to vector<16x1xf32>
    %441 = arith.mulf %440, %269 : vector<16x1xf32>
    %442 = arith.addf %157, %441 : vector<16x1xf32>
    %cst_161 = arith.constant 2.000000e+00 : f32
    %443 = vector.broadcast %cst_161 : f32 to vector<16x1xf32>
    %444 = arith.mulf %443, %317 : vector<16x1xf32>
    %445 = arith.addf %442, %444 : vector<16x1xf32>
    %446 = arith.addf %445, %429 : vector<16x1xf32>
    %cst_162 = arith.constant 0.020833334 : f32
    %447 = vector.broadcast %cst_162 : f32 to vector<16x1xf32>
    %448 = arith.mulf %447, %446 : vector<16x1xf32>
    %449 = arith.subf %48, %448 : vector<16x1xf32>
    %450 = arith.truncf %439 : vector<16x128xf32> to vector<16x128xbf16>
    %cst_163 = arith.constant dense<0.000000e+00> : vector<16x128xf32>
    %451 = tpu.matmul %450, %4, %cst_163 {dimension_numbers = #tpu.dot_dimension_numbers<[1], [0], [0], [1], [0, 0, 1, 1], [], []>} : vector<16x128xbf16>, vector<128x128xbf16>, vector<16x128xf32> -> vector<16x128xf32>
    %cst_164 = arith.constant dense<0.000000e+00> : vector<16x128xf32>
    %452 = tpu.matmul %3, %4, %cst_164 {dimension_numbers = #tpu.dot_dimension_numbers<[1], [0], [0], [1], [0, 0, 1, 1], [], []>} : vector<16x128xbf16>, vector<128x128xbf16>, vector<16x128xf32> -> vector<16x128xf32>
    %453 = arith.mulf %451, %329 : vector<16x128xf32>
    %454 = arith.addf %453, %336 : vector<16x128xf32>
    %455 = arith.mulf %452, %329 : vector<16x128xf32>
    %456 = math.tanh %454 : vector<16x128xf32>
    %457 = arith.mulf %456, %456 : vector<16x128xf32>
    %cst_165 = arith.constant 1.000000e+00 : f32
    %458 = vector.broadcast %cst_165 : f32 to vector<16x128xf32>
    %459 = arith.subf %458, %457 : vector<16x128xf32>
    %460 = arith.mulf %459, %455 : vector<16x128xf32>
    %461 = arith.truncf %456 : vector<16x128xf32> to vector<16x128xbf16>
    %cst_166 = arith.constant dense<0.000000e+00> : vector<16x128xf32>
    %462 = tpu.matmul %461, %15, %cst_166 {dimension_numbers = #tpu.dot_dimension_numbers<[1], [0], [0], [1], [0, 0, 1, 1], [], []>} : vector<16x128xbf16>, vector<128x128xbf16>, vector<16x128xf32> -> vector<16x128xf32>
    %463 = arith.truncf %460 : vector<16x128xf32> to vector<16x128xbf16>
    %cst_167 = arith.constant dense<0.000000e+00> : vector<16x128xf32>
    %464 = tpu.matmul %463, %15, %cst_167 {dimension_numbers = #tpu.dot_dimension_numbers<[1], [0], [0], [1], [0, 0, 1, 1], [], []>} : vector<16x128xbf16>, vector<128x128xbf16>, vector<16x128xf32> -> vector<16x128xf32>
    %465 = arith.mulf %462, %345 : vector<16x128xf32>
    %466 = arith.addf %465, %352 : vector<16x128xf32>
    %467 = arith.mulf %464, %345 : vector<16x128xf32>
    %468 = math.tanh %466 : vector<16x128xf32>
    %469 = arith.mulf %468, %468 : vector<16x128xf32>
    %cst_168 = arith.constant 1.000000e+00 : f32
    %470 = vector.broadcast %cst_168 : f32 to vector<16x128xf32>
    %471 = arith.subf %470, %469 : vector<16x128xf32>
    %472 = arith.mulf %471, %467 : vector<16x128xf32>
    %473 = arith.truncf %468 : vector<16x128xf32> to vector<16x128xbf16>
    %cst_169 = arith.constant dense<0.000000e+00> : vector<16x128xf32>
    %474 = tpu.matmul %473, %26, %cst_169 {dimension_numbers = #tpu.dot_dimension_numbers<[1], [0], [0], [1], [0, 0, 1, 1], [], []>} : vector<16x128xbf16>, vector<128x128xbf16>, vector<16x128xf32> -> vector<16x128xf32>
    %475 = arith.truncf %472 : vector<16x128xf32> to vector<16x128xbf16>
    %cst_170 = arith.constant dense<0.000000e+00> : vector<16x128xf32>
    %476 = tpu.matmul %475, %26, %cst_170 {dimension_numbers = #tpu.dot_dimension_numbers<[1], [0], [0], [1], [0, 0, 1, 1], [], []>} : vector<16x128xbf16>, vector<128x128xbf16>, vector<16x128xf32> -> vector<16x128xf32>
    %477 = arith.mulf %474, %361 : vector<16x128xf32>
    %478 = arith.addf %477, %368 : vector<16x128xf32>
    %479 = arith.mulf %476, %361 : vector<16x128xf32>
    %480 = math.tanh %478 : vector<16x128xf32>
    %481 = arith.mulf %480, %480 : vector<16x128xf32>
    %cst_171 = arith.constant 1.000000e+00 : f32
    %482 = vector.broadcast %cst_171 : f32 to vector<16x128xf32>
    %483 = arith.subf %482, %481 : vector<16x128xf32>
    %484 = arith.mulf %483, %479 : vector<16x128xf32>
    %485 = arith.truncf %480 : vector<16x128xf32> to vector<16x128xbf16>
    %cst_172 = arith.constant dense<0.000000e+00> : vector<16x128xf32>
    %486 = tpu.matmul %485, %37, %cst_172 {dimension_numbers = #tpu.dot_dimension_numbers<[1], [0], [0], [1], [0, 0, 1, 1], [], []>} : vector<16x128xbf16>, vector<128x128xbf16>, vector<16x128xf32> -> vector<16x128xf32>
    %487 = arith.truncf %484 : vector<16x128xf32> to vector<16x128xbf16>
    %cst_173 = arith.constant dense<0.000000e+00> : vector<16x128xf32>
    %488 = tpu.matmul %487, %37, %cst_173 {dimension_numbers = #tpu.dot_dimension_numbers<[1], [0], [0], [1], [0, 0, 1, 1], [], []>} : vector<16x128xbf16>, vector<128x128xbf16>, vector<16x128xf32> -> vector<16x128xf32>
    %489 = arith.mulf %486, %377 : vector<16x128xf32>
    %490 = arith.addf %489, %384 : vector<16x128xf32>
    %491 = arith.mulf %488, %377 : vector<16x128xf32>
    %492 = arith.mulf %1, %491 : vector<16x128xf32>
    %cst_174 = arith.constant dense<0.000000e+00> : vector<16xf32>
    %493 = vector.multi_reduction <add>, %492, %cst_174 [1] : vector<16x128xf32> to vector<16xf32>
    %494 = vector.shape_cast %493 : vector<16xf32> to vector<16x1xf32>
    %cst_175 = arith.constant 6.250000e-02 : f32
    %495 = vector.broadcast %cst_175 : f32 to vector<16x128xf32>
    %496 = arith.mulf %495, %490 : vector<16x128xf32>
    %497 = arith.addf %439, %496 : vector<16x128xf32>
    %cst_176 = arith.constant 1.875000e-01 : f32
    %498 = vector.broadcast %cst_176 : f32 to vector<1x128xf32>
    %499 = arith.mulf %498, %6 : vector<1x128xf32>
    %500 = vector.broadcast %499 : vector<1x128xf32> to vector<16x128xf32>
    %501 = arith.addf %12, %500 : vector<16x128xf32>
    %502 = arith.negf %501 : vector<16x128xf32>
    %503 = math.exp %502 : vector<16x128xf32>
    %cst_177 = arith.constant 1.000000e+00 : f32
    %504 = vector.broadcast %cst_177 : f32 to vector<16x128xf32>
    %505 = arith.addf %504, %503 : vector<16x128xf32>
    %506 = arith.divf %504, %505 : vector<16x128xf32>
    %507 = vector.broadcast %5 : vector<1x128xf32> to vector<16x128xf32>
    %508 = arith.mulf %507, %506 : vector<16x128xf32>
    %509 = arith.addf %508, %14 : vector<16x128xf32>
    %cst_178 = arith.constant 1.875000e-01 : f32
    %510 = vector.broadcast %cst_178 : f32 to vector<1x128xf32>
    %511 = arith.mulf %510, %7 : vector<1x128xf32>
    %512 = vector.broadcast %511 : vector<1x128xf32> to vector<16x128xf32>
    %513 = arith.addf %509, %512 : vector<16x128xf32>
    %cst_179 = arith.constant 1.875000e-01 : f32
    %514 = vector.broadcast %cst_179 : f32 to vector<1x128xf32>
    %515 = arith.mulf %514, %17 : vector<1x128xf32>
    %516 = vector.broadcast %515 : vector<1x128xf32> to vector<16x128xf32>
    %517 = arith.addf %23, %516 : vector<16x128xf32>
    %518 = arith.negf %517 : vector<16x128xf32>
    %519 = math.exp %518 : vector<16x128xf32>
    %cst_180 = arith.constant 1.000000e+00 : f32
    %520 = vector.broadcast %cst_180 : f32 to vector<16x128xf32>
    %521 = arith.addf %520, %519 : vector<16x128xf32>
    %522 = arith.divf %520, %521 : vector<16x128xf32>
    %523 = vector.broadcast %16 : vector<1x128xf32> to vector<16x128xf32>
    %524 = arith.mulf %523, %522 : vector<16x128xf32>
    %525 = arith.addf %524, %25 : vector<16x128xf32>
    %cst_181 = arith.constant 1.875000e-01 : f32
    %526 = vector.broadcast %cst_181 : f32 to vector<1x128xf32>
    %527 = arith.mulf %526, %18 : vector<1x128xf32>
    %528 = vector.broadcast %527 : vector<1x128xf32> to vector<16x128xf32>
    %529 = arith.addf %525, %528 : vector<16x128xf32>
    %cst_182 = arith.constant 1.875000e-01 : f32
    %530 = vector.broadcast %cst_182 : f32 to vector<1x128xf32>
    %531 = arith.mulf %530, %28 : vector<1x128xf32>
    %532 = vector.broadcast %531 : vector<1x128xf32> to vector<16x128xf32>
    %533 = arith.addf %34, %532 : vector<16x128xf32>
    %534 = arith.negf %533 : vector<16x128xf32>
    %535 = math.exp %534 : vector<16x128xf32>
    %cst_183 = arith.constant 1.000000e+00 : f32
    %536 = vector.broadcast %cst_183 : f32 to vector<16x128xf32>
    %537 = arith.addf %536, %535 : vector<16x128xf32>
    %538 = arith.divf %536, %537 : vector<16x128xf32>
    %539 = vector.broadcast %27 : vector<1x128xf32> to vector<16x128xf32>
    %540 = arith.mulf %539, %538 : vector<16x128xf32>
    %541 = arith.addf %540, %36 : vector<16x128xf32>
    %cst_184 = arith.constant 1.875000e-01 : f32
    %542 = vector.broadcast %cst_184 : f32 to vector<1x128xf32>
    %543 = arith.mulf %542, %29 : vector<1x128xf32>
    %544 = vector.broadcast %543 : vector<1x128xf32> to vector<16x128xf32>
    %545 = arith.addf %541, %544 : vector<16x128xf32>
    %cst_185 = arith.constant 1.875000e-01 : f32
    %546 = vector.broadcast %cst_185 : f32 to vector<1x128xf32>
    %547 = arith.mulf %546, %39 : vector<1x128xf32>
    %548 = vector.broadcast %547 : vector<1x128xf32> to vector<16x128xf32>
    %549 = arith.addf %45, %548 : vector<16x128xf32>
    %550 = arith.negf %549 : vector<16x128xf32>
    %551 = math.exp %550 : vector<16x128xf32>
    %cst_186 = arith.constant 1.000000e+00 : f32
    %552 = vector.broadcast %cst_186 : f32 to vector<16x128xf32>
    %553 = arith.addf %552, %551 : vector<16x128xf32>
    %554 = arith.divf %552, %553 : vector<16x128xf32>
    %555 = vector.broadcast %38 : vector<1x128xf32> to vector<16x128xf32>
    %556 = arith.mulf %555, %554 : vector<16x128xf32>
    %557 = arith.addf %556, %47 : vector<16x128xf32>
    %cst_187 = arith.constant 1.875000e-01 : f32
    %558 = vector.broadcast %cst_187 : f32 to vector<1x128xf32>
    %559 = arith.mulf %558, %40 : vector<1x128xf32>
    %560 = vector.broadcast %559 : vector<1x128xf32> to vector<16x128xf32>
    %561 = arith.addf %557, %560 : vector<16x128xf32>
    %562 = arith.truncf %497 : vector<16x128xf32> to vector<16x128xbf16>
    %cst_188 = arith.constant dense<0.000000e+00> : vector<16x128xf32>
    %563 = tpu.matmul %562, %4, %cst_188 {dimension_numbers = #tpu.dot_dimension_numbers<[1], [0], [0], [1], [0, 0, 1, 1], [], []>} : vector<16x128xbf16>, vector<128x128xbf16>, vector<16x128xf32> -> vector<16x128xf32>
    %cst_189 = arith.constant dense<0.000000e+00> : vector<16x128xf32>
    %564 = tpu.matmul %3, %4, %cst_189 {dimension_numbers = #tpu.dot_dimension_numbers<[1], [0], [0], [1], [0, 0, 1, 1], [], []>} : vector<16x128xbf16>, vector<128x128xbf16>, vector<16x128xf32> -> vector<16x128xf32>
    %565 = arith.mulf %563, %506 : vector<16x128xf32>
    %566 = arith.addf %565, %513 : vector<16x128xf32>
    %567 = arith.mulf %564, %506 : vector<16x128xf32>
    %568 = math.tanh %566 : vector<16x128xf32>
    %569 = arith.mulf %568, %568 : vector<16x128xf32>
    %cst_190 = arith.constant 1.000000e+00 : f32
    %570 = vector.broadcast %cst_190 : f32 to vector<16x128xf32>
    %571 = arith.subf %570, %569 : vector<16x128xf32>
    %572 = arith.mulf %571, %567 : vector<16x128xf32>
    %573 = arith.truncf %568 : vector<16x128xf32> to vector<16x128xbf16>
    %cst_191 = arith.constant dense<0.000000e+00> : vector<16x128xf32>
    %574 = tpu.matmul %573, %15, %cst_191 {dimension_numbers = #tpu.dot_dimension_numbers<[1], [0], [0], [1], [0, 0, 1, 1], [], []>} : vector<16x128xbf16>, vector<128x128xbf16>, vector<16x128xf32> -> vector<16x128xf32>
    %575 = arith.truncf %572 : vector<16x128xf32> to vector<16x128xbf16>
    %cst_192 = arith.constant dense<0.000000e+00> : vector<16x128xf32>
    %576 = tpu.matmul %575, %15, %cst_192 {dimension_numbers = #tpu.dot_dimension_numbers<[1], [0], [0], [1], [0, 0, 1, 1], [], []>} : vector<16x128xbf16>, vector<128x128xbf16>, vector<16x128xf32> -> vector<16x128xf32>
    %577 = arith.mulf %574, %522 : vector<16x128xf32>
    %578 = arith.addf %577, %529 : vector<16x128xf32>
    %579 = arith.mulf %576, %522 : vector<16x128xf32>
    %580 = math.tanh %578 : vector<16x128xf32>
    %581 = arith.mulf %580, %580 : vector<16x128xf32>
    %cst_193 = arith.constant 1.000000e+00 : f32
    %582 = vector.broadcast %cst_193 : f32 to vector<16x128xf32>
    %583 = arith.subf %582, %581 : vector<16x128xf32>
    %584 = arith.mulf %583, %579 : vector<16x128xf32>
    %585 = arith.truncf %580 : vector<16x128xf32> to vector<16x128xbf16>
    %cst_194 = arith.constant dense<0.000000e+00> : vector<16x128xf32>
    %586 = tpu.matmul %585, %26, %cst_194 {dimension_numbers = #tpu.dot_dimension_numbers<[1], [0], [0], [1], [0, 0, 1, 1], [], []>} : vector<16x128xbf16>, vector<128x128xbf16>, vector<16x128xf32> -> vector<16x128xf32>
    %587 = arith.truncf %584 : vector<16x128xf32> to vector<16x128xbf16>
    %cst_195 = arith.constant dense<0.000000e+00> : vector<16x128xf32>
    %588 = tpu.matmul %587, %26, %cst_195 {dimension_numbers = #tpu.dot_dimension_numbers<[1], [0], [0], [1], [0, 0, 1, 1], [], []>} : vector<16x128xbf16>, vector<128x128xbf16>, vector<16x128xf32> -> vector<16x128xf32>
    %589 = arith.mulf %586, %538 : vector<16x128xf32>
    %590 = arith.addf %589, %545 : vector<16x128xf32>
    %591 = arith.mulf %588, %538 : vector<16x128xf32>
    %592 = math.tanh %590 : vector<16x128xf32>
    %593 = arith.mulf %592, %592 : vector<16x128xf32>
    %cst_196 = arith.constant 1.000000e+00 : f32
    %594 = vector.broadcast %cst_196 : f32 to vector<16x128xf32>
    %595 = arith.subf %594, %593 : vector<16x128xf32>
    %596 = arith.mulf %595, %591 : vector<16x128xf32>
    %597 = arith.truncf %592 : vector<16x128xf32> to vector<16x128xbf16>
    %cst_197 = arith.constant dense<0.000000e+00> : vector<16x128xf32>
    %598 = tpu.matmul %597, %37, %cst_197 {dimension_numbers = #tpu.dot_dimension_numbers<[1], [0], [0], [1], [0, 0, 1, 1], [], []>} : vector<16x128xbf16>, vector<128x128xbf16>, vector<16x128xf32> -> vector<16x128xf32>
    %599 = arith.truncf %596 : vector<16x128xf32> to vector<16x128xbf16>
    %cst_198 = arith.constant dense<0.000000e+00> : vector<16x128xf32>
    %600 = tpu.matmul %599, %37, %cst_198 {dimension_numbers = #tpu.dot_dimension_numbers<[1], [0], [0], [1], [0, 0, 1, 1], [], []>} : vector<16x128xbf16>, vector<128x128xbf16>, vector<16x128xf32> -> vector<16x128xf32>
    %601 = arith.mulf %598, %554 : vector<16x128xf32>
    %602 = arith.addf %601, %561 : vector<16x128xf32>
    %603 = arith.mulf %600, %554 : vector<16x128xf32>
    %604 = arith.mulf %1, %603 : vector<16x128xf32>
    %cst_199 = arith.constant dense<0.000000e+00> : vector<16xf32>
    %605 = vector.multi_reduction <add>, %604, %cst_199 [1] : vector<16x128xf32> to vector<16xf32>
    %606 = vector.shape_cast %605 : vector<16xf32> to vector<16x1xf32>
    %cst_200 = arith.constant 6.250000e-02 : f32
    %607 = vector.broadcast %cst_200 : f32 to vector<16x128xf32>
    %608 = arith.mulf %607, %602 : vector<16x128xf32>
    %609 = arith.addf %439, %608 : vector<16x128xf32>
    %610 = arith.truncf %609 : vector<16x128xf32> to vector<16x128xbf16>
    %cst_201 = arith.constant dense<0.000000e+00> : vector<16x128xf32>
    %611 = tpu.matmul %610, %4, %cst_201 {dimension_numbers = #tpu.dot_dimension_numbers<[1], [0], [0], [1], [0, 0, 1, 1], [], []>} : vector<16x128xbf16>, vector<128x128xbf16>, vector<16x128xf32> -> vector<16x128xf32>
    %cst_202 = arith.constant dense<0.000000e+00> : vector<16x128xf32>
    %612 = tpu.matmul %3, %4, %cst_202 {dimension_numbers = #tpu.dot_dimension_numbers<[1], [0], [0], [1], [0, 0, 1, 1], [], []>} : vector<16x128xbf16>, vector<128x128xbf16>, vector<16x128xf32> -> vector<16x128xf32>
    %613 = arith.mulf %611, %506 : vector<16x128xf32>
    %614 = arith.addf %613, %513 : vector<16x128xf32>
    %615 = arith.mulf %612, %506 : vector<16x128xf32>
    %616 = math.tanh %614 : vector<16x128xf32>
    %617 = arith.mulf %616, %616 : vector<16x128xf32>
    %cst_203 = arith.constant 1.000000e+00 : f32
    %618 = vector.broadcast %cst_203 : f32 to vector<16x128xf32>
    %619 = arith.subf %618, %617 : vector<16x128xf32>
    %620 = arith.mulf %619, %615 : vector<16x128xf32>
    %621 = arith.truncf %616 : vector<16x128xf32> to vector<16x128xbf16>
    %cst_204 = arith.constant dense<0.000000e+00> : vector<16x128xf32>
    %622 = tpu.matmul %621, %15, %cst_204 {dimension_numbers = #tpu.dot_dimension_numbers<[1], [0], [0], [1], [0, 0, 1, 1], [], []>} : vector<16x128xbf16>, vector<128x128xbf16>, vector<16x128xf32> -> vector<16x128xf32>
    %623 = arith.truncf %620 : vector<16x128xf32> to vector<16x128xbf16>
    %cst_205 = arith.constant dense<0.000000e+00> : vector<16x128xf32>
    %624 = tpu.matmul %623, %15, %cst_205 {dimension_numbers = #tpu.dot_dimension_numbers<[1], [0], [0], [1], [0, 0, 1, 1], [], []>} : vector<16x128xbf16>, vector<128x128xbf16>, vector<16x128xf32> -> vector<16x128xf32>
    %625 = arith.mulf %622, %522 : vector<16x128xf32>
    %626 = arith.addf %625, %529 : vector<16x128xf32>
    %627 = arith.mulf %624, %522 : vector<16x128xf32>
    %628 = math.tanh %626 : vector<16x128xf32>
    %629 = arith.mulf %628, %628 : vector<16x128xf32>
    %cst_206 = arith.constant 1.000000e+00 : f32
    %630 = vector.broadcast %cst_206 : f32 to vector<16x128xf32>
    %631 = arith.subf %630, %629 : vector<16x128xf32>
    %632 = arith.mulf %631, %627 : vector<16x128xf32>
    %633 = arith.truncf %628 : vector<16x128xf32> to vector<16x128xbf16>
    %cst_207 = arith.constant dense<0.000000e+00> : vector<16x128xf32>
    %634 = tpu.matmul %633, %26, %cst_207 {dimension_numbers = #tpu.dot_dimension_numbers<[1], [0], [0], [1], [0, 0, 1, 1], [], []>} : vector<16x128xbf16>, vector<128x128xbf16>, vector<16x128xf32> -> vector<16x128xf32>
    %635 = arith.truncf %632 : vector<16x128xf32> to vector<16x128xbf16>
    %cst_208 = arith.constant dense<0.000000e+00> : vector<16x128xf32>
    %636 = tpu.matmul %635, %26, %cst_208 {dimension_numbers = #tpu.dot_dimension_numbers<[1], [0], [0], [1], [0, 0, 1, 1], [], []>} : vector<16x128xbf16>, vector<128x128xbf16>, vector<16x128xf32> -> vector<16x128xf32>
    %637 = arith.mulf %634, %538 : vector<16x128xf32>
    %638 = arith.addf %637, %545 : vector<16x128xf32>
    %639 = arith.mulf %636, %538 : vector<16x128xf32>
    %640 = math.tanh %638 : vector<16x128xf32>
    %641 = arith.mulf %640, %640 : vector<16x128xf32>
    %cst_209 = arith.constant 1.000000e+00 : f32
    %642 = vector.broadcast %cst_209 : f32 to vector<16x128xf32>
    %643 = arith.subf %642, %641 : vector<16x128xf32>
    %644 = arith.mulf %643, %639 : vector<16x128xf32>
    %645 = arith.truncf %640 : vector<16x128xf32> to vector<16x128xbf16>
    %cst_210 = arith.constant dense<0.000000e+00> : vector<16x128xf32>
    %646 = tpu.matmul %645, %37, %cst_210 {dimension_numbers = #tpu.dot_dimension_numbers<[1], [0], [0], [1], [0, 0, 1, 1], [], []>} : vector<16x128xbf16>, vector<128x128xbf16>, vector<16x128xf32> -> vector<16x128xf32>
    %647 = arith.truncf %644 : vector<16x128xf32> to vector<16x128xbf16>
    %cst_211 = arith.constant dense<0.000000e+00> : vector<16x128xf32>
    %648 = tpu.matmul %647, %37, %cst_211 {dimension_numbers = #tpu.dot_dimension_numbers<[1], [0], [0], [1], [0, 0, 1, 1], [], []>} : vector<16x128xbf16>, vector<128x128xbf16>, vector<16x128xf32> -> vector<16x128xf32>
    %649 = arith.mulf %646, %554 : vector<16x128xf32>
    %650 = arith.addf %649, %561 : vector<16x128xf32>
    %651 = arith.mulf %648, %554 : vector<16x128xf32>
    %652 = arith.mulf %1, %651 : vector<16x128xf32>
    %cst_212 = arith.constant dense<0.000000e+00> : vector<16xf32>
    %653 = vector.multi_reduction <add>, %652, %cst_212 [1] : vector<16x128xf32> to vector<16xf32>
    %654 = vector.shape_cast %653 : vector<16xf32> to vector<16x1xf32>
    %cst_213 = arith.constant 1.250000e-01 : f32
    %655 = vector.broadcast %cst_213 : f32 to vector<16x128xf32>
    %656 = arith.mulf %655, %650 : vector<16x128xf32>
    %657 = arith.addf %439, %656 : vector<16x128xf32>
    %cst_214 = arith.constant 2.500000e-01 : f32
    %658 = vector.broadcast %cst_214 : f32 to vector<1x128xf32>
    %659 = arith.mulf %658, %6 : vector<1x128xf32>
    %660 = vector.broadcast %659 : vector<1x128xf32> to vector<16x128xf32>
    %661 = arith.addf %12, %660 : vector<16x128xf32>
    %662 = arith.negf %661 : vector<16x128xf32>
    %663 = math.exp %662 : vector<16x128xf32>
    %cst_215 = arith.constant 1.000000e+00 : f32
    %664 = vector.broadcast %cst_215 : f32 to vector<16x128xf32>
    %665 = arith.addf %664, %663 : vector<16x128xf32>
    %666 = arith.divf %664, %665 : vector<16x128xf32>
    %667 = vector.broadcast %5 : vector<1x128xf32> to vector<16x128xf32>
    %668 = arith.mulf %667, %666 : vector<16x128xf32>
    %669 = arith.addf %668, %14 : vector<16x128xf32>
    %cst_216 = arith.constant 2.500000e-01 : f32
    %670 = vector.broadcast %cst_216 : f32 to vector<1x128xf32>
    %671 = arith.mulf %670, %7 : vector<1x128xf32>
    %672 = vector.broadcast %671 : vector<1x128xf32> to vector<16x128xf32>
    %673 = arith.addf %669, %672 : vector<16x128xf32>
    %cst_217 = arith.constant 2.500000e-01 : f32
    %674 = vector.broadcast %cst_217 : f32 to vector<1x128xf32>
    %675 = arith.mulf %674, %17 : vector<1x128xf32>
    %676 = vector.broadcast %675 : vector<1x128xf32> to vector<16x128xf32>
    %677 = arith.addf %23, %676 : vector<16x128xf32>
    %678 = arith.negf %677 : vector<16x128xf32>
    %679 = math.exp %678 : vector<16x128xf32>
    %cst_218 = arith.constant 1.000000e+00 : f32
    %680 = vector.broadcast %cst_218 : f32 to vector<16x128xf32>
    %681 = arith.addf %680, %679 : vector<16x128xf32>
    %682 = arith.divf %680, %681 : vector<16x128xf32>
    %683 = vector.broadcast %16 : vector<1x128xf32> to vector<16x128xf32>
    %684 = arith.mulf %683, %682 : vector<16x128xf32>
    %685 = arith.addf %684, %25 : vector<16x128xf32>
    %cst_219 = arith.constant 2.500000e-01 : f32
    %686 = vector.broadcast %cst_219 : f32 to vector<1x128xf32>
    %687 = arith.mulf %686, %18 : vector<1x128xf32>
    %688 = vector.broadcast %687 : vector<1x128xf32> to vector<16x128xf32>
    %689 = arith.addf %685, %688 : vector<16x128xf32>
    %cst_220 = arith.constant 2.500000e-01 : f32
    %690 = vector.broadcast %cst_220 : f32 to vector<1x128xf32>
    %691 = arith.mulf %690, %28 : vector<1x128xf32>
    %692 = vector.broadcast %691 : vector<1x128xf32> to vector<16x128xf32>
    %693 = arith.addf %34, %692 : vector<16x128xf32>
    %694 = arith.negf %693 : vector<16x128xf32>
    %695 = math.exp %694 : vector<16x128xf32>
    %cst_221 = arith.constant 1.000000e+00 : f32
    %696 = vector.broadcast %cst_221 : f32 to vector<16x128xf32>
    %697 = arith.addf %696, %695 : vector<16x128xf32>
    %698 = arith.divf %696, %697 : vector<16x128xf32>
    %699 = vector.broadcast %27 : vector<1x128xf32> to vector<16x128xf32>
    %700 = arith.mulf %699, %698 : vector<16x128xf32>
    %701 = arith.addf %700, %36 : vector<16x128xf32>
    %cst_222 = arith.constant 2.500000e-01 : f32
    %702 = vector.broadcast %cst_222 : f32 to vector<1x128xf32>
    %703 = arith.mulf %702, %29 : vector<1x128xf32>
    %704 = vector.broadcast %703 : vector<1x128xf32> to vector<16x128xf32>
    %705 = arith.addf %701, %704 : vector<16x128xf32>
    %cst_223 = arith.constant 2.500000e-01 : f32
    %706 = vector.broadcast %cst_223 : f32 to vector<1x128xf32>
    %707 = arith.mulf %706, %39 : vector<1x128xf32>
    %708 = vector.broadcast %707 : vector<1x128xf32> to vector<16x128xf32>
    %709 = arith.addf %45, %708 : vector<16x128xf32>
    %710 = arith.negf %709 : vector<16x128xf32>
    %711 = math.exp %710 : vector<16x128xf32>
    %cst_224 = arith.constant 1.000000e+00 : f32
    %712 = vector.broadcast %cst_224 : f32 to vector<16x128xf32>
    %713 = arith.addf %712, %711 : vector<16x128xf32>
    %714 = arith.divf %712, %713 : vector<16x128xf32>
    %715 = vector.broadcast %38 : vector<1x128xf32> to vector<16x128xf32>
    %716 = arith.mulf %715, %714 : vector<16x128xf32>
    %717 = arith.addf %716, %47 : vector<16x128xf32>
    %cst_225 = arith.constant 2.500000e-01 : f32
    %718 = vector.broadcast %cst_225 : f32 to vector<1x128xf32>
    %719 = arith.mulf %718, %40 : vector<1x128xf32>
    %720 = vector.broadcast %719 : vector<1x128xf32> to vector<16x128xf32>
    %721 = arith.addf %717, %720 : vector<16x128xf32>
    %722 = arith.truncf %657 : vector<16x128xf32> to vector<16x128xbf16>
    %cst_226 = arith.constant dense<0.000000e+00> : vector<16x128xf32>
    %723 = tpu.matmul %722, %4, %cst_226 {dimension_numbers = #tpu.dot_dimension_numbers<[1], [0], [0], [1], [0, 0, 1, 1], [], []>} : vector<16x128xbf16>, vector<128x128xbf16>, vector<16x128xf32> -> vector<16x128xf32>
    %cst_227 = arith.constant dense<0.000000e+00> : vector<16x128xf32>
    %724 = tpu.matmul %3, %4, %cst_227 {dimension_numbers = #tpu.dot_dimension_numbers<[1], [0], [0], [1], [0, 0, 1, 1], [], []>} : vector<16x128xbf16>, vector<128x128xbf16>, vector<16x128xf32> -> vector<16x128xf32>
    %725 = arith.mulf %723, %666 : vector<16x128xf32>
    %726 = arith.addf %725, %673 : vector<16x128xf32>
    %727 = arith.mulf %724, %666 : vector<16x128xf32>
    %728 = math.tanh %726 : vector<16x128xf32>
    %729 = arith.mulf %728, %728 : vector<16x128xf32>
    %cst_228 = arith.constant 1.000000e+00 : f32
    %730 = vector.broadcast %cst_228 : f32 to vector<16x128xf32>
    %731 = arith.subf %730, %729 : vector<16x128xf32>
    %732 = arith.mulf %731, %727 : vector<16x128xf32>
    %733 = arith.truncf %728 : vector<16x128xf32> to vector<16x128xbf16>
    %cst_229 = arith.constant dense<0.000000e+00> : vector<16x128xf32>
    %734 = tpu.matmul %733, %15, %cst_229 {dimension_numbers = #tpu.dot_dimension_numbers<[1], [0], [0], [1], [0, 0, 1, 1], [], []>} : vector<16x128xbf16>, vector<128x128xbf16>, vector<16x128xf32> -> vector<16x128xf32>
    %735 = arith.truncf %732 : vector<16x128xf32> to vector<16x128xbf16>
    %cst_230 = arith.constant dense<0.000000e+00> : vector<16x128xf32>
    %736 = tpu.matmul %735, %15, %cst_230 {dimension_numbers = #tpu.dot_dimension_numbers<[1], [0], [0], [1], [0, 0, 1, 1], [], []>} : vector<16x128xbf16>, vector<128x128xbf16>, vector<16x128xf32> -> vector<16x128xf32>
    %737 = arith.mulf %734, %682 : vector<16x128xf32>
    %738 = arith.addf %737, %689 : vector<16x128xf32>
    %739 = arith.mulf %736, %682 : vector<16x128xf32>
    %740 = math.tanh %738 : vector<16x128xf32>
    %741 = arith.mulf %740, %740 : vector<16x128xf32>
    %cst_231 = arith.constant 1.000000e+00 : f32
    %742 = vector.broadcast %cst_231 : f32 to vector<16x128xf32>
    %743 = arith.subf %742, %741 : vector<16x128xf32>
    %744 = arith.mulf %743, %739 : vector<16x128xf32>
    %745 = arith.truncf %740 : vector<16x128xf32> to vector<16x128xbf16>
    %cst_232 = arith.constant dense<0.000000e+00> : vector<16x128xf32>
    %746 = tpu.matmul %745, %26, %cst_232 {dimension_numbers = #tpu.dot_dimension_numbers<[1], [0], [0], [1], [0, 0, 1, 1], [], []>} : vector<16x128xbf16>, vector<128x128xbf16>, vector<16x128xf32> -> vector<16x128xf32>
    %747 = arith.truncf %744 : vector<16x128xf32> to vector<16x128xbf16>
    %cst_233 = arith.constant dense<0.000000e+00> : vector<16x128xf32>
    %748 = tpu.matmul %747, %26, %cst_233 {dimension_numbers = #tpu.dot_dimension_numbers<[1], [0], [0], [1], [0, 0, 1, 1], [], []>} : vector<16x128xbf16>, vector<128x128xbf16>, vector<16x128xf32> -> vector<16x128xf32>
    %749 = arith.mulf %746, %698 : vector<16x128xf32>
    %750 = arith.addf %749, %705 : vector<16x128xf32>
    %751 = arith.mulf %748, %698 : vector<16x128xf32>
    %752 = math.tanh %750 : vector<16x128xf32>
    %753 = arith.mulf %752, %752 : vector<16x128xf32>
    %cst_234 = arith.constant 1.000000e+00 : f32
    %754 = vector.broadcast %cst_234 : f32 to vector<16x128xf32>
    %755 = arith.subf %754, %753 : vector<16x128xf32>
    %756 = arith.mulf %755, %751 : vector<16x128xf32>
    %757 = arith.truncf %752 : vector<16x128xf32> to vector<16x128xbf16>
    %cst_235 = arith.constant dense<0.000000e+00> : vector<16x128xf32>
    %758 = tpu.matmul %757, %37, %cst_235 {dimension_numbers = #tpu.dot_dimension_numbers<[1], [0], [0], [1], [0, 0, 1, 1], [], []>} : vector<16x128xbf16>, vector<128x128xbf16>, vector<16x128xf32> -> vector<16x128xf32>
    %759 = arith.truncf %756 : vector<16x128xf32> to vector<16x128xbf16>
    %cst_236 = arith.constant dense<0.000000e+00> : vector<16x128xf32>
    %760 = tpu.matmul %759, %37, %cst_236 {dimension_numbers = #tpu.dot_dimension_numbers<[1], [0], [0], [1], [0, 0, 1, 1], [], []>} : vector<16x128xbf16>, vector<128x128xbf16>, vector<16x128xf32> -> vector<16x128xf32>
    %761 = arith.mulf %758, %714 : vector<16x128xf32>
    %762 = arith.addf %761, %721 : vector<16x128xf32>
    %763 = arith.mulf %760, %714 : vector<16x128xf32>
    %764 = arith.mulf %1, %763 : vector<16x128xf32>
    %cst_237 = arith.constant dense<0.000000e+00> : vector<16xf32>
    %765 = vector.multi_reduction <add>, %764, %cst_237 [1] : vector<16x128xf32> to vector<16xf32>
    %766 = vector.shape_cast %765 : vector<16xf32> to vector<16x1xf32>
    %cst_238 = arith.constant 2.000000e+00 : f32
    %767 = vector.broadcast %cst_238 : f32 to vector<16x128xf32>
    %768 = arith.mulf %767, %602 : vector<16x128xf32>
    %769 = arith.addf %490, %768 : vector<16x128xf32>
    %cst_239 = arith.constant 2.000000e+00 : f32
    %770 = vector.broadcast %cst_239 : f32 to vector<16x128xf32>
    %771 = arith.mulf %770, %650 : vector<16x128xf32>
    %772 = arith.addf %769, %771 : vector<16x128xf32>
    %773 = arith.addf %772, %762 : vector<16x128xf32>
    %cst_240 = arith.constant 0.020833334 : f32
    %774 = vector.broadcast %cst_240 : f32 to vector<16x128xf32>
    %775 = arith.mulf %774, %773 : vector<16x128xf32>
    %776 = arith.addf %439, %775 : vector<16x128xf32>
    %cst_241 = arith.constant 2.000000e+00 : f32
    %777 = vector.broadcast %cst_241 : f32 to vector<16x1xf32>
    %778 = arith.mulf %777, %606 : vector<16x1xf32>
    %779 = arith.addf %494, %778 : vector<16x1xf32>
    %cst_242 = arith.constant 2.000000e+00 : f32
    %780 = vector.broadcast %cst_242 : f32 to vector<16x1xf32>
    %781 = arith.mulf %780, %654 : vector<16x1xf32>
    %782 = arith.addf %779, %781 : vector<16x1xf32>
    %783 = arith.addf %782, %766 : vector<16x1xf32>
    %cst_243 = arith.constant 0.020833334 : f32
    %784 = vector.broadcast %cst_243 : f32 to vector<16x1xf32>
    %785 = arith.mulf %784, %783 : vector<16x1xf32>
    %786 = arith.subf %449, %785 : vector<16x1xf32>
    %787 = arith.truncf %776 : vector<16x128xf32> to vector<16x128xbf16>
    %cst_244 = arith.constant dense<0.000000e+00> : vector<16x128xf32>
    %788 = tpu.matmul %787, %4, %cst_244 {dimension_numbers = #tpu.dot_dimension_numbers<[1], [0], [0], [1], [0, 0, 1, 1], [], []>} : vector<16x128xbf16>, vector<128x128xbf16>, vector<16x128xf32> -> vector<16x128xf32>
    %cst_245 = arith.constant dense<0.000000e+00> : vector<16x128xf32>
    %789 = tpu.matmul %3, %4, %cst_245 {dimension_numbers = #tpu.dot_dimension_numbers<[1], [0], [0], [1], [0, 0, 1, 1], [], []>} : vector<16x128xbf16>, vector<128x128xbf16>, vector<16x128xf32> -> vector<16x128xf32>
    %790 = arith.mulf %788, %666 : vector<16x128xf32>
    %791 = arith.addf %790, %673 : vector<16x128xf32>
    %792 = arith.mulf %789, %666 : vector<16x128xf32>
    %793 = math.tanh %791 : vector<16x128xf32>
    %794 = arith.mulf %793, %793 : vector<16x128xf32>
    %cst_246 = arith.constant 1.000000e+00 : f32
    %795 = vector.broadcast %cst_246 : f32 to vector<16x128xf32>
    %796 = arith.subf %795, %794 : vector<16x128xf32>
    %797 = arith.mulf %796, %792 : vector<16x128xf32>
    %798 = arith.truncf %793 : vector<16x128xf32> to vector<16x128xbf16>
    %cst_247 = arith.constant dense<0.000000e+00> : vector<16x128xf32>
    %799 = tpu.matmul %798, %15, %cst_247 {dimension_numbers = #tpu.dot_dimension_numbers<[1], [0], [0], [1], [0, 0, 1, 1], [], []>} : vector<16x128xbf16>, vector<128x128xbf16>, vector<16x128xf32> -> vector<16x128xf32>
    %800 = arith.truncf %797 : vector<16x128xf32> to vector<16x128xbf16>
    %cst_248 = arith.constant dense<0.000000e+00> : vector<16x128xf32>
    %801 = tpu.matmul %800, %15, %cst_248 {dimension_numbers = #tpu.dot_dimension_numbers<[1], [0], [0], [1], [0, 0, 1, 1], [], []>} : vector<16x128xbf16>, vector<128x128xbf16>, vector<16x128xf32> -> vector<16x128xf32>
    %802 = arith.mulf %799, %682 : vector<16x128xf32>
    %803 = arith.addf %802, %689 : vector<16x128xf32>
    %804 = arith.mulf %801, %682 : vector<16x128xf32>
    %805 = math.tanh %803 : vector<16x128xf32>
    %806 = arith.mulf %805, %805 : vector<16x128xf32>
    %cst_249 = arith.constant 1.000000e+00 : f32
    %807 = vector.broadcast %cst_249 : f32 to vector<16x128xf32>
    %808 = arith.subf %807, %806 : vector<16x128xf32>
    %809 = arith.mulf %808, %804 : vector<16x128xf32>
    %810 = arith.truncf %805 : vector<16x128xf32> to vector<16x128xbf16>
    %cst_250 = arith.constant dense<0.000000e+00> : vector<16x128xf32>
    %811 = tpu.matmul %810, %26, %cst_250 {dimension_numbers = #tpu.dot_dimension_numbers<[1], [0], [0], [1], [0, 0, 1, 1], [], []>} : vector<16x128xbf16>, vector<128x128xbf16>, vector<16x128xf32> -> vector<16x128xf32>
    %812 = arith.truncf %809 : vector<16x128xf32> to vector<16x128xbf16>
    %cst_251 = arith.constant dense<0.000000e+00> : vector<16x128xf32>
    %813 = tpu.matmul %812, %26, %cst_251 {dimension_numbers = #tpu.dot_dimension_numbers<[1], [0], [0], [1], [0, 0, 1, 1], [], []>} : vector<16x128xbf16>, vector<128x128xbf16>, vector<16x128xf32> -> vector<16x128xf32>
    %814 = arith.mulf %811, %698 : vector<16x128xf32>
    %815 = arith.addf %814, %705 : vector<16x128xf32>
    %816 = arith.mulf %813, %698 : vector<16x128xf32>
    %817 = math.tanh %815 : vector<16x128xf32>
    %818 = arith.mulf %817, %817 : vector<16x128xf32>
    %cst_252 = arith.constant 1.000000e+00 : f32
    %819 = vector.broadcast %cst_252 : f32 to vector<16x128xf32>
    %820 = arith.subf %819, %818 : vector<16x128xf32>
    %821 = arith.mulf %820, %816 : vector<16x128xf32>
    %822 = arith.truncf %817 : vector<16x128xf32> to vector<16x128xbf16>
    %cst_253 = arith.constant dense<0.000000e+00> : vector<16x128xf32>
    %823 = tpu.matmul %822, %37, %cst_253 {dimension_numbers = #tpu.dot_dimension_numbers<[1], [0], [0], [1], [0, 0, 1, 1], [], []>} : vector<16x128xbf16>, vector<128x128xbf16>, vector<16x128xf32> -> vector<16x128xf32>
    %824 = arith.truncf %821 : vector<16x128xf32> to vector<16x128xbf16>
    %cst_254 = arith.constant dense<0.000000e+00> : vector<16x128xf32>
    %825 = tpu.matmul %824, %37, %cst_254 {dimension_numbers = #tpu.dot_dimension_numbers<[1], [0], [0], [1], [0, 0, 1, 1], [], []>} : vector<16x128xbf16>, vector<128x128xbf16>, vector<16x128xf32> -> vector<16x128xf32>
    %826 = arith.mulf %823, %714 : vector<16x128xf32>
    %827 = arith.addf %826, %721 : vector<16x128xf32>
    %828 = arith.mulf %825, %714 : vector<16x128xf32>
    %829 = arith.mulf %1, %828 : vector<16x128xf32>
    %cst_255 = arith.constant dense<0.000000e+00> : vector<16xf32>
    %830 = vector.multi_reduction <add>, %829, %cst_255 [1] : vector<16x128xf32> to vector<16xf32>
    %831 = vector.shape_cast %830 : vector<16xf32> to vector<16x1xf32>
    %cst_256 = arith.constant 6.250000e-02 : f32
    %832 = vector.broadcast %cst_256 : f32 to vector<16x128xf32>
    %833 = arith.mulf %832, %827 : vector<16x128xf32>
    %834 = arith.addf %776, %833 : vector<16x128xf32>
    %cst_257 = arith.constant 3.125000e-01 : f32
    %835 = vector.broadcast %cst_257 : f32 to vector<1x128xf32>
    %836 = arith.mulf %835, %6 : vector<1x128xf32>
    %837 = vector.broadcast %836 : vector<1x128xf32> to vector<16x128xf32>
    %838 = arith.addf %12, %837 : vector<16x128xf32>
    %839 = arith.negf %838 : vector<16x128xf32>
    %840 = math.exp %839 : vector<16x128xf32>
    %cst_258 = arith.constant 1.000000e+00 : f32
    %841 = vector.broadcast %cst_258 : f32 to vector<16x128xf32>
    %842 = arith.addf %841, %840 : vector<16x128xf32>
    %843 = arith.divf %841, %842 : vector<16x128xf32>
    %844 = vector.broadcast %5 : vector<1x128xf32> to vector<16x128xf32>
    %845 = arith.mulf %844, %843 : vector<16x128xf32>
    %846 = arith.addf %845, %14 : vector<16x128xf32>
    %cst_259 = arith.constant 3.125000e-01 : f32
    %847 = vector.broadcast %cst_259 : f32 to vector<1x128xf32>
    %848 = arith.mulf %847, %7 : vector<1x128xf32>
    %849 = vector.broadcast %848 : vector<1x128xf32> to vector<16x128xf32>
    %850 = arith.addf %846, %849 : vector<16x128xf32>
    %cst_260 = arith.constant 3.125000e-01 : f32
    %851 = vector.broadcast %cst_260 : f32 to vector<1x128xf32>
    %852 = arith.mulf %851, %17 : vector<1x128xf32>
    %853 = vector.broadcast %852 : vector<1x128xf32> to vector<16x128xf32>
    %854 = arith.addf %23, %853 : vector<16x128xf32>
    %855 = arith.negf %854 : vector<16x128xf32>
    %856 = math.exp %855 : vector<16x128xf32>
    %cst_261 = arith.constant 1.000000e+00 : f32
    %857 = vector.broadcast %cst_261 : f32 to vector<16x128xf32>
    %858 = arith.addf %857, %856 : vector<16x128xf32>
    %859 = arith.divf %857, %858 : vector<16x128xf32>
    %860 = vector.broadcast %16 : vector<1x128xf32> to vector<16x128xf32>
    %861 = arith.mulf %860, %859 : vector<16x128xf32>
    %862 = arith.addf %861, %25 : vector<16x128xf32>
    %cst_262 = arith.constant 3.125000e-01 : f32
    %863 = vector.broadcast %cst_262 : f32 to vector<1x128xf32>
    %864 = arith.mulf %863, %18 : vector<1x128xf32>
    %865 = vector.broadcast %864 : vector<1x128xf32> to vector<16x128xf32>
    %866 = arith.addf %862, %865 : vector<16x128xf32>
    %cst_263 = arith.constant 3.125000e-01 : f32
    %867 = vector.broadcast %cst_263 : f32 to vector<1x128xf32>
    %868 = arith.mulf %867, %28 : vector<1x128xf32>
    %869 = vector.broadcast %868 : vector<1x128xf32> to vector<16x128xf32>
    %870 = arith.addf %34, %869 : vector<16x128xf32>
    %871 = arith.negf %870 : vector<16x128xf32>
    %872 = math.exp %871 : vector<16x128xf32>
    %cst_264 = arith.constant 1.000000e+00 : f32
    %873 = vector.broadcast %cst_264 : f32 to vector<16x128xf32>
    %874 = arith.addf %873, %872 : vector<16x128xf32>
    %875 = arith.divf %873, %874 : vector<16x128xf32>
    %876 = vector.broadcast %27 : vector<1x128xf32> to vector<16x128xf32>
    %877 = arith.mulf %876, %875 : vector<16x128xf32>
    %878 = arith.addf %877, %36 : vector<16x128xf32>
    %cst_265 = arith.constant 3.125000e-01 : f32
    %879 = vector.broadcast %cst_265 : f32 to vector<1x128xf32>
    %880 = arith.mulf %879, %29 : vector<1x128xf32>
    %881 = vector.broadcast %880 : vector<1x128xf32> to vector<16x128xf32>
    %882 = arith.addf %878, %881 : vector<16x128xf32>
    %cst_266 = arith.constant 3.125000e-01 : f32
    %883 = vector.broadcast %cst_266 : f32 to vector<1x128xf32>
    %884 = arith.mulf %883, %39 : vector<1x128xf32>
    %885 = vector.broadcast %884 : vector<1x128xf32> to vector<16x128xf32>
    %886 = arith.addf %45, %885 : vector<16x128xf32>
    %887 = arith.negf %886 : vector<16x128xf32>
    %888 = math.exp %887 : vector<16x128xf32>
    %cst_267 = arith.constant 1.000000e+00 : f32
    %889 = vector.broadcast %cst_267 : f32 to vector<16x128xf32>
    %890 = arith.addf %889, %888 : vector<16x128xf32>
    %891 = arith.divf %889, %890 : vector<16x128xf32>
    %892 = vector.broadcast %38 : vector<1x128xf32> to vector<16x128xf32>
    %893 = arith.mulf %892, %891 : vector<16x128xf32>
    %894 = arith.addf %893, %47 : vector<16x128xf32>
    %cst_268 = arith.constant 3.125000e-01 : f32
    %895 = vector.broadcast %cst_268 : f32 to vector<1x128xf32>
    %896 = arith.mulf %895, %40 : vector<1x128xf32>
    %897 = vector.broadcast %896 : vector<1x128xf32> to vector<16x128xf32>
    %898 = arith.addf %894, %897 : vector<16x128xf32>
    %899 = arith.truncf %834 : vector<16x128xf32> to vector<16x128xbf16>
    %cst_269 = arith.constant dense<0.000000e+00> : vector<16x128xf32>
    %900 = tpu.matmul %899, %4, %cst_269 {dimension_numbers = #tpu.dot_dimension_numbers<[1], [0], [0], [1], [0, 0, 1, 1], [], []>} : vector<16x128xbf16>, vector<128x128xbf16>, vector<16x128xf32> -> vector<16x128xf32>
    %cst_270 = arith.constant dense<0.000000e+00> : vector<16x128xf32>
    %901 = tpu.matmul %3, %4, %cst_270 {dimension_numbers = #tpu.dot_dimension_numbers<[1], [0], [0], [1], [0, 0, 1, 1], [], []>} : vector<16x128xbf16>, vector<128x128xbf16>, vector<16x128xf32> -> vector<16x128xf32>
    %902 = arith.mulf %900, %843 : vector<16x128xf32>
    %903 = arith.addf %902, %850 : vector<16x128xf32>
    %904 = arith.mulf %901, %843 : vector<16x128xf32>
    %905 = math.tanh %903 : vector<16x128xf32>
    %906 = arith.mulf %905, %905 : vector<16x128xf32>
    %cst_271 = arith.constant 1.000000e+00 : f32
    %907 = vector.broadcast %cst_271 : f32 to vector<16x128xf32>
    %908 = arith.subf %907, %906 : vector<16x128xf32>
    %909 = arith.mulf %908, %904 : vector<16x128xf32>
    %910 = arith.truncf %905 : vector<16x128xf32> to vector<16x128xbf16>
    %cst_272 = arith.constant dense<0.000000e+00> : vector<16x128xf32>
    %911 = tpu.matmul %910, %15, %cst_272 {dimension_numbers = #tpu.dot_dimension_numbers<[1], [0], [0], [1], [0, 0, 1, 1], [], []>} : vector<16x128xbf16>, vector<128x128xbf16>, vector<16x128xf32> -> vector<16x128xf32>
    %912 = arith.truncf %909 : vector<16x128xf32> to vector<16x128xbf16>
    %cst_273 = arith.constant dense<0.000000e+00> : vector<16x128xf32>
    %913 = tpu.matmul %912, %15, %cst_273 {dimension_numbers = #tpu.dot_dimension_numbers<[1], [0], [0], [1], [0, 0, 1, 1], [], []>} : vector<16x128xbf16>, vector<128x128xbf16>, vector<16x128xf32> -> vector<16x128xf32>
    %914 = arith.mulf %911, %859 : vector<16x128xf32>
    %915 = arith.addf %914, %866 : vector<16x128xf32>
    %916 = arith.mulf %913, %859 : vector<16x128xf32>
    %917 = math.tanh %915 : vector<16x128xf32>
    %918 = arith.mulf %917, %917 : vector<16x128xf32>
    %cst_274 = arith.constant 1.000000e+00 : f32
    %919 = vector.broadcast %cst_274 : f32 to vector<16x128xf32>
    %920 = arith.subf %919, %918 : vector<16x128xf32>
    %921 = arith.mulf %920, %916 : vector<16x128xf32>
    %922 = arith.truncf %917 : vector<16x128xf32> to vector<16x128xbf16>
    %cst_275 = arith.constant dense<0.000000e+00> : vector<16x128xf32>
    %923 = tpu.matmul %922, %26, %cst_275 {dimension_numbers = #tpu.dot_dimension_numbers<[1], [0], [0], [1], [0, 0, 1, 1], [], []>} : vector<16x128xbf16>, vector<128x128xbf16>, vector<16x128xf32> -> vector<16x128xf32>
    %924 = arith.truncf %921 : vector<16x128xf32> to vector<16x128xbf16>
    %cst_276 = arith.constant dense<0.000000e+00> : vector<16x128xf32>
    %925 = tpu.matmul %924, %26, %cst_276 {dimension_numbers = #tpu.dot_dimension_numbers<[1], [0], [0], [1], [0, 0, 1, 1], [], []>} : vector<16x128xbf16>, vector<128x128xbf16>, vector<16x128xf32> -> vector<16x128xf32>
    %926 = arith.mulf %923, %875 : vector<16x128xf32>
    %927 = arith.addf %926, %882 : vector<16x128xf32>
    %928 = arith.mulf %925, %875 : vector<16x128xf32>
    %929 = math.tanh %927 : vector<16x128xf32>
    %930 = arith.mulf %929, %929 : vector<16x128xf32>
    %cst_277 = arith.constant 1.000000e+00 : f32
    %931 = vector.broadcast %cst_277 : f32 to vector<16x128xf32>
    %932 = arith.subf %931, %930 : vector<16x128xf32>
    %933 = arith.mulf %932, %928 : vector<16x128xf32>
    %934 = arith.truncf %929 : vector<16x128xf32> to vector<16x128xbf16>
    %cst_278 = arith.constant dense<0.000000e+00> : vector<16x128xf32>
    %935 = tpu.matmul %934, %37, %cst_278 {dimension_numbers = #tpu.dot_dimension_numbers<[1], [0], [0], [1], [0, 0, 1, 1], [], []>} : vector<16x128xbf16>, vector<128x128xbf16>, vector<16x128xf32> -> vector<16x128xf32>
    %936 = arith.truncf %933 : vector<16x128xf32> to vector<16x128xbf16>
    %cst_279 = arith.constant dense<0.000000e+00> : vector<16x128xf32>
    %937 = tpu.matmul %936, %37, %cst_279 {dimension_numbers = #tpu.dot_dimension_numbers<[1], [0], [0], [1], [0, 0, 1, 1], [], []>} : vector<16x128xbf16>, vector<128x128xbf16>, vector<16x128xf32> -> vector<16x128xf32>
    %938 = arith.mulf %935, %891 : vector<16x128xf32>
    %939 = arith.addf %938, %898 : vector<16x128xf32>
    %940 = arith.mulf %937, %891 : vector<16x128xf32>
    %941 = arith.mulf %1, %940 : vector<16x128xf32>
    %cst_280 = arith.constant dense<0.000000e+00> : vector<16xf32>
    %942 = vector.multi_reduction <add>, %941, %cst_280 [1] : vector<16x128xf32> to vector<16xf32>
    %943 = vector.shape_cast %942 : vector<16xf32> to vector<16x1xf32>
    %cst_281 = arith.constant 6.250000e-02 : f32
    %944 = vector.broadcast %cst_281 : f32 to vector<16x128xf32>
    %945 = arith.mulf %944, %939 : vector<16x128xf32>
    %946 = arith.addf %776, %945 : vector<16x128xf32>
    %947 = arith.truncf %946 : vector<16x128xf32> to vector<16x128xbf16>
    %cst_282 = arith.constant dense<0.000000e+00> : vector<16x128xf32>
    %948 = tpu.matmul %947, %4, %cst_282 {dimension_numbers = #tpu.dot_dimension_numbers<[1], [0], [0], [1], [0, 0, 1, 1], [], []>} : vector<16x128xbf16>, vector<128x128xbf16>, vector<16x128xf32> -> vector<16x128xf32>
    %cst_283 = arith.constant dense<0.000000e+00> : vector<16x128xf32>
    %949 = tpu.matmul %3, %4, %cst_283 {dimension_numbers = #tpu.dot_dimension_numbers<[1], [0], [0], [1], [0, 0, 1, 1], [], []>} : vector<16x128xbf16>, vector<128x128xbf16>, vector<16x128xf32> -> vector<16x128xf32>
    %950 = arith.mulf %948, %843 : vector<16x128xf32>
    %951 = arith.addf %950, %850 : vector<16x128xf32>
    %952 = arith.mulf %949, %843 : vector<16x128xf32>
    %953 = math.tanh %951 : vector<16x128xf32>
    %954 = arith.mulf %953, %953 : vector<16x128xf32>
    %cst_284 = arith.constant 1.000000e+00 : f32
    %955 = vector.broadcast %cst_284 : f32 to vector<16x128xf32>
    %956 = arith.subf %955, %954 : vector<16x128xf32>
    %957 = arith.mulf %956, %952 : vector<16x128xf32>
    %958 = arith.truncf %953 : vector<16x128xf32> to vector<16x128xbf16>
    %cst_285 = arith.constant dense<0.000000e+00> : vector<16x128xf32>
    %959 = tpu.matmul %958, %15, %cst_285 {dimension_numbers = #tpu.dot_dimension_numbers<[1], [0], [0], [1], [0, 0, 1, 1], [], []>} : vector<16x128xbf16>, vector<128x128xbf16>, vector<16x128xf32> -> vector<16x128xf32>
    %960 = arith.truncf %957 : vector<16x128xf32> to vector<16x128xbf16>
    %cst_286 = arith.constant dense<0.000000e+00> : vector<16x128xf32>
    %961 = tpu.matmul %960, %15, %cst_286 {dimension_numbers = #tpu.dot_dimension_numbers<[1], [0], [0], [1], [0, 0, 1, 1], [], []>} : vector<16x128xbf16>, vector<128x128xbf16>, vector<16x128xf32> -> vector<16x128xf32>
    %962 = arith.mulf %959, %859 : vector<16x128xf32>
    %963 = arith.addf %962, %866 : vector<16x128xf32>
    %964 = arith.mulf %961, %859 : vector<16x128xf32>
    %965 = math.tanh %963 : vector<16x128xf32>
    %966 = arith.mulf %965, %965 : vector<16x128xf32>
    %cst_287 = arith.constant 1.000000e+00 : f32
    %967 = vector.broadcast %cst_287 : f32 to vector<16x128xf32>
    %968 = arith.subf %967, %966 : vector<16x128xf32>
    %969 = arith.mulf %968, %964 : vector<16x128xf32>
    %970 = arith.truncf %965 : vector<16x128xf32> to vector<16x128xbf16>
    %cst_288 = arith.constant dense<0.000000e+00> : vector<16x128xf32>
    %971 = tpu.matmul %970, %26, %cst_288 {dimension_numbers = #tpu.dot_dimension_numbers<[1], [0], [0], [1], [0, 0, 1, 1], [], []>} : vector<16x128xbf16>, vector<128x128xbf16>, vector<16x128xf32> -> vector<16x128xf32>
    %972 = arith.truncf %969 : vector<16x128xf32> to vector<16x128xbf16>
    %cst_289 = arith.constant dense<0.000000e+00> : vector<16x128xf32>
    %973 = tpu.matmul %972, %26, %cst_289 {dimension_numbers = #tpu.dot_dimension_numbers<[1], [0], [0], [1], [0, 0, 1, 1], [], []>} : vector<16x128xbf16>, vector<128x128xbf16>, vector<16x128xf32> -> vector<16x128xf32>
    %974 = arith.mulf %971, %875 : vector<16x128xf32>
    %975 = arith.addf %974, %882 : vector<16x128xf32>
    %976 = arith.mulf %973, %875 : vector<16x128xf32>
    %977 = math.tanh %975 : vector<16x128xf32>
    %978 = arith.mulf %977, %977 : vector<16x128xf32>
    %cst_290 = arith.constant 1.000000e+00 : f32
    %979 = vector.broadcast %cst_290 : f32 to vector<16x128xf32>
    %980 = arith.subf %979, %978 : vector<16x128xf32>
    %981 = arith.mulf %980, %976 : vector<16x128xf32>
    %982 = arith.truncf %977 : vector<16x128xf32> to vector<16x128xbf16>
    %cst_291 = arith.constant dense<0.000000e+00> : vector<16x128xf32>
    %983 = tpu.matmul %982, %37, %cst_291 {dimension_numbers = #tpu.dot_dimension_numbers<[1], [0], [0], [1], [0, 0, 1, 1], [], []>} : vector<16x128xbf16>, vector<128x128xbf16>, vector<16x128xf32> -> vector<16x128xf32>
    %984 = arith.truncf %981 : vector<16x128xf32> to vector<16x128xbf16>
    %cst_292 = arith.constant dense<0.000000e+00> : vector<16x128xf32>
    %985 = tpu.matmul %984, %37, %cst_292 {dimension_numbers = #tpu.dot_dimension_numbers<[1], [0], [0], [1], [0, 0, 1, 1], [], []>} : vector<16x128xbf16>, vector<128x128xbf16>, vector<16x128xf32> -> vector<16x128xf32>
    %986 = arith.mulf %983, %891 : vector<16x128xf32>
    %987 = arith.addf %986, %898 : vector<16x128xf32>
    %988 = arith.mulf %985, %891 : vector<16x128xf32>
    %989 = arith.mulf %1, %988 : vector<16x128xf32>
    %cst_293 = arith.constant dense<0.000000e+00> : vector<16xf32>
    %990 = vector.multi_reduction <add>, %989, %cst_293 [1] : vector<16x128xf32> to vector<16xf32>
    %991 = vector.shape_cast %990 : vector<16xf32> to vector<16x1xf32>
    %cst_294 = arith.constant 1.250000e-01 : f32
    %992 = vector.broadcast %cst_294 : f32 to vector<16x128xf32>
    %993 = arith.mulf %992, %987 : vector<16x128xf32>
    %994 = arith.addf %776, %993 : vector<16x128xf32>
    %cst_295 = arith.constant 3.750000e-01 : f32
    %995 = vector.broadcast %cst_295 : f32 to vector<1x128xf32>
    %996 = arith.mulf %995, %6 : vector<1x128xf32>
    %997 = vector.broadcast %996 : vector<1x128xf32> to vector<16x128xf32>
    %998 = arith.addf %12, %997 : vector<16x128xf32>
    %999 = arith.negf %998 : vector<16x128xf32>
    %1000 = math.exp %999 : vector<16x128xf32>
    %cst_296 = arith.constant 1.000000e+00 : f32
    %1001 = vector.broadcast %cst_296 : f32 to vector<16x128xf32>
    %1002 = arith.addf %1001, %1000 : vector<16x128xf32>
    %1003 = arith.divf %1001, %1002 : vector<16x128xf32>
    %1004 = vector.broadcast %5 : vector<1x128xf32> to vector<16x128xf32>
    %1005 = arith.mulf %1004, %1003 : vector<16x128xf32>
    %1006 = arith.addf %1005, %14 : vector<16x128xf32>
    %cst_297 = arith.constant 3.750000e-01 : f32
    %1007 = vector.broadcast %cst_297 : f32 to vector<1x128xf32>
    %1008 = arith.mulf %1007, %7 : vector<1x128xf32>
    %1009 = vector.broadcast %1008 : vector<1x128xf32> to vector<16x128xf32>
    %1010 = arith.addf %1006, %1009 : vector<16x128xf32>
    %cst_298 = arith.constant 3.750000e-01 : f32
    %1011 = vector.broadcast %cst_298 : f32 to vector<1x128xf32>
    %1012 = arith.mulf %1011, %17 : vector<1x128xf32>
    %1013 = vector.broadcast %1012 : vector<1x128xf32> to vector<16x128xf32>
    %1014 = arith.addf %23, %1013 : vector<16x128xf32>
    %1015 = arith.negf %1014 : vector<16x128xf32>
    %1016 = math.exp %1015 : vector<16x128xf32>
    %cst_299 = arith.constant 1.000000e+00 : f32
    %1017 = vector.broadcast %cst_299 : f32 to vector<16x128xf32>
    %1018 = arith.addf %1017, %1016 : vector<16x128xf32>
    %1019 = arith.divf %1017, %1018 : vector<16x128xf32>
    %1020 = vector.broadcast %16 : vector<1x128xf32> to vector<16x128xf32>
    %1021 = arith.mulf %1020, %1019 : vector<16x128xf32>
    %1022 = arith.addf %1021, %25 : vector<16x128xf32>
    %cst_300 = arith.constant 3.750000e-01 : f32
    %1023 = vector.broadcast %cst_300 : f32 to vector<1x128xf32>
    %1024 = arith.mulf %1023, %18 : vector<1x128xf32>
    %1025 = vector.broadcast %1024 : vector<1x128xf32> to vector<16x128xf32>
    %1026 = arith.addf %1022, %1025 : vector<16x128xf32>
    %cst_301 = arith.constant 3.750000e-01 : f32
    %1027 = vector.broadcast %cst_301 : f32 to vector<1x128xf32>
    %1028 = arith.mulf %1027, %28 : vector<1x128xf32>
    %1029 = vector.broadcast %1028 : vector<1x128xf32> to vector<16x128xf32>
    %1030 = arith.addf %34, %1029 : vector<16x128xf32>
    %1031 = arith.negf %1030 : vector<16x128xf32>
    %1032 = math.exp %1031 : vector<16x128xf32>
    %cst_302 = arith.constant 1.000000e+00 : f32
    %1033 = vector.broadcast %cst_302 : f32 to vector<16x128xf32>
    %1034 = arith.addf %1033, %1032 : vector<16x128xf32>
    %1035 = arith.divf %1033, %1034 : vector<16x128xf32>
    %1036 = vector.broadcast %27 : vector<1x128xf32> to vector<16x128xf32>
    %1037 = arith.mulf %1036, %1035 : vector<16x128xf32>
    %1038 = arith.addf %1037, %36 : vector<16x128xf32>
    %cst_303 = arith.constant 3.750000e-01 : f32
    %1039 = vector.broadcast %cst_303 : f32 to vector<1x128xf32>
    %1040 = arith.mulf %1039, %29 : vector<1x128xf32>
    %1041 = vector.broadcast %1040 : vector<1x128xf32> to vector<16x128xf32>
    %1042 = arith.addf %1038, %1041 : vector<16x128xf32>
    %cst_304 = arith.constant 3.750000e-01 : f32
    %1043 = vector.broadcast %cst_304 : f32 to vector<1x128xf32>
    %1044 = arith.mulf %1043, %39 : vector<1x128xf32>
    %1045 = vector.broadcast %1044 : vector<1x128xf32> to vector<16x128xf32>
    %1046 = arith.addf %45, %1045 : vector<16x128xf32>
    %1047 = arith.negf %1046 : vector<16x128xf32>
    %1048 = math.exp %1047 : vector<16x128xf32>
    %cst_305 = arith.constant 1.000000e+00 : f32
    %1049 = vector.broadcast %cst_305 : f32 to vector<16x128xf32>
    %1050 = arith.addf %1049, %1048 : vector<16x128xf32>
    %1051 = arith.divf %1049, %1050 : vector<16x128xf32>
    %1052 = vector.broadcast %38 : vector<1x128xf32> to vector<16x128xf32>
    %1053 = arith.mulf %1052, %1051 : vector<16x128xf32>
    %1054 = arith.addf %1053, %47 : vector<16x128xf32>
    %cst_306 = arith.constant 3.750000e-01 : f32
    %1055 = vector.broadcast %cst_306 : f32 to vector<1x128xf32>
    %1056 = arith.mulf %1055, %40 : vector<1x128xf32>
    %1057 = vector.broadcast %1056 : vector<1x128xf32> to vector<16x128xf32>
    %1058 = arith.addf %1054, %1057 : vector<16x128xf32>
    %1059 = arith.truncf %994 : vector<16x128xf32> to vector<16x128xbf16>
    %cst_307 = arith.constant dense<0.000000e+00> : vector<16x128xf32>
    %1060 = tpu.matmul %1059, %4, %cst_307 {dimension_numbers = #tpu.dot_dimension_numbers<[1], [0], [0], [1], [0, 0, 1, 1], [], []>} : vector<16x128xbf16>, vector<128x128xbf16>, vector<16x128xf32> -> vector<16x128xf32>
    %cst_308 = arith.constant dense<0.000000e+00> : vector<16x128xf32>
    %1061 = tpu.matmul %3, %4, %cst_308 {dimension_numbers = #tpu.dot_dimension_numbers<[1], [0], [0], [1], [0, 0, 1, 1], [], []>} : vector<16x128xbf16>, vector<128x128xbf16>, vector<16x128xf32> -> vector<16x128xf32>
    %1062 = arith.mulf %1060, %1003 : vector<16x128xf32>
    %1063 = arith.addf %1062, %1010 : vector<16x128xf32>
    %1064 = arith.mulf %1061, %1003 : vector<16x128xf32>
    %1065 = math.tanh %1063 : vector<16x128xf32>
    %1066 = arith.mulf %1065, %1065 : vector<16x128xf32>
    %cst_309 = arith.constant 1.000000e+00 : f32
    %1067 = vector.broadcast %cst_309 : f32 to vector<16x128xf32>
    %1068 = arith.subf %1067, %1066 : vector<16x128xf32>
    %1069 = arith.mulf %1068, %1064 : vector<16x128xf32>
    %1070 = arith.truncf %1065 : vector<16x128xf32> to vector<16x128xbf16>
    %cst_310 = arith.constant dense<0.000000e+00> : vector<16x128xf32>
    %1071 = tpu.matmul %1070, %15, %cst_310 {dimension_numbers = #tpu.dot_dimension_numbers<[1], [0], [0], [1], [0, 0, 1, 1], [], []>} : vector<16x128xbf16>, vector<128x128xbf16>, vector<16x128xf32> -> vector<16x128xf32>
    %1072 = arith.truncf %1069 : vector<16x128xf32> to vector<16x128xbf16>
    %cst_311 = arith.constant dense<0.000000e+00> : vector<16x128xf32>
    %1073 = tpu.matmul %1072, %15, %cst_311 {dimension_numbers = #tpu.dot_dimension_numbers<[1], [0], [0], [1], [0, 0, 1, 1], [], []>} : vector<16x128xbf16>, vector<128x128xbf16>, vector<16x128xf32> -> vector<16x128xf32>
    %1074 = arith.mulf %1071, %1019 : vector<16x128xf32>
    %1075 = arith.addf %1074, %1026 : vector<16x128xf32>
    %1076 = arith.mulf %1073, %1019 : vector<16x128xf32>
    %1077 = math.tanh %1075 : vector<16x128xf32>
    %1078 = arith.mulf %1077, %1077 : vector<16x128xf32>
    %cst_312 = arith.constant 1.000000e+00 : f32
    %1079 = vector.broadcast %cst_312 : f32 to vector<16x128xf32>
    %1080 = arith.subf %1079, %1078 : vector<16x128xf32>
    %1081 = arith.mulf %1080, %1076 : vector<16x128xf32>
    %1082 = arith.truncf %1077 : vector<16x128xf32> to vector<16x128xbf16>
    %cst_313 = arith.constant dense<0.000000e+00> : vector<16x128xf32>
    %1083 = tpu.matmul %1082, %26, %cst_313 {dimension_numbers = #tpu.dot_dimension_numbers<[1], [0], [0], [1], [0, 0, 1, 1], [], []>} : vector<16x128xbf16>, vector<128x128xbf16>, vector<16x128xf32> -> vector<16x128xf32>
    %1084 = arith.truncf %1081 : vector<16x128xf32> to vector<16x128xbf16>
    %cst_314 = arith.constant dense<0.000000e+00> : vector<16x128xf32>
    %1085 = tpu.matmul %1084, %26, %cst_314 {dimension_numbers = #tpu.dot_dimension_numbers<[1], [0], [0], [1], [0, 0, 1, 1], [], []>} : vector<16x128xbf16>, vector<128x128xbf16>, vector<16x128xf32> -> vector<16x128xf32>
    %1086 = arith.mulf %1083, %1035 : vector<16x128xf32>
    %1087 = arith.addf %1086, %1042 : vector<16x128xf32>
    %1088 = arith.mulf %1085, %1035 : vector<16x128xf32>
    %1089 = math.tanh %1087 : vector<16x128xf32>
    %1090 = arith.mulf %1089, %1089 : vector<16x128xf32>
    %cst_315 = arith.constant 1.000000e+00 : f32
    %1091 = vector.broadcast %cst_315 : f32 to vector<16x128xf32>
    %1092 = arith.subf %1091, %1090 : vector<16x128xf32>
    %1093 = arith.mulf %1092, %1088 : vector<16x128xf32>
    %1094 = arith.truncf %1089 : vector<16x128xf32> to vector<16x128xbf16>
    %cst_316 = arith.constant dense<0.000000e+00> : vector<16x128xf32>
    %1095 = tpu.matmul %1094, %37, %cst_316 {dimension_numbers = #tpu.dot_dimension_numbers<[1], [0], [0], [1], [0, 0, 1, 1], [], []>} : vector<16x128xbf16>, vector<128x128xbf16>, vector<16x128xf32> -> vector<16x128xf32>
    %1096 = arith.truncf %1093 : vector<16x128xf32> to vector<16x128xbf16>
    %cst_317 = arith.constant dense<0.000000e+00> : vector<16x128xf32>
    %1097 = tpu.matmul %1096, %37, %cst_317 {dimension_numbers = #tpu.dot_dimension_numbers<[1], [0], [0], [1], [0, 0, 1, 1], [], []>} : vector<16x128xbf16>, vector<128x128xbf16>, vector<16x128xf32> -> vector<16x128xf32>
    %1098 = arith.mulf %1095, %1051 : vector<16x128xf32>
    %1099 = arith.addf %1098, %1058 : vector<16x128xf32>
    %1100 = arith.mulf %1097, %1051 : vector<16x128xf32>
    %1101 = arith.mulf %1, %1100 : vector<16x128xf32>
    %cst_318 = arith.constant dense<0.000000e+00> : vector<16xf32>
    %1102 = vector.multi_reduction <add>, %1101, %cst_318 [1] : vector<16x128xf32> to vector<16xf32>
    %1103 = vector.shape_cast %1102 : vector<16xf32> to vector<16x1xf32>
    %cst_319 = arith.constant 2.000000e+00 : f32
    %1104 = vector.broadcast %cst_319 : f32 to vector<16x128xf32>
    %1105 = arith.mulf %1104, %939 : vector<16x128xf32>
    %1106 = arith.addf %827, %1105 : vector<16x128xf32>
    %cst_320 = arith.constant 2.000000e+00 : f32
    %1107 = vector.broadcast %cst_320 : f32 to vector<16x128xf32>
    %1108 = arith.mulf %1107, %987 : vector<16x128xf32>
    %1109 = arith.addf %1106, %1108 : vector<16x128xf32>
    %1110 = arith.addf %1109, %1099 : vector<16x128xf32>
    %cst_321 = arith.constant 0.020833334 : f32
    %1111 = vector.broadcast %cst_321 : f32 to vector<16x128xf32>
    %1112 = arith.mulf %1111, %1110 : vector<16x128xf32>
    %1113 = arith.addf %776, %1112 : vector<16x128xf32>
    %cst_322 = arith.constant 2.000000e+00 : f32
    %1114 = vector.broadcast %cst_322 : f32 to vector<16x1xf32>
    %1115 = arith.mulf %1114, %943 : vector<16x1xf32>
    %1116 = arith.addf %831, %1115 : vector<16x1xf32>
    %cst_323 = arith.constant 2.000000e+00 : f32
    %1117 = vector.broadcast %cst_323 : f32 to vector<16x1xf32>
    %1118 = arith.mulf %1117, %991 : vector<16x1xf32>
    %1119 = arith.addf %1116, %1118 : vector<16x1xf32>
    %1120 = arith.addf %1119, %1103 : vector<16x1xf32>
    %cst_324 = arith.constant 0.020833334 : f32
    %1121 = vector.broadcast %cst_324 : f32 to vector<16x1xf32>
    %1122 = arith.mulf %1121, %1120 : vector<16x1xf32>
    %1123 = arith.subf %786, %1122 : vector<16x1xf32>
    %1124 = arith.truncf %1113 : vector<16x128xf32> to vector<16x128xbf16>
    %cst_325 = arith.constant dense<0.000000e+00> : vector<16x128xf32>
    %1125 = tpu.matmul %1124, %4, %cst_325 {dimension_numbers = #tpu.dot_dimension_numbers<[1], [0], [0], [1], [0, 0, 1, 1], [], []>} : vector<16x128xbf16>, vector<128x128xbf16>, vector<16x128xf32> -> vector<16x128xf32>
    %cst_326 = arith.constant dense<0.000000e+00> : vector<16x128xf32>
    %1126 = tpu.matmul %3, %4, %cst_326 {dimension_numbers = #tpu.dot_dimension_numbers<[1], [0], [0], [1], [0, 0, 1, 1], [], []>} : vector<16x128xbf16>, vector<128x128xbf16>, vector<16x128xf32> -> vector<16x128xf32>
    %1127 = arith.mulf %1125, %1003 : vector<16x128xf32>
    %1128 = arith.addf %1127, %1010 : vector<16x128xf32>
    %1129 = arith.mulf %1126, %1003 : vector<16x128xf32>
    %1130 = math.tanh %1128 : vector<16x128xf32>
    %1131 = arith.mulf %1130, %1130 : vector<16x128xf32>
    %cst_327 = arith.constant 1.000000e+00 : f32
    %1132 = vector.broadcast %cst_327 : f32 to vector<16x128xf32>
    %1133 = arith.subf %1132, %1131 : vector<16x128xf32>
    %1134 = arith.mulf %1133, %1129 : vector<16x128xf32>
    %1135 = arith.truncf %1130 : vector<16x128xf32> to vector<16x128xbf16>
    %cst_328 = arith.constant dense<0.000000e+00> : vector<16x128xf32>
    %1136 = tpu.matmul %1135, %15, %cst_328 {dimension_numbers = #tpu.dot_dimension_numbers<[1], [0], [0], [1], [0, 0, 1, 1], [], []>} : vector<16x128xbf16>, vector<128x128xbf16>, vector<16x128xf32> -> vector<16x128xf32>
    %1137 = arith.truncf %1134 : vector<16x128xf32> to vector<16x128xbf16>
    %cst_329 = arith.constant dense<0.000000e+00> : vector<16x128xf32>
    %1138 = tpu.matmul %1137, %15, %cst_329 {dimension_numbers = #tpu.dot_dimension_numbers<[1], [0], [0], [1], [0, 0, 1, 1], [], []>} : vector<16x128xbf16>, vector<128x128xbf16>, vector<16x128xf32> -> vector<16x128xf32>
    %1139 = arith.mulf %1136, %1019 : vector<16x128xf32>
    %1140 = arith.addf %1139, %1026 : vector<16x128xf32>
    %1141 = arith.mulf %1138, %1019 : vector<16x128xf32>
    %1142 = math.tanh %1140 : vector<16x128xf32>
    %1143 = arith.mulf %1142, %1142 : vector<16x128xf32>
    %cst_330 = arith.constant 1.000000e+00 : f32
    %1144 = vector.broadcast %cst_330 : f32 to vector<16x128xf32>
    %1145 = arith.subf %1144, %1143 : vector<16x128xf32>
    %1146 = arith.mulf %1145, %1141 : vector<16x128xf32>
    %1147 = arith.truncf %1142 : vector<16x128xf32> to vector<16x128xbf16>
    %cst_331 = arith.constant dense<0.000000e+00> : vector<16x128xf32>
    %1148 = tpu.matmul %1147, %26, %cst_331 {dimension_numbers = #tpu.dot_dimension_numbers<[1], [0], [0], [1], [0, 0, 1, 1], [], []>} : vector<16x128xbf16>, vector<128x128xbf16>, vector<16x128xf32> -> vector<16x128xf32>
    %1149 = arith.truncf %1146 : vector<16x128xf32> to vector<16x128xbf16>
    %cst_332 = arith.constant dense<0.000000e+00> : vector<16x128xf32>
    %1150 = tpu.matmul %1149, %26, %cst_332 {dimension_numbers = #tpu.dot_dimension_numbers<[1], [0], [0], [1], [0, 0, 1, 1], [], []>} : vector<16x128xbf16>, vector<128x128xbf16>, vector<16x128xf32> -> vector<16x128xf32>
    %1151 = arith.mulf %1148, %1035 : vector<16x128xf32>
    %1152 = arith.addf %1151, %1042 : vector<16x128xf32>
    %1153 = arith.mulf %1150, %1035 : vector<16x128xf32>
    %1154 = math.tanh %1152 : vector<16x128xf32>
    %1155 = arith.mulf %1154, %1154 : vector<16x128xf32>
    %cst_333 = arith.constant 1.000000e+00 : f32
    %1156 = vector.broadcast %cst_333 : f32 to vector<16x128xf32>
    %1157 = arith.subf %1156, %1155 : vector<16x128xf32>
    %1158 = arith.mulf %1157, %1153 : vector<16x128xf32>
    %1159 = arith.truncf %1154 : vector<16x128xf32> to vector<16x128xbf16>
    %cst_334 = arith.constant dense<0.000000e+00> : vector<16x128xf32>
    %1160 = tpu.matmul %1159, %37, %cst_334 {dimension_numbers = #tpu.dot_dimension_numbers<[1], [0], [0], [1], [0, 0, 1, 1], [], []>} : vector<16x128xbf16>, vector<128x128xbf16>, vector<16x128xf32> -> vector<16x128xf32>
    %1161 = arith.truncf %1158 : vector<16x128xf32> to vector<16x128xbf16>
    %cst_335 = arith.constant dense<0.000000e+00> : vector<16x128xf32>
    %1162 = tpu.matmul %1161, %37, %cst_335 {dimension_numbers = #tpu.dot_dimension_numbers<[1], [0], [0], [1], [0, 0, 1, 1], [], []>} : vector<16x128xbf16>, vector<128x128xbf16>, vector<16x128xf32> -> vector<16x128xf32>
    %1163 = arith.mulf %1160, %1051 : vector<16x128xf32>
    %1164 = arith.addf %1163, %1058 : vector<16x128xf32>
    %1165 = arith.mulf %1162, %1051 : vector<16x128xf32>
    %1166 = arith.mulf %1, %1165 : vector<16x128xf32>
    %cst_336 = arith.constant dense<0.000000e+00> : vector<16xf32>
    %1167 = vector.multi_reduction <add>, %1166, %cst_336 [1] : vector<16x128xf32> to vector<16xf32>
    %1168 = vector.shape_cast %1167 : vector<16xf32> to vector<16x1xf32>
    %cst_337 = arith.constant 6.250000e-02 : f32
    %1169 = vector.broadcast %cst_337 : f32 to vector<16x128xf32>
    %1170 = arith.mulf %1169, %1164 : vector<16x128xf32>
    %1171 = arith.addf %1113, %1170 : vector<16x128xf32>
    %cst_338 = arith.constant 4.375000e-01 : f32
    %1172 = vector.broadcast %cst_338 : f32 to vector<1x128xf32>
    %1173 = arith.mulf %1172, %6 : vector<1x128xf32>
    %1174 = vector.broadcast %1173 : vector<1x128xf32> to vector<16x128xf32>
    %1175 = arith.addf %12, %1174 : vector<16x128xf32>
    %1176 = arith.negf %1175 : vector<16x128xf32>
    %1177 = math.exp %1176 : vector<16x128xf32>
    %cst_339 = arith.constant 1.000000e+00 : f32
    %1178 = vector.broadcast %cst_339 : f32 to vector<16x128xf32>
    %1179 = arith.addf %1178, %1177 : vector<16x128xf32>
    %1180 = arith.divf %1178, %1179 : vector<16x128xf32>
    %1181 = vector.broadcast %5 : vector<1x128xf32> to vector<16x128xf32>
    %1182 = arith.mulf %1181, %1180 : vector<16x128xf32>
    %1183 = arith.addf %1182, %14 : vector<16x128xf32>
    %cst_340 = arith.constant 4.375000e-01 : f32
    %1184 = vector.broadcast %cst_340 : f32 to vector<1x128xf32>
    %1185 = arith.mulf %1184, %7 : vector<1x128xf32>
    %1186 = vector.broadcast %1185 : vector<1x128xf32> to vector<16x128xf32>
    %1187 = arith.addf %1183, %1186 : vector<16x128xf32>
    %cst_341 = arith.constant 4.375000e-01 : f32
    %1188 = vector.broadcast %cst_341 : f32 to vector<1x128xf32>
    %1189 = arith.mulf %1188, %17 : vector<1x128xf32>
    %1190 = vector.broadcast %1189 : vector<1x128xf32> to vector<16x128xf32>
    %1191 = arith.addf %23, %1190 : vector<16x128xf32>
    %1192 = arith.negf %1191 : vector<16x128xf32>
    %1193 = math.exp %1192 : vector<16x128xf32>
    %cst_342 = arith.constant 1.000000e+00 : f32
    %1194 = vector.broadcast %cst_342 : f32 to vector<16x128xf32>
    %1195 = arith.addf %1194, %1193 : vector<16x128xf32>
    %1196 = arith.divf %1194, %1195 : vector<16x128xf32>
    %1197 = vector.broadcast %16 : vector<1x128xf32> to vector<16x128xf32>
    %1198 = arith.mulf %1197, %1196 : vector<16x128xf32>
    %1199 = arith.addf %1198, %25 : vector<16x128xf32>
    %cst_343 = arith.constant 4.375000e-01 : f32
    %1200 = vector.broadcast %cst_343 : f32 to vector<1x128xf32>
    %1201 = arith.mulf %1200, %18 : vector<1x128xf32>
    %1202 = vector.broadcast %1201 : vector<1x128xf32> to vector<16x128xf32>
    %1203 = arith.addf %1199, %1202 : vector<16x128xf32>
    %cst_344 = arith.constant 4.375000e-01 : f32
    %1204 = vector.broadcast %cst_344 : f32 to vector<1x128xf32>
    %1205 = arith.mulf %1204, %28 : vector<1x128xf32>
    %1206 = vector.broadcast %1205 : vector<1x128xf32> to vector<16x128xf32>
    %1207 = arith.addf %34, %1206 : vector<16x128xf32>
    %1208 = arith.negf %1207 : vector<16x128xf32>
    %1209 = math.exp %1208 : vector<16x128xf32>
    %cst_345 = arith.constant 1.000000e+00 : f32
    %1210 = vector.broadcast %cst_345 : f32 to vector<16x128xf32>
    %1211 = arith.addf %1210, %1209 : vector<16x128xf32>
    %1212 = arith.divf %1210, %1211 : vector<16x128xf32>
    %1213 = vector.broadcast %27 : vector<1x128xf32> to vector<16x128xf32>
    %1214 = arith.mulf %1213, %1212 : vector<16x128xf32>
    %1215 = arith.addf %1214, %36 : vector<16x128xf32>
    %cst_346 = arith.constant 4.375000e-01 : f32
    %1216 = vector.broadcast %cst_346 : f32 to vector<1x128xf32>
    %1217 = arith.mulf %1216, %29 : vector<1x128xf32>
    %1218 = vector.broadcast %1217 : vector<1x128xf32> to vector<16x128xf32>
    %1219 = arith.addf %1215, %1218 : vector<16x128xf32>
    %cst_347 = arith.constant 4.375000e-01 : f32
    %1220 = vector.broadcast %cst_347 : f32 to vector<1x128xf32>
    %1221 = arith.mulf %1220, %39 : vector<1x128xf32>
    %1222 = vector.broadcast %1221 : vector<1x128xf32> to vector<16x128xf32>
    %1223 = arith.addf %45, %1222 : vector<16x128xf32>
    %1224 = arith.negf %1223 : vector<16x128xf32>
    %1225 = math.exp %1224 : vector<16x128xf32>
    %cst_348 = arith.constant 1.000000e+00 : f32
    %1226 = vector.broadcast %cst_348 : f32 to vector<16x128xf32>
    %1227 = arith.addf %1226, %1225 : vector<16x128xf32>
    %1228 = arith.divf %1226, %1227 : vector<16x128xf32>
    %1229 = vector.broadcast %38 : vector<1x128xf32> to vector<16x128xf32>
    %1230 = arith.mulf %1229, %1228 : vector<16x128xf32>
    %1231 = arith.addf %1230, %47 : vector<16x128xf32>
    %cst_349 = arith.constant 4.375000e-01 : f32
    %1232 = vector.broadcast %cst_349 : f32 to vector<1x128xf32>
    %1233 = arith.mulf %1232, %40 : vector<1x128xf32>
    %1234 = vector.broadcast %1233 : vector<1x128xf32> to vector<16x128xf32>
    %1235 = arith.addf %1231, %1234 : vector<16x128xf32>
    %1236 = arith.truncf %1171 : vector<16x128xf32> to vector<16x128xbf16>
    %cst_350 = arith.constant dense<0.000000e+00> : vector<16x128xf32>
    %1237 = tpu.matmul %1236, %4, %cst_350 {dimension_numbers = #tpu.dot_dimension_numbers<[1], [0], [0], [1], [0, 0, 1, 1], [], []>} : vector<16x128xbf16>, vector<128x128xbf16>, vector<16x128xf32> -> vector<16x128xf32>
    %cst_351 = arith.constant dense<0.000000e+00> : vector<16x128xf32>
    %1238 = tpu.matmul %3, %4, %cst_351 {dimension_numbers = #tpu.dot_dimension_numbers<[1], [0], [0], [1], [0, 0, 1, 1], [], []>} : vector<16x128xbf16>, vector<128x128xbf16>, vector<16x128xf32> -> vector<16x128xf32>
    %1239 = arith.mulf %1237, %1180 : vector<16x128xf32>
    %1240 = arith.addf %1239, %1187 : vector<16x128xf32>
    %1241 = arith.mulf %1238, %1180 : vector<16x128xf32>
    %1242 = math.tanh %1240 : vector<16x128xf32>
    %1243 = arith.mulf %1242, %1242 : vector<16x128xf32>
    %cst_352 = arith.constant 1.000000e+00 : f32
    %1244 = vector.broadcast %cst_352 : f32 to vector<16x128xf32>
    %1245 = arith.subf %1244, %1243 : vector<16x128xf32>
    %1246 = arith.mulf %1245, %1241 : vector<16x128xf32>
    %1247 = arith.truncf %1242 : vector<16x128xf32> to vector<16x128xbf16>
    %cst_353 = arith.constant dense<0.000000e+00> : vector<16x128xf32>
    %1248 = tpu.matmul %1247, %15, %cst_353 {dimension_numbers = #tpu.dot_dimension_numbers<[1], [0], [0], [1], [0, 0, 1, 1], [], []>} : vector<16x128xbf16>, vector<128x128xbf16>, vector<16x128xf32> -> vector<16x128xf32>
    %1249 = arith.truncf %1246 : vector<16x128xf32> to vector<16x128xbf16>
    %cst_354 = arith.constant dense<0.000000e+00> : vector<16x128xf32>
    %1250 = tpu.matmul %1249, %15, %cst_354 {dimension_numbers = #tpu.dot_dimension_numbers<[1], [0], [0], [1], [0, 0, 1, 1], [], []>} : vector<16x128xbf16>, vector<128x128xbf16>, vector<16x128xf32> -> vector<16x128xf32>
    %1251 = arith.mulf %1248, %1196 : vector<16x128xf32>
    %1252 = arith.addf %1251, %1203 : vector<16x128xf32>
    %1253 = arith.mulf %1250, %1196 : vector<16x128xf32>
    %1254 = math.tanh %1252 : vector<16x128xf32>
    %1255 = arith.mulf %1254, %1254 : vector<16x128xf32>
    %cst_355 = arith.constant 1.000000e+00 : f32
    %1256 = vector.broadcast %cst_355 : f32 to vector<16x128xf32>
    %1257 = arith.subf %1256, %1255 : vector<16x128xf32>
    %1258 = arith.mulf %1257, %1253 : vector<16x128xf32>
    %1259 = arith.truncf %1254 : vector<16x128xf32> to vector<16x128xbf16>
    %cst_356 = arith.constant dense<0.000000e+00> : vector<16x128xf32>
    %1260 = tpu.matmul %1259, %26, %cst_356 {dimension_numbers = #tpu.dot_dimension_numbers<[1], [0], [0], [1], [0, 0, 1, 1], [], []>} : vector<16x128xbf16>, vector<128x128xbf16>, vector<16x128xf32> -> vector<16x128xf32>
    %1261 = arith.truncf %1258 : vector<16x128xf32> to vector<16x128xbf16>
    %cst_357 = arith.constant dense<0.000000e+00> : vector<16x128xf32>
    %1262 = tpu.matmul %1261, %26, %cst_357 {dimension_numbers = #tpu.dot_dimension_numbers<[1], [0], [0], [1], [0, 0, 1, 1], [], []>} : vector<16x128xbf16>, vector<128x128xbf16>, vector<16x128xf32> -> vector<16x128xf32>
    %1263 = arith.mulf %1260, %1212 : vector<16x128xf32>
    %1264 = arith.addf %1263, %1219 : vector<16x128xf32>
    %1265 = arith.mulf %1262, %1212 : vector<16x128xf32>
    %1266 = math.tanh %1264 : vector<16x128xf32>
    %1267 = arith.mulf %1266, %1266 : vector<16x128xf32>
    %cst_358 = arith.constant 1.000000e+00 : f32
    %1268 = vector.broadcast %cst_358 : f32 to vector<16x128xf32>
    %1269 = arith.subf %1268, %1267 : vector<16x128xf32>
    %1270 = arith.mulf %1269, %1265 : vector<16x128xf32>
    %1271 = arith.truncf %1266 : vector<16x128xf32> to vector<16x128xbf16>
    %cst_359 = arith.constant dense<0.000000e+00> : vector<16x128xf32>
    %1272 = tpu.matmul %1271, %37, %cst_359 {dimension_numbers = #tpu.dot_dimension_numbers<[1], [0], [0], [1], [0, 0, 1, 1], [], []>} : vector<16x128xbf16>, vector<128x128xbf16>, vector<16x128xf32> -> vector<16x128xf32>
    %1273 = arith.truncf %1270 : vector<16x128xf32> to vector<16x128xbf16>
    %cst_360 = arith.constant dense<0.000000e+00> : vector<16x128xf32>
    %1274 = tpu.matmul %1273, %37, %cst_360 {dimension_numbers = #tpu.dot_dimension_numbers<[1], [0], [0], [1], [0, 0, 1, 1], [], []>} : vector<16x128xbf16>, vector<128x128xbf16>, vector<16x128xf32> -> vector<16x128xf32>
    %1275 = arith.mulf %1272, %1228 : vector<16x128xf32>
    %1276 = arith.addf %1275, %1235 : vector<16x128xf32>
    %1277 = arith.mulf %1274, %1228 : vector<16x128xf32>
    %1278 = arith.mulf %1, %1277 : vector<16x128xf32>
    %cst_361 = arith.constant dense<0.000000e+00> : vector<16xf32>
    %1279 = vector.multi_reduction <add>, %1278, %cst_361 [1] : vector<16x128xf32> to vector<16xf32>
    %1280 = vector.shape_cast %1279 : vector<16xf32> to vector<16x1xf32>
    %cst_362 = arith.constant 6.250000e-02 : f32
    %1281 = vector.broadcast %cst_362 : f32 to vector<16x128xf32>
    %1282 = arith.mulf %1281, %1276 : vector<16x128xf32>
    %1283 = arith.addf %1113, %1282 : vector<16x128xf32>
    %1284 = arith.truncf %1283 : vector<16x128xf32> to vector<16x128xbf16>
    %cst_363 = arith.constant dense<0.000000e+00> : vector<16x128xf32>
    %1285 = tpu.matmul %1284, %4, %cst_363 {dimension_numbers = #tpu.dot_dimension_numbers<[1], [0], [0], [1], [0, 0, 1, 1], [], []>} : vector<16x128xbf16>, vector<128x128xbf16>, vector<16x128xf32> -> vector<16x128xf32>
    %cst_364 = arith.constant dense<0.000000e+00> : vector<16x128xf32>
    %1286 = tpu.matmul %3, %4, %cst_364 {dimension_numbers = #tpu.dot_dimension_numbers<[1], [0], [0], [1], [0, 0, 1, 1], [], []>} : vector<16x128xbf16>, vector<128x128xbf16>, vector<16x128xf32> -> vector<16x128xf32>
    %1287 = arith.mulf %1285, %1180 : vector<16x128xf32>
    %1288 = arith.addf %1287, %1187 : vector<16x128xf32>
    %1289 = arith.mulf %1286, %1180 : vector<16x128xf32>
    %1290 = math.tanh %1288 : vector<16x128xf32>
    %1291 = arith.mulf %1290, %1290 : vector<16x128xf32>
    %cst_365 = arith.constant 1.000000e+00 : f32
    %1292 = vector.broadcast %cst_365 : f32 to vector<16x128xf32>
    %1293 = arith.subf %1292, %1291 : vector<16x128xf32>
    %1294 = arith.mulf %1293, %1289 : vector<16x128xf32>
    %1295 = arith.truncf %1290 : vector<16x128xf32> to vector<16x128xbf16>
    %cst_366 = arith.constant dense<0.000000e+00> : vector<16x128xf32>
    %1296 = tpu.matmul %1295, %15, %cst_366 {dimension_numbers = #tpu.dot_dimension_numbers<[1], [0], [0], [1], [0, 0, 1, 1], [], []>} : vector<16x128xbf16>, vector<128x128xbf16>, vector<16x128xf32> -> vector<16x128xf32>
    %1297 = arith.truncf %1294 : vector<16x128xf32> to vector<16x128xbf16>
    %cst_367 = arith.constant dense<0.000000e+00> : vector<16x128xf32>
    %1298 = tpu.matmul %1297, %15, %cst_367 {dimension_numbers = #tpu.dot_dimension_numbers<[1], [0], [0], [1], [0, 0, 1, 1], [], []>} : vector<16x128xbf16>, vector<128x128xbf16>, vector<16x128xf32> -> vector<16x128xf32>
    %1299 = arith.mulf %1296, %1196 : vector<16x128xf32>
    %1300 = arith.addf %1299, %1203 : vector<16x128xf32>
    %1301 = arith.mulf %1298, %1196 : vector<16x128xf32>
    %1302 = math.tanh %1300 : vector<16x128xf32>
    %1303 = arith.mulf %1302, %1302 : vector<16x128xf32>
    %cst_368 = arith.constant 1.000000e+00 : f32
    %1304 = vector.broadcast %cst_368 : f32 to vector<16x128xf32>
    %1305 = arith.subf %1304, %1303 : vector<16x128xf32>
    %1306 = arith.mulf %1305, %1301 : vector<16x128xf32>
    %1307 = arith.truncf %1302 : vector<16x128xf32> to vector<16x128xbf16>
    %cst_369 = arith.constant dense<0.000000e+00> : vector<16x128xf32>
    %1308 = tpu.matmul %1307, %26, %cst_369 {dimension_numbers = #tpu.dot_dimension_numbers<[1], [0], [0], [1], [0, 0, 1, 1], [], []>} : vector<16x128xbf16>, vector<128x128xbf16>, vector<16x128xf32> -> vector<16x128xf32>
    %1309 = arith.truncf %1306 : vector<16x128xf32> to vector<16x128xbf16>
    %cst_370 = arith.constant dense<0.000000e+00> : vector<16x128xf32>
    %1310 = tpu.matmul %1309, %26, %cst_370 {dimension_numbers = #tpu.dot_dimension_numbers<[1], [0], [0], [1], [0, 0, 1, 1], [], []>} : vector<16x128xbf16>, vector<128x128xbf16>, vector<16x128xf32> -> vector<16x128xf32>
    %1311 = arith.mulf %1308, %1212 : vector<16x128xf32>
    %1312 = arith.addf %1311, %1219 : vector<16x128xf32>
    %1313 = arith.mulf %1310, %1212 : vector<16x128xf32>
    %1314 = math.tanh %1312 : vector<16x128xf32>
    %1315 = arith.mulf %1314, %1314 : vector<16x128xf32>
    %cst_371 = arith.constant 1.000000e+00 : f32
    %1316 = vector.broadcast %cst_371 : f32 to vector<16x128xf32>
    %1317 = arith.subf %1316, %1315 : vector<16x128xf32>
    %1318 = arith.mulf %1317, %1313 : vector<16x128xf32>
    %1319 = arith.truncf %1314 : vector<16x128xf32> to vector<16x128xbf16>
    %cst_372 = arith.constant dense<0.000000e+00> : vector<16x128xf32>
    %1320 = tpu.matmul %1319, %37, %cst_372 {dimension_numbers = #tpu.dot_dimension_numbers<[1], [0], [0], [1], [0, 0, 1, 1], [], []>} : vector<16x128xbf16>, vector<128x128xbf16>, vector<16x128xf32> -> vector<16x128xf32>
    %1321 = arith.truncf %1318 : vector<16x128xf32> to vector<16x128xbf16>
    %cst_373 = arith.constant dense<0.000000e+00> : vector<16x128xf32>
    %1322 = tpu.matmul %1321, %37, %cst_373 {dimension_numbers = #tpu.dot_dimension_numbers<[1], [0], [0], [1], [0, 0, 1, 1], [], []>} : vector<16x128xbf16>, vector<128x128xbf16>, vector<16x128xf32> -> vector<16x128xf32>
    %1323 = arith.mulf %1320, %1228 : vector<16x128xf32>
    %1324 = arith.addf %1323, %1235 : vector<16x128xf32>
    %1325 = arith.mulf %1322, %1228 : vector<16x128xf32>
    %1326 = arith.mulf %1, %1325 : vector<16x128xf32>
    %cst_374 = arith.constant dense<0.000000e+00> : vector<16xf32>
    %1327 = vector.multi_reduction <add>, %1326, %cst_374 [1] : vector<16x128xf32> to vector<16xf32>
    %1328 = vector.shape_cast %1327 : vector<16xf32> to vector<16x1xf32>
    %cst_375 = arith.constant 1.250000e-01 : f32
    %1329 = vector.broadcast %cst_375 : f32 to vector<16x128xf32>
    %1330 = arith.mulf %1329, %1324 : vector<16x128xf32>
    %1331 = arith.addf %1113, %1330 : vector<16x128xf32>
    %cst_376 = arith.constant 5.000000e-01 : f32
    %1332 = vector.broadcast %cst_376 : f32 to vector<1x128xf32>
    %1333 = arith.mulf %1332, %6 : vector<1x128xf32>
    %1334 = vector.broadcast %1333 : vector<1x128xf32> to vector<16x128xf32>
    %1335 = arith.addf %12, %1334 : vector<16x128xf32>
    %1336 = arith.negf %1335 : vector<16x128xf32>
    %1337 = math.exp %1336 : vector<16x128xf32>
    %cst_377 = arith.constant 1.000000e+00 : f32
    %1338 = vector.broadcast %cst_377 : f32 to vector<16x128xf32>
    %1339 = arith.addf %1338, %1337 : vector<16x128xf32>
    %1340 = arith.divf %1338, %1339 : vector<16x128xf32>
    %1341 = vector.broadcast %5 : vector<1x128xf32> to vector<16x128xf32>
    %1342 = arith.mulf %1341, %1340 : vector<16x128xf32>
    %1343 = arith.addf %1342, %14 : vector<16x128xf32>
    %cst_378 = arith.constant 5.000000e-01 : f32
    %1344 = vector.broadcast %cst_378 : f32 to vector<1x128xf32>
    %1345 = arith.mulf %1344, %7 : vector<1x128xf32>
    %1346 = vector.broadcast %1345 : vector<1x128xf32> to vector<16x128xf32>
    %1347 = arith.addf %1343, %1346 : vector<16x128xf32>
    %cst_379 = arith.constant 5.000000e-01 : f32
    %1348 = vector.broadcast %cst_379 : f32 to vector<1x128xf32>
    %1349 = arith.mulf %1348, %17 : vector<1x128xf32>
    %1350 = vector.broadcast %1349 : vector<1x128xf32> to vector<16x128xf32>
    %1351 = arith.addf %23, %1350 : vector<16x128xf32>
    %1352 = arith.negf %1351 : vector<16x128xf32>
    %1353 = math.exp %1352 : vector<16x128xf32>
    %cst_380 = arith.constant 1.000000e+00 : f32
    %1354 = vector.broadcast %cst_380 : f32 to vector<16x128xf32>
    %1355 = arith.addf %1354, %1353 : vector<16x128xf32>
    %1356 = arith.divf %1354, %1355 : vector<16x128xf32>
    %1357 = vector.broadcast %16 : vector<1x128xf32> to vector<16x128xf32>
    %1358 = arith.mulf %1357, %1356 : vector<16x128xf32>
    %1359 = arith.addf %1358, %25 : vector<16x128xf32>
    %cst_381 = arith.constant 5.000000e-01 : f32
    %1360 = vector.broadcast %cst_381 : f32 to vector<1x128xf32>
    %1361 = arith.mulf %1360, %18 : vector<1x128xf32>
    %1362 = vector.broadcast %1361 : vector<1x128xf32> to vector<16x128xf32>
    %1363 = arith.addf %1359, %1362 : vector<16x128xf32>
    %cst_382 = arith.constant 5.000000e-01 : f32
    %1364 = vector.broadcast %cst_382 : f32 to vector<1x128xf32>
    %1365 = arith.mulf %1364, %28 : vector<1x128xf32>
    %1366 = vector.broadcast %1365 : vector<1x128xf32> to vector<16x128xf32>
    %1367 = arith.addf %34, %1366 : vector<16x128xf32>
    %1368 = arith.negf %1367 : vector<16x128xf32>
    %1369 = math.exp %1368 : vector<16x128xf32>
    %cst_383 = arith.constant 1.000000e+00 : f32
    %1370 = vector.broadcast %cst_383 : f32 to vector<16x128xf32>
    %1371 = arith.addf %1370, %1369 : vector<16x128xf32>
    %1372 = arith.divf %1370, %1371 : vector<16x128xf32>
    %1373 = vector.broadcast %27 : vector<1x128xf32> to vector<16x128xf32>
    %1374 = arith.mulf %1373, %1372 : vector<16x128xf32>
    %1375 = arith.addf %1374, %36 : vector<16x128xf32>
    %cst_384 = arith.constant 5.000000e-01 : f32
    %1376 = vector.broadcast %cst_384 : f32 to vector<1x128xf32>
    %1377 = arith.mulf %1376, %29 : vector<1x128xf32>
    %1378 = vector.broadcast %1377 : vector<1x128xf32> to vector<16x128xf32>
    %1379 = arith.addf %1375, %1378 : vector<16x128xf32>
    %cst_385 = arith.constant 5.000000e-01 : f32
    %1380 = vector.broadcast %cst_385 : f32 to vector<1x128xf32>
    %1381 = arith.mulf %1380, %39 : vector<1x128xf32>
    %1382 = vector.broadcast %1381 : vector<1x128xf32> to vector<16x128xf32>
    %1383 = arith.addf %45, %1382 : vector<16x128xf32>
    %1384 = arith.negf %1383 : vector<16x128xf32>
    %1385 = math.exp %1384 : vector<16x128xf32>
    %cst_386 = arith.constant 1.000000e+00 : f32
    %1386 = vector.broadcast %cst_386 : f32 to vector<16x128xf32>
    %1387 = arith.addf %1386, %1385 : vector<16x128xf32>
    %1388 = arith.divf %1386, %1387 : vector<16x128xf32>
    %1389 = vector.broadcast %38 : vector<1x128xf32> to vector<16x128xf32>
    %1390 = arith.mulf %1389, %1388 : vector<16x128xf32>
    %1391 = arith.addf %1390, %47 : vector<16x128xf32>
    %cst_387 = arith.constant 5.000000e-01 : f32
    %1392 = vector.broadcast %cst_387 : f32 to vector<1x128xf32>
    %1393 = arith.mulf %1392, %40 : vector<1x128xf32>
    %1394 = vector.broadcast %1393 : vector<1x128xf32> to vector<16x128xf32>
    %1395 = arith.addf %1391, %1394 : vector<16x128xf32>
    %1396 = arith.truncf %1331 : vector<16x128xf32> to vector<16x128xbf16>
    %cst_388 = arith.constant dense<0.000000e+00> : vector<16x128xf32>
    %1397 = tpu.matmul %1396, %4, %cst_388 {dimension_numbers = #tpu.dot_dimension_numbers<[1], [0], [0], [1], [0, 0, 1, 1], [], []>} : vector<16x128xbf16>, vector<128x128xbf16>, vector<16x128xf32> -> vector<16x128xf32>
    %cst_389 = arith.constant dense<0.000000e+00> : vector<16x128xf32>
    %1398 = tpu.matmul %3, %4, %cst_389 {dimension_numbers = #tpu.dot_dimension_numbers<[1], [0], [0], [1], [0, 0, 1, 1], [], []>} : vector<16x128xbf16>, vector<128x128xbf16>, vector<16x128xf32> -> vector<16x128xf32>
    %1399 = arith.mulf %1397, %1340 : vector<16x128xf32>
    %1400 = arith.addf %1399, %1347 : vector<16x128xf32>
    %1401 = arith.mulf %1398, %1340 : vector<16x128xf32>
    %1402 = math.tanh %1400 : vector<16x128xf32>
    %1403 = arith.mulf %1402, %1402 : vector<16x128xf32>
    %cst_390 = arith.constant 1.000000e+00 : f32
    %1404 = vector.broadcast %cst_390 : f32 to vector<16x128xf32>
    %1405 = arith.subf %1404, %1403 : vector<16x128xf32>
    %1406 = arith.mulf %1405, %1401 : vector<16x128xf32>
    %1407 = arith.truncf %1402 : vector<16x128xf32> to vector<16x128xbf16>
    %cst_391 = arith.constant dense<0.000000e+00> : vector<16x128xf32>
    %1408 = tpu.matmul %1407, %15, %cst_391 {dimension_numbers = #tpu.dot_dimension_numbers<[1], [0], [0], [1], [0, 0, 1, 1], [], []>} : vector<16x128xbf16>, vector<128x128xbf16>, vector<16x128xf32> -> vector<16x128xf32>
    %1409 = arith.truncf %1406 : vector<16x128xf32> to vector<16x128xbf16>
    %cst_392 = arith.constant dense<0.000000e+00> : vector<16x128xf32>
    %1410 = tpu.matmul %1409, %15, %cst_392 {dimension_numbers = #tpu.dot_dimension_numbers<[1], [0], [0], [1], [0, 0, 1, 1], [], []>} : vector<16x128xbf16>, vector<128x128xbf16>, vector<16x128xf32> -> vector<16x128xf32>
    %1411 = arith.mulf %1408, %1356 : vector<16x128xf32>
    %1412 = arith.addf %1411, %1363 : vector<16x128xf32>
    %1413 = arith.mulf %1410, %1356 : vector<16x128xf32>
    %1414 = math.tanh %1412 : vector<16x128xf32>
    %1415 = arith.mulf %1414, %1414 : vector<16x128xf32>
    %cst_393 = arith.constant 1.000000e+00 : f32
    %1416 = vector.broadcast %cst_393 : f32 to vector<16x128xf32>
    %1417 = arith.subf %1416, %1415 : vector<16x128xf32>
    %1418 = arith.mulf %1417, %1413 : vector<16x128xf32>
    %1419 = arith.truncf %1414 : vector<16x128xf32> to vector<16x128xbf16>
    %cst_394 = arith.constant dense<0.000000e+00> : vector<16x128xf32>
    %1420 = tpu.matmul %1419, %26, %cst_394 {dimension_numbers = #tpu.dot_dimension_numbers<[1], [0], [0], [1], [0, 0, 1, 1], [], []>} : vector<16x128xbf16>, vector<128x128xbf16>, vector<16x128xf32> -> vector<16x128xf32>
    %1421 = arith.truncf %1418 : vector<16x128xf32> to vector<16x128xbf16>
    %cst_395 = arith.constant dense<0.000000e+00> : vector<16x128xf32>
    %1422 = tpu.matmul %1421, %26, %cst_395 {dimension_numbers = #tpu.dot_dimension_numbers<[1], [0], [0], [1], [0, 0, 1, 1], [], []>} : vector<16x128xbf16>, vector<128x128xbf16>, vector<16x128xf32> -> vector<16x128xf32>
    %1423 = arith.mulf %1420, %1372 : vector<16x128xf32>
    %1424 = arith.addf %1423, %1379 : vector<16x128xf32>
    %1425 = arith.mulf %1422, %1372 : vector<16x128xf32>
    %1426 = math.tanh %1424 : vector<16x128xf32>
    %1427 = arith.mulf %1426, %1426 : vector<16x128xf32>
    %cst_396 = arith.constant 1.000000e+00 : f32
    %1428 = vector.broadcast %cst_396 : f32 to vector<16x128xf32>
    %1429 = arith.subf %1428, %1427 : vector<16x128xf32>
    %1430 = arith.mulf %1429, %1425 : vector<16x128xf32>
    %1431 = arith.truncf %1426 : vector<16x128xf32> to vector<16x128xbf16>
    %cst_397 = arith.constant dense<0.000000e+00> : vector<16x128xf32>
    %1432 = tpu.matmul %1431, %37, %cst_397 {dimension_numbers = #tpu.dot_dimension_numbers<[1], [0], [0], [1], [0, 0, 1, 1], [], []>} : vector<16x128xbf16>, vector<128x128xbf16>, vector<16x128xf32> -> vector<16x128xf32>
    %1433 = arith.truncf %1430 : vector<16x128xf32> to vector<16x128xbf16>
    %cst_398 = arith.constant dense<0.000000e+00> : vector<16x128xf32>
    %1434 = tpu.matmul %1433, %37, %cst_398 {dimension_numbers = #tpu.dot_dimension_numbers<[1], [0], [0], [1], [0, 0, 1, 1], [], []>} : vector<16x128xbf16>, vector<128x128xbf16>, vector<16x128xf32> -> vector<16x128xf32>
    %1435 = arith.mulf %1432, %1388 : vector<16x128xf32>
    %1436 = arith.addf %1435, %1395 : vector<16x128xf32>
    %1437 = arith.mulf %1434, %1388 : vector<16x128xf32>
    %1438 = arith.mulf %1, %1437 : vector<16x128xf32>
    %cst_399 = arith.constant dense<0.000000e+00> : vector<16xf32>
    %1439 = vector.multi_reduction <add>, %1438, %cst_399 [1] : vector<16x128xf32> to vector<16xf32>
    %1440 = vector.shape_cast %1439 : vector<16xf32> to vector<16x1xf32>
    %cst_400 = arith.constant 2.000000e+00 : f32
    %1441 = vector.broadcast %cst_400 : f32 to vector<16x128xf32>
    %1442 = arith.mulf %1441, %1276 : vector<16x128xf32>
    %1443 = arith.addf %1164, %1442 : vector<16x128xf32>
    %cst_401 = arith.constant 2.000000e+00 : f32
    %1444 = vector.broadcast %cst_401 : f32 to vector<16x128xf32>
    %1445 = arith.mulf %1444, %1324 : vector<16x128xf32>
    %1446 = arith.addf %1443, %1445 : vector<16x128xf32>
    %1447 = arith.addf %1446, %1436 : vector<16x128xf32>
    %cst_402 = arith.constant 0.020833334 : f32
    %1448 = vector.broadcast %cst_402 : f32 to vector<16x128xf32>
    %1449 = arith.mulf %1448, %1447 : vector<16x128xf32>
    %1450 = arith.addf %1113, %1449 : vector<16x128xf32>
    %cst_403 = arith.constant 2.000000e+00 : f32
    %1451 = vector.broadcast %cst_403 : f32 to vector<16x1xf32>
    %1452 = arith.mulf %1451, %1280 : vector<16x1xf32>
    %1453 = arith.addf %1168, %1452 : vector<16x1xf32>
    %cst_404 = arith.constant 2.000000e+00 : f32
    %1454 = vector.broadcast %cst_404 : f32 to vector<16x1xf32>
    %1455 = arith.mulf %1454, %1328 : vector<16x1xf32>
    %1456 = arith.addf %1453, %1455 : vector<16x1xf32>
    %1457 = arith.addf %1456, %1440 : vector<16x1xf32>
    %cst_405 = arith.constant 0.020833334 : f32
    %1458 = vector.broadcast %cst_405 : f32 to vector<16x1xf32>
    %1459 = arith.mulf %1458, %1457 : vector<16x1xf32>
    %1460 = arith.subf %1123, %1459 : vector<16x1xf32>
    %c0_406 = arith.constant 0 : index
    %c0_407 = arith.constant 0 : index
    %1461 = vector.load %arg33[%c0_406, %c0_407] : memref<16x128xf32, #tpu.memory_space<vmem>>, vector<16x128xf32>
    tpu.vector_store %arg33[%c0_406, %c0_407], %1450 {strides = array<i32>} : memref<16x128xf32, #tpu.memory_space<vmem>>, vector<16x128xf32>,
    %c0_408 = arith.constant 0 : index
    %c0_409 = arith.constant 0 : index
    %1462 = vector.load %arg34[%c0_408, %c0_409] : memref<16x1xf32, #tpu.memory_space<vmem>>, vector<16x1xf32>
    tpu.vector_store %arg34[%c0_408, %c0_409], %1460 {strides = array<i32>} : memref<16x1xf32, #tpu.memory_space<vmem>>, vector<16x1xf32>,
    return
  }
  func.func @transform_0(%arg0: i32) -> (i32, i32) {
    %c0_i32 = arith.constant 0 : i32
    %c0_i32_0 = arith.constant 0 : i32
    return %arg0, %c0_i32 : i32, i32
  }
  func.func @transform_1(%arg0: i32) -> (i32, i32) {
    %c0_i32 = arith.constant 0 : i32
    %c0_i32_0 = arith.constant 0 : i32
    return %arg0, %c0_i32 : i32, i32
  }
  func.func @transform_2(%arg0: i32) -> (i32, i32) {
    %c0_i32 = arith.constant 0 : i32
    %c0_i32_0 = arith.constant 0 : i32
    return %arg0, %c0_i32 : i32, i32
  }
  func.func @transform_3(%arg0: i32) -> (i32, i32) {
    %c0_i32 = arith.constant 0 : i32
    %c0_i32_0 = arith.constant 0 : i32
    return %arg0, %c0_i32 : i32, i32
  }
  func.func @transform_4(%arg0: i32) -> (i32, i32) {
    %c0_i32 = arith.constant 0 : i32
    %c0_i32_0 = arith.constant 0 : i32
    %c0_i32_1 = arith.constant 0 : i32
    return %c0_i32, %c0_i32_0 : i32, i32
  }
  func.func @transform_5(%arg0: i32) -> (i32, i32) {
    %c0_i32 = arith.constant 0 : i32
    %c0_i32_0 = arith.constant 0 : i32
    %c0_i32_1 = arith.constant 0 : i32
    return %c0_i32, %c0_i32_0 : i32, i32
  }
  func.func @transform_6(%arg0: i32) -> (i32, i32) {
    %c0_i32 = arith.constant 0 : i32
    %c0_i32_0 = arith.constant 0 : i32
    %c0_i32_1 = arith.constant 0 : i32
    return %c0_i32, %c0_i32_0 : i32, i32
  }
  func.func @transform_7(%arg0: i32) -> (i32, i32) {
    %c0_i32 = arith.constant 0 : i32
    %c0_i32_0 = arith.constant 0 : i32
    %c0_i32_1 = arith.constant 0 : i32
    return %c0_i32, %c0_i32_0 : i32, i32
  }
  func.func @transform_8(%arg0: i32) -> (i32, i32) {
    %c0_i32 = arith.constant 0 : i32
    %c0_i32_0 = arith.constant 0 : i32
    %c0_i32_1 = arith.constant 0 : i32
    return %c0_i32, %c0_i32_0 : i32, i32
  }
  func.func @transform_9(%arg0: i32) -> (i32, i32) {
    %c0_i32 = arith.constant 0 : i32
    %c0_i32_0 = arith.constant 0 : i32
    %c0_i32_1 = arith.constant 0 : i32
    return %c0_i32, %c0_i32_0 : i32, i32
  }
  func.func @transform_10(%arg0: i32) -> (i32, i32) {
    %c0_i32 = arith.constant 0 : i32
    %c0_i32_0 = arith.constant 0 : i32
    %c0_i32_1 = arith.constant 0 : i32
    return %c0_i32, %c0_i32_0 : i32, i32
  }
  func.func @transform_11(%arg0: i32) -> (i32, i32) {
    %c0_i32 = arith.constant 0 : i32
    %c0_i32_0 = arith.constant 0 : i32
    %c0_i32_1 = arith.constant 0 : i32
    return %c0_i32, %c0_i32_0 : i32, i32
  }
  func.func @transform_12(%arg0: i32) -> (i32, i32) {
    %c0_i32 = arith.constant 0 : i32
    %c0_i32_0 = arith.constant 0 : i32
    %c0_i32_1 = arith.constant 0 : i32
    return %c0_i32, %c0_i32_0 : i32, i32
  }
  func.func @transform_13(%arg0: i32) -> (i32, i32) {
    %c0_i32 = arith.constant 0 : i32
    %c0_i32_0 = arith.constant 0 : i32
    %c0_i32_1 = arith.constant 0 : i32
    return %c0_i32, %c0_i32_0 : i32, i32
  }
  func.func @transform_14(%arg0: i32) -> (i32, i32) {
    %c0_i32 = arith.constant 0 : i32
    %c0_i32_0 = arith.constant 0 : i32
    %c0_i32_1 = arith.constant 0 : i32
    return %c0_i32, %c0_i32_0 : i32, i32
  }
  func.func @transform_15(%arg0: i32) -> (i32, i32) {
    %c0_i32 = arith.constant 0 : i32
    %c0_i32_0 = arith.constant 0 : i32
    %c0_i32_1 = arith.constant 0 : i32
    return %c0_i32, %c0_i32_0 : i32, i32
  }
  func.func @transform_16(%arg0: i32) -> (i32, i32) {
    %c0_i32 = arith.constant 0 : i32
    %c0_i32_0 = arith.constant 0 : i32
    %c0_i32_1 = arith.constant 0 : i32
    return %c0_i32, %c0_i32_0 : i32, i32
  }
  func.func @transform_17(%arg0: i32) -> (i32, i32) {
    %c0_i32 = arith.constant 0 : i32
    %c0_i32_0 = arith.constant 0 : i32
    %c0_i32_1 = arith.constant 0 : i32
    return %c0_i32, %c0_i32_0 : i32, i32
  }
  func.func @transform_18(%arg0: i32) -> (i32, i32) {
    %c0_i32 = arith.constant 0 : i32
    %c0_i32_0 = arith.constant 0 : i32
    %c0_i32_1 = arith.constant 0 : i32
    return %c0_i32, %c0_i32_0 : i32, i32
  }
  func.func @transform_19(%arg0: i32) -> (i32, i32) {
    %c0_i32 = arith.constant 0 : i32
    %c0_i32_0 = arith.constant 0 : i32
    %c0_i32_1 = arith.constant 0 : i32
    return %c0_i32, %c0_i32_0 : i32, i32
  }
  func.func @transform_20(%arg0: i32) -> (i32, i32) {
    %c0_i32 = arith.constant 0 : i32
    %c0_i32_0 = arith.constant 0 : i32
    %c0_i32_1 = arith.constant 0 : i32
    return %c0_i32, %c0_i32_0 : i32, i32
  }
  func.func @transform_21(%arg0: i32) -> (i32, i32) {
    %c0_i32 = arith.constant 0 : i32
    %c0_i32_0 = arith.constant 0 : i32
    %c0_i32_1 = arith.constant 0 : i32
    return %c0_i32, %c0_i32_0 : i32, i32
  }
  func.func @transform_22(%arg0: i32) -> (i32, i32) {
    %c0_i32 = arith.constant 0 : i32
    %c0_i32_0 = arith.constant 0 : i32
    %c0_i32_1 = arith.constant 0 : i32
    return %c0_i32, %c0_i32_0 : i32, i32
  }
  func.func @transform_23(%arg0: i32) -> (i32, i32) {
    %c0_i32 = arith.constant 0 : i32
    %c0_i32_0 = arith.constant 0 : i32
    %c0_i32_1 = arith.constant 0 : i32
    return %c0_i32, %c0_i32_0 : i32, i32
  }
  func.func @transform_24(%arg0: i32) -> (i32, i32) {
    %c0_i32 = arith.constant 0 : i32
    %c0_i32_0 = arith.constant 0 : i32
    %c0_i32_1 = arith.constant 0 : i32
    return %c0_i32, %c0_i32_0 : i32, i32
  }
  func.func @transform_25(%arg0: i32) -> (i32, i32) {
    %c0_i32 = arith.constant 0 : i32
    %c0_i32_0 = arith.constant 0 : i32
    %c0_i32_1 = arith.constant 0 : i32
    return %c0_i32, %c0_i32_0 : i32, i32
  }
  func.func @transform_26(%arg0: i32) -> (i32, i32) {
    %c0_i32 = arith.constant 0 : i32
    %c0_i32_0 = arith.constant 0 : i32
    %c0_i32_1 = arith.constant 0 : i32
    return %c0_i32, %c0_i32_0 : i32, i32
  }
  func.func @transform_27(%arg0: i32) -> (i32, i32) {
    %c0_i32 = arith.constant 0 : i32
    %c0_i32_0 = arith.constant 0 : i32
    %c0_i32_1 = arith.constant 0 : i32
    return %c0_i32, %c0_i32_0 : i32, i32
  }
  func.func @transform_28(%arg0: i32) -> (i32, i32) {
    %c0_i32 = arith.constant 0 : i32
    %c0_i32_0 = arith.constant 0 : i32
    %c0_i32_1 = arith.constant 0 : i32
    return %c0_i32, %c0_i32_0 : i32, i32
  }
  func.func @transform_29(%arg0: i32) -> (i32, i32) {
    %c0_i32 = arith.constant 0 : i32
    %c0_i32_0 = arith.constant 0 : i32
    %c0_i32_1 = arith.constant 0 : i32
    return %c0_i32, %c0_i32_0 : i32, i32
  }
  func.func @transform_30(%arg0: i32) -> (i32, i32) {
    %c0_i32 = arith.constant 0 : i32
    %c0_i32_0 = arith.constant 0 : i32
    %c0_i32_1 = arith.constant 0 : i32
    return %c0_i32, %c0_i32_0 : i32, i32
  }
  func.func @transform_31(%arg0: i32) -> (i32, i32) {
    %c0_i32 = arith.constant 0 : i32
    %c0_i32_0 = arith.constant 0 : i32
    %c0_i32_1 = arith.constant 0 : i32
    return %c0_i32, %c0_i32_0 : i32, i32
  }
  func.func @transform_32(%arg0: i32) -> (i32, i32) {
    %c0_i32 = arith.constant 0 : i32
    %c0_i32_0 = arith.constant 0 : i32
    return %arg0, %c0_i32 : i32, i32
  }
  func.func @transform_33(%arg0: i32) -> (i32, i32) {
    %c0_i32 = arith.constant 0 : i32
    %c0_i32_0 = arith.constant 0 : i32
    return %arg0, %c0_i32 : i32, i32
  }
}

</mosaic_0001>

<bundles_post_ra>
// kernel: cnf_forward.1
= control target key start
LH: loop header
LB: loop body
LE: loop exit
PB: predicated region body
PF: predicated region fallthrough
CT: control target
= control target key end

     0   :  { %s6599_s6 = smov 1   ;;  %s6600_s10 = smov 2   ;;  %s9544_s0 = inlined_call_operand.smem [shape: u32[34], index: -1, kind: input, shape index: {}] }
   0x1   :  { %s6649_s5 = sld [smem:[%s9544_s0]]   ;;  %s6601_s14 = smov 3  }
   0x2   :  { %s6654_s9 = sld [smem:[%s9544_s0 + %s6599_s6]]   ;;  %s6602_s18 = smov 4  }
   0x3   :  { %s6659_s13 = sld [smem:[%s9544_s0 + %s6600_s10]]   ;;  %s6603_s22 = smov 5  }
   0x4   :  { %s6664_s17 = sld [smem:[%s9544_s0 + %s6601_s14]]   ;;  %s6604_s26 = smov 6  }
   0x5   :  { %s6669_s21 = sld [smem:[%s9544_s0 + %s6602_s18]]   ;;  %s6605_s30 = smov 7  }
   0x6   :  { %s6674_s25 = sld [smem:[%s9544_s0 + %s6603_s22]]   ;;  %s6606_s4 = smov 8  }
   0x7   :  { %s6679_s29 = sld [smem:[%s9544_s0 + %s6604_s26]]   ;;  %s6607_s10 = smov 9  }
   0x8   :  { %s6684_s3 = sld [smem:[%s9544_s0 + %s6605_s30]]   ;;  %s6608_s15 = smov 10  }
   0x9   :  { %s6689_s8 = sld [smem:[%s9544_s0 + %s6606_s4]]   ;;  %s6609_s20 = smov 11  }
   0xa   :  { %9676 = sst [smem:[#allocation15_spill]] %s6664_s17  ;;  %s6610_s26 = smov 12  }
   0xb   :  { %s6694_s14 = sld [smem:[%s9544_s0 + %s6607_s10]]   ;;  %s6611_s1 = smov 13  }
   0xc   :  { %9677 = sst [smem:[#allocation16_spill]] %s6674_s25  ;;  %s6612_s7 = smov 14  }
   0xd   :  { %s6699_s19 = sld [smem:[%s9544_s0 + %s6608_s15]]   ;;  %s6613_s15 = smov 15  }
   0xe   :  { %s6704_s24 = sld [smem:[%s9544_s0 + %s6609_s20]]   ;;  %s6614_s22 = smov 16  }
   0xf   :  { %9678 = sst [smem:[#allocation17_spill]] %s6689_s8  ;;  %s6615_s28 = smov 17  }
  0x10   :  { %s6709_s30 = sld [smem:[%s9544_s0 + %s6610_s26]]  }
  0x11   :  { %9679 = sst [smem:[#allocation18_spill]] %s6694_s14 }
  0x12   :  { %s6714_s6 = sld [smem:[%s9544_s0 + %s6611_s1]]  }
  0x13   :  { %s6719_s12 = sld [smem:[%s9544_s0 + %s6612_s7]]   ;;  %s6616_s7 = smov 18  }
  0x14   :  { %s6724_s20 = sld [smem:[%s9544_s0 + %s6613_s15]]   ;;  %s6617_s15 = smov 19  }
  0x15   :  { %s6729_s27 = sld [smem:[%s9544_s0 + %s6614_s22]]   ;;  %s6618_s22 = smov 20  }
  0x16   :  { %9680 = sst [smem:[#allocation19_spill]] %s6709_s30 }
  0x17   :  { %s6734_s4 = sld [smem:[%s9544_s0 + %s6615_s28]]   ;;  %s6619_s28 = smov 21  }
  0x18   :  { %9681 = sst [smem:[#allocation20_spill]] %s6714_s6 }
  0x19   :  { %s6739_s17 = sld [smem:[%s9544_s0 + %s6616_s7]]   ;;  %s6620_s7 = smov 22  }
  0x1a   :  { %9682 = sst [smem:[#allocation21_spill]] %s6724_s20 }
  0x1b   :  { %9683 = sst [smem:[#allocation22_spill]] %s6729_s27 }
  0x1c   :  { %s6744_s30 = sld [smem:[%s9544_s0 + %s6617_s15]]   ;;  %s6621_s15 = smov 23  }
  0x1d   :  { %9684 = sst [smem:[#allocation23_spill]] %s6734_s4 }
  0x1e   :  { %s6749_s27 = sld [smem:[%s9544_s0 + %s6618_s22]]   ;;  %s6622_s22 = smov 24  }
  0x1f   :  { %s6754_s20 = sld [smem:[%s9544_s0 + %s6619_s28]]   ;;  %s6623_s28 = smov 25  }
  0x20   :  { %s6759_s6 = sld [smem:[%s9544_s0 + %s6620_s7]]   ;;  %s6624_s7 = smov 26  }
  0x21   :  { %s6774_s25 = sld [smem:[%s9544_s0 + %s6623_s28]]   ;;  %s6627_s28 = smov 29  }
  0x22   :  { %9685 = sst [smem:[#allocation24_spill]] %s6744_s30 }
  0x23   :  { %s6764_s30 = sld [smem:[%s9544_s0 + %s6621_s15]]   ;;  %s6625_s15 = smov 27  }
  0x24   :  { %9686 = sst [smem:[#allocation25_spill]] %s6749_s27 }
  0x25   :  { %s6769_s27 = sld [smem:[%s9544_s0 + %s6622_s22]]   ;;  %s6626_s22 = smov 28  }
  0x26   :  { %9687 = sst [smem:[#allocation26_spill]] %s6759_s6 }
  0x27   :  { %s6779_s6 = sld [smem:[%s9544_s0 + %s6624_s7]]   ;;  %s6628_s7 = smov 30  }
  0x28   :  { %s6789_s14 = sld [smem:[%s9544_s0 + %s6626_s22]]   ;;  %s6630_s22 = smov 32  }
  0x29   :  { %9688 = sst [smem:[#allocation27_spill]] %s6764_s30 }
  0x2a   :  { %s6784_s30 = sld [smem:[%s9544_s0 + %s6625_s15]]   ;;  %s6629_s15 = smov 31  }
  0x2b   :  { %s6794_s8 = sld [smem:[%s9544_s0 + %s6627_s28]]   ;;  %s6631_s28 = smov 33  }
  0x2c   :  { %s6809_s4 = sld [smem:[%s9544_s0 + %s6630_s22]]  }
  0x2d   :  { %9689 = sst [smem:[#allocation28_spill]] %s6779_s6 }
  0x2e   :  { %s6799_s6 = sld [smem:[%s9544_s0 + %s6628_s7]]  }
  0x30   :  { %9690 = sst [smem:[#allocation29_spill]] %s6784_s30 }
  0x31   :  { %9691 = sst [smem:[#allocation30_spill]] %s6794_s8 }
  0x32   :  { %s6804_s30 = sld [smem:[%s9544_s0 + %s6629_s15]]  }
  0x33   :  { %s6814_s8 = sld [smem:[%s9544_s0 + %s6631_s28]]  }
  0x34   :  { %73 = vsyncpa [#allocation3], 0 }
  0x35   :  { %74 = vsyncpa [#allocation6], 0 }
  0x36   :  { %75 = vsyncpa [#allocation9], 0 }
  0x37   :  { %76 = vsyncpa [#allocation4], 0  ;;  %s114_s7 = sshll.u32 %s6704_s24, 4  ;;  %s6632_s10 = smov [#allocation5]   ;;  %s115_s7 = int_to_ptr.hbm [resolvable:$true] %s114_s7 }
  0x38   :  { %s116_s11 = sshll.u32 %s6632_s10, 4  ;;  %s89_s15 = sshll.u32 %s6669_s21, 4  ;;  %s117_s11 = int_to_ptr.vmem [resolvable:$true] %s116_s11  ;;  %s90_s15 = int_to_ptr.hbm [resolvable:$true] %s89_s15 }
  0x39   :  { %s6471_s16 = sshra.s32 %s115_s7, 4  ;;  %s6475_s0 = scalar_lea.hbm %s6704_s24, 64  ;;  %s6472_s16 = int_to_ptr.hbm [resolvable:$true] %s6471_s16 }
  0x3a   :  { %s6473_s18 = scalar_lea.hbm %s6472_s16, 64  ;;  %p6476_p1 = scmp.lt.s32.totalorder %s6472_s16, %s6704_s24 }
  0x3b   :  { %p6474_p0 = scmp.ne.s32.totalorder %s6472_s16, %s6473_s18  ;;  %p6477_p2 = scmp.lt.s32.totalorder %s6475_s0, %s6473_s18 }
  0x3d   :  { %p6478_p3 = por %p6477_p2, %p6476_p1 }
  0x3f   :  { %p6479_p4 = pnand %p6478_p3, %p6474_p0 }
  0x41   :  { %6482 = shalt.err (!%p6479_p4)
}
  0x42   :  { %s6633_s22 = smov 64   ;;  %s6634_s23 = smov 4  }
  0x43   :  { %122 = dma.hbm_to_vmem [thread:$0]  %s115_s7, 1024, %s117_s11, [#allocation6], %s6633_s22, %s6633_s22, %s6634_s23  }
  0x44   :  { %s6635_s26 = smov [#allocation2]   ;;  %s139_s1 = sshll.u32 %s6739_s17, 4  ;;  %s6824_s1 = int_to_ptr.hbm [resolvable:$true] %s139_s1 }
  0x45   :  { %s91_s28 = sshll.u32 %s6635_s26, 4  ;;  %s6495_s24 = sshra.s32 %s90_s15, 4  ;;  %s92_s28 = int_to_ptr.vmem [resolvable:$true] %s91_s28  ;;  %s6496_s24 = int_to_ptr.hbm [resolvable:$true] %s6495_s24 }
  0x46   :  { %s6497_s2 = scalar_lea.hbm %s6496_s24, 64  ;;  %s6499_s10 = scalar_lea.hbm %s6669_s21, 64 }
  0x47   :  { %p6498_p5 = scmp.ne.s32.totalorder %s6496_s24, %s6497_s2  ;;  %p6500_p6 = scmp.lt.s32.totalorder %s6496_s24, %s6669_s21 }
  0x48   :  { %p6501_p7 = scmp.lt.s32.totalorder %s6499_s10, %s6497_s2 }
  0x4a   :  { %p6502_p8 = por %p6501_p7, %p6500_p6 }
  0x4c   :  { %p6503_p9 = pnand %p6502_p8, %p6498_p5 }
  0x4e   :  { %6506 = shalt.err (!%p6503_p9)
}
  0x4f   :  { %97 = dma.hbm_to_vmem [thread:$0]  %s90_s15, 1024, %s92_s28, [#allocation3], %s6633_s22, %s6633_s22, %s6634_s23  }
  0x50   :  { %s164_s7 = sshll.u32 %s6774_s25, 4  ;;  %s6636_s11 = smov [#allocation7]   ;;  %s6832_s7 = int_to_ptr.hbm [resolvable:$true] %s164_s7 }
  0x51   :  { %s141_s16 = sshll.u32 %s6636_s11, 4  ;;  %s6519_s18 = sshra.s32 %s6824_s1, 4  ;;  %s142_s16 = int_to_ptr.vmem [resolvable:$true] %s141_s16  ;;  %s6520_s18 = int_to_ptr.hbm [resolvable:$true] %s6519_s18 }
  0x52   :  { %s6521_s21 = scalar_lea.hbm %s6520_s18, 64  ;;  %s6523_s0 = scalar_lea.hbm %s6739_s17, 64 }
  0x53   :  { %p6522_p10 = scmp.ne.s32.totalorder %s6520_s18, %s6521_s21  ;;  %p6524_p11 = scmp.lt.s32.totalorder %s6520_s18, %s6739_s17 }
  0x54   :  { %p6525_p12 = scmp.lt.s32.totalorder %s6523_s0, %s6521_s21 }
  0x56   :  { %p6526_p13 = por %p6525_p12, %p6524_p11 }
  0x58   :  { %p6527_p0 = pnand %p6526_p13, %p6522_p10 }
  0x5a   :  { %6530 = shalt.err (!%p6527_p0)
}
  0x5b   :  { %147 = dma.hbm_to_vmem [thread:$0]  %s6824_s1, 1024, %s142_s16, [#allocation6], %s6633_s22, %s6633_s22, %s6634_s23  }
  0x5c   :  { %s6637_s15 = smov [#allocation8]   ;;  %s6543_s28 = sshra.s32 %s6832_s7, 4  ;;  %s6544_s28 = int_to_ptr.hbm [resolvable:$true] %s6543_s28 }
  0x5d   :  { %s166_s26 = sshll.u32 %s6637_s15, 4  ;;  %s6545_s24 = scalar_lea.hbm %s6544_s28, 64  ;;  %s167_s26 = int_to_ptr.vmem [resolvable:$true] %s166_s26 }
  0x5e   :  { %p6546_p1 = scmp.ne.s32.totalorder %s6544_s28, %s6545_s24  ;;  %s6547_s17 = scalar_lea.hbm %s6774_s25, 64 }
  0x5f   :  { %p6548_p2 = scmp.lt.s32.totalorder %s6544_s28, %s6774_s25  ;;  %p6549_p3 = scmp.lt.s32.totalorder %s6547_s17, %s6545_s24 }
  0x61   :  { %p6550_p4 = por %p6549_p3, %p6548_p2 }
  0x63   :  { %p6551_p5 = pnand %p6550_p4, %p6546_p1 }
  0x65   :  { %6554 = shalt.err (!%p6551_p5)
}
  0x66   :  { %172 = dma.hbm_to_vmem [thread:$0]  %s6832_s7, 1024, %s167_s26, [#allocation9], %s6633_s22, %s6633_s22, %s6634_s23  }
  0x67   :  { %6591 = dma.done.wait [#allocation3], 1024  }
  0x68   :  { %6592 = vsyncadd [#allocation3], 4294966272 }
  0x69   :  { %6593 = dma.done.wait [#allocation6], 2048  }
  0x6a   :  { %6594 = vsyncadd [#allocation6], 4294965248 }
  0x6b   :  { %6595 = dma.done.wait [#allocation9], 1024  }
  0x6c   :  { %6596 = vsyncadd [#allocation9], 4294966272  ;;  %vm239_vm0 = vcmask 1041408   ;;  %vm232_vm1 = vcmask 15360   ;;  %v227_v0 = vld [vmem:[%s6684_s3] sm:$0x3] }
  0x6d   :  { %v6850_v1 = vld [vmem:[%s6659_s13] sm:$0xff]  ;;  %5441 = vmatpush.msk.msra.mxu1 %vm239_vm0, %v227_v0  ;;  %v6855_v3 = vld [vmem:[#allocation2 + $0x38] sm:$0xff]  ;;  %v6863_v5 = vld [vmem:[#allocation2 + $0x30] sm:$0xff]  ;;  %s9693_s25 = sld [smem:[#allocation17_spill]]  ;;  %s6583_s16 = scalar_lea.hbm %s6809_s4, 16 }
  0x6e   :  { %v389_v2 = vld [vmem:[%s6754_s20] sm:$0x3]  ;;  %5442 = vmatmul.msk.f32.vlgmr.msra.gmra.mxu1 %vm232_vm1, %v6850_v1  ;;  %v6869_v7 = vld [vmem:[%s6659_s13 + $0x8] sm:$0xff]  ;;  %v6882_v10 = vld [vmem:[#allocation2 + $0x18] sm:$0xff]  ;;  %s9692_s13 = sld [smem:[#allocation23_spill]] }
  0x6f   :  { %5453 = vmatpush.msk.msra.mxu0 %vm239_vm0, %v389_v2  ;;  %v266_v4 = vld [vmem:[%s6699_s19] sm:$0x3]  ;;  %v6871_v8 = vld [vmem:[#allocation2 + $0x28] sm:$0xff]  ;;  %v6888_v11 = vld [vmem:[#allocation2 + $0x10] sm:$0xff]  ;;  %s9697_s3 = sld [smem:[#allocation18_spill]] }
  0x70   :  { %5454 = vmatmul.msk.f32.vlgmr.msra.gmra.mxu0 %vm232_vm1, %v6850_v1  ;;  %5444 = vmatpush.msk.msrb.mxu1 %vm239_vm0, %v266_v4  ;;  %v420_v6 = vld [vmem:[%s6769_s27] sm:$0x3]  ;;  %v6892_v12 = vld [vmem:[#allocation2 + $0x8] sm:$0xff]  ;;  %v6936_v23 = vld [vmem:[#allocation5 + $0x38] sm:$0xff]  ;;  %s9704_s19 = sld [smem:[#allocation20_spill]] }
  0x71   :  { %803 = vmatpush.bf16.msrb.mxu0 %v6855_v3  ;;  %v6879_v9 = vld [vmem:[#allocation2 + $0x20] sm:$0xff]  ;;  %v6904_v15 = vld [vmem:[%s6649_s5 + $0x8] sm:$0xff]  ;;  %v6942_v25 = vld [vmem:[#allocation5 + $0x30] sm:$0xff]  ;;  %s9715_s20 = sld [smem:[#allocation22_spill]] }
  0x72   :  { %5456 = vmatpush.msk.msra.mxu1 %vm239_vm0, %v420_v6  ;;  %v6898_v13 = vld [vmem:[#allocation2] sm:$0xff]  ;;  %v6921_v18 = vld [vmem:[%s6654_s9 + $0x8] sm:$0xff]  ;;  %v6971_v38 = vld [vmem:[#allocation5 + $0x18] sm:$0xff]  ;;  %s9720_s27 = sld [smem:[#allocation25_spill]] }
  0x73   :  { %v6901_v14 = vld [vmem:[%s6649_s5] sm:$0xff]  ;;  %v6956_v32 = vld [vmem:[#allocation5 + $0x28] sm:$0xff]  ;;  %v6980_v44 = vld [vmem:[#allocation5 + $0x10] sm:$0xff]  ;;  %s9721_s22 = sld [smem:[#allocation26_spill]] }
  0x74   :  { %v754_v16 = vpack.c.bf16 %v6904_v15, %v6901_v14  ;;  %v6918_v17 = vld [vmem:[%s6654_s9] sm:$0xff]  ;;  %v6986_v46 = vld [vmem:[#allocation5 + $0x8] sm:$0xff]  ;;  %s9725_s23 = sld [smem:[#allocation24_spill]] }
  0x75   :  { %804 = vmatpush.bf16.msrb.mxu0 %v6863_v5  ;;  %v207_v19 = vpack.c.bf16 %v6921_v18, %v6918_v17  ;;  %v312_v20 = vld [vmem:[%s6719_s12] sm:$0x3]  ;;  %s9712_s12 = sld [smem:[#allocation19_spill]] }
  0x76   :  { %5443 = vmatmul.msk.f32.gmra.mxu1 %vm232_vm1, %v6869_v7  ;;  %5447 = vmatpush.msk.msra.mxu2 %vm239_vm0, %v312_v20  ;;  %v6933_v21 = vld [vmem:[%s6679_s29] sm:$0x1]  ;;  %s9728_s1 = sld [smem:[#allocation27_spill]] }
  0x77   :  { %5448 = vmatmul.msk.f32.vlgmr.msra.gmra.mxu2 %vm232_vm1, %v6850_v1  ;;  %v466_v22 = vld [vmem:[%s6789_s14] sm:$0x3]  ;;  %v526_v26 = vmul.f32 0.0, %v6933_v21  ;;  %s9698_s14 = sld [smem:[#allocation16_spill]] }
  0x78   :  { %5455 = vmatmul.msk.f32.gmra.mxu0 %vm232_vm1, %v6869_v7  ;;  %v343_v24 = vld [vmem:[%s9692_s13] sm:$0x3]  ;;  %5459 = vmatpush.msk.msrb.mxu2 %vm239_vm0, %v466_v22  ;;  %s9730_s2 = sld [smem:[#allocation29_spill]] }
  0x79   :  { %805 = vmatpush.bf16.msrb.mxu0 %v6871_v8  ;;  %5450 = vmatpush.msk.msra.mxu3 %vm239_vm0, %v343_v24  ;;  %v5739_v27 = vld [vmem:[%s9693_s25] ss:$0 sm:$0xff]  ;;  %v528_v28 = vperm.slane %v526_v26, 0  ;;  %s9731_s10 = sld [smem:[#allocation30_spill]] }
  0x7a   :  { %894 = vmatpush.bf16.msra.mxu2 %v6936_v23  ;;  %5451 = vmatmul.msk.f32.vlgmr.msra.gmra.mxu3 %vm232_vm1, %v6850_v1  ;;  %v497_v30 = vld [vmem:[%s6804_s30] sm:$0x3]  ;;  %s9705_s30 = sld [smem:[#allocation21_spill]] }
  0x7b   :  { %5462 = vmatpush.msk.msrb.mxu3 %vm239_vm0, %v497_v30  ;;  %v6965_v35 = vld [vmem:[#allocation5 + $0x20] sm:$0xff]  ;;  %s9734_s7 = sld [smem:[#allocation28_spill]] }
  0x7c   :  { %v6992_v50 = vld [vmem:[#allocation5] sm:$0xff] }
  0x7d   :  { %806 = vmatpush.bf16.msrb.mxu0 %v6879_v9  ;;  %909 = vmatpush.bf16.msra.mxu3 %v6936_v23  ;;  %v7000_v55 = vld [vmem:[%s9697_s3] sm:$0x1] }
  0x7e   :  { %5445 = vmatmul.msk.f32.vlgmr.msrb.gmra.mxu1 %vm232_vm1, %v6850_v1  ;;  %895 = vmatpush.bf16.msra.mxu2 %v6942_v25  ;;  %v7004_v60 = vld [vmem:[%s9698_s14] ss:$0 sm:$0xff]  ;;  %v577_v61 = vmul.f32 0.0, %v7000_v55 }
  0x7f   :  { %817 = vmatpush.bf16.msrb.mxu1 %v6855_v3  ;;  %5449 = vmatmul.msk.f32.gmra.mxu2 %vm232_vm1, %v6869_v7 }
  0x81   :  { %807 = vmatpush.bf16.msrb.mxu0 %v6882_v10  ;;  %910 = vmatpush.bf16.msra.mxu3 %v6942_v25 }
  0x82   :  { %5452 = vmatmul.msk.f32.gmra.mxu3 %vm232_vm1, %v6869_v7  ;;  %896 = vmatpush.bf16.msra.mxu2 %v6956_v32 }
  0x83   :  { %818 = vmatpush.bf16.msrb.mxu1 %v6863_v5 }
  0x85   :  { %808 = vmatpush.bf16.msrb.mxu0 %v6888_v11  ;;  %911 = vmatpush.bf16.msra.mxu3 %v6956_v32 }
  0x86   :  { %5446 = vmatmul.msk.f32.gmra.mxu1 %vm232_vm1, %v6869_v7  ;;  %897 = vmatpush.bf16.msra.mxu2 %v6965_v35 }
  0x87   :  { %819 = vmatpush.bf16.msrb.mxu1 %v6871_v8  ;;  %5460 = vmatmul.msk.f32.vlgmr.msrb.gmra.mxu2 %vm232_vm1, %v6850_v1 }
  0x89   :  { %809 = vmatpush.bf16.msrb.mxu0 %v6892_v12  ;;  %912 = vmatpush.bf16.msra.mxu3 %v6965_v35 }
  0x8a   :  { %5463 = vmatmul.msk.f32.vlgmr.msrb.gmra.mxu3 %vm232_vm1, %v6850_v1  ;;  %898 = vmatpush.bf16.msra.mxu2 %v6971_v38 }
  0x8b   :  { %820 = vmatpush.bf16.msrb.mxu1 %v6879_v9 }
  0x8d   :  { %810 = vmatpush.bf16.msrb.mxu0 %v6898_v13  ;;  %913 = vmatpush.bf16.msra.mxu3 %v6971_v38 }
  0x8e   :  { %5457 = vmatmul.msk.f32.vlgmr.msra.gmra.mxu1 %vm232_vm1, %v6850_v1  ;;  %899 = vmatpush.bf16.msra.mxu2 %v6980_v44 }
  0x8f   :  { %821 = vmatpush.bf16.msrb.mxu1 %v6882_v10  ;;  %5461 = vmatmul.msk.f32.gmra.mxu2 %vm232_vm1, %v6869_v7 }
  0x90   :  { %811 = vmatmul.bf16.vlgmr.msrb.gmra.mxu0 %v754_v16  ;;  %v579_v16 = vperm.slane %v577_v61, 0 }
  0x91   :  { %914 = vmatpush.bf16.msra.mxu3 %v6980_v44 }
  0x92   :  { %5464 = vmatmul.msk.f32.gmra.mxu3 %vm232_vm1, %v6869_v7  ;;  %900 = vmatpush.bf16.msra.mxu2 %v6986_v46 }
  0x93   :  { %822 = vmatpush.bf16.msrb.mxu1 %v6888_v11 }
  0x95   :  { %915 = vmatpush.bf16.msra.mxu3 %v6986_v46 }
  0x96   :  { %5458 = vmatmul.msk.f32.gmra.mxu1 %vm232_vm1, %v6869_v7  ;;  %901 = vmatpush.bf16.msra.mxu2 %v6992_v50 }
  0x97   :  { %823 = vmatpush.bf16.msrb.mxu1 %v6892_v12 }
  0x99   :  { %916 = vmatpush.bf16.msra.mxu3 %v6992_v50 }
  0x9b   :  { %824 = vmatpush.bf16.msrb.mxu1 %v6898_v13 }
  0x9e   :  { %825 = vmatmul.bf16.vlgmr.msrb.gmra.mxu1 %v207_v19 }
  0xeb   :  { %v260_v29 = vpop.f32.mrf.mxu1 }
  0xec   :  { %v6952_v31 = vadd.f32 %v5739_v27, %v260_v29 }
  0xed   :  { %v6977_v42 = vpop.f32.mrf.mxu0 }
  0xee   :  { %9694 = vst [vmem:[#allocation31_spill] sm:$0xff] %v6952_v31  ;;  %v530_v33 = vadd.f32 %v528_v28, %v6952_v31 }
  0xf0   :  { %v5465_v34 = vmul.f32 -1.442695, %v530_v33 }
  0xf2   :  { %5747 = vpow2.f32 %v5465_v34 }
  0xf3   :  { %v263_v36 = vpop.f32.mrf.mxu1 }
  0xf4   :  { %v6968_v37 = vadd.f32 %v5739_v27, %v263_v36 }
  0xf5   :  { %v6994_v52 = vpop.f32.mrf.mxu0 }
  0xf6   :  { %9695 = vst [vmem:[#allocation32_spill] sm:$0xff] %v6968_v37  ;;  %v531_v39 = vadd.f32 %v528_v28, %v6968_v37 }
  0xf8   :  { %v5748_v40 = vpop.eup %5747  ;;  %v5466_v41 = vmul.f32 -1.442695, %v531_v39 }
  0xf9   :  { %v538_v43 = vadd.f32 1.0, %v5748_v40 }
  0xfa   :  { %5749 = vpow2.f32 %v5466_v41 }
  0xfb   :  { %v6982_v45 = vpop.f32.mrf.mxu1  ;;  %5751 = vrcp.f32 %v538_v43  ;;  %v551_v56 = vand.u32 2147483648, %v538_v43  ;;  %v549_v58 = vand.u32 2147483647, %v538_v43  ;;  %vm545_vm3 = vweird.f32 %v538_v43 }
  0xfc   :  { %9696 = vst [vmem:[#allocation33_spill] sm:$0xff] %v6982_v45 }
  0xfd   :  { %v552_v63 = vor.u32 1.1754944e-38, %v551_v56  ;;  %vm550_vm5 = vcmp.eq.f32.partialorder %v549_v58, 8.507059e+37 }
 0x100   :  { %v5750_v47 = vpop.eup %5749 }
 0x101   :  { %v5752_v48 = vpop.eup %5751  ;;  %v539_v49 = vadd.f32 1.0, %v5750_v47 }
 0x102   :  { %v541_v51 = vmul.f32 %v5752_v48, %v538_v43  ;;  %vm546_vm2 = vweird.f32 %v5752_v48 }
 0x103   :  { %v6996_v53 = vpop.f32.mrf.mxu1  ;;  %5753 = vrcp.f32 %v539_v49  ;;  %vm547_vm4 = vmor %vm545_vm3, %vm546_vm2  ;;  %v566_v20 = vand.u32 2147483648, %v539_v49  ;;  %v564_v26 = vand.u32 2147483647, %v539_v49  ;;  %vm560_vm7 = vweird.f32 %v539_v49 }
 0x104   :  { %9699 = vst [vmem:[#allocation34_spill] sm:$0xff] %v6996_v53  ;;  %v542_v54 = vsub.f32 1.0, %v541_v51 }
 0x105   :  { %v567_v30 = vor.u32 1.1754944e-38, %v566_v20  ;;  %vm565_vm9 = vcmp.eq.f32.partialorder %v564_v26, 8.507059e+37  ;;  %v7025_v20 = vld [vmem:[#allocation7 + $0x30] sm:$0xff]  ;;  %v5742_v26 = vld [vmem:[%s9705_s30] ss:$0 sm:$0xff] }
 0x106   :  { %v543_v57 = vmul.f32 %v5752_v48, %v542_v54 }
 0x108   :  { %v544_v59 = vadd.f32 %v5752_v48, %v543_v57 }
 0x109   :  { %v5754_v62 = vpop.eup %5753 }
 0x10a   :  { %v548_v0 = vsel %vm547_vm4, %v5752_v48, %v544_v59  ;;  %v556_v1 = vmul.f32 %v5754_v62, %v539_v49  ;;  %vm561_vm6 = vweird.f32 %v5754_v62 }
 0x10b   :  { %v7008_v2 = vpop.f32.mrf.mxu1  ;;  %v553_v4 = vsel %vm550_vm5, %v552_v63, %v548_v0  ;;  %vm562_vm8 = vmor %vm560_vm7, %vm561_vm6 }
 0x10c   :  { %9700 = vst [vmem:[#allocation35_spill] sm:$0xff] %v7008_v2  ;;  %v573_v7 = vmul.f32 %v7004_v60, %v553_v4  ;;  %v557_v19 = vsub.f32 1.0, %v556_v1 }
 0x10d   :  { %v812_v6 = vpop.f32.mrf.mxu0 }
 0x10e   :  { %v575_v22 = vadd.f32 %v573_v7, %v6982_v45  ;;  %v558_v24 = vmul.f32 %v5754_v62, %v557_v19  ;;  %v831_v28 = vmul.f32 %v812_v6, %v553_v4  ;;  %v7022_v19 = vld [vmem:[#allocation7 + $0x38] sm:$0xff] }
 0x10f   :  { %9706 = vst [vmem:[#allocation39_spill] sm:$0xff] %v7022_v19  ;;  %986 = vmatpush.bf16.msra.mxu0 %v7022_v19  ;;  %1001 = vmatpush.bf16.msra.mxu1 %v7022_v19 }
 0x110   :  { %v581_v27 = vadd.f32 %v579_v16, %v575_v22  ;;  %v559_v29 = vadd.f32 %v5754_v62, %v558_v24  ;;  %v7033_v22 = vld [vmem:[%s9704_s19] sm:$0x1]  ;;  %v337_v24 = vpop.f32.mrf.mxu2 }
 0x111   :  { %9707 = vst [vmem:[#allocation40_spill] sm:$0xff] %v7033_v22 }
 0x112   :  { %v833_v33 = vadd.f32 %v831_v28, %v581_v27  ;;  %v563_v34 = vsel %vm562_vm8, %v5754_v62, %v559_v29  ;;  %v583_v27 = vmul.f32 0.0, %v7033_v22  ;;  %v7039_v28 = vadd.f32 %v5742_v26, %v337_v24 }
 0x113   :  { %v7012_v36 = vpop.f32.mrf.mxu1  ;;  %v568_v39 = vsel %vm565_vm9, %v567_v30, %v563_v34  ;;  %987 = vmatpush.bf16.msra.mxu0 %v7025_v20  ;;  %1002 = vmatpush.bf16.msra.mxu1 %v7025_v20 }
 0x114   :  { %9701 = vst [vmem:[#allocation36_spill] sm:$0xff] %v7012_v36  ;;  %v574_v40 = vmul.f32 %v7004_v60, %v568_v39  ;;  %5755 = vtanh.f32 %v833_v33  ;;  %v585_v29 = vperm.slane %v583_v27, 0 }
 0x115   :  { %v814_v41 = vpop.f32.mrf.mxu0  ;;  %9708 = vst [vmem:[#allocation41_spill] sm:$0xff] %v7039_v28 }
 0x116   :  { %v576_v43 = vadd.f32 %v574_v40, %v6996_v53  ;;  %v832_v48 = vmul.f32 %v814_v41, %v568_v39  ;;  %v587_v30 = vadd.f32 %v585_v29, %v7039_v28 }
 0x118   :  { %v582_v47 = vadd.f32 %v579_v16, %v576_v43  ;;  %v340_v33 = vpop.f32.mrf.mxu2 }
 0x119   :  { %v7042_v34 = vadd.f32 %v5742_v26, %v340_v33  ;;  %v7063_v26 = vld [vmem:[#allocation7 + $0x8] sm:$0xff] }
 0x11a   :  { %v834_v51 = vadd.f32 %v832_v48, %v582_v47  ;;  %v5756_v49 = vpop.eup %5755 }
 0x11b   :  { %v7016_v54 = vpop.f32.mrf.mxu1  ;;  %v839_v56 = vmul.f32 %v5756_v49, %v5756_v49  ;;  %9709 = vst [vmem:[#allocation42_spill] sm:$0xff] %v7042_v34  ;;  %v588_v40 = vadd.f32 %v585_v29, %v7042_v34  ;;  %v7093_v34 = vld [vmem:[#allocation8 + $0x38] sm:$0xff] }
 0x11c   :  { %9702 = vst [vmem:[#allocation37_spill] sm:$0xff] %v7016_v54  ;;  %5757 = vtanh.f32 %v834_v51  ;;  %v835_v63 = vmul.f32 %v7016_v54, %v553_v4  ;;  %v7030_v4 = vld [vmem:[#allocation7 + $0x28] sm:$0xff]  ;;  %1078 = vmatpush.bf16.msrb.mxu2 %v7093_v34  ;;  %1093 = vmatpush.bf16.msrb.mxu3 %v7093_v34 }
 0x11d   :  { %v841_v58 = vsub.f32 1.0, %v839_v56  ;;  %988 = vmatpush.bf16.msra.mxu0 %v7030_v4  ;;  %1003 = vmatpush.bf16.msra.mxu1 %v7030_v4  ;;  %v5468_v41 = vmul.f32 -1.442695, %v588_v40  ;;  %v7045_v56 = vpop.f32.mrf.mxu3  ;;  %v7071_v40 = vld [vmem:[#allocation7] sm:$0xff] }
 0x11e   :  { %9710 = vst [vmem:[#allocation43_spill] sm:$0xff] %v7045_v56 }
 0x11f   :  { %v843_v6 = vmul.f32 %v841_v58, %v835_v63 }
 0x122   :  { %v5758_v57 = vpop.eup %5757 }
 0x123   :  { %v840_v59 = vmul.f32 %v5758_v57, %v5758_v57  ;;  %v7018_v61 = vpop.f32.mrf.mxu1  ;;  %v845_v62 = vpack.c.bf16 %v5758_v57, %v5756_v49  ;;  %v7047_v57 = vld [vmem:[#allocation7 + $0x20] sm:$0xff] }
 0x124   :  { %9703 = vst [vmem:[#allocation38_spill] sm:$0xff] %v7018_v61  ;;  %v836_v0 = vmul.f32 %v7018_v61, %v568_v39  ;;  %v5467_v39 = vmul.f32 -1.442695, %v587_v30  ;;  %989 = vmatpush.bf16.msra.mxu0 %v7047_v57  ;;  %1004 = vmatpush.bf16.msra.mxu1 %v7047_v57 }
 0x125   :  { %902 = vmatmul.bf16.vlgmr.msra.gmra.mxu2 %v845_v62  ;;  %v842_v1 = vsub.f32 1.0, %v840_v59  ;;  %v7051_v59 = vld [vmem:[#allocation7 + $0x18] sm:$0xff] }
 0x126   :  { %5759 = vpow2.f32 %v5467_v39 }
 0x127   :  { %v844_v7 = vmul.f32 %v842_v1, %v836_v0  ;;  %5761 = vpow2.f32 %v5468_v41  ;;  %v7055_v0 = vld [vmem:[#allocation7 + $0x10] sm:$0xff]  ;;  %v7057_v1 = vpop.f32.mrf.mxu3 }
 0x128   :  { %990 = vmatpush.bf16.msra.mxu0 %v7051_v59  ;;  %1005 = vmatpush.bf16.msra.mxu1 %v7051_v59  ;;  %9711 = vst [vmem:[#allocation44_spill] sm:$0xff] %v7057_v1 }
 0x129   :  { %v908_v16 = vpack.c.bf16 %v844_v7, %v843_v6 }
 0x12b   :  { %917 = vmatmul.bf16.vlgmr.msra.gmra.mxu3 %v908_v16  ;;  %v7061_v16 = vpop.f32.mrf.mxu2 }
 0x12c   :  { %v5760_v43 = vpop.eup %5759  ;;  %991 = vmatpush.bf16.msra.mxu0 %v7055_v0  ;;  %1006 = vmatpush.bf16.msra.mxu1 %v7055_v0 }
 0x12d   :  { %v595_v47 = vadd.f32 1.0, %v5760_v43  ;;  %v5762_v48 = vpop.eup %5761 }
 0x12e   :  { %v596_v51 = vadd.f32 1.0, %v5762_v48  ;;  %v7080_v48 = vld [vmem:[%s9712_s12] ss:$0 sm:$0xff] }
 0x12f   :  { %5763 = vrcp.f32 %v595_v47  ;;  %vm602_vm10 = vweird.f32 %v595_v47  ;;  %v608_v24 = vand.u32 2147483648, %v595_v47  ;;  %v606_v29 = vand.u32 2147483647, %v595_v47  ;;  %9717 = vst [vmem:[#allocation46_spill] sm:$0xff] %v7080_v48 }
 0x130   :  { %5765 = vrcp.f32 %v596_v51  ;;  %992 = vmatpush.bf16.msra.mxu0 %v7063_v26  ;;  %1007 = vmatpush.bf16.msra.mxu1 %v7063_v26  ;;  %vm617_vm14 = vweird.f32 %v596_v51 }
 0x131   :  { %v609_v39 = vor.u32 1.1754944e-38, %v608_v24  ;;  %vm607_vm13 = vcmp.eq.f32.partialorder %v606_v29, 8.507059e+37 }
 0x133   :  { %v7087_v24 = vpop.f32.mrf.mxu2 }
 0x134   :  { %993 = vmatpush.bf16.msra.mxu0 %v7071_v40  ;;  %1008 = vmatpush.bf16.msra.mxu1 %v7071_v40 }
 0x135   :  { %v5764_v49 = vpop.eup %5763 }
 0x136   :  { %v598_v58 = vmul.f32 %v5764_v49, %v595_v47  ;;  %v5766_v63 = vpop.eup %5765  ;;  %vm603_vm11 = vweird.f32 %v5764_v49  ;;  %v7077_v47 = vpop.f32.mrf.mxu3 }
 0x137   :  { %v613_v7 = vmul.f32 %v5766_v63, %v596_v51  ;;  %vm7065_vm12 = vmor %vm602_vm10, %vm603_vm11  ;;  %9716 = vst [vmem:[#allocation45_spill] sm:$0xff] %v7077_v47  ;;  %vm618_vm15 = vweird.f32 %v5766_v63 }
 0x138   :  { %v599_v62 = vsub.f32 1.0, %v598_v58  ;;  %1340 = vmatpush.bf16.msrb.mxu0 %v6855_v3  ;;  %1369 = vmatpush.bf16.msrb.mxu1 %v6936_v23  ;;  %v7085_v58 = vld [vmem:[%s9715_s20] sm:$0x1]  ;;  %vm619_vm0 = vmor %vm617_vm14, %vm618_vm15 }
 0x139   :  { %v614_v30 = vsub.f32 1.0, %v613_v7  ;;  %9718 = vst [vmem:[#allocation47_spill] sm:$0xff] %v7085_v58  ;;  %v621_v7 = vand.u32 2147483647, %v596_v51  ;;  %v634_v29 = vmul.f32 0.0, %v7085_v58 }
 0x13a   :  { %v600_v6 = vmul.f32 %v5764_v49, %v599_v62 }
 0x13b   :  { %v615_v43 = vmul.f32 %v5766_v63, %v614_v30  ;;  %vm622_vm1 = vcmp.eq.f32.partialorder %v621_v7, 8.507059e+37 }
 0x13c   :  { %v601_v27 = vadd.f32 %v5764_v49, %v600_v6  ;;  %1341 = vmatpush.bf16.msrb.mxu0 %v6863_v5  ;;  %1370 = vmatpush.bf16.msrb.mxu1 %v6942_v25 }
 0x13d   :  { %v616_v6 = vadd.f32 %v5766_v63, %v615_v43  ;;  %v7099_v43 = vld [vmem:[#allocation8 + $0x30] sm:$0xff] }
 0x13e   :  { %v605_v41 = vsel %vm7065_vm12, %v5764_v49, %v601_v27  ;;  %v623_v49 = vand.u32 2147483648, %v596_v51  ;;  %v7102_v58 = vpop.f32.mrf.mxu3  ;;  %1079 = vmatpush.bf16.msrb.mxu2 %v7099_v43  ;;  %1094 = vmatpush.bf16.msrb.mxu3 %v7099_v43 }
 0x13f   :  { %v610_v62 = vsel %vm607_vm13, %v609_v39, %v605_v41  ;;  %v620_v33 = vsel %vm619_vm0, %v5766_v63, %v616_v6  ;;  %v636_v41 = vperm.slane %v634_v29, 0  ;;  %9719 = vst [vmem:[#allocation48_spill] sm:$0xff] %v7102_v58 }
 0x140   :  { %v630_v27 = vmul.f32 %v7080_v48, %v610_v62  ;;  %v624_v30 = vor.u32 1.1754944e-38, %v623_v49  ;;  %1342 = vmatpush.bf16.msrb.mxu0 %v6871_v8  ;;  %1371 = vmatpush.bf16.msrb.mxu1 %v6956_v32 }
 0x142   :  { %v632_v39 = vadd.f32 %v630_v27, %v7045_v56  ;;  %v625_v51 = vsel %vm622_vm1, %v624_v30, %v620_v33  ;;  %v7108_v27 = vld [vmem:[#allocation8 + $0x28] sm:$0xff] }
 0x143   :  { %v631_v7 = vmul.f32 %v7080_v48, %v625_v51  ;;  %1080 = vmatpush.bf16.msrb.mxu2 %v7108_v27  ;;  %1095 = vmatpush.bf16.msrb.mxu3 %v7108_v27 }
 0x144   :  { %v638_v49 = vadd.f32 %v636_v41, %v632_v39  ;;  %1343 = vmatpush.bf16.msrb.mxu0 %v6879_v9  ;;  %1372 = vmatpush.bf16.msrb.mxu1 %v6965_v35 }
 0x145   :  { %v633_v30 = vadd.f32 %v631_v7, %v7057_v1 }
 0x148   :  { %1344 = vmatpush.bf16.msrb.mxu0 %v6882_v10  ;;  %1373 = vmatpush.bf16.msrb.mxu1 %v6971_v38 }
 0x14c   :  { %1345 = vmatpush.bf16.msrb.mxu0 %v6888_v11  ;;  %1374 = vmatpush.bf16.msrb.mxu1 %v6980_v44 }
 0x150   :  { %1346 = vmatpush.bf16.msrb.mxu0 %v6892_v12  ;;  %1375 = vmatpush.bf16.msrb.mxu1 %v6986_v46 }
 0x154   :  { %1347 = vmatpush.bf16.msrb.mxu0 %v6898_v13  ;;  %1376 = vmatpush.bf16.msrb.mxu1 %v6992_v50 }
 0x1a8   :  { %v903_v63 = vpop.f32.mrf.mxu2 }
 0x1a9   :  { %v923_v6 = vmul.f32 %v903_v63, %v610_v62  ;;  %v639_v63 = vadd.f32 %v636_v41, %v633_v30 }
 0x1ab   :  { %v925_v29 = vadd.f32 %v923_v6, %v638_v49 }
 0x1ad   :  { %5767 = vtanh.f32 %v925_v29 }
 0x1ae   :  { %v918_v39 = vpop.f32.mrf.mxu3 }
 0x1af   :  { %v927_v48 = vmul.f32 %v918_v39, %v610_v62 }
 0x1b0   :  { %v905_v33 = vpop.f32.mrf.mxu2 }
 0x1b1   :  { %v924_v56 = vmul.f32 %v905_v33, %v625_v51 }
 0x1b3   :  { %v926_v49 = vadd.f32 %v924_v56, %v639_v63  ;;  %v5768_v6 = vpop.eup %5767 }
 0x1b4   :  { %v931_v7 = vmul.f32 %v5768_v6, %v5768_v6 }
 0x1b5   :  { %5769 = vtanh.f32 %v926_v49 }
 0x1b6   :  { %v920_v1 = vpop.f32.mrf.mxu3  ;;  %v933_v41 = vsub.f32 1.0, %v931_v7 }
 0x1b7   :  { %v928_v28 = vmul.f32 %v920_v1, %v625_v51 }
 0x1b8   :  { %v935_v56 = vmul.f32 %v933_v41, %v927_v48 }
 0x1bb   :  { %v5770_v29 = vpop.eup %5769 }
 0x1bc   :  { %v932_v30 = vmul.f32 %v5770_v29, %v5770_v29  ;;  %v937_v33 = vpack.c.bf16 %v5770_v29, %v5768_v6 }
 0x1be   :  { %v934_v22 = vsub.f32 1.0, %v932_v30  ;;  %994 = vmatmul.bf16.vlgmr.msra.gmra.mxu0 %v937_v33 }
 0x1bf   :  { %1428 = vmatpush.bf16.msra.mxu0 %v7022_v19 }
 0x1c0   :  { %v936_v63 = vmul.f32 %v934_v22, %v928_v28  ;;  %v7134_v22 = vld [vmem:[%s9720_s27] sm:$0x1] }
 0x1c1   :  { %9722 = vst [vmem:[#allocation49_spill] sm:$0xff] %v7134_v22  ;;  %v5740_v28 = vld [vmem:[%s9721_s22] ss:$0 sm:$0xff]  ;;  %v640_v1 = vmul.f32 0.0, %v7134_v22 }
 0x1c2   :  { %v1000_v49 = vpack.c.bf16 %v936_v63, %v935_v56  ;;  %v7139_v48 = vadd.f32 %v5740_v28, %v6977_v42  ;;  %v7143_v39 = vadd.f32 %v5740_v28, %v6994_v52  ;;  %v7146_v42 = vld [vmem:[#allocation8 + $0x20] sm:$0xff]  ;;  %v7151_v52 = vld [vmem:[#allocation8 + $0x18] sm:$0xff] }
 0x1c3   :  { %1429 = vmatpush.bf16.msra.mxu0 %v7025_v20  ;;  %v642_v62 = vperm.slane %v640_v1, 0  ;;  %1081 = vmatpush.bf16.msrb.mxu2 %v7146_v42 }
 0x1c4   :  { %1009 = vmatmul.bf16.vlgmr.msra.gmra.mxu1 %v1000_v49  ;;  %9723 = vst [vmem:[#allocation50_spill] sm:$0xff] %v7139_v48  ;;  %1096 = vmatpush.bf16.msrb.mxu3 %v7146_v42 }
 0x1c5   :  { %1457 = vmatpush.bf16.msra.mxu1 %v7093_v34  ;;  %v644_v51 = vadd.f32 %v642_v62, %v7139_v48  ;;  %9724 = vst [vmem:[#allocation51_spill] sm:$0xff] %v7143_v39  ;;  %v645_v7 = vadd.f32 %v642_v62, %v7143_v39  ;;  %v7156_v62 = vld [vmem:[#allocation8 + $0x10] sm:$0xff]  ;;  %v7170_v48 = vld [vmem:[#allocation8] sm:$0xff] }
 0x1c7   :  { %1430 = vmatpush.bf16.msra.mxu0 %v7030_v4  ;;  %v5469_v6 = vmul.f32 -1.442695, %v644_v51  ;;  %v5470_v29 = vmul.f32 -1.442695, %v645_v7  ;;  %1082 = vmatpush.bf16.msrb.mxu2 %v7151_v52 }
 0x1c8   :  { %1097 = vmatpush.bf16.msrb.mxu3 %v7151_v52 }
 0x1c9   :  { %1458 = vmatpush.bf16.msra.mxu1 %v7099_v43  ;;  %5771 = vpow2.f32 %v5469_v6 }
 0x1ca   :  { %5773 = vpow2.f32 %v5470_v29  ;;  %v7161_v29 = vld [vmem:[#allocation8 + $0x8] sm:$0xff] }
 0x1cb   :  { %1431 = vmatpush.bf16.msra.mxu0 %v7047_v57  ;;  %1083 = vmatpush.bf16.msrb.mxu2 %v7156_v62 }
 0x1cc   :  { %1098 = vmatpush.bf16.msrb.mxu3 %v7156_v62 }
 0x1cd   :  { %1459 = vmatpush.bf16.msra.mxu1 %v7108_v27 }
 0x1cf   :  { %1432 = vmatpush.bf16.msra.mxu0 %v7051_v59  ;;  %v5772_v41 = vpop.eup %5771  ;;  %1084 = vmatpush.bf16.msrb.mxu2 %v7161_v29 }
 0x1d0   :  { %v652_v30 = vadd.f32 1.0, %v5772_v41  ;;  %v5774_v33 = vpop.eup %5773  ;;  %1099 = vmatpush.bf16.msrb.mxu3 %v7161_v29 }
 0x1d1   :  { %v653_v56 = vadd.f32 1.0, %v5774_v33  ;;  %1460 = vmatpush.bf16.msra.mxu1 %v7146_v42 }
 0x1d2   :  { %5775 = vrcp.f32 %v652_v30  ;;  %vm659_vm2 = vweird.f32 %v652_v30  ;;  %v665_v7 = vand.u32 2147483648, %v652_v30  ;;  %v663_v33 = vand.u32 2147483647, %v652_v30 }
 0x1d3   :  { %1433 = vmatpush.bf16.msra.mxu0 %v7055_v0  ;;  %5777 = vrcp.f32 %v653_v56  ;;  %1085 = vmatpush.bf16.msrb.mxu2 %v7170_v48  ;;  %vm674_vm6 = vweird.f32 %v653_v56  ;;  %v680_v61 = vand.u32 2147483648, %v653_v56 }
 0x1d4   :  { %vm664_vm5 = vcmp.eq.f32.partialorder %v663_v33, 8.507059e+37  ;;  %1100 = vmatpush.bf16.msrb.mxu3 %v7170_v48 }
 0x1d5   :  { %1461 = vmatpush.bf16.msra.mxu1 %v7151_v52 }
 0x1d7   :  { %1434 = vmatpush.bf16.msra.mxu0 %v7063_v26  ;;  %1384 = vmatpush.bf16.msra.mxu2 %v6936_v23 }
 0x1d8   :  { %v5776_v63 = vpop.eup %5775  ;;  %1413 = vmatpush.bf16.msra.mxu3 %v7022_v19 }
 0x1d9   :  { %v655_v49 = vmul.f32 %v5776_v63, %v652_v30  ;;  %v5778_v1 = vpop.eup %5777  ;;  %vm660_vm3 = vweird.f32 %v5776_v63  ;;  %1462 = vmatpush.bf16.msra.mxu1 %v7156_v62 }
 0x1da   :  { %v670_v6 = vmul.f32 %v5778_v1, %v653_v56  ;;  %vm7163_vm4 = vmor %vm659_vm2, %vm660_vm3  ;;  %vm675_vm7 = vweird.f32 %v5778_v1 }
 0x1db   :  { %1435 = vmatpush.bf16.msra.mxu0 %v7071_v40  ;;  %v656_v28 = vsub.f32 1.0, %v655_v49  ;;  %vm676_vm8 = vmor %vm674_vm6, %vm675_vm7  ;;  %1385 = vmatpush.bf16.msra.mxu2 %v6942_v25 }
 0x1dc   :  { %v671_v49 = vsub.f32 1.0, %v670_v6  ;;  %v7182_v6 = vld [vmem:[%s9728_s1] sm:$0x1]  ;;  %1414 = vmatpush.bf16.msra.mxu3 %v7025_v20 }
 0x1dd   :  { %v657_v51 = vmul.f32 %v5776_v63, %v656_v28  ;;  %1463 = vmatpush.bf16.msra.mxu1 %v7161_v29  ;;  %v666_v28 = vor.u32 1.1754944e-38, %v665_v7  ;;  %9729 = vst [vmem:[#allocation52_spill] sm:$0xff] %v7182_v6  ;;  %v691_v33 = vmul.f32 0.0, %v7182_v6 }
 0x1de   :  { %v672_v30 = vmul.f32 %v5778_v1, %v671_v49  ;;  %v681_v49 = vor.u32 1.1754944e-38, %v680_v61 }
 0x1df   :  { %v658_v41 = vadd.f32 %v5776_v63, %v657_v51  ;;  %v7177_v51 = vld [vmem:[%s9725_s23] ss:$0 sm:$0xff]  ;;  %1386 = vmatpush.bf16.msra.mxu2 %v6956_v32 }
 0x1e0   :  { %v673_v39 = vadd.f32 %v5778_v1, %v672_v30  ;;  %1415 = vmatpush.bf16.msra.mxu3 %v7030_v4 }
 0x1e1   :  { %v662_v22 = vsel %vm7163_vm4, %v5776_v63, %v658_v41  ;;  %1464 = vmatpush.bf16.msra.mxu1 %v7170_v48  ;;  %v678_v63 = vand.u32 2147483647, %v653_v56 }
 0x1e2   :  { %v667_v7 = vsel %vm664_vm5, %v666_v28, %v662_v22  ;;  %v677_v54 = vsel %vm676_vm8, %v5778_v1, %v673_v39  ;;  %v693_v22 = vperm.slane %v691_v33, 0 }
 0x1e3   :  { %v687_v41 = vmul.f32 %v7177_v51, %v667_v7  ;;  %vm679_vm9 = vcmp.eq.f32.partialorder %v678_v63, 8.507059e+37  ;;  %1387 = vmatpush.bf16.msra.mxu2 %v6965_v35 }
 0x1e4   :  { %v682_v56 = vsel %vm679_vm9, %v681_v49, %v677_v54  ;;  %1416 = vmatpush.bf16.msra.mxu3 %v7047_v57 }
 0x1e5   :  { %v689_v19 = vadd.f32 %v687_v41, %v7008_v2  ;;  %v688_v6 = vmul.f32 %v7177_v51, %v682_v56 }
 0x1e7   :  { %v695_v30 = vadd.f32 %v693_v22, %v689_v19  ;;  %v690_v1 = vadd.f32 %v688_v6, %v7012_v36  ;;  %1388 = vmatpush.bf16.msra.mxu2 %v6971_v38 }
 0x1e8   :  { %1417 = vmatpush.bf16.msra.mxu3 %v7051_v59 }
 0x1e9   :  { %v696_v54 = vadd.f32 %v693_v22, %v690_v1 }
 0x1eb   :  { %1389 = vmatpush.bf16.msra.mxu2 %v6980_v44 }
 0x1ec   :  { %1418 = vmatpush.bf16.msra.mxu3 %v7055_v0 }
 0x1ef   :  { %1390 = vmatpush.bf16.msra.mxu2 %v6986_v46 }
 0x1f0   :  { %1419 = vmatpush.bf16.msra.mxu3 %v7063_v26 }
 0x1f3   :  { %1391 = vmatpush.bf16.msra.mxu2 %v6992_v50 }
 0x1f4   :  { %1420 = vmatpush.bf16.msra.mxu3 %v7071_v40 }
 0x23b   :  { %v995_v28 = vpop.f32.mrf.mxu0 }
 0x23c   :  { %v1015_v53 = vmul.f32 %v995_v28, %v667_v7 }
 0x23e   :  { %v1017_v61 = vadd.f32 %v1015_v53, %v695_v30 }
 0x240   :  { %5779 = vtanh.f32 %v1017_v61 }
 0x241   :  { %v1010_v63 = vpop.f32.mrf.mxu1 }
 0x242   :  { %v1019_v61 = vmul.f32 %v1010_v63, %v667_v7 }
 0x243   :  { %v997_v39 = vpop.f32.mrf.mxu0 }
 0x244   :  { %v1016_v41 = vmul.f32 %v997_v39, %v682_v56 }
 0x246   :  { %v1018_v19 = vadd.f32 %v1016_v41, %v696_v54  ;;  %v5780_v33 = vpop.eup %5779 }
 0x247   :  { %v1023_v53 = vmul.f32 %v5780_v33, %v5780_v33 }
 0x248   :  { %5781 = vtanh.f32 %v1018_v19 }
 0x249   :  { %v1012_v49 = vpop.f32.mrf.mxu1  ;;  %v1025_v22 = vsub.f32 1.0, %v1023_v53 }
 0x24a   :  { %v1020_v1 = vmul.f32 %v1012_v49, %v682_v56 }
 0x24b   :  { %v1027_v54 = vmul.f32 %v1025_v22, %v1019_v61 }
 0x24e   :  { %v5782_v6 = vpop.eup %5781 }
 0x24f   :  { %v1024_v28 = vmul.f32 %v5782_v6, %v5782_v6  ;;  %v1029_v30 = vpack.c.bf16 %v5782_v6, %v5780_v33 }
 0x251   :  { %v1026_v39 = vsub.f32 1.0, %v1024_v28  ;;  %1086 = vmatmul.bf16.vlgmr.msrb.gmra.mxu2 %v1029_v30 }
 0x252   :  { %1472 = vmatpush.bf16.msrb.mxu2 %v7093_v34 }
 0x253   :  { %v1028_v41 = vmul.f32 %v1026_v39, %v1020_v1 }
 0x255   :  { %v1092_v19 = vpack.c.bf16 %v1028_v41, %v1027_v54 }
 0x256   :  { %1473 = vmatpush.bf16.msrb.mxu2 %v7099_v43 }
 0x257   :  { %1101 = vmatmul.bf16.vlgmr.msrb.gmra.mxu3 %v1092_v19 }
 0x258   :  { %1503 = vmatpush.bf16.msrb.mxu3 %v6855_v3  ;;  %v7221_v3 = vld [vmem:[%s9730_s2] sm:$0x1] }
 0x25a   :  { %1474 = vmatpush.bf16.msrb.mxu2 %v7108_v27 }
 0x25c   :  { %1504 = vmatpush.bf16.msrb.mxu3 %v6863_v5  ;;  %v5743_v5 = vld [vmem:[%s9731_s10] ss:$0 sm:$0xff] }
 0x25e   :  { %1475 = vmatpush.bf16.msrb.mxu2 %v7146_v42 }
 0x260   :  { %1505 = vmatpush.bf16.msrb.mxu3 %v6871_v8  ;;  %v697_v8 = vmul.f32 0.0, %v7221_v3 }
 0x262   :  { %1476 = vmatpush.bf16.msrb.mxu2 %v7151_v52  ;;  %v699_v7 = vperm.slane %v697_v8, 0 }
 0x264   :  { %1506 = vmatpush.bf16.msrb.mxu3 %v6879_v9  ;;  %v7226_v9 = vadd.f32 %v5743_v5, %v7061_v16 }
 0x266   :  { %1477 = vmatpush.bf16.msrb.mxu2 %v7156_v62  ;;  %9732 = vst [vmem:[#allocation53_spill] sm:$0xff] %v7226_v9 }
 0x268   :  { %1507 = vmatpush.bf16.msrb.mxu3 %v6882_v10  ;;  %v7229_v10 = vadd.f32 %v5743_v5, %v7087_v24 }
 0x26a   :  { %1478 = vmatpush.bf16.msrb.mxu2 %v7161_v29  ;;  %9733 = vst [vmem:[#allocation54_spill] sm:$0xff] %v7229_v10  ;;  %v702_v63 = vadd.f32 %v699_v7, %v7229_v10 }
 0x26c   :  { %1508 = vmatpush.bf16.msrb.mxu3 %v6888_v11  ;;  %v701_v11 = vadd.f32 %v699_v7, %v7226_v9 }
 0x26e   :  { %1479 = vmatpush.bf16.msrb.mxu2 %v7170_v48  ;;  %v5471_v56 = vmul.f32 -1.442695, %v701_v11 }
 0x270   :  { %1509 = vmatpush.bf16.msrb.mxu3 %v6892_v12  ;;  %5783 = vpow2.f32 %v5471_v56  ;;  %v5472_v12 = vmul.f32 -1.442695, %v702_v63  ;;  %v7234_v56 = vld [vmem:[%s9734_s7] ss:$0 sm:$0xff] }
 0x271   :  { %v7237_v63 = vld [vmem:[%s6799_s6] sm:$0x1] }
 0x272   :  { %5785 = vpow2.f32 %v5472_v12 }
 0x274   :  { %1510 = vmatpush.bf16.msrb.mxu3 %v6898_v13 }
 0x276   :  { %v5784_v13 = vpop.eup %5783 }
 0x277   :  { %v709_v33 = vadd.f32 1.0, %v5784_v13 }
 0x278   :  { %v5786_v53 = vpop.eup %5785 }
 0x279   :  { %5787 = vrcp.f32 %v709_v33  ;;  %v710_v6 = vadd.f32 1.0, %v5786_v53  ;;  %vm716_vm10 = vweird.f32 %v709_v33  ;;  %v722_v1 = vand.u32 2147483648, %v709_v33 }
 0x27a   :  { %v720_v54 = vand.u32 2147483647, %v709_v33 }
 0x27b   :  { %5789 = vrcp.f32 %v710_v6  ;;  %vm731_vm13 = vweird.f32 %v710_v6  ;;  %v723_v19 = vor.u32 1.1754944e-38, %v722_v1  ;;  %v737_v5 = vand.u32 2147483648, %v710_v6 }
 0x27c   :  { %vm721_vm15 = vcmp.eq.f32.partialorder %v720_v54, 8.507059e+37  ;;  %v735_v11 = vand.u32 2147483647, %v710_v6 }
 0x27d   :  { %v738_v13 = vor.u32 1.1754944e-38, %v737_v5 }
 0x27e   :  { %vm736_vm1 = vcmp.eq.f32.partialorder %v735_v11, 8.507059e+37 }
 0x27f   :  { %v5788_v16 = vpop.eup %5787 }
 0x280   :  { %v712_v49 = vmul.f32 %v5788_v16, %v709_v33  ;;  %vm717_vm11 = vweird.f32 %v5788_v16 }
 0x281   :  { %v5790_v22 = vpop.eup %5789  ;;  %vm718_vm12 = vmor %vm716_vm10, %vm717_vm11 }
 0x282   :  { %v713_v28 = vsub.f32 1.0, %v712_v49  ;;  %v727_v24 = vmul.f32 %v5790_v22, %v710_v6  ;;  %vm732_vm14 = vweird.f32 %v5790_v22  ;;  %v748_v49 = vmul.f32 0.0, %v7237_v63 }
 0x283   :  { %vm733_vm0 = vmor %vm731_vm13, %vm732_vm14 }
 0x284   :  { %v714_v30 = vmul.f32 %v5788_v16, %v713_v28  ;;  %v728_v61 = vsub.f32 1.0, %v727_v24 }
 0x286   :  { %v715_v39 = vadd.f32 %v5788_v16, %v714_v30  ;;  %v729_v41 = vmul.f32 %v5790_v22, %v728_v61  ;;  %v750_v30 = vperm.slane %v748_v49, 0 }
 0x288   :  { %v719_v8 = vsel %vm718_vm12, %v5788_v16, %v715_v39  ;;  %v730_v7 = vadd.f32 %v5790_v22, %v729_v41 }
 0x289   :  { %v724_v12 = vsel %vm721_vm15, %v723_v19, %v719_v8 }
 0x28a   :  { %v734_v53 = vsel %vm733_vm0, %v5790_v22, %v730_v7  ;;  %v744_v33 = vmul.f32 %v7234_v56, %v724_v12 }
 0x28b   :  { %v739_v28 = vsel %vm736_vm1, %v738_v13, %v734_v53 }
 0x28c   :  { %v746_v16 = vadd.f32 %v744_v33, %v7077_v47  ;;  %v745_v6 = vmul.f32 %v7234_v56, %v739_v28 }
 0x28e   :  { %v752_v1 = vadd.f32 %v750_v30, %v746_v16  ;;  %v747_v39 = vadd.f32 %v745_v6, %v7102_v58 }
 0x290   :  { %v753_v5 = vadd.f32 %v750_v30, %v747_v39 }
 0x2d4   :  { %v1087_v24 = vpop.f32.mrf.mxu2 }
 0x2d5   :  { %v1107_v61 = vmul.f32 %v1087_v24, %v724_v12 }
 0x2d7   :  { %v7244_v41 = vadd.f32 %v1107_v61, %v752_v1 }
 0x2d9   :  { %v1119_v11 = vmul.f32 0.0625, %v7244_v41 }
 0x2da   :  { %v1102_v54 = vpop.f32.mrf.mxu3 }
 0x2db   :  { %v1111_v22 = vmul.f32 %v1102_v54, %v724_v12  ;;  %v1121_v49 = vadd.f32 %v1119_v11, %v6901_v14  ;;  %v1123_v14 = vmul.f32 0.0625, %v6933_v21 }
 0x2dc   :  { %v1089_v19 = vpop.f32.mrf.mxu2 }
 0x2dd   :  { %v1108_v8 = vmul.f32 %v1089_v19, %v739_v28  ;;  %v1113_v7 = vmul.f32 %v1111_v22, %v6918_v17 }
 0x2df   :  { %v7248_v13 = vadd.f32 %v1108_v8, %v753_v5  ;;  %1115 = vadd.xlane.f32.xlu0 %v1113_v7 }
 0x2e1   :  { %v1120_v53 = vmul.f32 0.0625, %v7248_v13 }
 0x2e2   :  { %v1104_v33 = vpop.f32.mrf.mxu3 }
 0x2e3   :  { %v1122_v24 = vadd.f32 %v1120_v53, %v6904_v15  ;;  %v1112_v16 = vmul.f32 %v1104_v33, %v739_v28  ;;  %v1125_v15 = vperm.slane %v1123_v14, 0 }
 0x2e5   :  { %v1339_v6 = vpack.c.bf16 %v1122_v24, %v1121_v49  ;;  %v1114_v12 = vmul.f32 %v1112_v16, %v6921_v18  ;;  %v1127_v17 = vadd.f32 %v1125_v15, %v6952_v31  ;;  %v1171_v49 = vmul.f32 0.0625, %v7000_v55 }
 0x2e7   :  { %1348 = vmatmul.bf16.vlgmr.msrb.gmra.mxu0 %v1339_v6  ;;  %1117 = vadd.xlane.f32.xlu0 %v1114_v12  ;;  %v5601_v18 = vmul.f32 -1.442695, %v1127_v17  ;;  %v1173_v14 = vperm.slane %v1171_v49, 0  ;;  %v7297_v49 = vld [vmem:[#allocation5 + $0x30] sm:$0xff] }
 0x2e8   :  { %1530 = vmatpush.bf16.msrb.mxu0 %v6936_v23  ;;  %v1128_v23 = vadd.f32 %v1125_v15, %v6968_v37 }
 0x2e9   :  { %5791 = vpow2.f32 %v5601_v18 }
 0x2ec   :  { %1531 = vmatpush.bf16.msrb.mxu0 %v6942_v25  ;;  %v5602_v25 = vmul.f32 -1.442695, %v1128_v23 }
 0x2ee   :  { %5793 = vpow2.f32 %v5602_v25 }
 0x2f0   :  { %1532 = vmatpush.bf16.msrb.mxu0 %v6956_v32  ;;  %v5792_v32 = vpop.eup %5791 }
 0x2f4   :  { %1533 = vmatpush.bf16.msrb.mxu0 %v6965_v35  ;;  %v1135_v35 = vadd.f32 1.0, %v5792_v32  ;;  %v9735_v32 = vld [vmem:[#allocation34_spill] sm:$0xff] }
 0x2f6   :  { %5795 = vrcp.f32 %v1135_v35  ;;  %v1148_v54 = vand.u32 2147483648, %v1135_v35  ;;  %vm1142_vm3 = vweird.f32 %v1135_v35  ;;  %v1146_v22 = vand.u32 2147483647, %v1135_v35 }
 0x2f8   :  { %1534 = vmatpush.bf16.msrb.mxu0 %v6971_v38  ;;  %v5794_v38 = vpop.eup %5793  ;;  %v1149_v8 = vor.u32 1.1754944e-38, %v1148_v54  ;;  %vm1147_vm5 = vcmp.eq.f32.partialorder %v1146_v22, 8.507059e+37  ;;  %v9737_v22 = vld [vmem:[#allocation38_spill] sm:$0xff] }
 0x2fc   :  { %1535 = vmatpush.bf16.msrb.mxu0 %v6980_v44  ;;  %v1136_v44 = vadd.f32 1.0, %v5794_v38  ;;  %v5796_v28 = vpop.eup %5795 }
 0x2fd   :  { %vm1143_vm2 = vweird.f32 %v5796_v28 }
 0x2fe   :  { %5797 = vrcp.f32 %v1136_v44  ;;  %vm1144_vm4 = vmor %vm1142_vm3, %vm1143_vm2  ;;  %v1163_v53 = vand.u32 2147483648, %v1136_v44  ;;  %vm1157_vm7 = vweird.f32 %v1136_v44  ;;  %v1161_v24 = vand.u32 2147483647, %v1136_v44 }
 0x300   :  { %1536 = vmatpush.bf16.msrb.mxu0 %v6986_v46  ;;  %v1138_v46 = vmul.f32 %v5796_v28, %v1135_v35  ;;  %v1164_v6 = vor.u32 1.1754944e-38, %v1163_v53  ;;  %vm1162_vm9 = vcmp.eq.f32.partialorder %v1161_v24, 8.507059e+37  ;;  %v9738_v24 = vld [vmem:[#allocation39_spill] sm:$0xff] }
 0x304   :  { %1537 = vmatpush.bf16.msrb.mxu0 %v6992_v50  ;;  %v1139_v50 = vsub.f32 1.0, %v1138_v46  ;;  %v5798_v30 = vpop.eup %5797 }
 0x305   :  { %v1153_v61 = vmul.f32 %v5798_v30, %v1136_v44  ;;  %vm1158_vm6 = vweird.f32 %v5798_v30 }
 0x306   :  { %v1140_v21 = vmul.f32 %v5796_v28, %v1139_v50  ;;  %vm1159_vm8 = vmor %vm1157_vm7, %vm1158_vm6 }
 0x307   :  { %v1154_v39 = vsub.f32 1.0, %v1153_v61 }
 0x308   :  { %v1141_v1 = vadd.f32 %v5796_v28, %v1140_v21 }
 0x309   :  { %v1155_v5 = vmul.f32 %v5798_v30, %v1154_v39 }
 0x30a   :  { %v1145_v19 = vsel %vm1144_vm4, %v5796_v28, %v1141_v1 }
 0x30b   :  { %v7265_v7 = vsel %vm1147_vm5, %v1149_v8, %v1145_v19  ;;  %v1156_v11 = vadd.f32 %v5798_v30, %v1155_v5  ;;  %v7292_v8 = vld [vmem:[#allocation5 + $0x38] sm:$0xff] }
 0x30c   :  { %v1167_v33 = vmul.f32 %v7004_v60, %v7265_v7 }
 0x30d   :  { %v1160_v16 = vsel %vm1159_vm8, %v5798_v30, %v1156_v11 }
 0x30e   :  { %v1169_v12 = vadd.f32 %v1167_v33, %v6982_v45  ;;  %v7271_v15 = vsel %vm1162_vm9, %v1164_v6, %v1160_v16  ;;  %v7301_v16 = vld [vmem:[#allocation5 + $0x28] sm:$0xff]  ;;  %v7305_v6 = vld [vmem:[#allocation5 + $0x20] sm:$0xff] }
 0x30f   :  { %v1168_v25 = vmul.f32 %v7004_v60, %v7271_v15  ;;  %v9736_v60 = vld [vmem:[#allocation37_spill] sm:$0xff]  ;;  %v7290_v19 = vmul.f32 %v7271_v15, %v9737_v22  ;;  %v9743_v22 = vld [vmem:[#allocation47_spill] sm:$0xff] }
 0x310   :  { %v7273_v18 = vadd.f32 %v1173_v14, %v1169_v12  ;;  %v7286_v54 = vmul.f32 %v7265_v7, %v9736_v60  ;;  %v7309_v12 = vld [vmem:[#allocation5 + $0x18] sm:$0xff] }
 0x311   :  { %v1170_v35 = vadd.f32 %v1168_v25, %v9735_v32  ;;  %v9745_v60 = vld [vmem:[#allocation44_spill] sm:$0xff] }
 0x313   :  { %v7280_v44 = vadd.f32 %v1173_v14, %v1170_v35  ;;  %v7313_v14 = vld [vmem:[#allocation5 + $0x10] sm:$0xff] }
 0x364   :  { %v1349_v17 = vpop.f32.mrf.mxu0 }
 0x365   :  { %v1354_v23 = vmul.f32 %v1349_v17, %v7265_v7  ;;  %v7317_v17 = vld [vmem:[#allocation5 + $0x8] sm:$0xff] }
 0x367   :  { %v1356_v55 = vadd.f32 %v1354_v23, %v7273_v18 }
 0x369   :  { %5799 = vtanh.f32 %v1356_v55  ;;  %v9740_v55 = vld [vmem:[#allocation41_spill] sm:$0xff] }
 0x36c   :  { %v1351_v38 = vpop.f32.mrf.mxu0 }
 0x36d   :  { %v1355_v28 = vmul.f32 %v1351_v38, %v7271_v15 }
 0x36f   :  { %v1357_v46 = vadd.f32 %v1355_v28, %v7280_v44  ;;  %v5800_v50 = vpop.eup %5799  ;;  %v9741_v28 = vld [vmem:[#allocation42_spill] sm:$0xff] }
 0x370   :  { %v1362_v30 = vmul.f32 %v5800_v50, %v5800_v50 }
 0x371   :  { %5801 = vtanh.f32 %v1357_v46 }
 0x372   :  { %v1364_v61 = vsub.f32 1.0, %v1362_v30 }
 0x374   :  { %v1366_v11 = vmul.f32 %v1364_v61, %v7286_v54 }
 0x377   :  { %v5802_v21 = vpop.eup %5801 }
 0x378   :  { %v1363_v1 = vmul.f32 %v5802_v21, %v5802_v21  ;;  %v1368_v39 = vpack.c.bf16 %v5802_v21, %v5800_v50 }
 0x37a   :  { %1377 = vmatmul.bf16.vlgmr.msrb.gmra.mxu1 %v1368_v39  ;;  %v1365_v5 = vsub.f32 1.0, %v1363_v1 }
 0x37b   :  { %1545 = vmatpush.bf16.msrb.mxu1 %v7292_v8 }
 0x37c   :  { %v1367_v53 = vmul.f32 %v1365_v5, %v7290_v19 }
 0x37e   :  { %v1383_v33 = vpack.c.bf16 %v1367_v53, %v1366_v11 }
 0x37f   :  { %1546 = vmatpush.bf16.msrb.mxu1 %v7297_v49 }
 0x380   :  { %1392 = vmatmul.bf16.vlgmr.msra.gmra.mxu2 %v1383_v33 }
 0x381   :  { %1574 = vmatpush.bf16.msra.mxu2 %v9738_v24 }
 0x383   :  { %1547 = vmatpush.bf16.msrb.mxu1 %v7301_v16 }
 0x385   :  { %1575 = vmatpush.bf16.msra.mxu2 %v7025_v20  ;;  %v7321_v20 = vld [vmem:[#allocation5] sm:$0xff] }
 0x387   :  { %1548 = vmatpush.bf16.msrb.mxu1 %v7305_v6 }
 0x389   :  { %1576 = vmatpush.bf16.msra.mxu2 %v7030_v4  ;;  %v9739_v4 = vld [vmem:[#allocation40_spill] sm:$0xff] }
 0x38a   :  { %v1177_v23 = vmul.f32 0.0625, %v9739_v4 }
 0x38b   :  { %1549 = vmatpush.bf16.msrb.mxu1 %v7309_v12 }
 0x38c   :  { %v1179_v25 = vperm.slane %v1177_v23, 0 }
 0x38d   :  { %1577 = vmatpush.bf16.msra.mxu2 %v7047_v57 }
 0x38e   :  { %v1181_v35 = vadd.f32 %v1179_v25, %v9740_v55  ;;  %v1182_v46 = vadd.f32 %v1179_v25, %v9741_v28 }
 0x38f   :  { %1550 = vmatpush.bf16.msrb.mxu1 %v7313_v14 }
 0x390   :  { %v5603_v38 = vmul.f32 -1.442695, %v1181_v35  ;;  %v5604_v50 = vmul.f32 -1.442695, %v1182_v46 }
 0x391   :  { %1578 = vmatpush.bf16.msra.mxu2 %v7051_v59 }
 0x392   :  { %5803 = vpow2.f32 %v5603_v38 }
 0x393   :  { %1551 = vmatpush.bf16.msrb.mxu1 %v7317_v17  ;;  %5805 = vpow2.f32 %v5604_v50 }
 0x395   :  { %1579 = vmatpush.bf16.msra.mxu2 %v7055_v0 }
 0x397   :  { %1552 = vmatpush.bf16.msrb.mxu1 %v7321_v20 }
 0x398   :  { %v5804_v30 = vpop.eup %5803 }
 0x399   :  { %1580 = vmatpush.bf16.msra.mxu2 %v7063_v26  ;;  %v1189_v21 = vadd.f32 1.0, %v5804_v30  ;;  %v5806_v61 = vpop.eup %5805 }
 0x39a   :  { %v1190_v1 = vadd.f32 1.0, %v5806_v61 }
 0x39b   :  { %5807 = vrcp.f32 %v1189_v21  ;;  %vm1196_vm10 = vweird.f32 %v1189_v21  ;;  %v1202_v4 = vand.u32 2147483648, %v1189_v21  ;;  %v1200_v35 = vand.u32 2147483647, %v1189_v21 }
 0x39c   :  { %5809 = vrcp.f32 %v1190_v1  ;;  %vm1211_vm14 = vweird.f32 %v1190_v1  ;;  %v1217_v61 = vand.u32 2147483648, %v1190_v1  ;;  %v1215_v28 = vand.u32 2147483647, %v1190_v1 }
 0x39d   :  { %1581 = vmatpush.bf16.msra.mxu2 %v7071_v40  ;;  %v1203_v38 = vor.u32 1.1754944e-38, %v1202_v4  ;;  %vm1201_vm13 = vcmp.eq.f32.partialorder %v1200_v35, 8.507059e+37  ;;  %v9744_v4 = vld [vmem:[#allocation43_spill] sm:$0xff] }
 0x39e   :  { %vm1216_vm1 = vcmp.eq.f32.partialorder %v1215_v28, 8.507059e+37 }
 0x3a1   :  { %v5808_v39 = vpop.eup %5807 }
 0x3a2   :  { %v1192_v5 = vmul.f32 %v5808_v39, %v1189_v21  ;;  %v5810_v53 = vpop.eup %5809  ;;  %vm1197_vm11 = vweird.f32 %v5808_v39  ;;  %v1218_v21 = vor.u32 1.1754944e-38, %v1217_v61 }
 0x3a3   :  { %v1207_v24 = vmul.f32 %v5810_v53, %v1190_v1  ;;  %vm1198_vm12 = vmor %vm1196_vm10, %vm1197_vm11  ;;  %vm1212_vm15 = vweird.f32 %v5810_v53 }
 0x3a4   :  { %v1193_v11 = vsub.f32 1.0, %v1192_v5  ;;  %vm1213_vm0 = vmor %vm1211_vm14, %vm1212_vm15 }
 0x3a5   :  { %v1208_v25 = vsub.f32 1.0, %v1207_v24 }
 0x3a6   :  { %v1194_v33 = vmul.f32 %v5808_v39, %v1193_v11  ;;  %v9742_v11 = vld [vmem:[#allocation46_spill] sm:$0xff] }
 0x3a7   :  { %v1209_v50 = vmul.f32 %v5810_v53, %v1208_v25 }
 0x3a8   :  { %v1195_v23 = vadd.f32 %v5808_v39, %v1194_v33  ;;  %v1225_v33 = vmul.f32 0.0625, %v9743_v22 }
 0x3a9   :  { %v1210_v5 = vadd.f32 %v5810_v53, %v1209_v50 }
 0x3aa   :  { %v1199_v46 = vsel %vm1198_vm12, %v5808_v39, %v1195_v23  ;;  %v1227_v23 = vperm.slane %v1225_v33, 0 }
 0x3ab   :  { %v7329_v30 = vsel %vm1201_vm13, %v1203_v38, %v1199_v46  ;;  %v1214_v24 = vsel %vm1213_vm0, %v5810_v53, %v1210_v5 }
 0x3ac   :  { %v1221_v55 = vmul.f32 %v9742_v11, %v7329_v30  ;;  %v7335_v35 = vsel %vm1216_vm1, %v1218_v21, %v1214_v24 }
 0x3ad   :  { %v1222_v1 = vmul.f32 %v9742_v11, %v7335_v35 }
 0x3ae   :  { %v1223_v39 = vadd.f32 %v1221_v55, %v9744_v4 }
 0x3af   :  { %v1224_v22 = vadd.f32 %v1222_v1, %v9745_v60 }
 0x3b0   :  { %v7337_v38 = vadd.f32 %v1227_v23, %v1223_v39 }
 0x3b1   :  { %v7344_v28 = vadd.f32 %v1227_v23, %v1224_v22  ;;  %v7350_v23 = vld [vmem:[#allocation7 + $0x38] sm:$0xff] }
 0x3f7   :  { %v1378_v25 = vpop.f32.mrf.mxu1 }
 0x3f8   :  { %v1398_v46 = vmul.f32 %v1378_v25, %v7329_v30 }
 0x3fa   :  { %v1400_v50 = vadd.f32 %v1398_v46, %v7337_v38 }
 0x3fc   :  { %5811 = vtanh.f32 %v1400_v50 }
 0x3ff   :  { %v1380_v53 = vpop.f32.mrf.mxu1 }
 0x400   :  { %v1399_v55 = vmul.f32 %v1380_v53, %v7335_v35 }
 0x402   :  { %v1401_v61 = vadd.f32 %v1399_v55, %v7344_v28  ;;  %v5812_v33 = vpop.eup %5811 }
 0x403   :  { %v1393_v5 = vpop.f32.mrf.mxu2  ;;  %v1406_v21 = vmul.f32 %v5812_v33, %v5812_v33 }
 0x404   :  { %5813 = vtanh.f32 %v1401_v61  ;;  %v1402_v39 = vmul.f32 %v1393_v5, %v7329_v30  ;;  %v7353_v61 = vld [vmem:[#allocation7 + $0x30] sm:$0xff]  ;;  %v7357_v5 = vld [vmem:[#allocation7 + $0x28] sm:$0xff] }
 0x405   :  { %v1408_v11 = vsub.f32 1.0, %v1406_v21 }
 0x407   :  { %v1410_v22 = vmul.f32 %v1408_v11, %v1402_v39 }
 0x40a   :  { %v5814_v24 = vpop.eup %5813 }
 0x40b   :  { %v1395_v25 = vpop.f32.mrf.mxu2  ;;  %v1407_v46 = vmul.f32 %v5814_v24, %v5814_v24  ;;  %v1412_v4 = vpack.c.bf16 %v5814_v24, %v5812_v33 }
 0x40c   :  { %v1403_v1 = vmul.f32 %v1395_v25, %v7335_v35 }
 0x40d   :  { %v1409_v50 = vsub.f32 1.0, %v1407_v46  ;;  %1421 = vmatmul.bf16.vlgmr.msra.gmra.mxu3 %v1412_v4 }
 0x40e   :  { %1589 = vmatpush.bf16.msra.mxu3 %v7350_v23 }
 0x40f   :  { %v1411_v53 = vmul.f32 %v1409_v50, %v1403_v1 }
 0x411   :  { %v1427_v55 = vpack.c.bf16 %v1411_v53, %v1410_v22 }
 0x412   :  { %1590 = vmatpush.bf16.msra.mxu3 %v7353_v61 }
 0x413   :  { %1436 = vmatmul.bf16.vlgmr.msra.gmra.mxu0 %v1427_v55 }
 0x414   :  { %1618 = vmatpush.bf16.msra.mxu0 %v7093_v34  ;;  %v9746_v34 = vld [vmem:[#allocation49_spill] sm:$0xff] }
 0x416   :  { %1591 = vmatpush.bf16.msra.mxu3 %v7357_v5 }
 0x418   :  { %1619 = vmatpush.bf16.msra.mxu0 %v7099_v43 }
 0x41a   :  { %1592 = vmatpush.bf16.msra.mxu3 %v7047_v57  ;;  %v1231_v57 = vmul.f32 0.0625, %v9746_v34 }
 0x41c   :  { %1620 = vmatpush.bf16.msra.mxu0 %v7108_v27  ;;  %v1233_v43 = vperm.slane %v1231_v57, 0 }
 0x41e   :  { %1593 = vmatpush.bf16.msra.mxu3 %v7051_v59  ;;  %v9747_v59 = vld [vmem:[#allocation50_spill] sm:$0xff] }
 0x41f   :  { %v1235_v27 = vadd.f32 %v1233_v43, %v9747_v59 }
 0x420   :  { %1621 = vmatpush.bf16.msra.mxu0 %v7146_v42 }
 0x421   :  { %v5605_v4 = vmul.f32 -1.442695, %v1235_v27 }
 0x422   :  { %1594 = vmatpush.bf16.msra.mxu3 %v7055_v0  ;;  %v9748_v0 = vld [vmem:[#allocation51_spill] sm:$0xff] }
 0x423   :  { %5815 = vpow2.f32 %v5605_v4  ;;  %v1236_v33 = vadd.f32 %v1233_v43, %v9748_v0 }
 0x424   :  { %1622 = vmatpush.bf16.msra.mxu0 %v7151_v52 }
 0x425   :  { %v5606_v21 = vmul.f32 -1.442695, %v1236_v33 }
 0x426   :  { %1595 = vmatpush.bf16.msra.mxu3 %v7063_v26 }
 0x427   :  { %5817 = vpow2.f32 %v5606_v21 }
 0x428   :  { %1623 = vmatpush.bf16.msra.mxu0 %v7156_v62 }
 0x429   :  { %v5816_v24 = vpop.eup %5815 }
 0x42a   :  { %1596 = vmatpush.bf16.msra.mxu3 %v7071_v40  ;;  %v1243_v26 = vadd.f32 1.0, %v5816_v24 }
 0x42c   :  { %1624 = vmatpush.bf16.msra.mxu0 %v7161_v29  ;;  %5819 = vrcp.f32 %v1243_v26  ;;  %vm1250_vm2 = vweird.f32 %v1243_v26  ;;  %v1256_v53 = vand.u32 2147483648, %v1243_v26  ;;  %v1254_v34 = vand.u32 2147483647, %v1243_v26 }
 0x42d   :  { %v5818_v39 = vpop.eup %5817 }
 0x42e   :  { %v1244_v40 = vadd.f32 1.0, %v5818_v39  ;;  %v1257_v43 = vor.u32 1.1754944e-38, %v1256_v53  ;;  %vm1255_vm5 = vcmp.eq.f32.partialorder %v1254_v34, 8.507059e+37 }
 0x430   :  { %1625 = vmatpush.bf16.msra.mxu0 %v7170_v48  ;;  %5821 = vrcp.f32 %v1244_v40  ;;  %vm1265_vm6 = vweird.f32 %v1244_v40  ;;  %v1271_v21 = vand.u32 2147483648, %v1244_v40  ;;  %v1269_v39 = vand.u32 2147483647, %v1244_v40 }
 0x432   :  { %v5820_v11 = vpop.eup %5819  ;;  %vm1270_vm9 = vcmp.eq.f32.partialorder %v1269_v39, 8.507059e+37 }
 0x433   :  { %v1246_v25 = vmul.f32 %v5820_v11, %v1243_v26  ;;  %vm1251_vm3 = vweird.f32 %v5820_v11  ;;  %v1272_v26 = vor.u32 1.1754944e-38, %v1271_v21 }
 0x434   :  { %vm1252_vm4 = vmor %vm1250_vm2, %vm1251_vm3 }
 0x435   :  { %v1247_v46 = vsub.f32 1.0, %v1246_v25 }
 0x436   :  { %v5822_v1 = vpop.eup %5821 }
 0x437   :  { %v1248_v50 = vmul.f32 %v5820_v11, %v1247_v46  ;;  %v1261_v22 = vmul.f32 %v5822_v1, %v1244_v40  ;;  %vm1266_vm7 = vweird.f32 %v5822_v1  ;;  %v9749_v46 = vld [vmem:[#allocation52_spill] sm:$0xff] }
 0x438   :  { %vm1267_vm8 = vmor %vm1265_vm6, %vm1266_vm7 }
 0x439   :  { %v1249_v55 = vadd.f32 %v5820_v11, %v1248_v50  ;;  %v1262_v57 = vsub.f32 1.0, %v1261_v22  ;;  %v1279_v50 = vmul.f32 0.0625, %v9749_v46 }
 0x43b   :  { %v1253_v27 = vsel %vm1252_vm4, %v5820_v11, %v1249_v55  ;;  %v1263_v4 = vmul.f32 %v5822_v1, %v1262_v57  ;;  %v1281_v53 = vperm.slane %v1279_v50, 0 }
 0x43c   :  { %v7375_v33 = vsel %vm1255_vm5, %v1257_v43, %v1253_v27 }
 0x43d   :  { %v1264_v24 = vadd.f32 %v5822_v1, %v1263_v4  ;;  %v1275_v25 = vmul.f32 %v7177_v51, %v7375_v33 }
 0x43f   :  { %v1268_v22 = vsel %vm1267_vm8, %v5822_v1, %v1264_v24  ;;  %v1277_v11 = vadd.f32 %v1275_v25, %v7008_v2 }
 0x440   :  { %v7381_v55 = vsel %vm1270_vm9, %v1272_v26, %v1268_v22 }
 0x441   :  { %v7383_v57 = vadd.f32 %v1281_v53, %v1277_v11  ;;  %v1276_v40 = vmul.f32 %v7177_v51, %v7381_v55 }
 0x443   :  { %v1278_v4 = vadd.f32 %v1276_v40, %v7012_v36 }
 0x445   :  { %v7390_v24 = vadd.f32 %v1281_v53, %v1278_v4  ;;  %v7396_v53 = vld [vmem:[#allocation8 + $0x38] sm:$0xff] }
 0x490   :  { %v1422_v34 = vpop.f32.mrf.mxu3  ;;  %v1437_v21 = vpop.f32.mrf.mxu0 }
 0x491   :  { %v1442_v43 = vmul.f32 %v1422_v34, %v7375_v33 }
 0x493   :  { %v1444_v27 = vadd.f32 %v1442_v43, %v7383_v57  ;;  %v1446_v43 = vmul.f32 %v1437_v21, %v7375_v33  ;;  %v7405_v21 = vld [vmem:[#allocation8 + $0x28] sm:$0xff] }
 0x495   :  { %5823 = vtanh.f32 %v1444_v27 }
 0x498   :  { %v1424_v1 = vpop.f32.mrf.mxu3  ;;  %v1439_v22 = vpop.f32.mrf.mxu0 }
 0x499   :  { %v1443_v39 = vmul.f32 %v1424_v1, %v7381_v55  ;;  %v1447_v40 = vmul.f32 %v1439_v22, %v7381_v55  ;;  %v7416_v22 = vld [vmem:[#allocation2 + $0x20] sm:$0xff] }
 0x49b   :  { %v1445_v25 = vadd.f32 %v1443_v39, %v7390_v24  ;;  %v5824_v46 = vpop.eup %5823 }
 0x49c   :  { %v1450_v50 = vmul.f32 %v5824_v46, %v5824_v46 }
 0x49d   :  { %5825 = vtanh.f32 %v1445_v25  ;;  %v7399_v25 = vld [vmem:[#allocation8 + $0x30] sm:$0xff] }
 0x49e   :  { %v1452_v11 = vsub.f32 1.0, %v1450_v50  ;;  %v7402_v50 = vld [vmem:[#allocation2 + $0x38] sm:$0xff] }
 0x4a0   :  { %v1454_v4 = vmul.f32 %v1452_v11, %v1446_v43  ;;  %v7420_v11 = vld [vmem:[#allocation2 + $0x18] sm:$0xff] }
 0x4a3   :  { %v5826_v26 = vpop.eup %5825 }
 0x4a4   :  { %v1451_v51 = vmul.f32 %v5826_v26, %v5826_v26  ;;  %v1456_v34 = vpack.c.bf16 %v5826_v26, %v5824_v46  ;;  %v7408_v46 = vld [vmem:[#allocation2 + $0x30] sm:$0xff]  ;;  %v7412_v26 = vld [vmem:[#allocation2 + $0x28] sm:$0xff] }
 0x4a6   :  { %v1453_v27 = vsub.f32 1.0, %v1451_v51  ;;  %1465 = vmatmul.bf16.vlgmr.msra.gmra.mxu1 %v1456_v34  ;;  %v7424_v51 = vld [vmem:[#allocation2 + $0x10] sm:$0xff] }
 0x4a7   :  { %1633 = vmatpush.bf16.msra.mxu1 %v7396_v53 }
 0x4a8   :  { %v1455_v1 = vmul.f32 %v1453_v27, %v1447_v40 }
 0x4aa   :  { %v1471_v39 = vpack.c.bf16 %v1455_v1, %v1454_v4 }
 0x4ab   :  { %1634 = vmatpush.bf16.msra.mxu1 %v7399_v25 }
 0x4ac   :  { %1480 = vmatmul.bf16.vlgmr.msrb.gmra.mxu2 %v1471_v39 }
 0x4ad   :  { %1880 = vmatpush.bf16.msrb.mxu2 %v7402_v50 }
 0x4af   :  { %1635 = vmatpush.bf16.msra.mxu1 %v7405_v21 }
 0x4b1   :  { %1881 = vmatpush.bf16.msrb.mxu2 %v7408_v46 }
 0x4b3   :  { %1636 = vmatpush.bf16.msra.mxu1 %v7146_v42  ;;  %v7428_v42 = vld [vmem:[#allocation2 + $0x8] sm:$0xff] }
 0x4b5   :  { %1882 = vmatpush.bf16.msrb.mxu2 %v7412_v26 }
 0x4b7   :  { %1637 = vmatpush.bf16.msra.mxu1 %v7151_v52  ;;  %v7431_v52 = vld [vmem:[#allocation2] sm:$0xff] }
 0x4b9   :  { %1883 = vmatpush.bf16.msrb.mxu2 %v7416_v22 }
 0x4bb   :  { %1638 = vmatpush.bf16.msra.mxu1 %v7156_v62  ;;  %v1285_v62 = vmul.f32 0.0625, %v7221_v3 }
 0x4bd   :  { %1884 = vmatpush.bf16.msrb.mxu2 %v7420_v11  ;;  %v1287_v34 = vperm.slane %v1285_v62, 0 }
 0x4bf   :  { %1639 = vmatpush.bf16.msra.mxu1 %v7161_v29  ;;  %v1289_v43 = vadd.f32 %v1287_v34, %v7226_v9  ;;  %v1290_v40 = vadd.f32 %v1287_v34, %v7229_v10 }
 0x4c1   :  { %1885 = vmatpush.bf16.msrb.mxu2 %v7424_v51  ;;  %v5607_v29 = vmul.f32 -1.442695, %v1289_v43  ;;  %v5608_v27 = vmul.f32 -1.442695, %v1290_v40 }
 0x4c3   :  { %1640 = vmatpush.bf16.msra.mxu1 %v7170_v48  ;;  %5827 = vpow2.f32 %v5607_v29 }
 0x4c4   :  { %5829 = vpow2.f32 %v5608_v27 }
 0x4c5   :  { %1886 = vmatpush.bf16.msrb.mxu2 %v7428_v42 }
 0x4c9   :  { %1887 = vmatpush.bf16.msrb.mxu2 %v7431_v52  ;;  %v5828_v48 = vpop.eup %5827 }
 0x4ca   :  { %v1297_v4 = vadd.f32 1.0, %v5828_v48  ;;  %v5830_v1 = vpop.eup %5829 }
 0x4cb   :  { %v1298_v39 = vadd.f32 1.0, %v5830_v1 }
 0x4cc   :  { %5831 = vrcp.f32 %v1297_v4  ;;  %vm1304_vm10 = vweird.f32 %v1297_v4  ;;  %v1310_v43 = vand.u32 2147483648, %v1297_v4  ;;  %v1308_v29 = vand.u32 2147483647, %v1297_v4 }
 0x4cd   :  { %5833 = vrcp.f32 %v1298_v39  ;;  %vm1319_vm13 = vweird.f32 %v1298_v39  ;;  %v1325_v48 = vand.u32 2147483648, %v1298_v39  ;;  %v1323_v9 = vand.u32 2147483647, %v1298_v39 }
 0x4ce   :  { %v1311_v27 = vor.u32 1.1754944e-38, %v1310_v43  ;;  %vm1309_vm15 = vcmp.eq.f32.partialorder %v1308_v29, 8.507059e+37 }
 0x4cf   :  { %vm1324_vm1 = vcmp.eq.f32.partialorder %v1323_v9, 8.507059e+37 }
 0x4d2   :  { %v5832_v36 = vpop.eup %5831 }
 0x4d3   :  { %v1300_v2 = vmul.f32 %v5832_v36, %v1297_v4  ;;  %v5834_v0 = vpop.eup %5833  ;;  %vm1305_vm11 = vweird.f32 %v5832_v36 }
 0x4d4   :  { %v1315_v3 = vmul.f32 %v5834_v0, %v1298_v39  ;;  %vm1306_vm12 = vmor %vm1304_vm10, %vm1305_vm11  ;;  %vm1320_vm14 = vweird.f32 %v5834_v0 }
 0x4d5   :  { %v1301_v59 = vsub.f32 1.0, %v1300_v2  ;;  %vm1321_vm0 = vmor %vm1319_vm13, %vm1320_vm14 }
 0x4d6   :  { %v1316_v60 = vsub.f32 1.0, %v1315_v3 }
 0x4d7   :  { %v1302_v62 = vmul.f32 %v5832_v36, %v1301_v59  ;;  %v1326_v59 = vor.u32 1.1754944e-38, %v1325_v48 }
 0x4d8   :  { %v1317_v40 = vmul.f32 %v5834_v0, %v1316_v60  ;;  %v1333_v60 = vmul.f32 0.0625, %v7237_v63 }
 0x4d9   :  { %v1303_v34 = vadd.f32 %v5832_v36, %v1302_v62 }
 0x4da   :  { %v1318_v10 = vadd.f32 %v5834_v0, %v1317_v40  ;;  %v1335_v43 = vperm.slane %v1333_v60, 0 }
 0x4db   :  { %v1307_v1 = vsel %vm1306_vm12, %v5832_v36, %v1303_v34 }
 0x4dc   :  { %v7437_v2 = vsel %vm1309_vm15, %v1311_v27, %v1307_v1  ;;  %v1322_v3 = vsel %vm1321_vm0, %v5834_v0, %v1318_v10 }
 0x4dd   :  { %v1329_v62 = vmul.f32 %v7234_v56, %v7437_v2  ;;  %v7442_v4 = vsel %vm1324_vm1, %v1326_v59, %v1322_v3  ;;  %v7464_v59 = vld [vmem:[%s6649_s5] sm:$0xff] }
 0x4de   :  { %v1330_v39 = vmul.f32 %v7234_v56, %v7442_v4 }
 0x4df   :  { %v1331_v36 = vadd.f32 %v1329_v62, %v7077_v47  ;;  %v7468_v62 = vld [vmem:[%s6649_s5 + $0x8] sm:$0xff]  ;;  %s6638_s5 = smov [#allocation10]  }
 0x4e0   :  { %v1332_v10 = vadd.f32 %v1330_v39, %v7102_v58 }
 0x4e1   :  { %v7448_v9 = vadd.f32 %v1335_v43, %v1331_v36  ;;  %v7472_v36 = vld [vmem:[%s6654_s9] sm:$0xff] }
 0x4e2   :  { %v7454_v29 = vadd.f32 %v1335_v43, %v1332_v10 }
 0x523   :  { %v1466_v32 = vpop.f32.mrf.mxu1 }
 0x524   :  { %v1486_v34 = vmul.f32 %v1466_v32, %v7437_v2 }
 0x526   :  { %v7452_v63 = vadd.f32 %v1486_v34, %v7448_v9 }
 0x528   :  { %v1498_v27 = vmul.f32 0.0625, %v7452_v63 }
 0x52a   :  { %v1500_v3 = vadd.f32 %v7464_v59, %v1498_v27 }
 0x52b   :  { %v1468_v0 = vpop.f32.mrf.mxu1 }
 0x52c   :  { %v1487_v40 = vmul.f32 %v1468_v0, %v7442_v4  ;;  %v7478_v0 = vld [vmem:[%s6654_s9 + $0x8] sm:$0xff] }
 0x52e   :  { %v7459_v48 = vadd.f32 %v1487_v40, %v7454_v29 }
 0x52f   :  { %v1481_v56 = vpop.f32.mrf.mxu2 }
 0x530   :  { %v1499_v32 = vmul.f32 0.0625, %v7459_v48  ;;  %v1490_v1 = vmul.f32 %v1481_v56, %v7437_v2 }
 0x532   :  { %v1501_v60 = vadd.f32 %v7468_v62, %v1499_v32  ;;  %v1492_v43 = vmul.f32 %v7472_v36, %v1490_v1 }
 0x534   :  { %1494 = vadd.xlane.f32.xlu1 %v1492_v43  ;;  %v1502_v39 = vpack.c.bf16 %v1501_v60, %v1500_v3 }
 0x536   :  { %1511 = vmatmul.bf16.vlgmr.msrb.gmra.mxu3 %v1502_v39 }
 0x537   :  { %v1483_v34 = vpop.f32.mrf.mxu2  ;;  %1909 = vmatpush.bf16.msrb.mxu3 %v7292_v8 }
 0x538   :  { %v1491_v10 = vmul.f32 %v1483_v34, %v7442_v4 }
 0x53a   :  { %v1493_v40 = vmul.f32 %v7478_v0, %v1491_v10 }
 0x53b   :  { %1910 = vmatpush.bf16.msrb.mxu3 %v7297_v49 }
 0x53c   :  { %1496 = vadd.xlane.f32.xlu1 %v1493_v40 }
 0x53f   :  { %1911 = vmatpush.bf16.msrb.mxu3 %v7301_v16 }
 0x543   :  { %1912 = vmatpush.bf16.msrb.mxu3 %v7305_v6 }
 0x547   :  { %1913 = vmatpush.bf16.msrb.mxu3 %v7309_v12 }
 0x54b   :  { %1914 = vmatpush.bf16.msrb.mxu3 %v7313_v14 }
 0x54f   :  { %1915 = vmatpush.bf16.msrb.mxu3 %v7317_v17 }
 0x553   :  { %1916 = vmatpush.bf16.msrb.mxu3 %v7321_v20 }
 0x5b9   :  { %v1512_v27 = vpop.f32.mrf.mxu3 }
 0x5ba   :  { %v1517_v56 = vmul.f32 %v1512_v27, %v7265_v7 }
 0x5bc   :  { %v1519_v32 = vadd.f32 %v1517_v56, %v7273_v18 }
 0x5be   :  { %5835 = vtanh.f32 %v1519_v32 }
 0x5c1   :  { %v1514_v1 = vpop.f32.mrf.mxu3 }
 0x5c2   :  { %v1518_v3 = vmul.f32 %v1514_v1, %v7271_v15  ;;  %v7510_v15 = vld [vmem:[#allocation7 + $0x10] sm:$0xff] }
 0x5c4   :  { %v1520_v60 = vadd.f32 %v1518_v3, %v7280_v44  ;;  %v5836_v43 = vpop.eup %5835  ;;  %v7514_v44 = vld [vmem:[#allocation7 + $0x8] sm:$0xff] }
 0x5c5   :  { %v1523_v39 = vmul.f32 %v5836_v43, %v5836_v43 }
 0x5c6   :  { %5837 = vtanh.f32 %v1520_v60 }
 0x5c7   :  { %v1525_v10 = vsub.f32 1.0, %v1523_v39 }
 0x5c9   :  { %v1527_v7 = vmul.f32 %v1525_v10, %v7286_v54  ;;  %v7517_v54 = vld [vmem:[#allocation7] sm:$0xff] }
 0x5ca   :  { %9750 = vst [vmem:[#allocation39_spill] sm:$0xff] %v7517_v54 }
 0x5cc   :  { %v5838_v34 = vpop.eup %5837 }
 0x5cd   :  { %v1524_v40 = vmul.f32 %v5838_v34, %v5838_v34  ;;  %v1529_v58 = vpack.c.bf16 %v5838_v34, %v5836_v43 }
 0x5cf   :  { %1538 = vmatmul.bf16.vlgmr.msrb.gmra.mxu0 %v1529_v58  ;;  %v1526_v47 = vsub.f32 1.0, %v1524_v40  ;;  %v7502_v58 = vld [vmem:[#allocation7 + $0x20] sm:$0xff] }
 0x5d0   :  { %1924 = vmatpush.bf16.msrb.mxu0 %v7292_v8 }
 0x5d1   :  { %v1528_v18 = vmul.f32 %v1526_v47, %v7290_v19  ;;  %v7506_v47 = vld [vmem:[#allocation7 + $0x18] sm:$0xff] }
 0x5d3   :  { %v1544_v27 = vpack.c.bf16 %v1528_v18, %v1527_v7 }
 0x5d4   :  { %1925 = vmatpush.bf16.msrb.mxu0 %v7297_v49 }
 0x5d5   :  { %1553 = vmatmul.bf16.vlgmr.msrb.gmra.mxu1 %v1544_v27 }
 0x5d6   :  { %1953 = vmatpush.bf16.msrb.mxu1 %v7350_v23 }
 0x5d8   :  { %1926 = vmatpush.bf16.msrb.mxu0 %v7301_v16 }
 0x5da   :  { %1954 = vmatpush.bf16.msrb.mxu1 %v7353_v61 }
 0x5dc   :  { %1927 = vmatpush.bf16.msrb.mxu0 %v7305_v6 }
 0x5de   :  { %1955 = vmatpush.bf16.msrb.mxu1 %v7357_v5 }
 0x5e0   :  { %1928 = vmatpush.bf16.msrb.mxu0 %v7309_v12 }
 0x5e2   :  { %1956 = vmatpush.bf16.msrb.mxu1 %v7502_v58 }
 0x5e4   :  { %1929 = vmatpush.bf16.msrb.mxu0 %v7313_v14 }
 0x5e6   :  { %1957 = vmatpush.bf16.msrb.mxu1 %v7506_v47 }
 0x5e8   :  { %1930 = vmatpush.bf16.msrb.mxu0 %v7317_v17 }
 0x5ea   :  { %1958 = vmatpush.bf16.msrb.mxu1 %v7510_v15 }
 0x5ec   :  { %1931 = vmatpush.bf16.msrb.mxu0 %v7321_v20 }
 0x5ee   :  { %1959 = vmatpush.bf16.msrb.mxu1 %v7514_v44 }
 0x5f2   :  { %1960 = vmatpush.bf16.msrb.mxu1 %v7517_v54 }
 0x64c   :  { %v1539_v19 = vpop.f32.mrf.mxu0 }
 0x64d   :  { %v1559_v56 = vmul.f32 %v1539_v19, %v7329_v30 }
 0x64f   :  { %v1561_v32 = vadd.f32 %v1559_v56, %v7337_v38 }
 0x651   :  { %5839 = vtanh.f32 %v1561_v32 }
 0x652   :  { %v1554_v3 = vpop.f32.mrf.mxu1 }
 0x653   :  { %v1563_v45 = vmul.f32 %v1554_v3, %v7329_v30  ;;  %v7534_v30 = vld [vmem:[#allocation8 + $0x20] sm:$0xff] }
 0x654   :  { %v1541_v1 = vpop.f32.mrf.mxu0  ;;  %v7549_v3 = vld [vmem:[#allocation8] sm:$0xff] }
 0x655   :  { %v1560_v60 = vmul.f32 %v1541_v1, %v7335_v35 }
 0x657   :  { %v1562_v43 = vadd.f32 %v1560_v60, %v7344_v28  ;;  %v5840_v39 = vpop.eup %5839  ;;  %v7546_v28 = vld [vmem:[#allocation8 + $0x8] sm:$0xff] }
 0x658   :  { %v1567_v34 = vmul.f32 %v5840_v39, %v5840_v39 }
 0x659   :  { %5841 = vtanh.f32 %v1562_v43 }
 0x65a   :  { %v1556_v40 = vpop.f32.mrf.mxu1  ;;  %v1569_v7 = vsub.f32 1.0, %v1567_v34 }
 0x65b   :  { %v1564_v19 = vmul.f32 %v1556_v40, %v7335_v35  ;;  %v7542_v35 = vld [vmem:[#allocation8 + $0x10] sm:$0xff] }
 0x65c   :  { %v1571_v56 = vmul.f32 %v1569_v7, %v1563_v45  ;;  %v7538_v45 = vld [vmem:[#allocation8 + $0x18] sm:$0xff] }
 0x65f   :  { %v5842_v10 = vpop.eup %5841 }
 0x660   :  { %v1568_v18 = vmul.f32 %v5842_v10, %v5842_v10  ;;  %v1573_v27 = vpack.c.bf16 %v5842_v10, %v5840_v39 }
 0x662   :  { %v1570_v38 = vsub.f32 1.0, %v1568_v18  ;;  %1582 = vmatmul.bf16.vlgmr.msra.gmra.mxu2 %v1573_v27 }
 0x663   :  { %1968 = vmatpush.bf16.msra.mxu2 %v7350_v23 }
 0x664   :  { %v1572_v32 = vmul.f32 %v1570_v38, %v1564_v19 }
 0x666   :  { %v1588_v1 = vpack.c.bf16 %v1572_v32, %v1571_v56 }
 0x667   :  { %1969 = vmatpush.bf16.msra.mxu2 %v7353_v61 }
 0x668   :  { %1597 = vmatmul.bf16.vlgmr.msra.gmra.mxu3 %v1588_v1 }
 0x669   :  { %1997 = vmatpush.bf16.msra.mxu3 %v7396_v53 }
 0x66b   :  { %1970 = vmatpush.bf16.msra.mxu2 %v7357_v5 }
 0x66d   :  { %1998 = vmatpush.bf16.msra.mxu3 %v7399_v25 }
 0x66f   :  { %1971 = vmatpush.bf16.msra.mxu2 %v7502_v58 }
 0x671   :  { %1999 = vmatpush.bf16.msra.mxu3 %v7405_v21 }
 0x673   :  { %1972 = vmatpush.bf16.msra.mxu2 %v7506_v47 }
 0x675   :  { %2000 = vmatpush.bf16.msra.mxu3 %v7534_v30 }
 0x677   :  { %1973 = vmatpush.bf16.msra.mxu2 %v7510_v15 }
 0x679   :  { %2001 = vmatpush.bf16.msra.mxu3 %v7538_v45 }
 0x67b   :  { %1974 = vmatpush.bf16.msra.mxu2 %v7514_v44 }
 0x67d   :  { %2002 = vmatpush.bf16.msra.mxu3 %v7542_v35 }
 0x67f   :  { %1975 = vmatpush.bf16.msra.mxu2 %v7517_v54 }
 0x681   :  { %2003 = vmatpush.bf16.msra.mxu3 %v7546_v28 }
 0x685   :  { %2004 = vmatpush.bf16.msra.mxu3 %v7549_v3 }
 0x6e5   :  { %v1583_v60 = vpop.f32.mrf.mxu2 }
 0x6e6   :  { %v1603_v43 = vmul.f32 %v1583_v60, %v7375_v33 }
 0x6e8   :  { %v1605_v39 = vadd.f32 %v1603_v43, %v7383_v57 }
 0x6ea   :  { %5843 = vtanh.f32 %v1605_v39 }
 0x6eb   :  { %v1598_v10 = vpop.f32.mrf.mxu3 }
 0x6ec   :  { %v1607_v54 = vmul.f32 %v1598_v10, %v7375_v33 }
 0x6ed   :  { %v1585_v34 = vpop.f32.mrf.mxu2 }
 0x6ee   :  { %v1604_v40 = vmul.f32 %v1585_v34, %v7381_v55 }
 0x6f0   :  { %v1606_v7 = vadd.f32 %v1604_v40, %v7390_v24  ;;  %v5844_v18 = vpop.eup %5843 }
 0x6f1   :  { %v1611_v27 = vmul.f32 %v5844_v18, %v5844_v18 }
 0x6f2   :  { %5845 = vtanh.f32 %v1606_v7 }
 0x6f3   :  { %v1600_v38 = vpop.f32.mrf.mxu3  ;;  %v1613_v56 = vsub.f32 1.0, %v1611_v27 }
 0x6f4   :  { %v1608_v60 = vmul.f32 %v1600_v38, %v7381_v55  ;;  %v2038_v38 = vmul.f32 2.0, %v7452_v63  ;;  %v2039_v63 = vmul.f32 2.0, %v7459_v48 }
 0x6f5   :  { %v1615_v43 = vmul.f32 %v1613_v56, %v1607_v54 }
 0x6f8   :  { %v5846_v19 = vpop.eup %5845 }
 0x6f9   :  { %v1612_v32 = vmul.f32 %v5846_v19, %v5846_v19  ;;  %v1617_v1 = vpack.c.bf16 %v5846_v19, %v5844_v18 }
 0x6fb   :  { %v1614_v57 = vsub.f32 1.0, %v1612_v32  ;;  %1626 = vmatmul.bf16.vlgmr.msra.gmra.mxu0 %v1617_v1 }
 0x6fc   :  { %2012 = vmatpush.bf16.msra.mxu0 %v7396_v53 }
 0x6fd   :  { %v1616_v39 = vmul.f32 %v1614_v57, %v1608_v60  ;;  %v2040_v57 = vadd.f32 %v2038_v38, %v7244_v41  ;;  %v7601_v41 = vld [vmem:[%s6679_s29] sm:$0x1] }
 0x6ff   :  { %v1632_v34 = vpack.c.bf16 %v1616_v39, %v1615_v43 }
 0x700   :  { %2013 = vmatpush.bf16.msra.mxu0 %v7399_v25 }
 0x701   :  { %1641 = vmatmul.bf16.vlgmr.msra.gmra.mxu1 %v1632_v34 }
 0x702   :  { %2067 = vmatpush.bf16.msra.mxu1 %v7402_v50 }
 0x704   :  { %2014 = vmatpush.bf16.msra.mxu0 %v7405_v21 }
 0x706   :  { %2068 = vmatpush.bf16.msra.mxu1 %v7408_v46 }
 0x708   :  { %2015 = vmatpush.bf16.msra.mxu0 %v7534_v30 }
 0x70a   :  { %2069 = vmatpush.bf16.msra.mxu1 %v7412_v26 }
 0x70c   :  { %2016 = vmatpush.bf16.msra.mxu0 %v7538_v45 }
 0x70e   :  { %2070 = vmatpush.bf16.msra.mxu1 %v7416_v22 }
 0x710   :  { %2017 = vmatpush.bf16.msra.mxu0 %v7542_v35 }
 0x712   :  { %2071 = vmatpush.bf16.msra.mxu1 %v7420_v11 }
 0x714   :  { %2018 = vmatpush.bf16.msra.mxu0 %v7546_v28 }
 0x716   :  { %2072 = vmatpush.bf16.msra.mxu1 %v7424_v51 }
 0x718   :  { %2019 = vmatpush.bf16.msra.mxu0 %v7549_v3 }
 0x71a   :  { %2073 = vmatpush.bf16.msra.mxu1 %v7428_v42 }
 0x71e   :  { %2074 = vmatpush.bf16.msra.mxu1 %v7431_v52 }
 0x778   :  { %v1627_v33 = vpop.f32.mrf.mxu0 }
 0x779   :  { %v1647_v55 = vmul.f32 %v1627_v33, %v7437_v2  ;;  %v2041_v33 = vadd.f32 %v2039_v63, %v7248_v13  ;;  %v1663_v13 = vmul.f32 0.125, %v7601_v41 }
 0x77b   :  { %v1649_v54 = vadd.f32 %v1647_v55, %v7448_v9  ;;  %v1665_v48 = vperm.slane %v1663_v13, 0 }
 0x77d   :  { %v1659_v27 = vmul.f32 0.125, %v1649_v54  ;;  %v2042_v32 = vmul.f32 2.0, %v1649_v54  ;;  %v1667_v55 = vadd.f32 %v1665_v48, %v6952_v31  ;;  %v1668_v54 = vadd.f32 %v1665_v48, %v6968_v37 }
 0x77e   :  { %v1642_v24 = vpop.f32.mrf.mxu1 }
 0x77f   :  { %v1651_v10 = vmul.f32 %v1642_v24, %v7437_v2  ;;  %v1661_v60 = vadd.f32 %v7464_v59, %v1659_v27  ;;  %v7586_v34 = vadd.f32 %v2042_v32, %v2040_v57  ;;  %v5609_v24 = vmul.f32 -1.442695, %v1667_v55  ;;  %v7609_v55 = vld [vmem:[%s9698_s14] ss:$0 sm:$0xff] }
 0x780   :  { %v1629_v40 = vpop.f32.mrf.mxu0 }
 0x781   :  { %v1648_v7 = vmul.f32 %v1629_v40, %v7442_v4  ;;  %v1653_v18 = vmul.f32 %v7472_v36, %v1651_v10  ;;  %5847 = vpow2.f32 %v5609_v24  ;;  %v5610_v10 = vmul.f32 -1.442695, %v1668_v54  ;;  %v7614_v54 = vld [vmem:[%s9697_s3] sm:$0x1] }
 0x783   :  { %v1650_v19 = vadd.f32 %v1648_v7, %v7454_v29  ;;  %1655 = vadd.xlane.f32.xlu2 %v1653_v18  ;;  %5849 = vpow2.f32 %v5610_v10  ;;  %v1711_v10 = vmul.f32 0.125, %v7614_v54 }
 0x785   :  { %v1660_v56 = vmul.f32 0.125, %v1650_v19  ;;  %v2043_v29 = vmul.f32 2.0, %v1650_v19 }
 0x786   :  { %v1644_v1 = vpop.f32.mrf.mxu1 }
 0x787   :  { %v1662_v9 = vadd.f32 %v7468_v62, %v1660_v56  ;;  %v1652_v2 = vmul.f32 %v1644_v1, %v7442_v4  ;;  %v7592_v4 = vadd.f32 %v2043_v29, %v2041_v33  ;;  %v5848_v40 = vpop.eup %5847 }
 0x788   :  { %v1675_v7 = vadd.f32 1.0, %v5848_v40 }
 0x789   :  { %v1879_v43 = vpack.c.bf16 %v1662_v9, %v1661_v60  ;;  %v1654_v39 = vmul.f32 %v7478_v0, %v1652_v2  ;;  %v5850_v18 = vpop.eup %5849 }
 0x78a   :  { %5851 = vrcp.f32 %v1675_v7  ;;  %v1676_v27 = vadd.f32 1.0, %v5850_v18  ;;  %v1688_v57 = vand.u32 2147483648, %v1675_v7  ;;  %vm1682_vm3 = vweird.f32 %v1675_v7 }
 0x78b   :  { %1888 = vmatmul.bf16.vlgmr.msrb.gmra.mxu2 %v1879_v43  ;;  %1657 = vadd.xlane.f32.xlu2 %v1654_v39  ;;  %v1686_v43 = vand.u32 2147483647, %v1675_v7 }
 0x78c   :  { %2094 = vmatpush.bf16.msrb.mxu2 %v7292_v8  ;;  %5853 = vrcp.f32 %v1676_v27  ;;  %v1689_v29 = vor.u32 1.1754944e-38, %v1688_v57  ;;  %v1703_v48 = vand.u32 2147483648, %v1676_v27  ;;  %vm1697_vm7 = vweird.f32 %v1676_v27 }
 0x78d   :  { %vm1687_vm5 = vcmp.eq.f32.partialorder %v1686_v43, 8.507059e+37  ;;  %v1701_v40 = vand.u32 2147483647, %v1676_v27 }
 0x78e   :  { %v1704_v18 = vor.u32 1.1754944e-38, %v1703_v48 }
 0x78f   :  { %vm1702_vm9 = vcmp.eq.f32.partialorder %v1701_v40, 8.507059e+37 }
 0x790   :  { %2095 = vmatpush.bf16.msrb.mxu2 %v7297_v49  ;;  %v5852_v19 = vpop.eup %5851 }
 0x791   :  { %v1678_v38 = vmul.f32 %v5852_v19, %v1675_v7  ;;  %vm1683_vm2 = vweird.f32 %v5852_v19 }
 0x792   :  { %v5854_v32 = vpop.eup %5853  ;;  %vm1684_vm4 = vmor %vm1682_vm3, %vm1683_vm2 }
 0x793   :  { %v1679_v56 = vsub.f32 1.0, %v1678_v38  ;;  %v1693_v60 = vmul.f32 %v5854_v32, %v1676_v27  ;;  %vm1698_vm6 = vweird.f32 %v5854_v32  ;;  %v9752_v27 = vld [vmem:[#allocation34_spill] sm:$0xff] }
 0x794   :  { %2096 = vmatpush.bf16.msrb.mxu2 %v7301_v16  ;;  %vm1699_vm8 = vmor %vm1697_vm7, %vm1698_vm6 }
 0x795   :  { %v1680_v1 = vmul.f32 %v5852_v19, %v1679_v56  ;;  %v1694_v2 = vsub.f32 1.0, %v1693_v60  ;;  %v1713_v56 = vperm.slane %v1711_v10, 0 }
 0x797   :  { %v1681_v9 = vadd.f32 %v5852_v19, %v1680_v1  ;;  %v1695_v63 = vmul.f32 %v5854_v32, %v1694_v2 }
 0x798   :  { %2097 = vmatpush.bf16.msrb.mxu2 %v7305_v6 }
 0x799   :  { %v1685_v39 = vsel %vm1684_vm4, %v5852_v19, %v1681_v9  ;;  %v1696_v13 = vadd.f32 %v5854_v32, %v1695_v63  ;;  %v9751_v19 = vld [vmem:[#allocation33_spill] sm:$0xff] }
 0x79a   :  { %v7606_v33 = vsel %vm1687_vm5, %v1689_v29, %v1685_v39 }
 0x79b   :  { %v1707_v24 = vmul.f32 %v7609_v55, %v7606_v33  ;;  %v1700_v7 = vsel %vm1699_vm8, %v5854_v32, %v1696_v13 }
 0x79c   :  { %2098 = vmatpush.bf16.msrb.mxu2 %v7309_v12  ;;  %v7618_v1 = vsel %vm1702_vm9, %v1704_v18, %v1700_v7 }
 0x79d   :  { %v1709_v38 = vadd.f32 %v1707_v24, %v9751_v19  ;;  %v1708_v57 = vmul.f32 %v7609_v55, %v7618_v1 }
 0x79f   :  { %v7620_v9 = vadd.f32 %v1713_v56, %v1709_v38  ;;  %v1710_v39 = vadd.f32 %v1708_v57, %v9752_v27  ;;  %v9753_v38 = vld [vmem:[#allocation37_spill] sm:$0xff]  ;;  %v9769_v27 = vld [vmem:[#allocation36_spill] sm:$0xff] }
 0x7a0   :  { %2099 = vmatpush.bf16.msrb.mxu2 %v7313_v14 }
 0x7a1   :  { %v7627_v63 = vadd.f32 %v1713_v56, %v1710_v39 }
 0x7a4   :  { %2100 = vmatpush.bf16.msrb.mxu2 %v7317_v17 }
 0x7a8   :  { %2101 = vmatpush.bf16.msrb.mxu2 %v7321_v20 }
 0x80e   :  { %v1889_v60 = vpop.f32.mrf.mxu2 }
 0x80f   :  { %v1894_v2 = vmul.f32 %v1889_v60, %v7606_v33  ;;  %v7633_v60 = vmul.f32 %v7606_v33, %v9753_v38  ;;  %v9762_v38 = vld [vmem:[#allocation44_spill] sm:$0xff] }
 0x811   :  { %v1896_v43 = vadd.f32 %v1894_v2, %v7620_v9  ;;  %v9754_v2 = vld [vmem:[#allocation38_spill] sm:$0xff] }
 0x812   :  { %v7637_v57 = vmul.f32 %v7618_v1, %v9754_v2 }
 0x813   :  { %5855 = vtanh.f32 %v1896_v43 }
 0x816   :  { %v1891_v32 = vpop.f32.mrf.mxu2 }
 0x817   :  { %v1895_v29 = vmul.f32 %v1891_v32, %v7618_v1 }
 0x819   :  { %v1897_v13 = vadd.f32 %v1895_v29, %v7627_v63  ;;  %v5856_v48 = vpop.eup %5855 }
 0x81a   :  { %v1902_v24 = vmul.f32 %v5856_v48, %v5856_v48 }
 0x81b   :  { %5857 = vtanh.f32 %v1897_v13  ;;  %v9758_v13 = vld [vmem:[#allocation42_spill] sm:$0xff] }
 0x81c   :  { %v1904_v40 = vsub.f32 1.0, %v1902_v24 }
 0x81e   :  { %v1906_v43 = vmul.f32 %v1904_v40, %v7633_v60 }
 0x821   :  { %v5858_v10 = vpop.eup %5857 }
 0x822   :  { %v1903_v7 = vmul.f32 %v5858_v10, %v5858_v10  ;;  %v1908_v18 = vpack.c.bf16 %v5858_v10, %v5856_v48 }
 0x824   :  { %1917 = vmatmul.bf16.vlgmr.msrb.gmra.mxu3 %v1908_v18  ;;  %v1905_v56 = vsub.f32 1.0, %v1903_v7 }
 0x825   :  { %2109 = vmatpush.bf16.msrb.mxu3 %v7292_v8  ;;  %v9755_v8 = vld [vmem:[#allocation39_spill] sm:$0xff] }
 0x826   :  { %v1907_v39 = vmul.f32 %v1905_v56, %v7637_v57 }
 0x828   :  { %v1923_v32 = vpack.c.bf16 %v1907_v39, %v1906_v43 }
 0x829   :  { %2110 = vmatpush.bf16.msrb.mxu3 %v7297_v49  ;;  %v7658_v49 = vld [vmem:[%s9704_s19] sm:$0x1] }
 0x82a   :  { %1932 = vmatmul.bf16.vlgmr.msrb.gmra.mxu0 %v1923_v32  ;;  %9756 = vst [vmem:[#allocation40_spill] sm:$0xff] %v7658_v49 }
 0x82b   :  { %2138 = vmatpush.bf16.msrb.mxu0 %v7350_v23 }
 0x82d   :  { %2111 = vmatpush.bf16.msrb.mxu3 %v7301_v16  ;;  %v1717_v16 = vmul.f32 0.125, %v7658_v49 }
 0x82f   :  { %2139 = vmatpush.bf16.msrb.mxu0 %v7353_v61 }
 0x831   :  { %2112 = vmatpush.bf16.msrb.mxu3 %v7305_v6  ;;  %v1719_v6 = vperm.slane %v1717_v16, 0 }
 0x833   :  { %2140 = vmatpush.bf16.msrb.mxu0 %v7357_v5  ;;  %v1722_v48 = vadd.f32 %v1719_v6, %v9758_v13 }
 0x835   :  { %2113 = vmatpush.bf16.msrb.mxu3 %v7309_v12  ;;  %v9757_v12 = vld [vmem:[#allocation41_spill] sm:$0xff] }
 0x836   :  { %v1721_v29 = vadd.f32 %v1719_v6, %v9757_v12  ;;  %v7666_v12 = vld [vmem:[%s9712_s12] ss:$0 sm:$0xff] }
 0x837   :  { %2141 = vmatpush.bf16.msrb.mxu0 %v7502_v58  ;;  %9759 = vst [vmem:[#allocation46_spill] sm:$0xff] %v7666_v12 }
 0x839   :  { %2114 = vmatpush.bf16.msrb.mxu3 %v7313_v14  ;;  %v5611_v14 = vmul.f32 -1.442695, %v1721_v29 }
 0x83b   :  { %2142 = vmatpush.bf16.msrb.mxu0 %v7506_v47  ;;  %5859 = vpow2.f32 %v5611_v14 }
 0x83d   :  { %2115 = vmatpush.bf16.msrb.mxu3 %v7317_v17  ;;  %v5612_v17 = vmul.f32 -1.442695, %v1722_v48 }
 0x83f   :  { %2143 = vmatpush.bf16.msrb.mxu0 %v7510_v15  ;;  %5861 = vpow2.f32 %v5612_v17 }
 0x841   :  { %2116 = vmatpush.bf16.msrb.mxu3 %v7321_v20  ;;  %v5860_v24 = vpop.eup %5859 }
 0x842   :  { %v1729_v10 = vadd.f32 1.0, %v5860_v24 }
 0x843   :  { %2144 = vmatpush.bf16.msrb.mxu0 %v7514_v44 }
 0x844   :  { %5863 = vrcp.f32 %v1729_v10  ;;  %vm1736_vm10 = vweird.f32 %v1729_v10  ;;  %v1742_v16 = vand.u32 2147483648, %v1729_v10  ;;  %v1740_v6 = vand.u32 2147483647, %v1729_v10 }
 0x845   :  { %v5862_v20 = vpop.eup %5861 }
 0x846   :  { %v1730_v40 = vadd.f32 1.0, %v5862_v20  ;;  %v1743_v48 = vor.u32 1.1754944e-38, %v1742_v16  ;;  %vm1741_vm13 = vcmp.eq.f32.partialorder %v1740_v6, 8.507059e+37 }
 0x847   :  { %2145 = vmatpush.bf16.msrb.mxu0 %v9755_v8 }
 0x848   :  { %5865 = vrcp.f32 %v1730_v40  ;;  %vm1751_vm14 = vweird.f32 %v1730_v40  ;;  %v1755_v13 = vand.u32 2147483647, %v1730_v40 }
 0x84a   :  { %v5864_v7 = vpop.eup %5863  ;;  %vm1756_vm1 = vcmp.eq.f32.partialorder %v1755_v13, 8.507059e+37 }
 0x84b   :  { %v1732_v18 = vmul.f32 %v5864_v7, %v1729_v10  ;;  %vm1737_vm11 = vweird.f32 %v5864_v7 }
 0x84c   :  { %vm1738_vm12 = vmor %vm1736_vm10, %vm1737_vm11 }
 0x84d   :  { %v1733_v56 = vsub.f32 1.0, %v1732_v18  ;;  %v1757_v18 = vand.u32 2147483648, %v1730_v40 }
 0x84e   :  { %v5866_v43 = vpop.eup %5865 }
 0x84f   :  { %v1734_v39 = vmul.f32 %v5864_v7, %v1733_v56  ;;  %v1747_v32 = vmul.f32 %v5866_v43, %v1730_v40  ;;  %vm1752_vm15 = vweird.f32 %v5866_v43 }
 0x850   :  { %vm1753_vm0 = vmor %vm1751_vm14, %vm1752_vm15 }
 0x851   :  { %v1735_v29 = vadd.f32 %v5864_v7, %v1734_v39  ;;  %v1748_v14 = vsub.f32 1.0, %v1747_v32  ;;  %v7671_v39 = vld [vmem:[%s9715_s20] sm:$0x1] }
 0x852   :  { %9760 = vst [vmem:[#allocation47_spill] sm:$0xff] %v7671_v39  ;;  %v1765_v32 = vmul.f32 0.125, %v7671_v39 }
 0x853   :  { %v1739_v17 = vsel %vm1738_vm12, %v5864_v7, %v1735_v29  ;;  %v1749_v24 = vmul.f32 %v5866_v43, %v1748_v14  ;;  %v1758_v7 = vor.u32 1.1754944e-38, %v1757_v18  ;;  %v9761_v29 = vld [vmem:[#allocation43_spill] sm:$0xff] }
 0x854   :  { %v7663_v20 = vsel %vm1741_vm13, %v1743_v48, %v1739_v17  ;;  %v1767_v14 = vperm.slane %v1765_v32, 0 }
 0x855   :  { %v1750_v56 = vadd.f32 %v5866_v43, %v1749_v24  ;;  %v1761_v10 = vmul.f32 %v7666_v12, %v7663_v20 }
 0x857   :  { %v1754_v16 = vsel %vm1753_vm0, %v5866_v43, %v1750_v56  ;;  %v1763_v6 = vadd.f32 %v1761_v10, %v9761_v29 }
 0x858   :  { %v7675_v48 = vsel %vm1756_vm1, %v1758_v7, %v1754_v16 }
 0x859   :  { %v7677_v40 = vadd.f32 %v1767_v14, %v1763_v6  ;;  %v1762_v49 = vmul.f32 %v7666_v12, %v7675_v48 }
 0x85b   :  { %v1764_v39 = vadd.f32 %v1762_v49, %v9762_v38 }
 0x85d   :  { %v7684_v18 = vadd.f32 %v1767_v14, %v1764_v39 }
 0x8a7   :  { %v1918_v17 = vpop.f32.mrf.mxu3  ;;  %v1933_v13 = vpop.f32.mrf.mxu0 }
 0x8a8   :  { %v1938_v24 = vmul.f32 %v1918_v17, %v7663_v20 }
 0x8aa   :  { %v1940_v2 = vadd.f32 %v1938_v24, %v7677_v40  ;;  %v1942_v24 = vmul.f32 %v1933_v13, %v7663_v20 }
 0x8ac   :  { %5867 = vtanh.f32 %v1940_v2 }
 0x8af   :  { %v1920_v43 = vpop.f32.mrf.mxu3  ;;  %v1935_v6 = vpop.f32.mrf.mxu0 }
 0x8b0   :  { %v1939_v56 = vmul.f32 %v1920_v43, %v7675_v48  ;;  %v1943_v2 = vmul.f32 %v1935_v6, %v7675_v48 }
 0x8b2   :  { %v1941_v10 = vadd.f32 %v1939_v56, %v7684_v18  ;;  %v5868_v32 = vpop.eup %5867  ;;  %v9765_v56 = vld [vmem:[#allocation51_spill] sm:$0xff] }
 0x8b3   :  { %v1946_v7 = vmul.f32 %v5868_v32, %v5868_v32 }
 0x8b4   :  { %5869 = vtanh.f32 %v1941_v10 }
 0x8b5   :  { %v1948_v17 = vsub.f32 1.0, %v1946_v7 }
 0x8b7   :  { %v1950_v39 = vmul.f32 %v1948_v17, %v1942_v24 }
 0x8ba   :  { %v5870_v16 = vpop.eup %5869 }
 0x8bb   :  { %v1947_v29 = vmul.f32 %v5870_v16, %v5870_v16  ;;  %v1952_v12 = vpack.c.bf16 %v5870_v16, %v5868_v32 }
 0x8bd   :  { %v1949_v49 = vsub.f32 1.0, %v1947_v29  ;;  %1961 = vmatmul.bf16.vlgmr.msrb.gmra.mxu1 %v1952_v12  ;;  %v9764_v12 = vld [vmem:[#allocation50_spill] sm:$0xff] }
 0x8be   :  { %2153 = vmatpush.bf16.msrb.mxu1 %v7350_v23  ;;  %v7707_v23 = vld [vmem:[%s9720_s27] sm:$0x1] }
 0x8bf   :  { %v1951_v14 = vmul.f32 %v1949_v49, %v1943_v2  ;;  %9763 = vst [vmem:[#allocation49_spill] sm:$0xff] %v7707_v23 }
 0x8c1   :  { %v1967_v43 = vpack.c.bf16 %v1951_v14, %v1950_v39 }
 0x8c2   :  { %2154 = vmatpush.bf16.msrb.mxu1 %v7353_v61  ;;  %v1771_v61 = vmul.f32 0.125, %v7707_v23 }
 0x8c3   :  { %1976 = vmatmul.bf16.vlgmr.msra.gmra.mxu2 %v1967_v43 }
 0x8c4   :  { %2182 = vmatpush.bf16.msra.mxu2 %v7396_v53 }
 0x8c6   :  { %2155 = vmatpush.bf16.msrb.mxu1 %v7357_v5  ;;  %v1773_v5 = vperm.slane %v1771_v61, 0 }
 0x8c8   :  { %2183 = vmatpush.bf16.msra.mxu2 %v7399_v25  ;;  %v1775_v29 = vadd.f32 %v1773_v5, %v9764_v12  ;;  %v1776_v10 = vadd.f32 %v1773_v5, %v9765_v56  ;;  %v7715_v12 = vld [vmem:[%s9725_s23] ss:$0 sm:$0xff] }
 0x8c9   :  { %9766 = vst [vmem:[#allocation52_spill] sm:$0xff] %v7715_v12 }
 0x8ca   :  { %2156 = vmatpush.bf16.msrb.mxu1 %v7502_v58  ;;  %v5613_v13 = vmul.f32 -1.442695, %v1775_v29  ;;  %v5614_v32 = vmul.f32 -1.442695, %v1776_v10 }
 0x8cc   :  { %2184 = vmatpush.bf16.msra.mxu2 %v7405_v21  ;;  %5871 = vpow2.f32 %v5613_v13 }
 0x8cd   :  { %5873 = vpow2.f32 %v5614_v32 }
 0x8ce   :  { %2157 = vmatpush.bf16.msrb.mxu1 %v7506_v47 }
 0x8d0   :  { %2185 = vmatpush.bf16.msra.mxu2 %v7534_v30 }
 0x8d2   :  { %2158 = vmatpush.bf16.msrb.mxu1 %v7510_v15  ;;  %v5872_v7 = vpop.eup %5871 }
 0x8d3   :  { %v1783_v16 = vadd.f32 1.0, %v5872_v7  ;;  %v5874_v6 = vpop.eup %5873 }
 0x8d4   :  { %2186 = vmatpush.bf16.msra.mxu2 %v7538_v45  ;;  %v1784_v17 = vadd.f32 1.0, %v5874_v6 }
 0x8d5   :  { %5875 = vrcp.f32 %v1783_v16  ;;  %vm1790_vm2 = vweird.f32 %v1783_v16  ;;  %v1796_v61 = vand.u32 2147483648, %v1783_v16  ;;  %v1794_v5 = vand.u32 2147483647, %v1783_v16 }
 0x8d6   :  { %2159 = vmatpush.bf16.msrb.mxu1 %v7514_v44  ;;  %5877 = vrcp.f32 %v1784_v17  ;;  %vm1805_vm6 = vweird.f32 %v1784_v17  ;;  %v1809_v56 = vand.u32 2147483647, %v1784_v17 }
 0x8d7   :  { %v1797_v10 = vor.u32 1.1754944e-38, %v1796_v61  ;;  %vm1795_vm5 = vcmp.eq.f32.partialorder %v1794_v5, 8.507059e+37 }
 0x8d8   :  { %2187 = vmatpush.bf16.msra.mxu2 %v7542_v35  ;;  %vm1810_vm9 = vcmp.eq.f32.partialorder %v1809_v56, 8.507059e+37 }
 0x8da   :  { %2160 = vmatpush.bf16.msrb.mxu1 %v9755_v8 }
 0x8db   :  { %v5876_v24 = vpop.eup %5875 }
 0x8dc   :  { %2188 = vmatpush.bf16.msra.mxu2 %v7546_v28  ;;  %v1786_v2 = vmul.f32 %v5876_v24, %v1783_v16  ;;  %v5878_v39 = vpop.eup %5877  ;;  %vm1791_vm3 = vweird.f32 %v5876_v24 }
 0x8dd   :  { %v1801_v43 = vmul.f32 %v5878_v39, %v1784_v17  ;;  %vm1792_vm4 = vmor %vm1790_vm2, %vm1791_vm3  ;;  %vm1806_vm7 = vweird.f32 %v5878_v39 }
 0x8de   :  { %v1787_v49 = vsub.f32 1.0, %v1786_v2  ;;  %v1811_v2 = vand.u32 2147483648, %v1784_v17  ;;  %vm1807_vm8 = vmor %vm1805_vm6, %vm1806_vm7 }
 0x8df   :  { %v1802_v13 = vsub.f32 1.0, %v1801_v43 }
 0x8e0   :  { %2189 = vmatpush.bf16.msra.mxu2 %v7549_v3  ;;  %v1788_v14 = vmul.f32 %v5876_v24, %v1787_v49 }
 0x8e1   :  { %v1803_v7 = vmul.f32 %v5878_v39, %v1802_v13 }
 0x8e2   :  { %v1789_v29 = vadd.f32 %v5876_v24, %v1788_v14  ;;  %v7720_v14 = vld [vmem:[%s9728_s1] sm:$0x1] }
 0x8e3   :  { %v1804_v49 = vadd.f32 %v5878_v39, %v1803_v7  ;;  %9767 = vst [vmem:[#allocation39_spill] sm:$0xff] %v7720_v14  ;;  %v1819_v43 = vmul.f32 0.125, %v7720_v14 }
 0x8e4   :  { %v1793_v32 = vsel %vm1792_vm4, %v5876_v24, %v1789_v29  ;;  %v1812_v24 = vor.u32 1.1754944e-38, %v1811_v2  ;;  %v9768_v29 = vld [vmem:[#allocation35_spill] sm:$0xff] }
 0x8e5   :  { %v7712_v6 = vsel %vm1795_vm5, %v1797_v10, %v1793_v32  ;;  %v1808_v61 = vsel %vm1807_vm8, %v5878_v39, %v1804_v49  ;;  %v1821_v13 = vperm.slane %v1819_v43, 0 }
 0x8e6   :  { %v1815_v16 = vmul.f32 %v7715_v12, %v7712_v6  ;;  %v7724_v10 = vsel %vm1810_vm9, %v1812_v24, %v1808_v61 }
 0x8e7   :  { %v1816_v23 = vmul.f32 %v7715_v12, %v7724_v10 }
 0x8e8   :  { %v1817_v5 = vadd.f32 %v1815_v16, %v9768_v29 }
 0x8e9   :  { %v1818_v14 = vadd.f32 %v1816_v23, %v9769_v27 }
 0x8ea   :  { %v7726_v17 = vadd.f32 %v1821_v13, %v1817_v5 }
 0x8eb   :  { %v7733_v56 = vadd.f32 %v1821_v13, %v1818_v14 }
 0x93a   :  { %v1962_v32 = vpop.f32.mrf.mxu1 }
 0x93b   :  { %v1982_v7 = vmul.f32 %v1962_v32, %v7712_v6 }
 0x93d   :  { %v1984_v38 = vadd.f32 %v1982_v7, %v7726_v17 }
 0x93f   :  { %5879 = vtanh.f32 %v1984_v38 }
 0x942   :  { %v1964_v39 = vpop.f32.mrf.mxu1 }
 0x943   :  { %v1983_v2 = vmul.f32 %v1964_v39, %v7724_v10 }
 0x945   :  { %v1985_v49 = vadd.f32 %v1983_v2, %v7733_v56  ;;  %v5880_v43 = vpop.eup %5879 }
 0x946   :  { %v1977_v16 = vpop.f32.mrf.mxu2  ;;  %v1990_v24 = vmul.f32 %v5880_v43, %v5880_v43 }
 0x947   :  { %5881 = vtanh.f32 %v1985_v49  ;;  %v1986_v5 = vmul.f32 %v1977_v16, %v7712_v6 }
 0x948   :  { %v1992_v32 = vsub.f32 1.0, %v1990_v24 }
 0x94a   :  { %v1994_v14 = vmul.f32 %v1992_v32, %v1986_v5 }
 0x94d   :  { %v5882_v61 = vpop.eup %5881 }
 0x94e   :  { %v1979_v29 = vpop.f32.mrf.mxu2  ;;  %v1991_v7 = vmul.f32 %v5882_v61, %v5882_v61  ;;  %v1996_v12 = vpack.c.bf16 %v5882_v61, %v5880_v43 }
 0x94f   :  { %v1987_v38 = vmul.f32 %v1979_v29, %v7724_v10 }
 0x950   :  { %v1993_v23 = vsub.f32 1.0, %v1991_v7  ;;  %2005 = vmatmul.bf16.vlgmr.msra.gmra.mxu3 %v1996_v12 }
 0x951   :  { %2197 = vmatpush.bf16.msra.mxu3 %v7396_v53  ;;  %v7756_v53 = vld [vmem:[%s9730_s2] sm:$0x1] }
 0x952   :  { %v1995_v13 = vmul.f32 %v1993_v23, %v1987_v38 }
 0x954   :  { %v2011_v39 = vpack.c.bf16 %v1995_v13, %v1994_v14 }
 0x955   :  { %2198 = vmatpush.bf16.msra.mxu3 %v7399_v25  ;;  %v1825_v25 = vmul.f32 0.125, %v7756_v53 }
 0x956   :  { %2020 = vmatmul.bf16.vlgmr.msra.gmra.mxu0 %v2011_v39 }
 0x957   :  { %2444 = vmatpush.bf16.msra.mxu0 %v7402_v50  ;;  %v1827_v50 = vperm.slane %v1825_v25, 0 }
 0x959   :  { %2199 = vmatpush.bf16.msra.mxu3 %v7405_v21  ;;  %v9770_v21 = vld [vmem:[#allocation53_spill] sm:$0xff] }
 0x95b   :  { %2445 = vmatpush.bf16.msra.mxu0 %v7408_v46  ;;  %v1829_v46 = vadd.f32 %v1827_v50, %v9770_v21 }
 0x95d   :  { %2200 = vmatpush.bf16.msra.mxu3 %v7534_v30 }
 0x95f   :  { %2446 = vmatpush.bf16.msra.mxu0 %v7412_v26  ;;  %v5615_v26 = vmul.f32 -1.442695, %v1829_v46 }
 0x961   :  { %2201 = vmatpush.bf16.msra.mxu3 %v7538_v45  ;;  %5883 = vpow2.f32 %v5615_v26 }
 0x963   :  { %2447 = vmatpush.bf16.msra.mxu0 %v7416_v22  ;;  %v9771_v22 = vld [vmem:[#allocation54_spill] sm:$0xff] }
 0x965   :  { %2202 = vmatpush.bf16.msra.mxu3 %v7542_v35 }
 0x967   :  { %2448 = vmatpush.bf16.msra.mxu0 %v7420_v11  ;;  %v1830_v11 = vadd.f32 %v1827_v50, %v9771_v22  ;;  %v5884_v29 = vpop.eup %5883 }
 0x969   :  { %2203 = vmatpush.bf16.msra.mxu3 %v7546_v28  ;;  %v5616_v12 = vmul.f32 -1.442695, %v1830_v11  ;;  %v7764_v11 = vld [vmem:[%s9734_s7] ss:$0 sm:$0xff] }
 0x96b   :  { %2449 = vmatpush.bf16.msra.mxu0 %v7424_v51  ;;  %5885 = vpow2.f32 %v5616_v12  ;;  %v1837_v51 = vadd.f32 1.0, %v5884_v29  ;;  %v7769_v29 = vld [vmem:[%s6799_s6] sm:$0x1] }
 0x96d   :  { %2204 = vmatpush.bf16.msra.mxu3 %v7549_v3  ;;  %5887 = vrcp.f32 %v1837_v51  ;;  %vm1844_vm10 = vweird.f32 %v1837_v51  ;;  %v1850_v32 = vand.u32 2147483648, %v1837_v51  ;;  %v1848_v38 = vand.u32 2147483647, %v1837_v51 }
 0x96f   :  { %2450 = vmatpush.bf16.msra.mxu0 %v7428_v42  ;;  %v1851_v14 = vor.u32 1.1754944e-38, %v1850_v32  ;;  %vm1849_vm13 = vcmp.eq.f32.partialorder %v1848_v38, 8.507059e+37 }
 0x971   :  { %v5886_v2 = vpop.eup %5885 }
 0x972   :  { %v1838_v42 = vadd.f32 1.0, %v5886_v2 }
 0x973   :  { %2451 = vmatpush.bf16.msra.mxu0 %v7431_v52  ;;  %v5888_v49 = vpop.eup %5887 }
 0x974   :  { %5889 = vrcp.f32 %v1838_v42  ;;  %v1840_v52 = vmul.f32 %v5888_v49, %v1837_v51  ;;  %vm1845_vm11 = vweird.f32 %v5888_v49  ;;  %vm1859_vm14 = vweird.f32 %v1838_v42 }
 0x975   :  { %vm1846_vm12 = vmor %vm1844_vm10, %vm1845_vm11  ;;  %v1865_v39 = vand.u32 2147483648, %v1838_v42  ;;  %v1863_v50 = vand.u32 2147483647, %v1838_v42  ;;  %v1873_v51 = vmul.f32 0.125, %v7769_v29 }
 0x976   :  { %v1841_v43 = vsub.f32 1.0, %v1840_v52  ;;  %v9772_v52 = vld [vmem:[#allocation45_spill] sm:$0xff] }
 0x977   :  { %v1866_v26 = vor.u32 1.1754944e-38, %v1865_v39  ;;  %vm1864_vm1 = vcmp.eq.f32.partialorder %v1863_v50, 8.507059e+37 }
 0x978   :  { %v1842_v61 = vmul.f32 %v5888_v49, %v1841_v43 }
 0x97a   :  { %v5890_v16 = vpop.eup %5889  ;;  %v1843_v7 = vadd.f32 %v5888_v49, %v1842_v61 }
 0x97b   :  { %v1855_v24 = vmul.f32 %v5890_v16, %v1838_v42  ;;  %vm1860_vm15 = vweird.f32 %v5890_v16  ;;  %v1875_v42 = vperm.slane %v1873_v51, 0 }
 0x97c   :  { %v1847_v13 = vsel %vm1846_vm12, %v5888_v49, %v1843_v7  ;;  %vm1861_vm0 = vmor %vm1859_vm14, %vm1860_vm15 }
 0x97d   :  { %v1856_v5 = vsub.f32 1.0, %v1855_v24  ;;  %v7761_v46 = vsel %vm1849_vm13, %v1851_v14, %v1847_v13  ;;  %v9773_v14 = vld [vmem:[#allocation48_spill] sm:$0xff] }
 0x97e   :  { %v1869_v12 = vmul.f32 %v7764_v11, %v7761_v46 }
 0x97f   :  { %v1857_v23 = vmul.f32 %v5890_v16, %v1856_v5 }
 0x980   :  { %v1871_v43 = vadd.f32 %v1869_v12, %v9772_v52 }
 0x981   :  { %v1858_v25 = vadd.f32 %v5890_v16, %v1857_v23 }
 0x982   :  { %v7779_v38 = vadd.f32 %v1875_v42, %v1871_v43 }
 0x983   :  { %v1862_v2 = vsel %vm1861_vm0, %v5890_v16, %v1858_v25 }
 0x984   :  { %v7772_v49 = vsel %vm1864_vm1, %v1866_v26, %v1862_v2 }
 0x985   :  { %v1870_v7 = vmul.f32 %v7764_v11, %v7772_v49 }
 0x987   :  { %v1872_v13 = vadd.f32 %v1870_v7, %v9773_v14  ;;  %v7815_v7 = vld [vmem:[#allocation5 + $0x10] sm:$0xff] }
 0x989   :  { %v7785_v26 = vadd.f32 %v1875_v42, %v1872_v13 }
 0x9d3   :  { %v2006_v24 = vpop.f32.mrf.mxu3  ;;  %v2021_v61 = vpop.f32.mrf.mxu0 }
 0x9d4   :  { %v2026_v5 = vmul.f32 %v2006_v24, %v7761_v46  ;;  %v2030_v32 = vmul.f32 %v2021_v61, %v7761_v46 }
 0x9d6   :  { %v2032_v23 = vmul.f32 %v7472_v36, %v2030_v32  ;;  %v2028_v16 = vadd.f32 %v2026_v5, %v7779_v38  ;;  %v7800_v32 = vld [vmem:[#allocation5 + $0x38] sm:$0xff] }
 0x9d8   :  { %2034 = vadd.xlane.f32.xlu0 %v2032_v23  ;;  %v2046_v50 = vadd.f32 %v7586_v34, %v2028_v16  ;;  %v7818_v23 = vld [vmem:[#allocation5 + $0x8] sm:$0xff]  ;;  %v7821_v16 = vld [vmem:[#allocation5] sm:$0xff] }
 0x9da   :  { %v2048_v36 = vmul.f32 0.020833334, %v2046_v50 }
 0x9db   :  { %v2008_v39 = vpop.f32.mrf.mxu3  ;;  %v2023_v25 = vpop.f32.mrf.mxu0 }
 0x9dc   :  { %v2027_v12 = vmul.f32 %v2008_v39, %v7772_v49  ;;  %v2031_v51 = vmul.f32 %v2023_v25, %v7772_v49  ;;  %v7793_v5 = vadd.f32 %v7464_v59, %v2048_v36  ;;  %v7809_v59 = vld [vmem:[#allocation5 + $0x20] sm:$0xff] }
 0x9de   :  { %v2029_v2 = vadd.f32 %v2027_v12, %v7785_v26  ;;  %v2033_v43 = vmul.f32 %v7478_v0, %v2031_v51  ;;  %v7803_v0 = vld [vmem:[#allocation5 + $0x30] sm:$0xff] }
 0x9e0   :  { %v2047_v24 = vadd.f32 %v7592_v4, %v2029_v2  ;;  %2036 = vadd.xlane.f32.xlu1 %v2033_v43  ;;  %v7806_v4 = vld [vmem:[#allocation5 + $0x28] sm:$0xff] }
 0x9e2   :  { %v2049_v61 = vmul.f32 0.020833334, %v2047_v24 }
 0x9e4   :  { %v7796_v34 = vadd.f32 %v7468_v62, %v2049_v61  ;;  %v7812_v62 = vld [vmem:[#allocation5 + $0x18] sm:$0xff] }
 0x9e6   :  { %v2066_v42 = vpack.c.bf16 %v7796_v34, %v7793_v5 }
 0x9e8   :  { %2075 = vmatmul.bf16.vlgmr.msra.gmra.mxu1 %v2066_v42 }
 0x9e9   :  { %2473 = vmatpush.bf16.msra.mxu1 %v7800_v32 }
 0x9ed   :  { %2474 = vmatpush.bf16.msra.mxu1 %v7803_v0 }
 0x9f1   :  { %2475 = vmatpush.bf16.msra.mxu1 %v7806_v4 }
 0x9f5   :  { %2476 = vmatpush.bf16.msra.mxu1 %v7809_v59 }
 0x9f9   :  { %2477 = vmatpush.bf16.msra.mxu1 %v7812_v62 }
 0x9fd   :  { %2478 = vmatpush.bf16.msra.mxu1 %v7815_v7 }
 0xa01   :  { %2479 = vmatpush.bf16.msra.mxu1 %v7818_v23 }
 0xa05   :  { %2480 = vmatpush.bf16.msra.mxu1 %v7821_v16 }
 0xa65   :  { %v2076_v13 = vpop.f32.mrf.mxu1 }
 0xa66   :  { %v2081_v39 = vmul.f32 %v2076_v13, %v7606_v33 }
 0xa68   :  { %v2083_v25 = vadd.f32 %v2081_v39, %v7620_v9  ;;  %v7840_v39 = vld [vmem:[#allocation7 + $0x28] sm:$0xff] }
 0xa6a   :  { %5891 = vtanh.f32 %v2083_v25 }
 0xa6d   :  { %v2078_v50 = vpop.f32.mrf.mxu1 }
 0xa6e   :  { %v2082_v12 = vmul.f32 %v2078_v50, %v7618_v1  ;;  %v7832_v1 = vld [vmem:[#allocation7 + $0x38] sm:$0xff] }
 0xa70   :  { %v2084_v51 = vadd.f32 %v2082_v12, %v7627_v63  ;;  %v5892_v2 = vpop.eup %5891  ;;  %v7836_v63 = vld [vmem:[#allocation7 + $0x30] sm:$0xff] }
 0xa71   :  { %v2087_v43 = vmul.f32 %v5892_v2, %v5892_v2 }
 0xa72   :  { %5893 = vtanh.f32 %v2084_v51 }
 0xa73   :  { %v2089_v24 = vsub.f32 1.0, %v2087_v43 }
 0xa75   :  { %v2091_v33 = vmul.f32 %v2089_v24, %v7633_v60 }
 0xa78   :  { %v5894_v36 = vpop.eup %5893 }
 0xa79   :  { %v2088_v61 = vmul.f32 %v5894_v36, %v5894_v36  ;;  %v2093_v42 = vpack.c.bf16 %v5894_v36, %v5892_v2 }
 0xa7b   :  { %2102 = vmatmul.bf16.vlgmr.msrb.gmra.mxu2 %v2093_v42  ;;  %v2090_v14 = vsub.f32 1.0, %v2088_v61 }
 0xa7c   :  { %2488 = vmatpush.bf16.msrb.mxu2 %v7800_v32 }
 0xa7d   :  { %v2092_v9 = vmul.f32 %v2090_v14, %v7637_v57 }
 0xa7f   :  { %v2108_v13 = vpack.c.bf16 %v2092_v9, %v2091_v33  ;;  %v7864_v9 = vld [vmem:[#allocation8 + $0x30] sm:$0xff] }
 0xa80   :  { %2489 = vmatpush.bf16.msrb.mxu2 %v7803_v0 }
 0xa81   :  { %2117 = vmatmul.bf16.vlgmr.msrb.gmra.mxu3 %v2108_v13  ;;  %v7873_v13 = vld [vmem:[#allocation7 + $0x18] sm:$0xff] }
 0xa82   :  { %2517 = vmatpush.bf16.msrb.mxu3 %v7832_v1 }
 0xa84   :  { %2490 = vmatpush.bf16.msrb.mxu2 %v7806_v4 }
 0xa86   :  { %2518 = vmatpush.bf16.msrb.mxu3 %v7836_v63 }
 0xa88   :  { %2491 = vmatpush.bf16.msrb.mxu2 %v7809_v59 }
 0xa8a   :  { %2519 = vmatpush.bf16.msrb.mxu3 %v7840_v39 }
 0xa8c   :  { %2492 = vmatpush.bf16.msrb.mxu2 %v7812_v62 }
 0xa8e   :  { %2520 = vmatpush.bf16.msrb.mxu3 %v7502_v58 }
 0xa90   :  { %2493 = vmatpush.bf16.msrb.mxu2 %v7815_v7 }
 0xa92   :  { %2521 = vmatpush.bf16.msrb.mxu3 %v7506_v47 }
 0xa94   :  { %2494 = vmatpush.bf16.msrb.mxu2 %v7818_v23 }
 0xa96   :  { %2522 = vmatpush.bf16.msrb.mxu3 %v7510_v15 }
 0xa98   :  { %2495 = vmatpush.bf16.msrb.mxu2 %v7821_v16 }
 0xa9a   :  { %2523 = vmatpush.bf16.msrb.mxu3 %v7514_v44 }
 0xa9e   :  { %2524 = vmatpush.bf16.msrb.mxu3 %v9755_v8 }
 0xafe   :  { %v2103_v60 = vpop.f32.mrf.mxu2 }
 0xaff   :  { %v2123_v57 = vmul.f32 %v2103_v60, %v7663_v20  ;;  %v7877_v60 = vld [vmem:[#allocation7 + $0x10] sm:$0xff] }
 0xb01   :  { %v2125_v14 = vadd.f32 %v2123_v57, %v7677_v40  ;;  %v7881_v57 = vld [vmem:[#allocation7 + $0x8] sm:$0xff] }
 0xb03   :  { %5895 = vtanh.f32 %v2125_v14  ;;  %v7885_v14 = vld [vmem:[#allocation7] sm:$0xff] }
 0xb04   :  { %v2118_v25 = vpop.f32.mrf.mxu3 }
 0xb05   :  { %v2127_v36 = vmul.f32 %v2118_v25, %v7663_v20  ;;  %v7867_v20 = vld [vmem:[#allocation7 + $0x20] sm:$0xff] }
 0xb06   :  { %v2105_v58 = vpop.f32.mrf.mxu2 }
 0xb07   :  { %v2124_v47 = vmul.f32 %v2105_v58, %v7675_v48 }
 0xb09   :  { %v2126_v50 = vadd.f32 %v2124_v47, %v7684_v18  ;;  %v5896_v12 = vpop.eup %5895  ;;  %v7860_v18 = vld [vmem:[#allocation8 + $0x38] sm:$0xff] }
 0xb0a   :  { %v2131_v15 = vmul.f32 %v5896_v12, %v5896_v12 }
 0xb0b   :  { %5897 = vtanh.f32 %v2126_v50 }
 0xb0c   :  { %v2120_v2 = vpop.f32.mrf.mxu3  ;;  %v2133_v44 = vsub.f32 1.0, %v2131_v15 }
 0xb0d   :  { %v2128_v24 = vmul.f32 %v2120_v2, %v7675_v48  ;;  %v7870_v48 = vld [vmem:[#allocation8 + $0x28] sm:$0xff] }
 0xb0e   :  { %v2135_v61 = vmul.f32 %v2133_v44, %v2127_v36 }
 0xb11   :  { %v5898_v51 = vpop.eup %5897 }
 0xb12   :  { %v2132_v43 = vmul.f32 %v5898_v51, %v5898_v51  ;;  %v2137_v8 = vpack.c.bf16 %v5898_v51, %v5896_v12 }
 0xb14   :  { %v2134_v40 = vsub.f32 1.0, %v2132_v43  ;;  %2146 = vmatmul.bf16.vlgmr.msrb.gmra.mxu0 %v2137_v8 }
 0xb15   :  { %2532 = vmatpush.bf16.msrb.mxu0 %v7832_v1 }
 0xb16   :  { %v2136_v42 = vmul.f32 %v2134_v40, %v2128_v24 }
 0xb18   :  { %v2152_v33 = vpack.c.bf16 %v2136_v42, %v2135_v61  ;;  %v7902_v61 = vld [vmem:[#allocation2 + $0x30] sm:$0xff]  ;;  %v7911_v42 = vld [vmem:[#allocation8 + $0x18] sm:$0xff] }
 0xb19   :  { %2533 = vmatpush.bf16.msrb.mxu0 %v7836_v63 }
 0xb1a   :  { %2161 = vmatmul.bf16.vlgmr.msrb.gmra.mxu1 %v2152_v33  ;;  %v7914_v33 = vld [vmem:[#allocation2 + $0x20] sm:$0xff] }
 0xb1b   :  { %2561 = vmatpush.bf16.msrb.mxu1 %v7860_v18 }
 0xb1d   :  { %2534 = vmatpush.bf16.msrb.mxu0 %v7840_v39 }
 0xb1f   :  { %2562 = vmatpush.bf16.msrb.mxu1 %v7864_v9 }
 0xb21   :  { %2535 = vmatpush.bf16.msrb.mxu0 %v7867_v20 }
 0xb23   :  { %2563 = vmatpush.bf16.msrb.mxu1 %v7870_v48 }
 0xb25   :  { %2536 = vmatpush.bf16.msrb.mxu0 %v7873_v13 }
 0xb27   :  { %2564 = vmatpush.bf16.msrb.mxu1 %v7534_v30 }
 0xb29   :  { %2537 = vmatpush.bf16.msrb.mxu0 %v7877_v60 }
 0xb2b   :  { %2565 = vmatpush.bf16.msrb.mxu1 %v7538_v45 }
 0xb2d   :  { %2538 = vmatpush.bf16.msrb.mxu0 %v7881_v57 }
 0xb2f   :  { %2566 = vmatpush.bf16.msrb.mxu1 %v7542_v35 }
 0xb31   :  { %2539 = vmatpush.bf16.msrb.mxu0 %v7885_v14 }
 0xb33   :  { %2567 = vmatpush.bf16.msrb.mxu1 %v7546_v28 }
 0xb37   :  { %2568 = vmatpush.bf16.msrb.mxu1 %v7549_v3 }
 0xb91   :  { %v2147_v30 = vpop.f32.mrf.mxu0 }
 0xb92   :  { %v2167_v58 = vmul.f32 %v2147_v30, %v7712_v6  ;;  %v7917_v30 = vld [vmem:[#allocation8 + $0x10] sm:$0xff] }
 0xb94   :  { %v2169_v25 = vadd.f32 %v2167_v58, %v7726_v17  ;;  %v7920_v58 = vld [vmem:[#allocation2 + $0x18] sm:$0xff] }
 0xb96   :  { %5899 = vtanh.f32 %v2169_v25  ;;  %v7923_v25 = vld [vmem:[#allocation8 + $0x8] sm:$0xff] }
 0xb97   :  { %v2162_v47 = vpop.f32.mrf.mxu1 }
 0xb98   :  { %v2171_v43 = vmul.f32 %v2162_v47, %v7712_v6  ;;  %v7905_v6 = vld [vmem:[#allocation8 + $0x20] sm:$0xff] }
 0xb99   :  { %v2149_v45 = vpop.f32.mrf.mxu0  ;;  %v7929_v47 = vld [vmem:[#allocation8] sm:$0xff] }
 0xb9a   :  { %v2168_v50 = vmul.f32 %v2149_v45, %v7724_v10  ;;  %v7926_v45 = vld [vmem:[#allocation2 + $0x10] sm:$0xff] }
 0xb9c   :  { %v2170_v35 = vadd.f32 %v2168_v50, %v7733_v56  ;;  %v5900_v12 = vpop.eup %5899  ;;  %v7898_v56 = vld [vmem:[#allocation2 + $0x38] sm:$0xff]  ;;  %v7932_v50 = vld [vmem:[#allocation2 + $0x8] sm:$0xff] }
 0xb9d   :  { %v2175_v15 = vmul.f32 %v5900_v12, %v5900_v12 }
 0xb9e   :  { %5901 = vtanh.f32 %v2170_v35  ;;  %v7935_v35 = vld [vmem:[#allocation2] sm:$0xff] }
 0xb9f   :  { %v2164_v2 = vpop.f32.mrf.mxu1  ;;  %v2177_v28 = vsub.f32 1.0, %v2175_v15 }
 0xba0   :  { %v2172_v8 = vmul.f32 %v2164_v2, %v7724_v10  ;;  %v7908_v10 = vld [vmem:[#allocation2 + $0x28] sm:$0xff] }
 0xba1   :  { %v2179_v36 = vmul.f32 %v2177_v28, %v2171_v43  ;;  %v7945_v43 = vld [vmem:[%s6654_s9] sm:$0xff] }
 0xba4   :  { %v5902_v51 = vpop.eup %5901 }
 0xba5   :  { %v2176_v44 = vmul.f32 %v5902_v51, %v5902_v51  ;;  %v2181_v3 = vpack.c.bf16 %v5902_v51, %v5900_v12 }
 0xba7   :  { %v2178_v17 = vsub.f32 1.0, %v2176_v44  ;;  %2190 = vmatmul.bf16.vlgmr.msra.gmra.mxu2 %v2181_v3 }
 0xba8   :  { %2576 = vmatpush.bf16.msra.mxu2 %v7860_v18 }
 0xba9   :  { %v2180_v24 = vmul.f32 %v2178_v17, %v2172_v8 }
 0xbab   :  { %v2196_v40 = vpack.c.bf16 %v2180_v24, %v2179_v36 }
 0xbac   :  { %2577 = vmatpush.bf16.msra.mxu2 %v7864_v9 }
 0xbad   :  { %2205 = vmatmul.bf16.vlgmr.msra.gmra.mxu3 %v2196_v40 }
 0xbae   :  { %2607 = vmatpush.bf16.msra.mxu3 %v7898_v56 }
 0xbb0   :  { %2578 = vmatpush.bf16.msra.mxu2 %v7870_v48 }
 0xbb2   :  { %2608 = vmatpush.bf16.msra.mxu3 %v7902_v61 }
 0xbb4   :  { %2579 = vmatpush.bf16.msra.mxu2 %v7905_v6 }
 0xbb6   :  { %2609 = vmatpush.bf16.msra.mxu3 %v7908_v10 }
 0xbb8   :  { %2580 = vmatpush.bf16.msra.mxu2 %v7911_v42 }
 0xbba   :  { %2610 = vmatpush.bf16.msra.mxu3 %v7914_v33 }
 0xbbc   :  { %2581 = vmatpush.bf16.msra.mxu2 %v7917_v30 }
 0xbbe   :  { %2611 = vmatpush.bf16.msra.mxu3 %v7920_v58 }
 0xbc0   :  { %2582 = vmatpush.bf16.msra.mxu2 %v7923_v25 }
 0xbc2   :  { %2612 = vmatpush.bf16.msra.mxu3 %v7926_v45 }
 0xbc4   :  { %2583 = vmatpush.bf16.msra.mxu2 %v7929_v47 }
 0xbc6   :  { %2613 = vmatpush.bf16.msra.mxu3 %v7932_v50 }
 0xbca   :  { %2614 = vmatpush.bf16.msra.mxu3 %v7935_v35 }
 0xc2a   :  { %v2191_v12 = vpop.f32.mrf.mxu2 }
 0xc2b   :  { %v2211_v15 = vmul.f32 %v2191_v12, %v7761_v46 }
 0xc2d   :  { %v7940_v2 = vadd.f32 %v2211_v15, %v7779_v38 }
 0xc2f   :  { %9774 = vst [vmem:[#allocation55_spill] sm:$0xff] %v7940_v2  ;;  %v2223_v17 = vmul.f32 0.0625, %v7940_v2 }
 0xc30   :  { %v2206_v51 = vpop.f32.mrf.mxu3 }
 0xc31   :  { %v2215_v28 = vmul.f32 %v2206_v51, %v7761_v46  ;;  %v2225_v38 = vadd.f32 %v2223_v17, %v7793_v5  ;;  %v7957_v51 = vld [vmem:[%s6654_s9 + $0x8] sm:$0xff] }
 0xc32   :  { %v2193_v44 = vpop.f32.mrf.mxu2 }
 0xc33   :  { %v2212_v3 = vmul.f32 %v2193_v44, %v7772_v49  ;;  %v2217_v8 = vmul.f32 %v7945_v43, %v2215_v28 }
 0xc35   :  { %v7950_v36 = vadd.f32 %v2212_v3, %v7785_v26  ;;  %2219 = vadd.xlane.f32.xlu2 %v2217_v8 }
 0xc37   :  { %9775 = vst [vmem:[#allocation56_spill] sm:$0xff] %v7950_v36  ;;  %v2224_v24 = vmul.f32 0.0625, %v7950_v36 }
 0xc38   :  { %v2208_v40 = vpop.f32.mrf.mxu3 }
 0xc39   :  { %v2226_v46 = vadd.f32 %v2224_v24, %v7796_v34  ;;  %v2216_v12 = vmul.f32 %v2208_v40, %v7772_v49  ;;  %v2227_v49 = vmul.f32 0.1875, %v7601_v41 }
 0xc3b   :  { %v2443_v15 = vpack.c.bf16 %v2226_v46, %v2225_v38  ;;  %v2218_v28 = vmul.f32 %v7957_v51, %v2216_v12  ;;  %v2229_v26 = vperm.slane %v2227_v49, 0 }
 0xc3d   :  { %2452 = vmatmul.bf16.vlgmr.msra.gmra.mxu0 %v2443_v15  ;;  %2221 = vadd.xlane.f32.xlu0 %v2218_v28  ;;  %v2231_v44 = vadd.f32 %v2229_v26, %v6952_v31  ;;  %v2232_v8 = vadd.f32 %v2229_v26, %v6968_v37 }
 0xc3e   :  { %2634 = vmatpush.bf16.msra.mxu0 %v7800_v32 }
 0xc3f   :  { %v5617_v3 = vmul.f32 -1.442695, %v2231_v44  ;;  %v5618_v17 = vmul.f32 -1.442695, %v2232_v8 }
 0xc41   :  { %5903 = vpow2.f32 %v5617_v3 }
 0xc42   :  { %2635 = vmatpush.bf16.msra.mxu0 %v7803_v0  ;;  %5905 = vpow2.f32 %v5618_v17 }
 0xc46   :  { %2636 = vmatpush.bf16.msra.mxu0 %v7806_v4 }
 0xc47   :  { %v5904_v24 = vpop.eup %5903 }
 0xc48   :  { %v2239_v40 = vadd.f32 1.0, %v5904_v24  ;;  %v5906_v38 = vpop.eup %5905 }
 0xc49   :  { %v2240_v46 = vadd.f32 1.0, %v5906_v38 }
 0xc4a   :  { %2637 = vmatpush.bf16.msra.mxu0 %v7809_v59  ;;  %5907 = vrcp.f32 %v2239_v40  ;;  %v2252_v3 = vand.u32 2147483648, %v2239_v40  ;;  %vm2246_vm3 = vweird.f32 %v2239_v40  ;;  %v2250_v26 = vand.u32 2147483647, %v2239_v40 }
 0xc4b   :  { %5909 = vrcp.f32 %v2240_v46  ;;  %v2267_v31 = vand.u32 2147483648, %v2240_v46  ;;  %vm2261_vm7 = vweird.f32 %v2240_v46 }
 0xc4c   :  { %v2253_v24 = vor.u32 1.1754944e-38, %v2252_v3  ;;  %vm2251_vm5 = vcmp.eq.f32.partialorder %v2250_v26, 8.507059e+37 }
 0xc4e   :  { %2638 = vmatpush.bf16.msra.mxu0 %v7812_v62 }
 0xc50   :  { %v5908_v12 = vpop.eup %5907 }
 0xc51   :  { %v2242_v15 = vmul.f32 %v5908_v12, %v2239_v40  ;;  %v5910_v36 = vpop.eup %5909  ;;  %vm2247_vm2 = vweird.f32 %v5908_v12  ;;  %v2268_v40 = vor.u32 1.1754944e-38, %v2267_v31 }
 0xc52   :  { %2639 = vmatpush.bf16.msra.mxu0 %v7815_v7  ;;  %v2257_v49 = vmul.f32 %v5910_v36, %v2240_v46  ;;  %vm2248_vm4 = vmor %vm2246_vm3, %vm2247_vm2  ;;  %vm2262_vm6 = vweird.f32 %v5910_v36 }
 0xc53   :  { %v2243_v28 = vsub.f32 1.0, %v2242_v15  ;;  %vm2263_vm8 = vmor %vm2261_vm7, %vm2262_vm6 }
 0xc54   :  { %v2258_v44 = vsub.f32 1.0, %v2257_v49 }
 0xc55   :  { %v2244_v41 = vmul.f32 %v5908_v12, %v2243_v28  ;;  %v2275_v28 = vmul.f32 0.1875, %v7614_v54 }
 0xc56   :  { %2640 = vmatpush.bf16.msra.mxu0 %v7818_v23  ;;  %v2259_v17 = vmul.f32 %v5910_v36, %v2258_v44 }
 0xc57   :  { %v2245_v2 = vadd.f32 %v5908_v12, %v2244_v41  ;;  %v2265_v41 = vand.u32 2147483647, %v2240_v46  ;;  %v9779_v46 = vld [vmem:[#allocation34_spill] sm:$0xff] }
 0xc58   :  { %v2260_v38 = vadd.f32 %v5910_v36, %v2259_v17 }
 0xc59   :  { %v2249_v8 = vsel %vm2248_vm4, %v5908_v12, %v2245_v2  ;;  %v2277_v12 = vperm.slane %v2275_v28, 0  ;;  %vm2266_vm9 = vcmp.eq.f32.partialorder %v2265_v41, 8.507059e+37 }
 0xc5a   :  { %2641 = vmatpush.bf16.msra.mxu0 %v7821_v16  ;;  %v7971_v37 = vsel %vm2251_vm5, %v2253_v24, %v2249_v8  ;;  %v2264_v49 = vsel %vm2263_vm8, %v5910_v36, %v2260_v38 }
 0xc5b   :  { %9776 = vst [vmem:[#allocation57_spill] sm:$0xff] %v7971_v37  ;;  %v2271_v15 = vmul.f32 %v7609_v55, %v7971_v37  ;;  %v7977_v44 = vsel %vm2266_vm9, %v2268_v40, %v2264_v49 }
 0xc5c   :  { %9777 = vst [vmem:[#allocation58_spill] sm:$0xff] %v7977_v44  ;;  %v2272_v17 = vmul.f32 %v7609_v55, %v7977_v44  ;;  %v9781_v55 = vld [vmem:[#allocation37_spill] sm:$0xff] }
 0xc5d   :  { %v2273_v2 = vadd.f32 %v2271_v15, %v9751_v19 }
 0xc5e   :  { %v2274_v24 = vadd.f32 %v2272_v17, %v9779_v46  ;;  %v9783_v17 = vld [vmem:[#allocation38_spill] sm:$0xff] }
 0xc5f   :  { %v7979_v26 = vadd.f32 %v2277_v12, %v2273_v2 }
 0xc60   :  { %v7986_v36 = vadd.f32 %v2277_v12, %v2274_v24 }
 0xc61   :  { %9778 = vst [vmem:[#allocation59_spill] sm:$0xff] %v7979_v26 }
 0xc62   :  { %9780 = vst [vmem:[#allocation60_spill] sm:$0xff] %v7986_v36 }
 0xcba   :  { %v2453_v3 = vpop.f32.mrf.mxu0 }
 0xcbb   :  { %v2458_v8 = vmul.f32 %v2453_v3, %v7971_v37 }
 0xcbd   :  { %v2460_v54 = vadd.f32 %v2458_v8, %v7979_v26  ;;  %v7992_v8 = vmul.f32 %v7971_v37, %v9781_v55  ;;  %v9789_v26 = vld [vmem:[#allocation47_spill] sm:$0xff]  ;;  %v9793_v37 = vld [vmem:[#allocation44_spill] sm:$0xff] }
 0xcbf   :  { %5911 = vtanh.f32 %v2460_v54  ;;  %9782 = vst [vmem:[#allocation61_spill] sm:$0xff] %v7992_v8  ;;  %v7996_v54 = vmul.f32 %v7977_v44, %v9783_v17 }
 0xcc1   :  { %9784 = vst [vmem:[#allocation62_spill] sm:$0xff] %v7996_v54 }
 0xcc2   :  { %v2455_v31 = vpop.f32.mrf.mxu0 }
 0xcc3   :  { %v2459_v38 = vmul.f32 %v2455_v31, %v7977_v44 }
 0xcc5   :  { %v2461_v15 = vadd.f32 %v2459_v38, %v7986_v36  ;;  %v5912_v28 = vpop.eup %5911 }
 0xcc6   :  { %v2466_v41 = vmul.f32 %v5912_v28, %v5912_v28 }
 0xcc7   :  { %5913 = vtanh.f32 %v2461_v15  ;;  %v9785_v15 = vld [vmem:[#allocation40_spill] sm:$0xff] }
 0xcc8   :  { %v2468_v40 = vsub.f32 1.0, %v2466_v41 }
 0xcca   :  { %v2470_v24 = vmul.f32 %v2468_v40, %v7992_v8 }
 0xccd   :  { %v5914_v49 = vpop.eup %5913 }
 0xcce   :  { %v2467_v2 = vmul.f32 %v5914_v49, %v5914_v49  ;;  %v2472_v3 = vpack.c.bf16 %v5914_v49, %v5912_v28  ;;  %v2281_v28 = vmul.f32 0.1875, %v9785_v15  ;;  %v9786_v49 = vld [vmem:[#allocation41_spill] sm:$0xff] }
 0xcd0   :  { %2481 = vmatmul.bf16.vlgmr.msra.gmra.mxu1 %v2472_v3  ;;  %v2469_v12 = vsub.f32 1.0, %v2467_v2  ;;  %v2283_v41 = vperm.slane %v2281_v28, 0  ;;  %v9787_v3 = vld [vmem:[#allocation42_spill] sm:$0xff] }
 0xcd1   :  { %2649 = vmatpush.bf16.msra.mxu1 %v7800_v32 }
 0xcd2   :  { %v2471_v31 = vmul.f32 %v2469_v12, %v7996_v54  ;;  %v2285_v40 = vadd.f32 %v2283_v41, %v9786_v49  ;;  %v2286_v12 = vadd.f32 %v2283_v41, %v9787_v3 }
 0xcd4   :  { %v2487_v38 = vpack.c.bf16 %v2471_v31, %v2470_v24  ;;  %v5619_v2 = vmul.f32 -1.442695, %v2285_v40  ;;  %v5620_v24 = vmul.f32 -1.442695, %v2286_v12 }
 0xcd5   :  { %2650 = vmatpush.bf16.msra.mxu1 %v7803_v0 }
 0xcd6   :  { %2496 = vmatmul.bf16.vlgmr.msrb.gmra.mxu2 %v2487_v38  ;;  %5915 = vpow2.f32 %v5619_v2 }
 0xcd7   :  { %2678 = vmatpush.bf16.msrb.mxu2 %v7832_v1  ;;  %5917 = vpow2.f32 %v5620_v24 }
 0xcd9   :  { %2651 = vmatpush.bf16.msra.mxu1 %v7806_v4 }
 0xcdb   :  { %2679 = vmatpush.bf16.msrb.mxu2 %v7836_v63 }
 0xcdc   :  { %v5916_v31 = vpop.eup %5915 }
 0xcdd   :  { %2652 = vmatpush.bf16.msra.mxu1 %v7809_v59  ;;  %v2293_v38 = vadd.f32 1.0, %v5916_v31  ;;  %v5918_v17 = vpop.eup %5917 }
 0xcde   :  { %v2294_v55 = vadd.f32 1.0, %v5918_v17 }
 0xcdf   :  { %2680 = vmatpush.bf16.msrb.mxu2 %v7840_v39  ;;  %5919 = vrcp.f32 %v2293_v38  ;;  %vm2300_vm10 = vweird.f32 %v2293_v38  ;;  %v2306_v40 = vand.u32 2147483648, %v2293_v38  ;;  %v2304_v49 = vand.u32 2147483647, %v2293_v38 }
 0xce0   :  { %5921 = vrcp.f32 %v2294_v55  ;;  %vm2315_vm14 = vweird.f32 %v2294_v55  ;;  %v2321_v3 = vand.u32 2147483648, %v2294_v55  ;;  %v2319_v36 = vand.u32 2147483647, %v2294_v55 }
 0xce1   :  { %2653 = vmatpush.bf16.msra.mxu1 %v7812_v62  ;;  %v2307_v12 = vor.u32 1.1754944e-38, %v2306_v40  ;;  %vm2305_vm13 = vcmp.eq.f32.partialorder %v2304_v49, 8.507059e+37  ;;  %v9790_v40 = vld [vmem:[#allocation43_spill] sm:$0xff] }
 0xce2   :  { %vm2320_vm1 = vcmp.eq.f32.partialorder %v2319_v36, 8.507059e+37 }
 0xce3   :  { %2681 = vmatpush.bf16.msrb.mxu2 %v7867_v20 }
 0xce5   :  { %2654 = vmatpush.bf16.msra.mxu1 %v7815_v7  ;;  %v5920_v46 = vpop.eup %5919 }
 0xce6   :  { %v2296_v19 = vmul.f32 %v5920_v46, %v2293_v38  ;;  %v5922_v8 = vpop.eup %5921  ;;  %vm2301_vm11 = vweird.f32 %v5920_v46  ;;  %v2322_v38 = vor.u32 1.1754944e-38, %v2321_v3 }
 0xce7   :  { %2682 = vmatpush.bf16.msrb.mxu2 %v7873_v13  ;;  %v2311_v28 = vmul.f32 %v5922_v8, %v2294_v55  ;;  %vm2302_vm12 = vmor %vm2300_vm10, %vm2301_vm11  ;;  %vm2316_vm15 = vweird.f32 %v5922_v8 }
 0xce8   :  { %v2297_v54 = vsub.f32 1.0, %v2296_v19  ;;  %vm2317_vm0 = vmor %vm2315_vm14, %vm2316_vm15 }
 0xce9   :  { %2655 = vmatpush.bf16.msra.mxu1 %v7818_v23  ;;  %v2312_v41 = vsub.f32 1.0, %v2311_v28 }
 0xcea   :  { %v2298_v15 = vmul.f32 %v5920_v46, %v2297_v54  ;;  %v9788_v54 = vld [vmem:[#allocation46_spill] sm:$0xff] }
 0xceb   :  { %2683 = vmatpush.bf16.msrb.mxu2 %v7877_v60  ;;  %v2313_v31 = vmul.f32 %v5922_v8, %v2312_v41 }
 0xcec   :  { %v2299_v2 = vadd.f32 %v5920_v46, %v2298_v15  ;;  %v2329_v15 = vmul.f32 0.1875, %v9789_v26 }
 0xced   :  { %2656 = vmatpush.bf16.msra.mxu1 %v7821_v16  ;;  %v2314_v19 = vadd.f32 %v5922_v8, %v2313_v31 }
 0xcee   :  { %v2303_v24 = vsel %vm2302_vm12, %v5920_v46, %v2299_v2  ;;  %v2331_v49 = vperm.slane %v2329_v15, 0 }
 0xcef   :  { %2684 = vmatpush.bf16.msrb.mxu2 %v7881_v57  ;;  %v8019_v17 = vsel %vm2305_vm13, %v2307_v12, %v2303_v24  ;;  %v2318_v28 = vsel %vm2317_vm0, %v5922_v8, %v2314_v19 }
 0xcf0   :  { %v2325_v44 = vmul.f32 %v9788_v54, %v8019_v17  ;;  %v8025_v2 = vsel %vm2320_vm1, %v2322_v38, %v2318_v28 }
 0xcf1   :  { %9791 = vst [vmem:[#allocation40_spill] sm:$0xff] %v8025_v2  ;;  %v2326_v55 = vmul.f32 %v9788_v54, %v8025_v2 }
 0xcf2   :  { %v2327_v46 = vadd.f32 %v2325_v44, %v9790_v40 }
 0xcf3   :  { %2685 = vmatpush.bf16.msrb.mxu2 %v7885_v14  ;;  %v2328_v26 = vadd.f32 %v2326_v55, %v9793_v37 }
 0xcf4   :  { %v8027_v12 = vadd.f32 %v2331_v49, %v2327_v46 }
 0xcf5   :  { %v8034_v36 = vadd.f32 %v2331_v49, %v2328_v26 }
 0xcf6   :  { %9792 = vst [vmem:[#allocation46_spill] sm:$0xff] %v8027_v12 }
 0xcf7   :  { %9794 = vst [vmem:[#allocation47_spill] sm:$0xff] %v8034_v36 }
 0xd4d   :  { %v2482_v41 = vpop.f32.mrf.mxu1 }
 0xd4e   :  { %v2502_v24 = vmul.f32 %v2482_v41, %v8019_v17 }
 0xd50   :  { %v2504_v31 = vadd.f32 %v2502_v24, %v8027_v12  ;;  %v9799_v12 = vld [vmem:[#allocation39_spill] sm:$0xff] }
 0xd52   :  { %5923 = vtanh.f32 %v2504_v31 }
 0xd55   :  { %v2484_v8 = vpop.f32.mrf.mxu1 }
 0xd56   :  { %v2503_v44 = vmul.f32 %v2484_v8, %v8025_v2 }
 0xd58   :  { %v2505_v3 = vadd.f32 %v2503_v44, %v8034_v36  ;;  %v5924_v15 = vpop.eup %5923 }
 0xd59   :  { %v2497_v19 = vpop.f32.mrf.mxu2  ;;  %v2510_v38 = vmul.f32 %v5924_v15, %v5924_v15 }
 0xd5a   :  { %5925 = vtanh.f32 %v2505_v3  ;;  %v2506_v46 = vmul.f32 %v2497_v19, %v8019_v17  ;;  %v9796_v19 = vld [vmem:[#allocation50_spill] sm:$0xff] }
 0xd5b   :  { %v2512_v54 = vsub.f32 1.0, %v2510_v38 }
 0xd5d   :  { %v2514_v49 = vmul.f32 %v2512_v54, %v2506_v46 }
 0xd60   :  { %v5926_v28 = vpop.eup %5925 }
 0xd61   :  { %v2499_v41 = vpop.f32.mrf.mxu2  ;;  %v2511_v24 = vmul.f32 %v5926_v28, %v5926_v28  ;;  %v2516_v40 = vpack.c.bf16 %v5926_v28, %v5924_v15  ;;  %v9797_v28 = vld [vmem:[#allocation51_spill] sm:$0xff] }
 0xd62   :  { %v2507_v55 = vmul.f32 %v2499_v41, %v8025_v2 }
 0xd63   :  { %v2513_v31 = vsub.f32 1.0, %v2511_v24  ;;  %2525 = vmatmul.bf16.vlgmr.msrb.gmra.mxu3 %v2516_v40  ;;  %v9795_v40 = vld [vmem:[#allocation49_spill] sm:$0xff] }
 0xd64   :  { %2693 = vmatpush.bf16.msrb.mxu3 %v7832_v1  ;;  %v2335_v44 = vmul.f32 0.1875, %v9795_v40 }
 0xd65   :  { %v2515_v26 = vmul.f32 %v2513_v31, %v2507_v55 }
 0xd66   :  { %v2337_v3 = vperm.slane %v2335_v44, 0 }
 0xd67   :  { %v2531_v8 = vpack.c.bf16 %v2515_v26, %v2514_v49 }
 0xd68   :  { %2694 = vmatpush.bf16.msrb.mxu3 %v7836_v63  ;;  %v2339_v15 = vadd.f32 %v2337_v3, %v9796_v19  ;;  %v2340_v46 = vadd.f32 %v2337_v3, %v9797_v28 }
 0xd69   :  { %2540 = vmatmul.bf16.vlgmr.msrb.gmra.mxu0 %v2531_v8 }
 0xd6a   :  { %2722 = vmatpush.bf16.msrb.mxu0 %v7860_v18  ;;  %v5621_v38 = vmul.f32 -1.442695, %v2339_v15  ;;  %v5622_v54 = vmul.f32 -1.442695, %v2340_v46 }
 0xd6c   :  { %2695 = vmatpush.bf16.msrb.mxu3 %v7840_v39  ;;  %5927 = vpow2.f32 %v5621_v38 }
 0xd6d   :  { %5929 = vpow2.f32 %v5622_v54 }
 0xd6e   :  { %2723 = vmatpush.bf16.msrb.mxu0 %v7864_v9 }
 0xd70   :  { %2696 = vmatpush.bf16.msrb.mxu3 %v7867_v20 }
 0xd72   :  { %2724 = vmatpush.bf16.msrb.mxu0 %v7870_v48  ;;  %v5928_v41 = vpop.eup %5927 }
 0xd73   :  { %v2347_v24 = vadd.f32 1.0, %v5928_v41  ;;  %v5930_v55 = vpop.eup %5929 }
 0xd74   :  { %2697 = vmatpush.bf16.msrb.mxu3 %v7873_v13  ;;  %v2348_v31 = vadd.f32 1.0, %v5930_v55 }
 0xd75   :  { %5931 = vrcp.f32 %v2347_v24  ;;  %vm2354_vm2 = vweird.f32 %v2347_v24  ;;  %v2360_v15 = vand.u32 2147483648, %v2347_v24  ;;  %v2358_v19 = vand.u32 2147483647, %v2347_v24 }
 0xd76   :  { %2725 = vmatpush.bf16.msrb.mxu0 %v7905_v6  ;;  %5933 = vrcp.f32 %v2348_v31  ;;  %vm2369_vm6 = vweird.f32 %v2348_v31  ;;  %v2375_v28 = vand.u32 2147483648, %v2348_v31  ;;  %v2373_v36 = vand.u32 2147483647, %v2348_v31 }
 0xd77   :  { %v2361_v46 = vor.u32 1.1754944e-38, %v2360_v15  ;;  %vm2359_vm5 = vcmp.eq.f32.partialorder %v2358_v19, 8.507059e+37  ;;  %v9800_v15 = vld [vmem:[#allocation35_spill] sm:$0xff] }
 0xd78   :  { %2698 = vmatpush.bf16.msrb.mxu3 %v7877_v60  ;;  %vm2374_vm9 = vcmp.eq.f32.partialorder %v2373_v36, 8.507059e+37 }
 0xd7a   :  { %2726 = vmatpush.bf16.msrb.mxu0 %v7911_v42 }
 0xd7b   :  { %v5932_v49 = vpop.eup %5931 }
 0xd7c   :  { %2699 = vmatpush.bf16.msrb.mxu3 %v7881_v57  ;;  %v2350_v26 = vmul.f32 %v5932_v49, %v2347_v24  ;;  %v5934_v37 = vpop.eup %5933  ;;  %vm2355_vm3 = vweird.f32 %v5932_v49  ;;  %v2376_v24 = vor.u32 1.1754944e-38, %v2375_v28 }
 0xd7d   :  { %v2365_v44 = vmul.f32 %v5934_v37, %v2348_v31  ;;  %vm2356_vm4 = vmor %vm2354_vm2, %vm2355_vm3  ;;  %vm2370_vm7 = vweird.f32 %v5934_v37 }
 0xd7e   :  { %2727 = vmatpush.bf16.msrb.mxu0 %v7917_v30  ;;  %v2351_v8 = vsub.f32 1.0, %v2350_v26  ;;  %vm2371_vm8 = vmor %vm2369_vm6, %vm2370_vm7 }
 0xd7f   :  { %v2366_v3 = vsub.f32 1.0, %v2365_v44 }
 0xd80   :  { %2700 = vmatpush.bf16.msrb.mxu3 %v7885_v14  ;;  %v2352_v40 = vmul.f32 %v5932_v49, %v2351_v8  ;;  %v9798_v8 = vld [vmem:[#allocation52_spill] sm:$0xff] }
 0xd81   :  { %v2367_v41 = vmul.f32 %v5934_v37, %v2366_v3 }
 0xd82   :  { %2728 = vmatpush.bf16.msrb.mxu0 %v7923_v25  ;;  %v2353_v38 = vadd.f32 %v5932_v49, %v2352_v40  ;;  %v2383_v40 = vmul.f32 0.1875, %v9799_v12 }
 0xd83   :  { %v2368_v26 = vadd.f32 %v5934_v37, %v2367_v41 }
 0xd84   :  { %v2357_v54 = vsel %vm2356_vm4, %v5932_v49, %v2353_v38  ;;  %v2385_v19 = vperm.slane %v2383_v40, 0 }
 0xd85   :  { %v8059_v55 = vsel %vm2359_vm5, %v2361_v46, %v2357_v54  ;;  %v2372_v44 = vsel %vm2371_vm8, %v5934_v37, %v2368_v26 }
 0xd86   :  { %2729 = vmatpush.bf16.msrb.mxu0 %v7929_v47  ;;  %v2379_v2 = vmul.f32 %v9798_v8, %v8059_v55  ;;  %v8065_v38 = vsel %vm2374_vm9, %v2376_v24, %v2372_v44 }
 0xd87   :  { %v2380_v31 = vmul.f32 %v9798_v8, %v8065_v38 }
 0xd88   :  { %v2381_v49 = vadd.f32 %v2379_v2, %v9800_v15 }
 0xd89   :  { %v2382_v12 = vadd.f32 %v2380_v31, %v9769_v27 }
 0xd8a   :  { %v8067_v46 = vadd.f32 %v2385_v19, %v2381_v49 }
 0xd8b   :  { %v8074_v28 = vadd.f32 %v2385_v19, %v2382_v12 }
 0xde6   :  { %v2526_v3 = vpop.f32.mrf.mxu3  ;;  %v2541_v36 = vpop.f32.mrf.mxu0 }
 0xde7   :  { %v2546_v54 = vmul.f32 %v2526_v3, %v8059_v55 }
 0xde9   :  { %v2548_v41 = vadd.f32 %v2546_v54, %v8067_v46  ;;  %v2550_v54 = vmul.f32 %v2541_v36, %v8059_v55 }
 0xdeb   :  { %5935 = vtanh.f32 %v2548_v41 }
 0xdee   :  { %v2528_v37 = vpop.f32.mrf.mxu3  ;;  %v2543_v49 = vpop.f32.mrf.mxu0 }
 0xdef   :  { %v2547_v2 = vmul.f32 %v2528_v37, %v8065_v38  ;;  %v2551_v31 = vmul.f32 %v2543_v49, %v8065_v38 }
 0xdf1   :  { %v2549_v26 = vadd.f32 %v2547_v2, %v8074_v28  ;;  %v5936_v40 = vpop.eup %5935 }
 0xdf2   :  { %v2554_v24 = vmul.f32 %v5936_v40, %v5936_v40 }
 0xdf3   :  { %5937 = vtanh.f32 %v2549_v26 }
 0xdf4   :  { %v2556_v3 = vsub.f32 1.0, %v2554_v24 }
 0xdf6   :  { %v2558_v19 = vmul.f32 %v2556_v3, %v2550_v54 }
 0xdf9   :  { %v5938_v44 = vpop.eup %5937 }
 0xdfa   :  { %v2560_v8 = vpack.c.bf16 %v5938_v44, %v5936_v40  ;;  %v2555_v15 = vmul.f32 %v5938_v44, %v5938_v44 }
 0xdfc   :  { %v2557_v41 = vsub.f32 1.0, %v2555_v15  ;;  %2569 = vmatmul.bf16.vlgmr.msrb.gmra.mxu1 %v2560_v8  ;;  %v2389_v15 = vmul.f32 0.1875, %v7756_v53 }
 0xdfd   :  { %2737 = vmatpush.bf16.msrb.mxu1 %v7860_v18 }
 0xdfe   :  { %v2559_v12 = vmul.f32 %v2557_v41, %v2551_v31  ;;  %v2391_v36 = vperm.slane %v2389_v15, 0 }
 0xe00   :  { %v2575_v37 = vpack.c.bf16 %v2559_v12, %v2558_v19  ;;  %v2393_v2 = vadd.f32 %v2391_v36, %v9770_v21  ;;  %v2394_v40 = vadd.f32 %v2391_v36, %v9771_v22 }
 0xe01   :  { %2738 = vmatpush.bf16.msrb.mxu1 %v7864_v9 }
 0xe02   :  { %2584 = vmatmul.bf16.vlgmr.msra.gmra.mxu2 %v2575_v37  ;;  %v5623_v26 = vmul.f32 -1.442695, %v2393_v2  ;;  %v5624_v24 = vmul.f32 -1.442695, %v2394_v40 }
 0xe03   :  { %2984 = vmatpush.bf16.msra.mxu2 %v7898_v56 }
 0xe04   :  { %5939 = vpow2.f32 %v5623_v26 }
 0xe05   :  { %2739 = vmatpush.bf16.msrb.mxu1 %v7870_v48  ;;  %5941 = vpow2.f32 %v5624_v24 }
 0xe07   :  { %2985 = vmatpush.bf16.msra.mxu2 %v7902_v61 }
 0xe09   :  { %2740 = vmatpush.bf16.msrb.mxu1 %v7905_v6 }
 0xe0a   :  { %v5940_v44 = vpop.eup %5939 }
 0xe0b   :  { %2986 = vmatpush.bf16.msra.mxu2 %v7908_v10  ;;  %v2401_v49 = vadd.f32 1.0, %v5940_v44  ;;  %v5942_v3 = vpop.eup %5941 }
 0xe0c   :  { %v2402_v8 = vadd.f32 1.0, %v5942_v3 }
 0xe0d   :  { %2741 = vmatpush.bf16.msrb.mxu1 %v7911_v42  ;;  %5943 = vrcp.f32 %v2401_v49  ;;  %vm2408_vm10 = vweird.f32 %v2401_v49  ;;  %v2414_v15 = vand.u32 2147483648, %v2401_v49  ;;  %v2412_v2 = vand.u32 2147483647, %v2401_v49 }
 0xe0e   :  { %5945 = vrcp.f32 %v2402_v8  ;;  %vm2423_vm13 = vweird.f32 %v2402_v8  ;;  %v2429_v24 = vand.u32 2147483648, %v2402_v8  ;;  %v2427_v22 = vand.u32 2147483647, %v2402_v8 }
 0xe0f   :  { %2987 = vmatpush.bf16.msra.mxu2 %v7914_v33  ;;  %v2415_v40 = vor.u32 1.1754944e-38, %v2414_v15  ;;  %vm2413_vm15 = vcmp.eq.f32.partialorder %v2412_v2, 8.507059e+37 }
 0xe10   :  { %vm2428_vm1 = vcmp.eq.f32.partialorder %v2427_v22, 8.507059e+37 }
 0xe11   :  { %2742 = vmatpush.bf16.msrb.mxu1 %v7917_v30 }
 0xe13   :  { %2988 = vmatpush.bf16.msra.mxu2 %v7920_v58  ;;  %v5944_v54 = vpop.eup %5943 }
 0xe14   :  { %v2404_v31 = vmul.f32 %v5944_v54, %v2401_v49  ;;  %v5946_v41 = vpop.eup %5945  ;;  %vm2409_vm11 = vweird.f32 %v5944_v54  ;;  %v2437_v49 = vmul.f32 0.1875, %v7769_v29 }
 0xe15   :  { %2743 = vmatpush.bf16.msrb.mxu1 %v7923_v25  ;;  %v2419_v53 = vmul.f32 %v5946_v41, %v2402_v8  ;;  %vm2410_vm12 = vmor %vm2408_vm10, %vm2409_vm11  ;;  %vm2424_vm14 = vweird.f32 %v5946_v41 }
 0xe16   :  { %v2405_v19 = vsub.f32 1.0, %v2404_v31  ;;  %vm2425_vm0 = vmor %vm2423_vm13, %vm2424_vm14 }
 0xe17   :  { %2989 = vmatpush.bf16.msra.mxu2 %v7926_v45  ;;  %v2420_v37 = vsub.f32 1.0, %v2419_v53 }
 0xe18   :  { %v2406_v12 = vmul.f32 %v5944_v54, %v2405_v19  ;;  %v2430_v19 = vor.u32 1.1754944e-38, %v2429_v24 }
 0xe19   :  { %2744 = vmatpush.bf16.msrb.mxu1 %v7929_v47  ;;  %v2421_v26 = vmul.f32 %v5946_v41, %v2420_v37 }
 0xe1a   :  { %v2407_v36 = vadd.f32 %v5944_v54, %v2406_v12 }
 0xe1b   :  { %2990 = vmatpush.bf16.msra.mxu2 %v7932_v50  ;;  %v2422_v3 = vadd.f32 %v5946_v41, %v2421_v26 }
 0xe1c   :  { %v2411_v44 = vsel %vm2410_vm12, %v5944_v54, %v2407_v36  ;;  %v2439_v54 = vperm.slane %v2437_v49, 0 }
 0xe1d   :  { %v8099_v31 = vsel %vm2413_vm15, %v2415_v40, %v2411_v44  ;;  %v2426_v53 = vsel %vm2425_vm0, %v5946_v41, %v2422_v3  ;;  %v9801_v41 = vld [vmem:[#allocation48_spill] sm:$0xff] }
 0xe1e   :  { %v2433_v12 = vmul.f32 %v7764_v11, %v8099_v31  ;;  %v8104_v37 = vsel %vm2428_vm1, %v2430_v19, %v2426_v53 }
 0xe1f   :  { %2991 = vmatpush.bf16.msra.mxu2 %v7935_v35  ;;  %v2434_v8 = vmul.f32 %v7764_v11, %v8104_v37 }
 0xe20   :  { %v2435_v15 = vadd.f32 %v2433_v12, %v9772_v52 }
 0xe21   :  { %v2436_v22 = vadd.f32 %v2434_v8, %v9801_v41 }
 0xe22   :  { %v8110_v2 = vadd.f32 %v2439_v54, %v2435_v15 }
 0xe23   :  { %v8116_v29 = vadd.f32 %v2439_v54, %v2436_v22  ;;  %v9802_v22 = vld [vmem:[#allocation57_spill] sm:$0xff] }
 0xe79   :  { %v2570_v21 = vpop.f32.mrf.mxu1 }
 0xe7a   :  { %v2590_v36 = vmul.f32 %v2570_v21, %v8099_v31 }
 0xe7c   :  { %v8114_v26 = vadd.f32 %v2590_v36, %v8110_v2 }
 0xe7e   :  { %v2602_v44 = vmul.f32 0.0625, %v8114_v26 }
 0xe80   :  { %v2604_v53 = vadd.f32 %v2602_v44, %v7793_v5 }
 0xe81   :  { %v2572_v40 = vpop.f32.mrf.mxu1 }
 0xe82   :  { %v2591_v24 = vmul.f32 %v2572_v40, %v8104_v37 }
 0xe84   :  { %v8121_v3 = vadd.f32 %v2591_v24, %v8116_v29  ;;  %v9803_v24 = vld [vmem:[#allocation59_spill] sm:$0xff] }
 0xe85   :  { %v2585_v11 = vpop.f32.mrf.mxu2 }
 0xe86   :  { %v2603_v21 = vmul.f32 0.0625, %v8121_v3  ;;  %v2594_v19 = vmul.f32 %v2585_v11, %v8099_v31  ;;  %v9804_v11 = vld [vmem:[#allocation58_spill] sm:$0xff] }
 0xe88   :  { %v2605_v12 = vadd.f32 %v2603_v21, %v7796_v34  ;;  %v2596_v49 = vmul.f32 %v7945_v43, %v2594_v19 }
 0xe8a   :  { %v2606_v15 = vpack.c.bf16 %v2605_v12, %v2604_v53  ;;  %2598 = vadd.xlane.f32.xlu1 %v2596_v49 }
 0xe8c   :  { %2615 = vmatmul.bf16.vlgmr.msra.gmra.mxu3 %v2606_v15  ;;  %v9806_v15 = vld [vmem:[#allocation61_spill] sm:$0xff] }
 0xe8d   :  { %v2587_v54 = vpop.f32.mrf.mxu2  ;;  %3013 = vmatpush.bf16.msra.mxu3 %v7800_v32 }
 0xe8e   :  { %v2595_v8 = vmul.f32 %v2587_v54, %v8104_v37 }
 0xe90   :  { %v2597_v36 = vmul.f32 %v7957_v51, %v2595_v8  ;;  %v9807_v8 = vld [vmem:[#allocation62_spill] sm:$0xff] }
 0xe91   :  { %3014 = vmatpush.bf16.msra.mxu3 %v7803_v0 }
 0xe92   :  { %2600 = vadd.xlane.f32.xlu2 %v2597_v36 }
 0xe95   :  { %3015 = vmatpush.bf16.msra.mxu3 %v7806_v4  ;;  %v9805_v4 = vld [vmem:[#allocation60_spill] sm:$0xff] }
 0xe99   :  { %3016 = vmatpush.bf16.msra.mxu3 %v7809_v59 }
 0xe9d   :  { %3017 = vmatpush.bf16.msra.mxu3 %v7812_v62 }
 0xea1   :  { %3018 = vmatpush.bf16.msra.mxu3 %v7815_v7 }
 0xea5   :  { %3019 = vmatpush.bf16.msra.mxu3 %v7818_v23 }
 0xea9   :  { %3020 = vmatpush.bf16.msra.mxu3 %v7821_v16  ;;  %v8142_v16 = vld [vmem:[#allocation5 + $0x38] sm:$0xff] }
 0xf0f   :  { %v2616_v32 = vpop.f32.mrf.mxu3 }
 0xf10   :  { %v2621_v40 = vmul.f32 %v2616_v32, %v9802_v22  ;;  %v8147_v22 = vld [vmem:[#allocation5 + $0x30] sm:$0xff] }
 0xf12   :  { %v2623_v44 = vadd.f32 %v2621_v40, %v9803_v24  ;;  %v8151_v40 = vld [vmem:[#allocation5 + $0x28] sm:$0xff]  ;;  %v8155_v24 = vld [vmem:[#allocation5 + $0x20] sm:$0xff] }
 0xf14   :  { %5947 = vtanh.f32 %v2623_v44  ;;  %v8159_v44 = vld [vmem:[#allocation5 + $0x18] sm:$0xff] }
 0xf17   :  { %v2618_v0 = vpop.f32.mrf.mxu3 }
 0xf18   :  { %v2622_v21 = vmul.f32 %v2618_v0, %v9804_v11  ;;  %v8163_v0 = vld [vmem:[#allocation5 + $0x10] sm:$0xff] }
 0xf1a   :  { %v2624_v19 = vadd.f32 %v2622_v21, %v9805_v4  ;;  %v5948_v59 = vpop.eup %5947  ;;  %v9808_v21 = vld [vmem:[#allocation46_spill] sm:$0xff] }
 0xf1b   :  { %v2627_v62 = vmul.f32 %v5948_v59, %v5948_v59 }
 0xf1c   :  { %5949 = vtanh.f32 %v2624_v19 }
 0xf1d   :  { %v2629_v7 = vsub.f32 1.0, %v2627_v62  ;;  %v9809_v62 = vld [vmem:[#allocation40_spill] sm:$0xff] }
 0xf1f   :  { %v2631_v54 = vmul.f32 %v2629_v7, %v9806_v15  ;;  %v9810_v7 = vld [vmem:[#allocation47_spill] sm:$0xff] }
 0xf22   :  { %v5950_v53 = vpop.eup %5949 }
 0xf23   :  { %v2628_v12 = vmul.f32 %v5950_v53, %v5950_v53  ;;  %v2633_v23 = vpack.c.bf16 %v5950_v53, %v5948_v59 }
 0xf25   :  { %v2630_v49 = vsub.f32 1.0, %v2628_v12  ;;  %2642 = vmatmul.bf16.vlgmr.msra.gmra.mxu0 %v2633_v23 }
 0xf26   :  { %3028 = vmatpush.bf16.msra.mxu0 %v8142_v16 }
 0xf27   :  { %v2632_v36 = vmul.f32 %v2630_v49, %v9807_v8 }
 0xf29   :  { %v2648_v32 = vpack.c.bf16 %v2632_v36, %v2631_v54 }
 0xf2a   :  { %3029 = vmatpush.bf16.msra.mxu0 %v8147_v22 }
 0xf2b   :  { %2657 = vmatmul.bf16.vlgmr.msra.gmra.mxu1 %v2648_v32 }
 0xf2c   :  { %3057 = vmatpush.bf16.msra.mxu1 %v7832_v1  ;;  %v8167_v1 = vld [vmem:[#allocation5 + $0x8] sm:$0xff] }
 0xf2e   :  { %3030 = vmatpush.bf16.msra.mxu0 %v8151_v40 }
 0xf30   :  { %3058 = vmatpush.bf16.msra.mxu1 %v7836_v63  ;;  %v8171_v63 = vld [vmem:[#allocation5] sm:$0xff] }
 0xf32   :  { %3031 = vmatpush.bf16.msra.mxu0 %v8155_v24 }
 0xf34   :  { %3059 = vmatpush.bf16.msra.mxu1 %v7840_v39 }
 0xf36   :  { %3032 = vmatpush.bf16.msra.mxu0 %v8159_v44 }
 0xf38   :  { %3060 = vmatpush.bf16.msra.mxu1 %v7867_v20 }
 0xf3a   :  { %3033 = vmatpush.bf16.msra.mxu0 %v8163_v0 }
 0xf3c   :  { %3061 = vmatpush.bf16.msra.mxu1 %v7873_v13 }
 0xf3e   :  { %3034 = vmatpush.bf16.msra.mxu0 %v8167_v1 }
 0xf40   :  { %3062 = vmatpush.bf16.msra.mxu1 %v7877_v60 }
 0xf42   :  { %3035 = vmatpush.bf16.msra.mxu0 %v8171_v63 }
 0xf44   :  { %3063 = vmatpush.bf16.msra.mxu1 %v7881_v57 }
 0xf48   :  { %3064 = vmatpush.bf16.msra.mxu1 %v7885_v14 }
 0xfa2   :  { %v2643_v39 = vpop.f32.mrf.mxu0 }
 0xfa3   :  { %v2663_v11 = vmul.f32 %v2643_v39, %v8019_v17 }
 0xfa5   :  { %v2665_v4 = vadd.f32 %v2663_v11, %v9808_v21  ;;  %v8182_v21 = vld [vmem:[#allocation7 + $0x38] sm:$0xff] }
 0xfa7   :  { %5951 = vtanh.f32 %v2665_v4 }
 0xfa8   :  { %v2658_v59 = vpop.f32.mrf.mxu1 }
 0xfa9   :  { %v2667_v41 = vmul.f32 %v2658_v59, %v8019_v17 }
 0xfaa   :  { %v2645_v19 = vpop.f32.mrf.mxu0 }
 0xfab   :  { %v2664_v53 = vmul.f32 %v2645_v19, %v9809_v62 }
 0xfad   :  { %v2666_v12 = vadd.f32 %v2664_v53, %v9810_v7  ;;  %v5952_v23 = vpop.eup %5951  ;;  %v8185_v7 = vld [vmem:[#allocation7 + $0x30] sm:$0xff] }
 0xfae   :  { %v2671_v49 = vmul.f32 %v5952_v23, %v5952_v23 }
 0xfaf   :  { %5953 = vtanh.f32 %v2666_v12  ;;  %v8189_v12 = vld [vmem:[#allocation7 + $0x28] sm:$0xff] }
 0xfb0   :  { %v2660_v54 = vpop.f32.mrf.mxu1  ;;  %v2673_v8 = vsub.f32 1.0, %v2671_v49 }
 0xfb1   :  { %v2668_v39 = vmul.f32 %v2660_v54, %v9809_v62 }
 0xfb2   :  { %v2675_v4 = vmul.f32 %v2673_v8, %v2667_v41  ;;  %v8210_v8 = vld [vmem:[#allocation8 + $0x38] sm:$0xff] }
 0xfb5   :  { %v5954_v15 = vpop.eup %5953 }
 0xfb6   :  { %v2677_v36 = vpack.c.bf16 %v5954_v15, %v5952_v23  ;;  %v2672_v32 = vmul.f32 %v5954_v15, %v5954_v15 }
 0xfb8   :  { %v2674_v11 = vsub.f32 1.0, %v2672_v32  ;;  %2686 = vmatmul.bf16.vlgmr.msrb.gmra.mxu2 %v2677_v36 }
 0xfb9   :  { %3072 = vmatpush.bf16.msrb.mxu2 %v8182_v21 }
 0xfba   :  { %v2676_v19 = vmul.f32 %v2674_v11, %v2668_v39  ;;  %v8213_v39 = vld [vmem:[#allocation8 + $0x30] sm:$0xff]  ;;  %v8217_v11 = vld [vmem:[#allocation8 + $0x28] sm:$0xff] }
 0xfbc   :  { %v2692_v53 = vpack.c.bf16 %v2676_v19, %v2675_v4  ;;  %v3143_v19 = vmul.f32 2.0, %v8121_v3 }
 0xfbd   :  { %3073 = vmatpush.bf16.msrb.mxu2 %v8185_v7 }
 0xfbe   :  { %2701 = vmatmul.bf16.vlgmr.msrb.gmra.mxu3 %v2692_v53 }
 0xfbf   :  { %3101 = vmatpush.bf16.msrb.mxu3 %v7860_v18 }
 0xfc1   :  { %3074 = vmatpush.bf16.msrb.mxu2 %v8189_v12 }
 0xfc3   :  { %3102 = vmatpush.bf16.msrb.mxu3 %v7864_v9 }
 0xfc5   :  { %3075 = vmatpush.bf16.msrb.mxu2 %v7867_v20 }
 0xfc7   :  { %3103 = vmatpush.bf16.msrb.mxu3 %v7870_v48 }
 0xfc9   :  { %3076 = vmatpush.bf16.msrb.mxu2 %v7873_v13 }
 0xfcb   :  { %3104 = vmatpush.bf16.msrb.mxu3 %v7905_v6 }
 0xfcd   :  { %3077 = vmatpush.bf16.msrb.mxu2 %v7877_v60 }
 0xfcf   :  { %3105 = vmatpush.bf16.msrb.mxu3 %v7911_v42 }
 0xfd1   :  { %3078 = vmatpush.bf16.msrb.mxu2 %v7881_v57 }
 0xfd3   :  { %3106 = vmatpush.bf16.msrb.mxu3 %v7917_v30 }
 0xfd5   :  { %3079 = vmatpush.bf16.msrb.mxu2 %v7885_v14 }
 0xfd7   :  { %3107 = vmatpush.bf16.msrb.mxu3 %v7923_v25 }
 0xfdb   :  { %3108 = vmatpush.bf16.msrb.mxu3 %v7929_v47 }
0x103b   :  { %v2687_v18 = vpop.f32.mrf.mxu2 }
0x103c   :  { %v2707_v9 = vmul.f32 %v2687_v18, %v8059_v55  ;;  %v9812_v18 = vld [vmem:[#allocation56_spill] sm:$0xff] }
0x103e   :  { %v2709_v20 = vadd.f32 %v2707_v9, %v8067_v46  ;;  %v3145_v9 = vadd.f32 %v3143_v19, %v9812_v18 }
0x1040   :  { %5955 = vtanh.f32 %v2709_v20 }
0x1041   :  { %v2702_v13 = vpop.f32.mrf.mxu3 }
0x1042   :  { %v2711_v15 = vmul.f32 %v2702_v13, %v8059_v55 }
0x1043   :  { %v2689_v48 = vpop.f32.mrf.mxu2 }
0x1044   :  { %v2708_v60 = vmul.f32 %v2689_v48, %v8065_v38  ;;  %v8259_v48 = vld [vmem:[%s6679_s29] sm:$0x1] }
0x1045   :  { %9813 = vst [vmem:[#allocation49_spill] sm:$0xff] %v8259_v48  ;;  %v2767_v13 = vmul.f32 0.25, %v8259_v48 }
0x1046   :  { %v2710_v57 = vadd.f32 %v2708_v60, %v8074_v28  ;;  %v5956_v17 = vpop.eup %5955 }
0x1047   :  { %v2715_v41 = vmul.f32 %v5956_v17, %v5956_v17  ;;  %v2769_v60 = vperm.slane %v2767_v13, 0 }
0x1048   :  { %5957 = vtanh.f32 %v2710_v57  ;;  %v9814_v57 = vld [vmem:[#allocation31_spill] sm:$0xff] }
0x1049   :  { %v2704_v59 = vpop.f32.mrf.mxu3  ;;  %v2717_v62 = vsub.f32 1.0, %v2715_v41  ;;  %v9815_v41 = vld [vmem:[#allocation32_spill] sm:$0xff] }
0x104a   :  { %v2712_v54 = vmul.f32 %v2704_v59, %v8065_v38 }
0x104b   :  { %v2719_v36 = vmul.f32 %v2717_v62, %v2711_v15 }
0x104e   :  { %v5958_v14 = vpop.eup %5957 }
0x104f   :  { %v2721_v23 = vpack.c.bf16 %v5958_v14, %v5956_v17  ;;  %v2716_v49 = vmul.f32 %v5958_v14, %v5958_v14  ;;  %v2771_v17 = vadd.f32 %v2769_v60, %v9814_v57  ;;  %v2772_v14 = vadd.f32 %v2769_v60, %v9815_v41  ;;  %v9819_v60 = vld [vmem:[#allocation34_spill] sm:$0xff] }
0x1051   :  { %v2718_v46 = vsub.f32 1.0, %v2716_v49  ;;  %2730 = vmatmul.bf16.vlgmr.msrb.gmra.mxu0 %v2721_v23  ;;  %v5626_v59 = vmul.f32 -1.442695, %v2772_v14 }
0x1052   :  { %3116 = vmatpush.bf16.msrb.mxu0 %v8210_v8 }
0x1053   :  { %v2720_v28 = vmul.f32 %v2718_v46, %v2712_v54 }
0x1055   :  { %v2736_v32 = vpack.c.bf16 %v2720_v28, %v2719_v36 }
0x1056   :  { %3117 = vmatpush.bf16.msrb.mxu0 %v8213_v39 }
0x1057   :  { %2745 = vmatmul.bf16.vlgmr.msrb.gmra.mxu1 %v2736_v32 }
0x1058   :  { %3171 = vmatpush.bf16.msrb.mxu1 %v7898_v56 }
0x105a   :  { %3118 = vmatpush.bf16.msrb.mxu0 %v8217_v11 }
0x105c   :  { %3172 = vmatpush.bf16.msrb.mxu1 %v7902_v61 }
0x105e   :  { %3119 = vmatpush.bf16.msrb.mxu0 %v7905_v6 }
0x1060   :  { %3173 = vmatpush.bf16.msrb.mxu1 %v7908_v10 }
0x1062   :  { %3120 = vmatpush.bf16.msrb.mxu0 %v7911_v42 }
0x1064   :  { %3174 = vmatpush.bf16.msrb.mxu1 %v7914_v33 }
0x1066   :  { %3121 = vmatpush.bf16.msrb.mxu0 %v7917_v30 }
0x1068   :  { %3175 = vmatpush.bf16.msrb.mxu1 %v7920_v58 }
0x106a   :  { %3122 = vmatpush.bf16.msrb.mxu0 %v7923_v25 }
0x106c   :  { %3176 = vmatpush.bf16.msrb.mxu1 %v7926_v45 }
0x106e   :  { %3123 = vmatpush.bf16.msrb.mxu0 %v7929_v47 }
0x1070   :  { %3177 = vmatpush.bf16.msrb.mxu1 %v7932_v50 }
0x1074   :  { %3178 = vmatpush.bf16.msrb.mxu1 %v7935_v35 }
0x10ce   :  { %v2731_v56 = vpop.f32.mrf.mxu0 }
0x10cf   :  { %v2751_v61 = vmul.f32 %v2731_v56, %v8099_v31 }
0x10d1   :  { %v2753_v10 = vadd.f32 %v2751_v61, %v8110_v2 }
0x10d3   :  { %v2763_v25 = vmul.f32 0.125, %v2753_v10 }
0x10d4   :  { %v2746_v6 = vpop.f32.mrf.mxu1 }
0x10d5   :  { %v2755_v42 = vmul.f32 %v2746_v6, %v8099_v31  ;;  %v2765_v35 = vadd.f32 %v2763_v25, %v7793_v5 }
0x10d6   :  { %v2733_v33 = vpop.f32.mrf.mxu0 }
0x10d7   :  { %v2752_v30 = vmul.f32 %v2733_v33, %v8104_v37  ;;  %v2757_v58 = vmul.f32 %v7945_v43, %v2755_v42  ;;  %v3142_v43 = vmul.f32 2.0, %v8114_v26  ;;  %v5625_v26 = vmul.f32 -1.442695, %v2771_v17 }
0x10d9   :  { %v2754_v45 = vadd.f32 %v2752_v30, %v8116_v29  ;;  %2759 = vadd.xlane.f32.xlu0 %v2757_v58  ;;  %5959 = vpow2.f32 %v5625_v26 }
0x10da   :  { %5961 = vpow2.f32 %v5626_v59 }
0x10db   :  { %v2764_v47 = vmul.f32 0.125, %v2754_v45  ;;  %v3147_v53 = vmul.f32 2.0, %v2754_v45 }
0x10dc   :  { %v2748_v50 = vpop.f32.mrf.mxu1 }
0x10dd   :  { %v2766_v55 = vadd.f32 %v2764_v47, %v7796_v34  ;;  %v2756_v38 = vmul.f32 %v2748_v50, %v8104_v37  ;;  %v9811_v37 = vld [vmem:[#allocation55_spill] sm:$0xff]  ;;  %v8256_v20 = vadd.f32 %v3147_v53, %v3145_v9  ;;  %v8267_v47 = vld [vmem:[%s9698_s14] ss:$0 sm:$0xff] }
0x10de   :  { %v3144_v29 = vadd.f32 %v3142_v43, %v9811_v37  ;;  %9816 = vst [vmem:[#allocation52_spill] sm:$0xff] %v8267_v47  ;;  %v9818_v43 = vld [vmem:[#allocation33_spill] sm:$0xff] }
0x10df   :  { %v2983_v2 = vpack.c.bf16 %v2766_v55, %v2765_v35  ;;  %v2758_v31 = vmul.f32 %v7957_v51, %v2756_v38  ;;  %v3146_v51 = vmul.f32 2.0, %v2753_v10  ;;  %v5960_v62 = vpop.eup %5959  ;;  %v8272_v35 = vld [vmem:[%s9697_s3] sm:$0x1] }
0x10e0   :  { %v2779_v3 = vadd.f32 1.0, %v5960_v62  ;;  %v5962_v23 = vpop.eup %5961  ;;  %9817 = vst [vmem:[#allocation39_spill] sm:$0xff] %v8272_v35  ;;  %v2815_v55 = vmul.f32 0.25, %v8272_v35 }
0x10e1   :  { %2992 = vmatmul.bf16.vlgmr.msra.gmra.mxu2 %v2983_v2  ;;  %2761 = vadd.xlane.f32.xlu1 %v2758_v31  ;;  %v8252_v4 = vadd.f32 %v3146_v51, %v3144_v29  ;;  %v2780_v49 = vadd.f32 1.0, %v5962_v23 }
0x10e2   :  { %3198 = vmatpush.bf16.msra.mxu2 %v8142_v16  ;;  %5963 = vrcp.f32 %v2779_v3  ;;  %v2792_v6 = vand.u32 2147483648, %v2779_v3  ;;  %vm2786_vm3 = vweird.f32 %v2779_v3  ;;  %v2790_v10 = vand.u32 2147483647, %v2779_v3 }
0x10e3   :  { %5965 = vrcp.f32 %v2780_v49  ;;  %v2807_v45 = vand.u32 2147483648, %v2780_v49  ;;  %vm2801_vm7 = vweird.f32 %v2780_v49  ;;  %v2805_v38 = vand.u32 2147483647, %v2780_v49 }
0x10e4   :  { %v2793_v30 = vor.u32 1.1754944e-38, %v2792_v6  ;;  %vm2791_vm5 = vcmp.eq.f32.partialorder %v2790_v10, 8.507059e+37  ;;  %v2817_v37 = vperm.slane %v2815_v55, 0  ;;  %v8326_v55 = vld [vmem:[%s9704_s19] sm:$0x1] }
0x10e5   :  { %v2808_v31 = vor.u32 1.1754944e-38, %v2807_v45  ;;  %vm2806_vm9 = vcmp.eq.f32.partialorder %v2805_v38, 8.507059e+37  ;;  %v8319_v45 = vld [vmem:[#allocation7 + $0x8] sm:$0xff]  ;;  %9822 = vst [vmem:[#allocation57_spill] sm:$0xff] %v8326_v55  ;;  %v2821_v38 = vmul.f32 0.25, %v8326_v55 }
0x10e6   :  { %3199 = vmatpush.bf16.msra.mxu2 %v8147_v22 }
0x10e8   :  { %v5964_v15 = vpop.eup %5963 }
0x10e9   :  { %v2782_v54 = vmul.f32 %v5964_v15, %v2779_v3  ;;  %v5966_v36 = vpop.eup %5965  ;;  %vm2787_vm2 = vweird.f32 %v5964_v15 }
0x10ea   :  { %3200 = vmatpush.bf16.msra.mxu2 %v8151_v40  ;;  %v2797_v32 = vmul.f32 %v5966_v36, %v2780_v49  ;;  %vm2788_vm4 = vmor %vm2786_vm3, %vm2787_vm2  ;;  %vm2802_vm6 = vweird.f32 %v5966_v36 }
0x10eb   :  { %v2783_v46 = vsub.f32 1.0, %v2782_v54  ;;  %vm2803_vm8 = vmor %vm2801_vm7, %vm2802_vm6 }
0x10ec   :  { %v2798_v61 = vsub.f32 1.0, %v2797_v32  ;;  %v9821_v32 = vld [vmem:[#allocation38_spill] sm:$0xff] }
0x10ed   :  { %v2784_v28 = vmul.f32 %v5964_v15, %v2783_v46 }
0x10ee   :  { %3201 = vmatpush.bf16.msra.mxu2 %v8155_v24  ;;  %v2799_v33 = vmul.f32 %v5966_v36, %v2798_v61 }
0x10ef   :  { %v2785_v56 = vadd.f32 %v5964_v15, %v2784_v28 }
0x10f0   :  { %v2800_v25 = vadd.f32 %v5966_v36, %v2799_v33  ;;  %v8307_v33 = vld [vmem:[#allocation7 + $0x20] sm:$0xff] }
0x10f1   :  { %v2789_v42 = vsel %vm2788_vm4, %v5964_v15, %v2785_v56 }
0x10f2   :  { %3202 = vmatpush.bf16.msra.mxu2 %v8159_v44  ;;  %v8264_v58 = vsel %vm2791_vm5, %v2793_v30, %v2789_v42  ;;  %v2804_v2 = vsel %vm2803_vm8, %v5966_v36, %v2800_v25  ;;  %v9820_v36 = vld [vmem:[#allocation37_spill] sm:$0xff]  ;;  %v8311_v30 = vld [vmem:[#allocation7 + $0x18] sm:$0xff]  ;;  %v8315_v25 = vld [vmem:[#allocation7 + $0x10] sm:$0xff] }
0x10f3   :  { %v2811_v50 = vmul.f32 %v8267_v47, %v8264_v58  ;;  %v8276_v29 = vsel %vm2806_vm9, %v2808_v31, %v2804_v2  ;;  %v8291_v28 = vmul.f32 %v8264_v58, %v9820_v36  ;;  %v2823_v2 = vperm.slane %v2821_v38, 0  ;;  %v9823_v31 = vld [vmem:[#allocation41_spill] sm:$0xff] }
0x10f4   :  { %v2812_v9 = vmul.f32 %v8267_v47, %v8276_v29  ;;  %v8295_v56 = vmul.f32 %v8276_v29, %v9821_v32 }
0x10f5   :  { %v2813_v51 = vadd.f32 %v2811_v50, %v9818_v43  ;;  %v8322_v50 = vld [vmem:[#allocation7] sm:$0xff] }
0x10f6   :  { %3203 = vmatpush.bf16.msra.mxu2 %v8163_v0  ;;  %v2814_v17 = vadd.f32 %v2812_v9, %v9819_v60  ;;  %v8393_v60 = vld [vmem:[%s9725_s23] ss:$0 sm:$0xff] }
0x10f7   :  { %v8278_v53 = vadd.f32 %v2817_v37, %v2813_v51  ;;  %v2825_v51 = vadd.f32 %v2823_v2, %v9823_v31  ;;  %9832 = vst [vmem:[#allocation61_spill] sm:$0xff] %v8393_v60 }
0x10f8   :  { %v8285_v14 = vadd.f32 %v2817_v37, %v2814_v17 }
0x10f9   :  { %v5627_v37 = vmul.f32 -1.442695, %v2825_v51 }
0x10fa   :  { %3204 = vmatpush.bf16.msra.mxu2 %v8167_v1 }
0x10fe   :  { %3205 = vmatpush.bf16.msra.mxu2 %v8171_v63 }
0x1164   :  { %v2993_v19 = vpop.f32.mrf.mxu2 }
0x1165   :  { %v2998_v18 = vmul.f32 %v2993_v19, %v8264_v58  ;;  %v9824_v19 = vld [vmem:[#allocation42_spill] sm:$0xff] }
0x1167   :  { %v3000_v13 = vadd.f32 %v2998_v18, %v8278_v53  ;;  %v2826_v18 = vadd.f32 %v2823_v2, %v9824_v19 }
0x1169   :  { %5967 = vtanh.f32 %v3000_v13  ;;  %v5628_v9 = vmul.f32 -1.442695, %v2826_v18 }
0x116c   :  { %v2995_v26 = vpop.f32.mrf.mxu2 }
0x116d   :  { %v2999_v59 = vmul.f32 %v2995_v26, %v8276_v29 }
0x116f   :  { %v3001_v62 = vadd.f32 %v2999_v59, %v8285_v14  ;;  %v5968_v3 = vpop.eup %5967 }
0x1170   :  { %v3006_v23 = vmul.f32 %v5968_v3, %v5968_v3 }
0x1171   :  { %5969 = vtanh.f32 %v3001_v62 }
0x1172   :  { %v3008_v15 = vsub.f32 1.0, %v3006_v23  ;;  %5971 = vpow2.f32 %v5627_v37 }
0x1173   :  { %5973 = vpow2.f32 %v5628_v9 }
0x1174   :  { %v3010_v6 = vmul.f32 %v3008_v15, %v8291_v28 }
0x1177   :  { %v5970_v49 = vpop.eup %5969 }
0x1178   :  { %v3007_v54 = vmul.f32 %v5970_v49, %v5970_v49  ;;  %v3012_v46 = vpack.c.bf16 %v5970_v49, %v5968_v3  ;;  %v5972_v13 = vpop.eup %5971 }
0x1179   :  { %v2833_v17 = vadd.f32 1.0, %v5972_v13  ;;  %v5974_v26 = vpop.eup %5973  ;;  %v8334_v13 = vld [vmem:[%s9712_s12] ss:$0 sm:$0xff] }
0x117a   :  { %v3009_v61 = vsub.f32 1.0, %v3007_v54  ;;  %3021 = vmatmul.bf16.vlgmr.msra.gmra.mxu3 %v3012_v46  ;;  %v2834_v59 = vadd.f32 1.0, %v5974_v26  ;;  %9825 = vst [vmem:[#allocation59_spill] sm:$0xff] %v8334_v13  ;;  %v8339_v26 = vld [vmem:[%s9715_s20] sm:$0x1] }
0x117b   :  { %3213 = vmatpush.bf16.msra.mxu3 %v8142_v16  ;;  %5975 = vrcp.f32 %v2833_v17  ;;  %vm2840_vm10 = vweird.f32 %v2833_v17  ;;  %v2846_v46 = vand.u32 2147483648, %v2833_v17  ;;  %9826 = vst [vmem:[#allocation58_spill] sm:$0xff] %v8339_v26 }
0x117c   :  { %v3011_v10 = vmul.f32 %v3009_v61, %v8295_v56  ;;  %5977 = vrcp.f32 %v2834_v59  ;;  %vm2855_vm14 = vweird.f32 %v2834_v59  ;;  %v2861_v37 = vand.u32 2147483648, %v2834_v59 }
0x117d   :  { %v2859_v9 = vand.u32 2147483647, %v2834_v59 }
0x117e   :  { %v3027_v42 = vpack.c.bf16 %v3011_v10, %v3010_v6  ;;  %v2844_v6 = vand.u32 2147483647, %v2833_v17 }
0x117f   :  { %3214 = vmatpush.bf16.msra.mxu3 %v8147_v22  ;;  %vm2860_vm1 = vcmp.eq.f32.partialorder %v2859_v9, 8.507059e+37 }
0x1180   :  { %3036 = vmatmul.bf16.vlgmr.msra.gmra.mxu0 %v3027_v42  ;;  %v2847_v42 = vor.u32 1.1754944e-38, %v2846_v46  ;;  %vm2845_vm13 = vcmp.eq.f32.partialorder %v2844_v6, 8.507059e+37 }
0x1181   :  { %3242 = vmatpush.bf16.msra.mxu0 %v8182_v21  ;;  %v5976_v62 = vpop.eup %5975 }
0x1182   :  { %v2836_v3 = vmul.f32 %v5976_v62, %v2833_v17  ;;  %v5978_v49 = vpop.eup %5977  ;;  %vm2841_vm11 = vweird.f32 %v5976_v62 }
0x1183   :  { %3215 = vmatpush.bf16.msra.mxu3 %v8151_v40  ;;  %v2851_v54 = vmul.f32 %v5978_v49, %v2834_v59  ;;  %vm2842_vm12 = vmor %vm2840_vm10, %vm2841_vm11  ;;  %vm2856_vm15 = vweird.f32 %v5978_v49 }
0x1184   :  { %v2837_v23 = vsub.f32 1.0, %v2836_v3  ;;  %vm2857_vm0 = vmor %vm2855_vm14, %vm2856_vm15  ;;  %v2869_v3 = vmul.f32 0.25, %v8339_v26 }
0x1185   :  { %3243 = vmatpush.bf16.msra.mxu0 %v8185_v7  ;;  %v2852_v10 = vsub.f32 1.0, %v2851_v54 }
0x1186   :  { %v2838_v15 = vmul.f32 %v5976_v62, %v2837_v23  ;;  %v2871_v46 = vperm.slane %v2869_v3, 0 }
0x1187   :  { %3216 = vmatpush.bf16.msra.mxu3 %v8155_v24  ;;  %v2853_v2 = vmul.f32 %v5978_v49, %v2852_v10 }
0x1188   :  { %v2839_v61 = vadd.f32 %v5976_v62, %v2838_v15  ;;  %v9827_v15 = vld [vmem:[#allocation43_spill] sm:$0xff] }
0x1189   :  { %3244 = vmatpush.bf16.msra.mxu0 %v8189_v12  ;;  %v2854_v18 = vadd.f32 %v5978_v49, %v2853_v2  ;;  %v9828_v2 = vld [vmem:[#allocation44_spill] sm:$0xff] }
0x118a   :  { %v2843_v38 = vsel %vm2842_vm12, %v5976_v62, %v2839_v61  ;;  %v2862_v62 = vor.u32 1.1754944e-38, %v2861_v37 }
0x118b   :  { %3217 = vmatpush.bf16.msra.mxu3 %v8159_v44  ;;  %v8331_v51 = vsel %vm2845_vm13, %v2847_v42, %v2843_v38  ;;  %v2858_v23 = vsel %vm2857_vm0, %v5978_v49, %v2854_v18 }
0x118c   :  { %v2865_v17 = vmul.f32 %v8334_v13, %v8331_v51  ;;  %v8343_v61 = vsel %vm2860_vm1, %v2862_v62, %v2858_v23 }
0x118d   :  { %3245 = vmatpush.bf16.msra.mxu0 %v8307_v33  ;;  %v2866_v42 = vmul.f32 %v8334_v13, %v8343_v61 }
0x118e   :  { %v2867_v54 = vadd.f32 %v2865_v17, %v9827_v15 }
0x118f   :  { %3218 = vmatpush.bf16.msra.mxu3 %v8163_v0  ;;  %v2868_v26 = vadd.f32 %v2866_v42, %v9828_v2 }
0x1190   :  { %v8345_v59 = vadd.f32 %v2871_v46, %v2867_v54 }
0x1191   :  { %3246 = vmatpush.bf16.msra.mxu0 %v8311_v30  ;;  %v8352_v18 = vadd.f32 %v2871_v46, %v2868_v26 }
0x1193   :  { %3219 = vmatpush.bf16.msra.mxu3 %v8167_v1 }
0x1195   :  { %3247 = vmatpush.bf16.msra.mxu0 %v8315_v25 }
0x1197   :  { %3220 = vmatpush.bf16.msra.mxu3 %v8171_v63 }
0x1199   :  { %3248 = vmatpush.bf16.msra.mxu0 %v8319_v45 }
0x119d   :  { %3249 = vmatpush.bf16.msra.mxu0 %v8322_v50 }
0x11fd   :  { %v3022_v6 = vpop.f32.mrf.mxu3  ;;  %v3037_v37 = vpop.f32.mrf.mxu0 }
0x11fe   :  { %v3042_v10 = vmul.f32 %v3022_v6, %v8331_v51 }
0x1200   :  { %v3044_v38 = vadd.f32 %v3042_v10, %v8345_v59  ;;  %v3046_v10 = vmul.f32 %v3037_v37, %v8331_v51  ;;  %v8374_v37 = vld [vmem:[#allocation8 + $0x10] sm:$0xff] }
0x1202   :  { %5979 = vtanh.f32 %v3044_v38 }
0x1205   :  { %v3024_v49 = vpop.f32.mrf.mxu3  ;;  %v3039_v54 = vpop.f32.mrf.mxu0 }
0x1206   :  { %v3043_v9 = vmul.f32 %v3024_v49, %v8343_v61  ;;  %v3047_v42 = vmul.f32 %v3039_v54, %v8343_v61  ;;  %v9830_v54 = vld [vmem:[#allocation50_spill] sm:$0xff] }
0x1208   :  { %v3045_v17 = vadd.f32 %v3043_v9, %v8352_v18  ;;  %v5980_v3 = vpop.eup %5979  ;;  %v8378_v9 = vld [vmem:[#allocation8 + $0x8] sm:$0xff] }
0x1209   :  { %v3050_v62 = vmul.f32 %v5980_v3, %v5980_v3 }
0x120a   :  { %5981 = vtanh.f32 %v3045_v17  ;;  %v8381_v17 = vld [vmem:[#allocation8] sm:$0xff] }
0x120b   :  { %v3052_v6 = vsub.f32 1.0, %v3050_v62 }
0x120d   :  { %v3054_v26 = vmul.f32 %v3052_v6, %v3046_v10 }
0x1210   :  { %v5982_v23 = vpop.eup %5981 }
0x1211   :  { %v3056_v15 = vpack.c.bf16 %v5982_v23, %v5980_v3  ;;  %v3051_v13 = vmul.f32 %v5982_v23, %v5982_v23  ;;  %v8385_v3 = vld [vmem:[%s9720_s27] sm:$0x1] }
0x1212   :  { %9829 = vst [vmem:[#allocation60_spill] sm:$0xff] %v8385_v3  ;;  %v2875_v62 = vmul.f32 0.25, %v8385_v3 }
0x1213   :  { %v3053_v38 = vsub.f32 1.0, %v3051_v13  ;;  %3065 = vmatmul.bf16.vlgmr.msra.gmra.mxu1 %v3056_v15  ;;  %v8366_v13 = vld [vmem:[#allocation8 + $0x20] sm:$0xff]  ;;  %v8370_v15 = vld [vmem:[#allocation8 + $0x18] sm:$0xff] }
0x1214   :  { %3257 = vmatpush.bf16.msra.mxu1 %v8182_v21  ;;  %v2877_v23 = vperm.slane %v2875_v62, 0 }
0x1215   :  { %v3055_v46 = vmul.f32 %v3053_v38, %v3047_v42  ;;  %v9831_v42 = vld [vmem:[#allocation51_spill] sm:$0xff] }
0x1216   :  { %v2879_v6 = vadd.f32 %v2877_v23, %v9830_v54  ;;  %v2880_v38 = vadd.f32 %v2877_v23, %v9831_v42 }
0x1217   :  { %v3071_v49 = vpack.c.bf16 %v3055_v46, %v3054_v26 }
0x1218   :  { %3258 = vmatpush.bf16.msra.mxu1 %v8185_v7  ;;  %v5629_v10 = vmul.f32 -1.442695, %v2879_v6  ;;  %v5630_v26 = vmul.f32 -1.442695, %v2880_v38 }
0x1219   :  { %3080 = vmatmul.bf16.vlgmr.msrb.gmra.mxu2 %v3071_v49 }
0x121a   :  { %3286 = vmatpush.bf16.msrb.mxu2 %v8210_v8  ;;  %5983 = vpow2.f32 %v5629_v10 }
0x121b   :  { %5985 = vpow2.f32 %v5630_v26 }
0x121c   :  { %3259 = vmatpush.bf16.msra.mxu1 %v8189_v12 }
0x121e   :  { %3287 = vmatpush.bf16.msrb.mxu2 %v8213_v39 }
0x1220   :  { %3260 = vmatpush.bf16.msra.mxu1 %v8307_v33  ;;  %v5984_v46 = vpop.eup %5983 }
0x1221   :  { %v2887_v49 = vadd.f32 1.0, %v5984_v46  ;;  %v5986_v2 = vpop.eup %5985 }
0x1222   :  { %3288 = vmatpush.bf16.msrb.mxu2 %v8217_v11  ;;  %v2888_v19 = vadd.f32 1.0, %v5986_v2 }
0x1223   :  { %5987 = vrcp.f32 %v2887_v49  ;;  %vm2894_vm2 = vweird.f32 %v2887_v49  ;;  %v2900_v6 = vand.u32 2147483648, %v2887_v49  ;;  %v2898_v23 = vand.u32 2147483647, %v2887_v49 }
0x1224   :  { %3261 = vmatpush.bf16.msra.mxu1 %v8311_v30  ;;  %5989 = vrcp.f32 %v2888_v19  ;;  %vm2909_vm6 = vweird.f32 %v2888_v19  ;;  %v2913_v54 = vand.u32 2147483647, %v2888_v19 }
0x1225   :  { %v2901_v26 = vor.u32 1.1754944e-38, %v2900_v6  ;;  %vm2899_vm5 = vcmp.eq.f32.partialorder %v2898_v23, 8.507059e+37 }
0x1226   :  { %3289 = vmatpush.bf16.msrb.mxu2 %v8366_v13  ;;  %vm2914_vm9 = vcmp.eq.f32.partialorder %v2913_v54, 8.507059e+37 }
0x1228   :  { %3262 = vmatpush.bf16.msra.mxu1 %v8315_v25 }
0x1229   :  { %v5988_v31 = vpop.eup %5987 }
0x122a   :  { %3290 = vmatpush.bf16.msrb.mxu2 %v8370_v15  ;;  %v2890_v55 = vmul.f32 %v5988_v31, %v2887_v49  ;;  %v5990_v36 = vpop.eup %5989  ;;  %vm2895_vm3 = vweird.f32 %v5988_v31  ;;  %v8398_v49 = vld [vmem:[%s9728_s1] sm:$0x1] }
0x122b   :  { %v2905_v62 = vmul.f32 %v5990_v36, %v2888_v19  ;;  %vm2896_vm4 = vmor %vm2894_vm2, %vm2895_vm3  ;;  %vm2910_vm7 = vweird.f32 %v5990_v36  ;;  %9833 = vst [vmem:[#allocation62_spill] sm:$0xff] %v8398_v49 }
0x122c   :  { %3263 = vmatpush.bf16.msra.mxu1 %v8319_v45  ;;  %v2891_v32 = vsub.f32 1.0, %v2890_v55  ;;  %v2915_v55 = vand.u32 2147483648, %v2888_v19  ;;  %vm2911_vm8 = vmor %vm2909_vm6, %vm2910_vm7 }
0x122d   :  { %v2906_v38 = vsub.f32 1.0, %v2905_v62  ;;  %v2923_v62 = vmul.f32 0.25, %v8398_v49 }
0x122e   :  { %3291 = vmatpush.bf16.msrb.mxu2 %v8374_v37  ;;  %v2892_v3 = vmul.f32 %v5988_v31, %v2891_v32 }
0x122f   :  { %v2907_v2 = vmul.f32 %v5990_v36, %v2906_v38  ;;  %v2925_v38 = vperm.slane %v2923_v62, 0 }
0x1230   :  { %3264 = vmatpush.bf16.msra.mxu1 %v8322_v50  ;;  %v2893_v10 = vadd.f32 %v5988_v31, %v2892_v3 }
0x1231   :  { %v2908_v32 = vadd.f32 %v5990_v36, %v2907_v2 }
0x1232   :  { %3292 = vmatpush.bf16.msrb.mxu2 %v8378_v9  ;;  %v2897_v46 = vsel %vm2896_vm4, %v5988_v31, %v2893_v10  ;;  %v2916_v31 = vor.u32 1.1754944e-38, %v2915_v55  ;;  %v9834_v10 = vld [vmem:[#allocation35_spill] sm:$0xff] }
0x1233   :  { %v8390_v42 = vsel %vm2899_vm5, %v2901_v26, %v2897_v46  ;;  %v2912_v6 = vsel %vm2911_vm8, %v5990_v36, %v2908_v32 }
0x1234   :  { %v2919_v3 = vmul.f32 %v8393_v60, %v8390_v42  ;;  %v8402_v26 = vsel %vm2914_vm9, %v2916_v31, %v2912_v6 }
0x1235   :  { %v2920_v43 = vmul.f32 %v8393_v60, %v8402_v26 }
0x1236   :  { %3293 = vmatpush.bf16.msrb.mxu2 %v8381_v17  ;;  %v2921_v23 = vadd.f32 %v2919_v3, %v9834_v10 }
0x1237   :  { %v2922_v49 = vadd.f32 %v2920_v43, %v9769_v27 }
0x1238   :  { %v8404_v19 = vadd.f32 %v2925_v38, %v2921_v23 }
0x1239   :  { %v8411_v54 = vadd.f32 %v2925_v38, %v2922_v49 }
0x1290   :  { %v3066_v46 = vpop.f32.mrf.mxu1 }
0x1291   :  { %v3086_v2 = vmul.f32 %v3066_v46, %v8390_v42 }
0x1293   :  { %v3088_v35 = vadd.f32 %v3086_v2, %v8404_v19 }
0x1295   :  { %5991 = vtanh.f32 %v3088_v35 }
0x1298   :  { %v3068_v36 = vpop.f32.mrf.mxu1 }
0x1299   :  { %v3087_v55 = vmul.f32 %v3068_v36, %v8402_v26 }
0x129b   :  { %v3089_v32 = vadd.f32 %v3087_v55, %v8411_v54  ;;  %v5992_v62 = vpop.eup %5991  ;;  %v8419_v55 = vld [vmem:[#allocation2 + $0x38] sm:$0xff] }
0x129c   :  { %v3081_v3 = vpop.f32.mrf.mxu2  ;;  %v3094_v31 = vmul.f32 %v5992_v62, %v5992_v62 }
0x129d   :  { %5993 = vtanh.f32 %v3089_v32  ;;  %v3090_v46 = vmul.f32 %v3081_v3, %v8390_v42  ;;  %v8423_v32 = vld [vmem:[#allocation2 + $0x30] sm:$0xff]  ;;  %v8435_v3 = vld [vmem:[#allocation2 + $0x18] sm:$0xff] }
0x129e   :  { %v3096_v10 = vsub.f32 1.0, %v3094_v31  ;;  %9837 = vst [vmem:[#allocation47_spill] sm:$0xff] %v8435_v3  ;;  %v8443_v31 = vld [vmem:[#allocation2 + $0x8] sm:$0xff] }
0x129f   :  { %9839 = vst [vmem:[#allocation56_spill] sm:$0xff] %v8443_v31 }
0x12a0   :  { %v3098_v49 = vmul.f32 %v3096_v10, %v3090_v46  ;;  %v8431_v10 = vld [vmem:[#allocation2 + $0x20] sm:$0xff] }
0x12a1   :  { %9836 = vst [vmem:[#allocation40_spill] sm:$0xff] %v8431_v10 }
0x12a3   :  { %v5994_v6 = vpop.eup %5993 }
0x12a4   :  { %v3100_v23 = vpack.c.bf16 %v5994_v6, %v5992_v62  ;;  %v3083_v2 = vpop.f32.mrf.mxu2  ;;  %v3095_v60 = vmul.f32 %v5994_v6, %v5994_v6  ;;  %v8439_v62 = vld [vmem:[#allocation2 + $0x10] sm:$0xff]  ;;  %v8446_v6 = vld [vmem:[#allocation2] sm:$0xff] }
0x12a5   :  { %v3091_v35 = vmul.f32 %v3083_v2, %v8402_v26  ;;  %9838 = vst [vmem:[#allocation55_spill] sm:$0xff] %v8439_v62 }
0x12a6   :  { %v3097_v43 = vsub.f32 1.0, %v3095_v60  ;;  %3109 = vmatmul.bf16.vlgmr.msrb.gmra.mxu3 %v3100_v23  ;;  %v8427_v60 = vld [vmem:[#allocation2 + $0x28] sm:$0xff]  ;;  %9840 = vst [vmem:[#allocation63_spill] sm:$0xff] %v8446_v6  ;;  %v8450_v23 = vld [vmem:[%s9730_s2] sm:$0x1] }
0x12a7   :  { %3301 = vmatpush.bf16.msrb.mxu3 %v8210_v8  ;;  %9835 = vst [vmem:[#allocation46_spill] sm:$0xff] %v8427_v60  ;;  %v2929_v46 = vmul.f32 0.25, %v8450_v23 }
0x12a8   :  { %v3099_v38 = vmul.f32 %v3097_v43, %v3091_v35  ;;  %9841 = vst [vmem:[#allocation64_spill] sm:$0xff] %v8450_v23  ;;  %v9842_v35 = vld [vmem:[#allocation53_spill] sm:$0xff] }
0x12a9   :  { %v2931_v2 = vperm.slane %v2929_v46, 0 }
0x12aa   :  { %v3115_v36 = vpack.c.bf16 %v3099_v38, %v3098_v49  ;;  %v9843_v38 = vld [vmem:[#allocation54_spill] sm:$0xff] }
0x12ab   :  { %3302 = vmatpush.bf16.msrb.mxu3 %v8213_v39  ;;  %v2933_v43 = vadd.f32 %v2931_v2, %v9842_v35 }
0x12ac   :  { %3124 = vmatmul.bf16.vlgmr.msrb.gmra.mxu0 %v3115_v36  ;;  %v2934_v36 = vadd.f32 %v2931_v2, %v9843_v38 }
0x12ad   :  { %3548 = vmatpush.bf16.msrb.mxu0 %v8419_v55  ;;  %v5631_v49 = vmul.f32 -1.442695, %v2933_v43 }
0x12ae   :  { %v5632_v27 = vmul.f32 -1.442695, %v2934_v36 }
0x12af   :  { %3303 = vmatpush.bf16.msrb.mxu3 %v8217_v11  ;;  %5995 = vpow2.f32 %v5631_v49 }
0x12b0   :  { %5997 = vpow2.f32 %v5632_v27 }
0x12b1   :  { %3549 = vmatpush.bf16.msrb.mxu0 %v8423_v32 }
0x12b3   :  { %3304 = vmatpush.bf16.msrb.mxu3 %v8366_v13 }
0x12b5   :  { %3550 = vmatpush.bf16.msrb.mxu0 %v8427_v60  ;;  %v5996_v47 = vpop.eup %5995 }
0x12b6   :  { %v2941_v41 = vadd.f32 1.0, %v5996_v47  ;;  %v5998_v57 = vpop.eup %5997 }
0x12b7   :  { %3305 = vmatpush.bf16.msrb.mxu3 %v8370_v15  ;;  %v2942_v48 = vadd.f32 1.0, %v5998_v57 }
0x12b8   :  { %5999 = vrcp.f32 %v2941_v41  ;;  %vm2948_vm10 = vweird.f32 %v2941_v41  ;;  %v2954_v35 = vand.u32 2147483648, %v2941_v41  ;;  %v2952_v49 = vand.u32 2147483647, %v2941_v41 }
0x12b9   :  { %3551 = vmatpush.bf16.msrb.mxu0 %v8431_v10  ;;  %6001 = vrcp.f32 %v2942_v48  ;;  %vm2963_vm14 = vweird.f32 %v2942_v48  ;;  %v2969_v57 = vand.u32 2147483648, %v2942_v48 }
0x12ba   :  { %v2955_v47 = vor.u32 1.1754944e-38, %v2954_v35  ;;  %vm2953_vm13 = vcmp.eq.f32.partialorder %v2952_v49, 8.507059e+37 }
0x12bb   :  { %3306 = vmatpush.bf16.msrb.mxu3 %v8374_v37 }
0x12bd   :  { %3552 = vmatpush.bf16.msrb.mxu0 %v8435_v3 }
0x12bf   :  { %3307 = vmatpush.bf16.msrb.mxu3 %v8378_v9 }
0x12c1   :  { %3553 = vmatpush.bf16.msrb.mxu0 %v8439_v62 }
0x12c3   :  { %3308 = vmatpush.bf16.msrb.mxu3 %v8381_v17 }
0x12c5   :  { %3554 = vmatpush.bf16.msrb.mxu0 %v8443_v31  ;;  %v6000_v31 = vpop.eup %5999 }
0x12c6   :  { %v6002_v62 = vpop.eup %6001  ;;  %vm2949_vm11 = vweird.f32 %v6000_v31 }
0x12c7   :  { %v2959_v23 = vmul.f32 %v6002_v62, %v2942_v48  ;;  %vm2950_vm12 = vmor %vm2948_vm10, %vm2949_vm11  ;;  %vm2964_vm15 = vweird.f32 %v6002_v62 }
0x12c8   :  { %vm2965_vm0 = vmor %vm2963_vm14, %vm2964_vm15 }
0x12c9   :  { %3555 = vmatpush.bf16.msrb.mxu0 %v8446_v6  ;;  %v2944_v6 = vmul.f32 %v6000_v31, %v2941_v41  ;;  %v2960_v43 = vsub.f32 1.0, %v2959_v23  ;;  %v8458_v23 = vld [vmem:[%s9734_s7] ss:$0 sm:$0xff] }
0x12ca   :  { %9844 = vst [vmem:[#allocation65_spill] sm:$0xff] %v8458_v23 }
0x12cb   :  { %v2945_v3 = vsub.f32 1.0, %v2944_v6  ;;  %v2961_v27 = vmul.f32 %v6002_v62, %v2960_v43  ;;  %v2967_v6 = vand.u32 2147483647, %v2942_v48 }
0x12cd   :  { %v2946_v46 = vmul.f32 %v6000_v31, %v2945_v3  ;;  %v2962_v38 = vadd.f32 %v6002_v62, %v2961_v27  ;;  %v2970_v3 = vor.u32 1.1754944e-38, %v2969_v57  ;;  %vm2968_vm1 = vcmp.eq.f32.partialorder %v2967_v6, 8.507059e+37  ;;  %v9846_v6 = vld [vmem:[#allocation48_spill] sm:$0xff] }
0x12cf   :  { %v2947_v2 = vadd.f32 %v6000_v31, %v2946_v46  ;;  %v8463_v46 = vld [vmem:[%s6799_s6] sm:$0x1]  ;;  %v2966_v35 = vsel %vm2965_vm0, %v6002_v62, %v2962_v38 }
0x12d0   :  { %9845 = vst [vmem:[#allocation66_spill] sm:$0xff] %v8463_v46  ;;  %v8466_v43 = vsel %vm2968_vm1, %v2970_v3, %v2966_v35 }
0x12d1   :  { %v2951_v36 = vsel %vm2950_vm12, %v6000_v31, %v2947_v2  ;;  %v2977_v31 = vmul.f32 0.25, %v8463_v46  ;;  %v2974_v57 = vmul.f32 %v8458_v23, %v8466_v43  ;;  %v8476_v46 = vld [vmem:[%s6654_s9] sm:$0xff] }
0x12d2   :  { %v8455_v10 = vsel %vm2953_vm13, %v2955_v47, %v2951_v36 }
0x12d3   :  { %v2973_v41 = vmul.f32 %v8458_v23, %v8455_v10  ;;  %v2979_v2 = vperm.slane %v2977_v31, 0  ;;  %v2976_v3 = vadd.f32 %v2974_v57, %v9846_v6  ;;  %v8488_v23 = vld [vmem:[%s6654_s9 + $0x8] sm:$0xff] }
0x12d5   :  { %v2975_v48 = vadd.f32 %v2973_v41, %v9772_v52 }
0x12d7   :  { %v8473_v60 = vadd.f32 %v2979_v2, %v2975_v48 }
0x1329   :  { %v3110_v49 = vpop.f32.mrf.mxu3  ;;  %v3125_v27 = vpop.f32.mrf.mxu0 }
0x132a   :  { %v3130_v47 = vmul.f32 %v3110_v49, %v8455_v10  ;;  %v3134_v36 = vmul.f32 %v3125_v27, %v8455_v10  ;;  %v8482_v49 = vadd.f32 %v2979_v2, %v2976_v3 }
0x132c   :  { %v3136_v62 = vmul.f32 %v8476_v46, %v3134_v36  ;;  %v3132_v38 = vadd.f32 %v3130_v47, %v8473_v60 }
0x132e   :  { %3138 = vadd.xlane.f32.xlu1 %v3136_v62  ;;  %v3150_v35 = vadd.f32 %v8252_v4, %v3132_v38 }
0x1330   :  { %v3152_v47 = vmul.f32 0.020833334, %v3150_v35 }
0x1331   :  { %v3112_v41 = vpop.f32.mrf.mxu3  ;;  %v3127_v31 = vpop.f32.mrf.mxu0 }
0x1332   :  { %v3131_v27 = vmul.f32 %v3112_v41, %v8466_v43  ;;  %v3135_v48 = vmul.f32 %v3127_v31, %v8466_v43  ;;  %v8493_v6 = vadd.f32 %v3152_v47, %v7793_v5 }
0x1334   :  { %v3133_v52 = vadd.f32 %v3131_v27, %v8482_v49  ;;  %v3137_v36 = vmul.f32 %v8488_v23, %v3135_v48 }
0x1336   :  { %v3151_v62 = vadd.f32 %v8256_v20, %v3133_v52  ;;  %3140 = vadd.xlane.f32.xlu2 %v3137_v36 }
0x1338   :  { %v3153_v57 = vmul.f32 0.020833334, %v3151_v62 }
0x133a   :  { %v8496_v4 = vadd.f32 %v3153_v57, %v7796_v34 }
0x133c   :  { %v3170_v2 = vpack.c.bf16 %v8496_v4, %v8493_v6 }
0x133e   :  { %3179 = vmatmul.bf16.vlgmr.msrb.gmra.mxu1 %v3170_v2 }
0x133f   :  { %3577 = vmatpush.bf16.msrb.mxu1 %v8142_v16 }
0x1343   :  { %3578 = vmatpush.bf16.msrb.mxu1 %v8147_v22 }
0x1347   :  { %3579 = vmatpush.bf16.msrb.mxu1 %v8151_v40 }
0x134b   :  { %3580 = vmatpush.bf16.msrb.mxu1 %v8155_v24 }
0x134f   :  { %3581 = vmatpush.bf16.msrb.mxu1 %v8159_v44 }
0x1353   :  { %3582 = vmatpush.bf16.msrb.mxu1 %v8163_v0 }
0x1357   :  { %3583 = vmatpush.bf16.msrb.mxu1 %v8167_v1 }
0x135b   :  { %3584 = vmatpush.bf16.msrb.mxu1 %v8171_v63 }
0x13bb   :  { %v3180_v52 = vpop.f32.mrf.mxu1 }
0x13bc   :  { %v3185_v5 = vmul.f32 %v3180_v52, %v8264_v58 }
0x13be   :  { %v3187_v34 = vadd.f32 %v3185_v5, %v8278_v53 }
0x13c0   :  { %6003 = vtanh.f32 %v3187_v34 }
0x13c3   :  { %v3182_v20 = vpop.f32.mrf.mxu1 }
0x13c4   :  { %v3186_v38 = vmul.f32 %v3182_v20, %v8276_v29 }
0x13c6   :  { %v3188_v3 = vadd.f32 %v3186_v38, %v8285_v14  ;;  %v6004_v41 = vpop.eup %6003 }
0x13c7   :  { %v3191_v31 = vmul.f32 %v6004_v41, %v6004_v41 }
0x13c8   :  { %6005 = vtanh.f32 %v3188_v3 }
0x13c9   :  { %v3193_v27 = vsub.f32 1.0, %v3191_v31 }
0x13cb   :  { %v3195_v58 = vmul.f32 %v3193_v27, %v8291_v28 }
0x13ce   :  { %v6006_v35 = vpop.eup %6005 }
0x13cf   :  { %v3192_v48 = vmul.f32 %v6006_v35, %v6006_v35  ;;  %v3197_v36 = vpack.c.bf16 %v6006_v35, %v6004_v41 }
0x13d1   :  { %v3194_v47 = vsub.f32 1.0, %v3192_v48  ;;  %3206 = vmatmul.bf16.vlgmr.msra.gmra.mxu2 %v3197_v36 }
0x13d2   :  { %3592 = vmatpush.bf16.msra.mxu2 %v8142_v16 }
0x13d3   :  { %v3196_v53 = vmul.f32 %v3194_v47, %v8295_v56 }
0x13d5   :  { %v3212_v62 = vpack.c.bf16 %v3196_v53, %v3195_v58 }
0x13d6   :  { %3593 = vmatpush.bf16.msra.mxu2 %v8147_v22 }
0x13d7   :  { %3221 = vmatmul.bf16.vlgmr.msra.gmra.mxu3 %v3212_v62 }
0x13d8   :  { %3621 = vmatpush.bf16.msra.mxu3 %v8182_v21 }
0x13da   :  { %3594 = vmatpush.bf16.msra.mxu2 %v8151_v40 }
0x13dc   :  { %3622 = vmatpush.bf16.msra.mxu3 %v8185_v7 }
0x13de   :  { %3595 = vmatpush.bf16.msra.mxu2 %v8155_v24 }
0x13e0   :  { %3623 = vmatpush.bf16.msra.mxu3 %v8189_v12 }
0x13e2   :  { %3596 = vmatpush.bf16.msra.mxu2 %v8159_v44 }
0x13e4   :  { %3624 = vmatpush.bf16.msra.mxu3 %v8307_v33 }
0x13e6   :  { %3597 = vmatpush.bf16.msra.mxu2 %v8163_v0 }
0x13e8   :  { %3625 = vmatpush.bf16.msra.mxu3 %v8311_v30 }
0x13ea   :  { %3598 = vmatpush.bf16.msra.mxu2 %v8167_v1 }
0x13ec   :  { %3626 = vmatpush.bf16.msra.mxu3 %v8315_v25 }
0x13ee   :  { %3599 = vmatpush.bf16.msra.mxu2 %v8171_v63 }
0x13f0   :  { %3627 = vmatpush.bf16.msra.mxu3 %v8319_v45 }
0x13f4   :  { %3628 = vmatpush.bf16.msra.mxu3 %v8322_v50 }
0x1454   :  { %v3207_v16 = vpop.f32.mrf.mxu2 }
0x1455   :  { %v3227_v22 = vmul.f32 %v3207_v16, %v8331_v51 }
0x1457   :  { %v3229_v40 = vadd.f32 %v3227_v22, %v8345_v59 }
0x1459   :  { %6007 = vtanh.f32 %v3229_v40 }
0x145a   :  { %v3222_v44 = vpop.f32.mrf.mxu3 }
0x145b   :  { %v3231_v52 = vmul.f32 %v3222_v44, %v8331_v51 }
0x145c   :  { %v3209_v24 = vpop.f32.mrf.mxu2 }
0x145d   :  { %v3228_v0 = vmul.f32 %v3209_v24, %v8343_v61 }
0x145f   :  { %v3230_v1 = vadd.f32 %v3228_v0, %v8352_v18  ;;  %v6008_v29 = vpop.eup %6007 }
0x1460   :  { %v3235_v14 = vmul.f32 %v6008_v29, %v6008_v29 }
0x1461   :  { %6009 = vtanh.f32 %v3230_v1 }
0x1462   :  { %v3224_v28 = vpop.f32.mrf.mxu3  ;;  %v3237_v56 = vsub.f32 1.0, %v3235_v14 }
0x1463   :  { %v3232_v5 = vmul.f32 %v3224_v28, %v8343_v61 }
0x1464   :  { %v3239_v34 = vmul.f32 %v3237_v56, %v3231_v52 }
0x1467   :  { %v6010_v63 = vpop.eup %6009 }
0x1468   :  { %v3241_v57 = vpack.c.bf16 %v6010_v63, %v6008_v29  ;;  %v3236_v2 = vmul.f32 %v6010_v63, %v6010_v63 }
0x146a   :  { %v3238_v59 = vsub.f32 1.0, %v3236_v2  ;;  %3250 = vmatmul.bf16.vlgmr.msra.gmra.mxu0 %v3241_v57 }
0x146b   :  { %3636 = vmatpush.bf16.msra.mxu0 %v8182_v21 }
0x146c   :  { %v3240_v20 = vmul.f32 %v3238_v59, %v3232_v5 }
0x146e   :  { %v3256_v38 = vpack.c.bf16 %v3240_v20, %v3239_v34  ;;  %v8590_v34 = vld [vmem:[#allocation5 + $0x38] sm:$0xff]  ;;  %v8596_v20 = vld [vmem:[#allocation5 + $0x28] sm:$0xff] }
0x146f   :  { %3637 = vmatpush.bf16.msra.mxu0 %v8185_v7 }
0x1470   :  { %3265 = vmatmul.bf16.vlgmr.msra.gmra.mxu1 %v3256_v38  ;;  %v8599_v38 = vld [vmem:[#allocation5 + $0x20] sm:$0xff] }
0x1471   :  { %3665 = vmatpush.bf16.msra.mxu1 %v8210_v8 }
0x1473   :  { %3638 = vmatpush.bf16.msra.mxu0 %v8189_v12 }
0x1475   :  { %3666 = vmatpush.bf16.msra.mxu1 %v8213_v39 }
0x1477   :  { %3639 = vmatpush.bf16.msra.mxu0 %v8307_v33 }
0x1479   :  { %3667 = vmatpush.bf16.msra.mxu1 %v8217_v11 }
0x147b   :  { %3640 = vmatpush.bf16.msra.mxu0 %v8311_v30 }
0x147d   :  { %3668 = vmatpush.bf16.msra.mxu1 %v8366_v13 }
0x147f   :  { %3641 = vmatpush.bf16.msra.mxu0 %v8315_v25 }
0x1481   :  { %3669 = vmatpush.bf16.msra.mxu1 %v8370_v15 }
0x1483   :  { %3642 = vmatpush.bf16.msra.mxu0 %v8319_v45 }
0x1485   :  { %3670 = vmatpush.bf16.msra.mxu1 %v8374_v37 }
0x1487   :  { %3643 = vmatpush.bf16.msra.mxu0 %v8322_v50 }
0x1489   :  { %3671 = vmatpush.bf16.msra.mxu1 %v8378_v9 }
0x148d   :  { %3672 = vmatpush.bf16.msra.mxu1 %v8381_v17 }
0x14e7   :  { %v3251_v21 = vpop.f32.mrf.mxu0 }
0x14e8   :  { %v3271_v7 = vmul.f32 %v3251_v21, %v8390_v42  ;;  %v8605_v21 = vld [vmem:[#allocation5 + $0x10] sm:$0xff] }
0x14ea   :  { %v3273_v12 = vadd.f32 %v3271_v7, %v8404_v19  ;;  %v8608_v7 = vld [vmem:[#allocation5 + $0x8] sm:$0xff] }
0x14ec   :  { %6011 = vtanh.f32 %v3273_v12  ;;  %v8611_v12 = vld [vmem:[#allocation5] sm:$0xff] }
0x14ed   :  { %v3266_v61 = vpop.f32.mrf.mxu1 }
0x14ee   :  { %v3275_v58 = vmul.f32 %v3266_v61, %v8390_v42  ;;  %v9847_v42 = vld [vmem:[#allocation46_spill] sm:$0xff] }
0x14ef   :  { %v3253_v51 = vpop.f32.mrf.mxu0 }
0x14f0   :  { %v3272_v18 = vmul.f32 %v3253_v51, %v8402_v26  ;;  %v9855_v51 = vld [vmem:[#allocation49_spill] sm:$0xff] }
0x14f1   :  { %v3331_v61 = vmul.f32 0.3125, %v9855_v51 }
0x14f2   :  { %v3274_v3 = vadd.f32 %v3272_v18, %v8411_v54  ;;  %v6012_v41 = vpop.eup %6011  ;;  %v9852_v54 = vld [vmem:[#allocation63_spill] sm:$0xff] }
0x14f3   :  { %v3279_v31 = vmul.f32 %v6012_v41, %v6012_v41  ;;  %v3333_v18 = vperm.slane %v3331_v61, 0 }
0x14f4   :  { %6013 = vtanh.f32 %v3274_v3  ;;  %v9856_v3 = vld [vmem:[#allocation31_spill] sm:$0xff] }
0x14f5   :  { %v3268_v27 = vpop.f32.mrf.mxu1  ;;  %v3281_v48 = vsub.f32 1.0, %v3279_v31 }
0x14f6   :  { %v3276_v53 = vmul.f32 %v3268_v27, %v8402_v26  ;;  %v9848_v26 = vld [vmem:[#allocation40_spill] sm:$0xff] }
0x14f7   :  { %v3283_v62 = vmul.f32 %v3281_v48, %v3275_v58 }
0x14fa   :  { %v6014_v35 = vpop.eup %6013 }
0x14fb   :  { %v3285_v36 = vpack.c.bf16 %v6014_v35, %v6012_v41  ;;  %v3280_v47 = vmul.f32 %v6014_v35, %v6014_v35  ;;  %v3335_v41 = vadd.f32 %v3333_v18, %v9856_v3  ;;  %v9857_v35 = vld [vmem:[#allocation32_spill] sm:$0xff] }
0x14fc   :  { %v3336_v27 = vadd.f32 %v3333_v18, %v9857_v35 }
0x14fd   :  { %v3282_v19 = vsub.f32 1.0, %v3280_v47  ;;  %3294 = vmatmul.bf16.vlgmr.msrb.gmra.mxu2 %v3285_v36  ;;  %v5633_v31 = vmul.f32 -1.442695, %v3335_v41 }
0x14fe   :  { %3680 = vmatpush.bf16.msrb.mxu2 %v8210_v8  ;;  %v9849_v8 = vld [vmem:[#allocation47_spill] sm:$0xff]  ;;  %v5634_v48 = vmul.f32 -1.442695, %v3336_v27 }
0x14ff   :  { %v3284_v16 = vmul.f32 %v3282_v19, %v3276_v53  ;;  %6015 = vpow2.f32 %v5633_v31  ;;  %v9860_v31 = vld [vmem:[#allocation33_spill] sm:$0xff] }
0x1500   :  { %6017 = vpow2.f32 %v5634_v48 }
0x1501   :  { %v3300_v22 = vpack.c.bf16 %v3284_v16, %v3283_v62 }
0x1502   :  { %3681 = vmatpush.bf16.msrb.mxu2 %v8213_v39  ;;  %v9850_v39 = vld [vmem:[#allocation55_spill] sm:$0xff] }
0x1503   :  { %3309 = vmatmul.bf16.vlgmr.msrb.gmra.mxu3 %v3300_v22 }
0x1504   :  { %3711 = vmatpush.bf16.msrb.mxu3 %v8419_v55 }
0x1505   :  { %v6016_v36 = vpop.eup %6015 }
0x1506   :  { %3682 = vmatpush.bf16.msrb.mxu2 %v8217_v11  ;;  %v9851_v11 = vld [vmem:[#allocation56_spill] sm:$0xff]  ;;  %v3343_v47 = vadd.f32 1.0, %v6016_v36  ;;  %v6018_v58 = vpop.eup %6017 }
0x1507   :  { %v3344_v53 = vadd.f32 1.0, %v6018_v58 }
0x1508   :  { %3712 = vmatpush.bf16.msrb.mxu3 %v8423_v32  ;;  %6019 = vrcp.f32 %v3343_v47  ;;  %vm3350_vm3 = vweird.f32 %v3343_v47 }
0x1509   :  { %6021 = vrcp.f32 %v3344_v53  ;;  %vm3365_vm7 = vweird.f32 %v3344_v53  ;;  %v3369_v61 = vand.u32 2147483647, %v3344_v53 }
0x150a   :  { %3683 = vmatpush.bf16.msrb.mxu2 %v8366_v13 }
0x150b   :  { %vm3370_vm9 = vcmp.eq.f32.partialorder %v3369_v61, 8.507059e+37 }
0x150c   :  { %3713 = vmatpush.bf16.msrb.mxu3 %v9847_v42 }
0x150e   :  { %3684 = vmatpush.bf16.msrb.mxu2 %v8370_v15  ;;  %v6020_v19 = vpop.eup %6019 }
0x150f   :  { %v3346_v62 = vmul.f32 %v6020_v19, %v3343_v47  ;;  %v6022_v22 = vpop.eup %6021  ;;  %vm3351_vm2 = vweird.f32 %v6020_v19 }
0x1510   :  { %3714 = vmatpush.bf16.msrb.mxu3 %v9848_v26  ;;  %vm3352_vm4 = vmor %vm3350_vm3, %vm3351_vm2  ;;  %vm3366_vm6 = vweird.f32 %v6022_v22 }
0x1511   :  { %v3347_v16 = vsub.f32 1.0, %v3346_v62  ;;  %vm3367_vm8 = vmor %vm3365_vm7, %vm3366_vm6 }
0x1512   :  { %3685 = vmatpush.bf16.msrb.mxu2 %v8374_v37 }
0x1514   :  { %3715 = vmatpush.bf16.msrb.mxu3 %v9849_v8 }
0x1516   :  { %3686 = vmatpush.bf16.msrb.mxu2 %v8378_v9 }
0x1518   :  { %3716 = vmatpush.bf16.msrb.mxu3 %v9850_v39 }
0x151a   :  { %3687 = vmatpush.bf16.msrb.mxu2 %v8381_v17 }
0x151c   :  { %3717 = vmatpush.bf16.msrb.mxu3 %v9851_v11 }
0x1520   :  { %3718 = vmatpush.bf16.msrb.mxu3 %v9852_v54 }
0x1580   :  { %v3295_v40 = vpop.f32.mrf.mxu2 }
0x1581   :  { %v3315_v24 = vmul.f32 %v3295_v40, %v8455_v10  ;;  %v3348_v40 = vmul.f32 %v6020_v19, %v3347_v16 }
0x1583   :  { %v8576_v0 = vadd.f32 %v3315_v24, %v8473_v60  ;;  %v3361_v24 = vmul.f32 %v6022_v22, %v3344_v53 }
0x1585   :  { %9853 = vst [vmem:[#allocation46_spill] sm:$0xff] %v8576_v0  ;;  %v3327_v28 = vmul.f32 0.0625, %v8576_v0 }
0x1586   :  { %v3310_v44 = vpop.f32.mrf.mxu3 }
0x1587   :  { %v3319_v1 = vmul.f32 %v3310_v44, %v8455_v10  ;;  %v3329_v52 = vadd.f32 %v3327_v28, %v8493_v6  ;;  %v3349_v44 = vadd.f32 %v6020_v19, %v3348_v40 }
0x1588   :  { %v3297_v29 = vpop.f32.mrf.mxu2 }
0x1589   :  { %v3316_v14 = vmul.f32 %v3297_v29, %v8466_v43  ;;  %v3321_v63 = vmul.f32 %v8476_v46, %v3319_v1  ;;  %v3362_v1 = vsub.f32 1.0, %v3361_v24  ;;  %v3356_v29 = vand.u32 2147483648, %v3343_v47 }
0x158b   :  { %v8583_v56 = vadd.f32 %v3316_v14, %v8482_v49  ;;  %3323 = vadd.xlane.f32.xlu1 %v3321_v63  ;;  %v8593_v49 = vld [vmem:[#allocation5 + $0x30] sm:$0xff]  ;;  %v3354_v14 = vand.u32 2147483647, %v3343_v47  ;;  %v3353_v63 = vsel %vm3352_vm4, %v6020_v19, %v3349_v44  ;;  %v3363_v28 = vmul.f32 %v6022_v22, %v3362_v1 }
0x158d   :  { %9854 = vst [vmem:[#allocation40_spill] sm:$0xff] %v8583_v56  ;;  %v3328_v57 = vmul.f32 0.0625, %v8583_v56  ;;  %vm3355_vm5 = vcmp.eq.f32.partialorder %v3354_v14, 8.507059e+37 }
0x158e   :  { %v3312_v2 = vpop.f32.mrf.mxu3 }
0x158f   :  { %v3330_v60 = vadd.f32 %v3328_v57, %v8496_v4  ;;  %v3320_v10 = vmul.f32 %v3312_v2, %v8466_v43  ;;  %v8602_v43 = vld [vmem:[#allocation5 + $0x18] sm:$0xff]  ;;  %v3357_v57 = vor.u32 1.1754944e-38, %v3356_v29 }
0x1591   :  { %v3547_v5 = vpack.c.bf16 %v3330_v60, %v3329_v52  ;;  %v3322_v59 = vmul.f32 %v8488_v23, %v3320_v10  ;;  %v8617_v2 = vsel %vm3355_vm5, %v3357_v57, %v3353_v63  ;;  %v3364_v52 = vadd.f32 %v6022_v22, %v3363_v28  ;;  %v9858_v10 = vld [vmem:[#allocation52_spill] sm:$0xff] }
0x1592   :  { %v3371_v60 = vand.u32 2147483648, %v3344_v53  ;;  %v9861_v53 = vld [vmem:[#allocation34_spill] sm:$0xff] }
0x1593   :  { %3556 = vmatmul.bf16.vlgmr.msrb.gmra.mxu0 %v3547_v5  ;;  %3325 = vadd.xlane.f32.xlu2 %v3322_v59  ;;  %v3375_v5 = vmul.f32 %v9858_v10, %v8617_v2  ;;  %v9859_v59 = vld [vmem:[#allocation39_spill] sm:$0xff]  ;;  %v3368_v18 = vsel %vm3367_vm8, %v6022_v22, %v3364_v52 }
0x1594   :  { %3738 = vmatpush.bf16.msrb.mxu0 %v8590_v34  ;;  %v3379_v51 = vmul.f32 0.3125, %v9859_v59  ;;  %v3372_v41 = vor.u32 1.1754944e-38, %v3371_v60  ;;  %v9862_v60 = vld [vmem:[#allocation37_spill] sm:$0xff] }
0x1595   :  { %v3377_v27 = vadd.f32 %v3375_v5, %v9860_v31  ;;  %v9863_v5 = vld [vmem:[#allocation38_spill] sm:$0xff]  ;;  %v9877_v31 = vld [vmem:[#allocation36_spill] sm:$0xff] }
0x1596   :  { %v3381_v48 = vperm.slane %v3379_v51, 0  ;;  %v8623_v36 = vsel %vm3370_vm9, %v3372_v41, %v3368_v18 }
0x1597   :  { %v3376_v62 = vmul.f32 %v9858_v10, %v8623_v36  ;;  %v8638_v10 = vmul.f32 %v8617_v2, %v9862_v60  ;;  %v8642_v59 = vmul.f32 %v8623_v36, %v9863_v5 }
0x1598   :  { %3739 = vmatpush.bf16.msrb.mxu0 %v8593_v49  ;;  %v8625_v58 = vadd.f32 %v3381_v48, %v3377_v27  ;;  %v8648_v27 = vld [vmem:[#allocation7 + $0x38] sm:$0xff] }
0x1599   :  { %v3378_v40 = vadd.f32 %v3376_v62, %v9861_v53  ;;  %v9875_v53 = vld [vmem:[#allocation62_spill] sm:$0xff] }
0x159b   :  { %v8632_v24 = vadd.f32 %v3381_v48, %v3378_v40  ;;  %v8652_v48 = vld [vmem:[#allocation7 + $0x30] sm:$0xff]  ;;  %v9865_v40 = vld [vmem:[#allocation41_spill] sm:$0xff] }
0x159c   :  { %3740 = vmatpush.bf16.msrb.mxu0 %v8596_v20 }
0x15a0   :  { %3741 = vmatpush.bf16.msrb.mxu0 %v8599_v38 }
0x15a4   :  { %3742 = vmatpush.bf16.msrb.mxu0 %v8602_v43 }
0x15a8   :  { %3743 = vmatpush.bf16.msrb.mxu0 %v8605_v21 }
0x15ac   :  { %3744 = vmatpush.bf16.msrb.mxu0 %v8608_v7 }
0x15b0   :  { %3745 = vmatpush.bf16.msrb.mxu0 %v8611_v12 }
0x1610   :  { %v3557_v47 = vpop.f32.mrf.mxu0 }
0x1611   :  { %v3562_v19 = vmul.f32 %v3557_v47, %v8617_v2  ;;  %v8656_v47 = vld [vmem:[#allocation7 + $0x28] sm:$0xff] }
0x1613   :  { %v3564_v16 = vadd.f32 %v3562_v19, %v8625_v58  ;;  %v9864_v19 = vld [vmem:[#allocation57_spill] sm:$0xff] }
0x1614   :  { %v3385_v62 = vmul.f32 0.3125, %v9864_v19 }
0x1615   :  { %6023 = vtanh.f32 %v3564_v16 }
0x1616   :  { %v3387_v16 = vperm.slane %v3385_v62, 0 }
0x1618   :  { %v3559_v22 = vpop.f32.mrf.mxu0 }
0x1619   :  { %v3563_v44 = vmul.f32 %v3559_v22, %v8623_v36  ;;  %v3389_v22 = vadd.f32 %v3387_v16, %v9865_v40 }
0x161b   :  { %v3565_v1 = vadd.f32 %v3563_v44, %v8632_v24  ;;  %v6024_v29 = vpop.eup %6023  ;;  %v9866_v44 = vld [vmem:[#allocation42_spill] sm:$0xff] }
0x161c   :  { %v3570_v14 = vmul.f32 %v6024_v29, %v6024_v29 }
0x161d   :  { %6025 = vtanh.f32 %v3565_v1  ;;  %v3390_v1 = vadd.f32 %v3387_v16, %v9866_v44  ;;  %v9870_v44 = vld [vmem:[#allocation44_spill] sm:$0xff] }
0x161e   :  { %v3572_v28 = vsub.f32 1.0, %v3570_v14 }
0x1620   :  { %v3574_v61 = vmul.f32 %v3572_v28, %v8638_v10 }
0x1623   :  { %v6026_v63 = vpop.eup %6025 }
0x1624   :  { %v3571_v57 = vmul.f32 %v6026_v63, %v6026_v63  ;;  %v3576_v52 = vpack.c.bf16 %v6026_v63, %v6024_v29 }
0x1626   :  { %v3573_v51 = vsub.f32 1.0, %v3571_v57  ;;  %3585 = vmatmul.bf16.vlgmr.msrb.gmra.mxu1 %v3576_v52 }
0x1627   :  { %3753 = vmatpush.bf16.msrb.mxu1 %v8590_v34 }
0x1628   :  { %v3575_v18 = vmul.f32 %v3573_v51, %v8642_v59 }
0x162a   :  { %v3591_v41 = vpack.c.bf16 %v3575_v18, %v3574_v61 }
0x162b   :  { %3754 = vmatpush.bf16.msrb.mxu1 %v8593_v49 }
0x162c   :  { %3600 = vmatmul.bf16.vlgmr.msra.gmra.mxu2 %v3591_v41 }
0x162d   :  { %3782 = vmatpush.bf16.msra.mxu2 %v8648_v27 }
0x162f   :  { %3755 = vmatpush.bf16.msrb.mxu1 %v8596_v20 }
0x1631   :  { %3783 = vmatpush.bf16.msra.mxu2 %v8652_v48 }
0x1633   :  { %3756 = vmatpush.bf16.msrb.mxu1 %v8599_v38 }
0x1635   :  { %3784 = vmatpush.bf16.msra.mxu2 %v8656_v47 }
0x1637   :  { %3757 = vmatpush.bf16.msrb.mxu1 %v8602_v43 }
0x1639   :  { %3785 = vmatpush.bf16.msra.mxu2 %v8307_v33  ;;  %v5635_v33 = vmul.f32 -1.442695, %v3389_v22 }
0x163b   :  { %3758 = vmatpush.bf16.msrb.mxu1 %v8605_v21  ;;  %6027 = vpow2.f32 %v5635_v33 }
0x163d   :  { %3786 = vmatpush.bf16.msra.mxu2 %v8311_v30  ;;  %v5636_v30 = vmul.f32 -1.442695, %v3390_v1 }
0x163f   :  { %3759 = vmatpush.bf16.msrb.mxu1 %v8608_v7  ;;  %6029 = vpow2.f32 %v5636_v30 }
0x1641   :  { %3787 = vmatpush.bf16.msra.mxu2 %v8315_v25  ;;  %v6028_v29 = vpop.eup %6027 }
0x1642   :  { %v3397_v14 = vadd.f32 1.0, %v6028_v29 }
0x1643   :  { %3760 = vmatpush.bf16.msrb.mxu1 %v8611_v12 }
0x1644   :  { %6031 = vrcp.f32 %v3397_v14  ;;  %vm3404_vm10 = vweird.f32 %v3397_v14  ;;  %v3410_v61 = vand.u32 2147483648, %v3397_v14  ;;  %v3408_v41 = vand.u32 2147483647, %v3397_v14 }
0x1645   :  { %3788 = vmatpush.bf16.msra.mxu2 %v8319_v45  ;;  %v6030_v25 = vpop.eup %6029 }
0x1646   :  { %v3398_v63 = vadd.f32 1.0, %v6030_v25  ;;  %v3411_v62 = vor.u32 1.1754944e-38, %v3410_v61  ;;  %vm3409_vm13 = vcmp.eq.f32.partialorder %v3408_v41, 8.507059e+37  ;;  %v9867_v25 = vld [vmem:[#allocation59_spill] sm:$0xff] }
0x1647   :  { %v9869_v61 = vld [vmem:[#allocation43_spill] sm:$0xff] }
0x1648   :  { %6033 = vrcp.f32 %v3398_v63  ;;  %vm3419_vm14 = vweird.f32 %v3398_v63  ;;  %v3425_v1 = vand.u32 2147483648, %v3398_v63  ;;  %v3423_v29 = vand.u32 2147483647, %v3398_v63 }
0x1649   :  { %3789 = vmatpush.bf16.msra.mxu2 %v8322_v50 }
0x164a   :  { %v6032_v28 = vpop.eup %6031  ;;  %vm3424_vm1 = vcmp.eq.f32.partialorder %v3423_v29, 8.507059e+37 }
0x164b   :  { %v3400_v45 = vmul.f32 %v6032_v28, %v3397_v14  ;;  %vm3405_vm11 = vweird.f32 %v6032_v28  ;;  %v3426_v14 = vor.u32 1.1754944e-38, %v3425_v1 }
0x164c   :  { %vm3406_vm12 = vmor %vm3404_vm10, %vm3405_vm11 }
0x164d   :  { %v3401_v50 = vsub.f32 1.0, %v3400_v45 }
0x164e   :  { %v6034_v57 = vpop.eup %6033 }
0x164f   :  { %v3402_v52 = vmul.f32 %v6032_v28, %v3401_v50  ;;  %v3415_v51 = vmul.f32 %v6034_v57, %v3398_v63  ;;  %vm3420_vm15 = vweird.f32 %v6034_v57  ;;  %v9868_v50 = vld [vmem:[#allocation58_spill] sm:$0xff] }
0x1650   :  { %vm3421_vm0 = vmor %vm3419_vm14, %vm3420_vm15 }
0x1651   :  { %v3403_v18 = vadd.f32 %v6032_v28, %v3402_v52  ;;  %v3416_v19 = vsub.f32 1.0, %v3415_v51  ;;  %v3433_v52 = vmul.f32 0.3125, %v9868_v50 }
0x1653   :  { %v3407_v16 = vsel %vm3406_vm12, %v6032_v28, %v3403_v18  ;;  %v3417_v22 = vmul.f32 %v6034_v57, %v3416_v19  ;;  %v3435_v18 = vperm.slane %v3433_v52, 0 }
0x1654   :  { %v8671_v33 = vsel %vm3409_vm13, %v3411_v62, %v3407_v16 }
0x1655   :  { %v3418_v30 = vadd.f32 %v6034_v57, %v3417_v22  ;;  %v3429_v45 = vmul.f32 %v9867_v25, %v8671_v33 }
0x1657   :  { %v3422_v51 = vsel %vm3421_vm0, %v6034_v57, %v3418_v30  ;;  %v3431_v28 = vadd.f32 %v3429_v45, %v9869_v61 }
0x1658   :  { %v8677_v41 = vsel %vm3424_vm1, %v3426_v14, %v3422_v51 }
0x1659   :  { %v8679_v62 = vadd.f32 %v3435_v18, %v3431_v28  ;;  %v3430_v63 = vmul.f32 %v9867_v25, %v8677_v41 }
0x165b   :  { %v3432_v50 = vadd.f32 %v3430_v63, %v9870_v44 }
0x165d   :  { %v8686_v1 = vadd.f32 %v3435_v18, %v3432_v50 }
0x16a3   :  { %v3586_v19 = vpop.f32.mrf.mxu1 }
0x16a4   :  { %v3606_v16 = vmul.f32 %v3586_v19, %v8671_v33 }
0x16a6   :  { %v3608_v22 = vadd.f32 %v3606_v16, %v8679_v62 }
0x16a8   :  { %6035 = vtanh.f32 %v3608_v22 }
0x16ab   :  { %v3588_v57 = vpop.f32.mrf.mxu1 }
0x16ac   :  { %v3607_v30 = vmul.f32 %v3588_v57, %v8677_v41 }
0x16ae   :  { %v3609_v29 = vadd.f32 %v3607_v30, %v8686_v1  ;;  %v6036_v52 = vpop.eup %6035  ;;  %v8694_v30 = vld [vmem:[#allocation8 + $0x38] sm:$0xff] }
0x16af   :  { %v3601_v45 = vpop.f32.mrf.mxu2  ;;  %v3614_v14 = vmul.f32 %v6036_v52, %v6036_v52 }
0x16b0   :  { %6037 = vtanh.f32 %v3609_v29  ;;  %v3610_v25 = vmul.f32 %v3601_v45, %v8671_v33  ;;  %v8698_v29 = vld [vmem:[#allocation8 + $0x30] sm:$0xff]  ;;  %v8704_v45 = vld [vmem:[#allocation8 + $0x28] sm:$0xff] }
0x16b1   :  { %v3616_v19 = vsub.f32 1.0, %v3614_v14  ;;  %v8711_v14 = vld [vmem:[#allocation7 + $0x10] sm:$0xff] }
0x16b3   :  { %v3618_v18 = vmul.f32 %v3616_v19, %v3610_v25 }
0x16b6   :  { %v6038_v51 = vpop.eup %6037 }
0x16b7   :  { %v3620_v28 = vpack.c.bf16 %v6038_v51, %v6036_v52  ;;  %v3603_v16 = vpop.f32.mrf.mxu2  ;;  %v3615_v61 = vmul.f32 %v6038_v51, %v6038_v51  ;;  %v8707_v52 = vld [vmem:[#allocation7 + $0x18] sm:$0xff]  ;;  %v8715_v51 = vld [vmem:[#allocation7 + $0x8] sm:$0xff] }
0x16b8   :  { %v3611_v63 = vmul.f32 %v3603_v16, %v8677_v41  ;;  %v9872_v16 = vld [vmem:[#allocation50_spill] sm:$0xff] }
0x16b9   :  { %v3617_v22 = vsub.f32 1.0, %v3615_v61  ;;  %3629 = vmatmul.bf16.vlgmr.msra.gmra.mxu3 %v3620_v28  ;;  %v8701_v61 = vld [vmem:[#allocation7 + $0x20] sm:$0xff] }
0x16ba   :  { %3797 = vmatpush.bf16.msra.mxu3 %v8648_v27  ;;  %v8719_v28 = vld [vmem:[#allocation7] sm:$0xff] }
0x16bb   :  { %v3619_v50 = vmul.f32 %v3617_v22, %v3611_v63  ;;  %v9873_v22 = vld [vmem:[#allocation51_spill] sm:$0xff] }
0x16bd   :  { %v3635_v57 = vpack.c.bf16 %v3619_v50, %v3618_v18 }
0x16be   :  { %3798 = vmatpush.bf16.msra.mxu3 %v8652_v48 }
0x16bf   :  { %3644 = vmatmul.bf16.vlgmr.msra.gmra.mxu0 %v3635_v57 }
0x16c0   :  { %3826 = vmatpush.bf16.msra.mxu0 %v8694_v30 }
0x16c2   :  { %3799 = vmatpush.bf16.msra.mxu3 %v8656_v47 }
0x16c4   :  { %3827 = vmatpush.bf16.msra.mxu0 %v8698_v29 }
0x16c6   :  { %3800 = vmatpush.bf16.msra.mxu3 %v8701_v61 }
0x16c8   :  { %3828 = vmatpush.bf16.msra.mxu0 %v8704_v45 }
0x16ca   :  { %3801 = vmatpush.bf16.msra.mxu3 %v8707_v52 }
0x16cc   :  { %3829 = vmatpush.bf16.msra.mxu0 %v8366_v13  ;;  %v9871_v13 = vld [vmem:[#allocation60_spill] sm:$0xff] }
0x16cd   :  { %v3439_v25 = vmul.f32 0.3125, %v9871_v13 }
0x16ce   :  { %3802 = vmatpush.bf16.msra.mxu3 %v8711_v14 }
0x16cf   :  { %v3441_v19 = vperm.slane %v3439_v25, 0 }
0x16d0   :  { %3830 = vmatpush.bf16.msra.mxu0 %v8370_v15 }
0x16d1   :  { %v3443_v63 = vadd.f32 %v3441_v19, %v9872_v16  ;;  %v3444_v18 = vadd.f32 %v3441_v19, %v9873_v22 }
0x16d2   :  { %3803 = vmatpush.bf16.msra.mxu3 %v8715_v51 }
0x16d3   :  { %v5637_v15 = vmul.f32 -1.442695, %v3443_v63  ;;  %v5638_v50 = vmul.f32 -1.442695, %v3444_v18 }
0x16d4   :  { %3831 = vmatpush.bf16.msra.mxu0 %v8374_v37 }
0x16d5   :  { %6039 = vpow2.f32 %v5637_v15 }
0x16d6   :  { %3804 = vmatpush.bf16.msra.mxu3 %v8719_v28  ;;  %6041 = vpow2.f32 %v5638_v50 }
0x16d8   :  { %3832 = vmatpush.bf16.msra.mxu0 %v8378_v9 }
0x16db   :  { %v6040_v57 = vpop.eup %6039 }
0x16dc   :  { %3833 = vmatpush.bf16.msra.mxu0 %v8381_v17  ;;  %v3451_v37 = vadd.f32 1.0, %v6040_v57  ;;  %v6042_v44 = vpop.eup %6041 }
0x16dd   :  { %v3452_v40 = vadd.f32 1.0, %v6042_v44 }
0x16de   :  { %6043 = vrcp.f32 %v3451_v37  ;;  %vm3458_vm2 = vweird.f32 %v3451_v37  ;;  %v3464_v63 = vand.u32 2147483648, %v3451_v37  ;;  %v3462_v16 = vand.u32 2147483647, %v3451_v37 }
0x16df   :  { %6045 = vrcp.f32 %v3452_v40  ;;  %vm3473_vm6 = vweird.f32 %v3452_v40  ;;  %v3479_v22 = vand.u32 2147483648, %v3452_v40  ;;  %v3477_v5 = vand.u32 2147483647, %v3452_v40 }
0x16e0   :  { %v3465_v18 = vor.u32 1.1754944e-38, %v3464_v63  ;;  %vm3463_vm5 = vcmp.eq.f32.partialorder %v3462_v16, 8.507059e+37  ;;  %v9876_v63 = vld [vmem:[#allocation35_spill] sm:$0xff] }
0x16e1   :  { %vm3478_vm9 = vcmp.eq.f32.partialorder %v3477_v5, 8.507059e+37 }
0x16e4   :  { %v6044_v56 = vpop.eup %6043 }
0x16e5   :  { %v3454_v9 = vmul.f32 %v6044_v56, %v3451_v37  ;;  %v6046_v0 = vpop.eup %6045  ;;  %vm3459_vm3 = vweird.f32 %v6044_v56  ;;  %v3480_v37 = vor.u32 1.1754944e-38, %v3479_v22 }
0x16e6   :  { %v3469_v25 = vmul.f32 %v6046_v0, %v3452_v40  ;;  %vm3460_vm4 = vmor %vm3458_vm2, %vm3459_vm3  ;;  %vm3474_vm7 = vweird.f32 %v6046_v0 }
0x16e7   :  { %v3455_v17 = vsub.f32 1.0, %v3454_v9  ;;  %vm3475_vm8 = vmor %vm3473_vm6, %vm3474_vm7 }
0x16e8   :  { %v3470_v19 = vsub.f32 1.0, %v3469_v25 }
0x16e9   :  { %v3456_v13 = vmul.f32 %v6044_v56, %v3455_v17  ;;  %v9874_v17 = vld [vmem:[#allocation61_spill] sm:$0xff] }
0x16ea   :  { %v3471_v57 = vmul.f32 %v6046_v0, %v3470_v19 }
0x16eb   :  { %v3457_v15 = vadd.f32 %v6044_v56, %v3456_v13  ;;  %v3487_v13 = vmul.f32 0.3125, %v9875_v53 }
0x16ec   :  { %v3472_v9 = vadd.f32 %v6046_v0, %v3471_v57 }
0x16ed   :  { %v3461_v50 = vsel %vm3460_vm4, %v6044_v56, %v3457_v15  ;;  %v3489_v16 = vperm.slane %v3487_v13, 0 }
0x16ee   :  { %v8727_v44 = vsel %vm3463_vm5, %v3465_v18, %v3461_v50  ;;  %v3476_v25 = vsel %vm3475_vm8, %v6046_v0, %v3472_v9 }
0x16ef   :  { %v3483_v60 = vmul.f32 %v9874_v17, %v8727_v44  ;;  %v8733_v15 = vsel %vm3478_vm9, %v3480_v37, %v3476_v25 }
0x16f0   :  { %v3484_v40 = vmul.f32 %v9874_v17, %v8733_v15 }
0x16f1   :  { %v3485_v56 = vadd.f32 %v3483_v60, %v9876_v63 }
0x16f2   :  { %v3486_v53 = vadd.f32 %v3484_v40, %v9877_v31 }
0x16f3   :  { %v8735_v18 = vadd.f32 %v3489_v16, %v3485_v56 }
0x16f4   :  { %v8742_v22 = vadd.f32 %v3489_v16, %v3486_v53 }
0x173c   :  { %v3630_v19 = vpop.f32.mrf.mxu3  ;;  %v3645_v5 = vpop.f32.mrf.mxu0 }
0x173d   :  { %v3650_v50 = vmul.f32 %v3630_v19, %v8727_v44 }
0x173f   :  { %v3652_v57 = vadd.f32 %v3650_v50, %v8735_v18  ;;  %v3654_v50 = vmul.f32 %v3645_v5, %v8727_v44  ;;  %v8761_v5 = vld [vmem:[#allocation8 + $0x10] sm:$0xff] }
0x1741   :  { %6047 = vtanh.f32 %v3652_v57 }
0x1744   :  { %v3632_v0 = vpop.f32.mrf.mxu3  ;;  %v3647_v56 = vpop.f32.mrf.mxu0 }
0x1745   :  { %v3651_v60 = vmul.f32 %v3632_v0, %v8733_v15  ;;  %v3655_v40 = vmul.f32 %v3647_v56, %v8733_v15 }
0x1747   :  { %v3653_v9 = vadd.f32 %v3651_v60, %v8742_v22  ;;  %v6048_v13 = vpop.eup %6047  ;;  %v8753_v60 = vld [vmem:[#allocation8 + $0x20] sm:$0xff] }
0x1748   :  { %v3658_v37 = vmul.f32 %v6048_v13, %v6048_v13 }
0x1749   :  { %6049 = vtanh.f32 %v3653_v9 }
0x174a   :  { %v3660_v19 = vsub.f32 1.0, %v3658_v37 }
0x174c   :  { %v3662_v16 = vmul.f32 %v3660_v19, %v3654_v50 }
0x174f   :  { %v6050_v25 = vpop.eup %6049 }
0x1750   :  { %v3664_v17 = vpack.c.bf16 %v6050_v25, %v6048_v13  ;;  %v3659_v63 = vmul.f32 %v6050_v25, %v6050_v25  ;;  %v9879_v13 = vld [vmem:[#allocation53_spill] sm:$0xff]  ;;  %v9880_v25 = vld [vmem:[#allocation54_spill] sm:$0xff] }
0x1752   :  { %v3661_v57 = vsub.f32 1.0, %v3659_v63  ;;  %3673 = vmatmul.bf16.vlgmr.msra.gmra.mxu1 %v3664_v17  ;;  %v8757_v63 = vld [vmem:[#allocation8 + $0x18] sm:$0xff] }
0x1753   :  { %3841 = vmatpush.bf16.msra.mxu1 %v8694_v30 }
0x1754   :  { %v3663_v53 = vmul.f32 %v3661_v57, %v3655_v40 }
0x1756   :  { %v3679_v0 = vpack.c.bf16 %v3663_v53, %v3662_v16 }
0x1757   :  { %3842 = vmatpush.bf16.msra.mxu1 %v8698_v29 }
0x1758   :  { %3688 = vmatmul.bf16.vlgmr.msrb.gmra.mxu2 %v3679_v0 }
0x1759   :  { %4088 = vmatpush.bf16.msrb.mxu2 %v8419_v55  ;;  %v8765_v55 = vld [vmem:[#allocation8 + $0x8] sm:$0xff] }
0x175b   :  { %3843 = vmatpush.bf16.msra.mxu1 %v8704_v45 }
0x175d   :  { %4089 = vmatpush.bf16.msrb.mxu2 %v8423_v32  ;;  %v8769_v32 = vld [vmem:[#allocation8] sm:$0xff] }
0x175f   :  { %3844 = vmatpush.bf16.msra.mxu1 %v8753_v60 }
0x1761   :  { %4090 = vmatpush.bf16.msrb.mxu2 %v9847_v42  ;;  %v9878_v42 = vld [vmem:[#allocation64_spill] sm:$0xff] }
0x1763   :  { %3845 = vmatpush.bf16.msra.mxu1 %v8757_v63 }
0x1765   :  { %4091 = vmatpush.bf16.msrb.mxu2 %v9848_v26  ;;  %v3493_v26 = vmul.f32 0.3125, %v9878_v42 }
0x1767   :  { %3846 = vmatpush.bf16.msra.mxu1 %v8761_v5  ;;  %v3495_v9 = vperm.slane %v3493_v26, 0 }
0x1769   :  { %4092 = vmatpush.bf16.msrb.mxu2 %v9849_v8  ;;  %v3497_v37 = vadd.f32 %v3495_v9, %v9879_v13  ;;  %v3498_v56 = vadd.f32 %v3495_v9, %v9880_v25  ;;  %v9881_v13 = vld [vmem:[#allocation65_spill] sm:$0xff] }
0x176b   :  { %3847 = vmatpush.bf16.msra.mxu1 %v8765_v55  ;;  %v5639_v8 = vmul.f32 -1.442695, %v3497_v37  ;;  %v5640_v19 = vmul.f32 -1.442695, %v3498_v56 }
0x176d   :  { %4093 = vmatpush.bf16.msrb.mxu2 %v9850_v39  ;;  %6051 = vpow2.f32 %v5639_v8 }
0x176e   :  { %6053 = vpow2.f32 %v5640_v19 }
0x176f   :  { %3848 = vmatpush.bf16.msra.mxu1 %v8769_v32 }
0x1771   :  { %4094 = vmatpush.bf16.msrb.mxu2 %v9851_v11 }
0x1773   :  { %v6052_v39 = vpop.eup %6051 }
0x1774   :  { %v3505_v17 = vadd.f32 1.0, %v6052_v39  ;;  %v6054_v50 = vpop.eup %6053 }
0x1775   :  { %4095 = vmatpush.bf16.msrb.mxu2 %v9852_v54  ;;  %v3506_v40 = vadd.f32 1.0, %v6054_v50 }
0x1776   :  { %6055 = vrcp.f32 %v3505_v17  ;;  %vm3512_vm10 = vweird.f32 %v3505_v17  ;;  %v3518_v26 = vand.u32 2147483648, %v3505_v17  ;;  %v3516_v37 = vand.u32 2147483647, %v3505_v17 }
0x1777   :  { %6057 = vrcp.f32 %v3506_v40  ;;  %vm3527_vm13 = vweird.f32 %v3506_v40  ;;  %v3533_v19 = vand.u32 2147483648, %v3506_v40  ;;  %v3531_v25 = vand.u32 2147483647, %v3506_v40 }
0x1778   :  { %v3519_v56 = vor.u32 1.1754944e-38, %v3518_v26  ;;  %vm3517_vm15 = vcmp.eq.f32.partialorder %v3516_v37, 8.507059e+37  ;;  %v9883_v26 = vld [vmem:[#allocation45_spill] sm:$0xff] }
0x1779   :  { %vm3532_vm1 = vcmp.eq.f32.partialorder %v3531_v25, 8.507059e+37 }
0x177c   :  { %v6056_v11 = vpop.eup %6055 }
0x177d   :  { %v3508_v57 = vmul.f32 %v6056_v11, %v3505_v17  ;;  %v6058_v54 = vpop.eup %6057  ;;  %vm3513_vm11 = vweird.f32 %v6056_v11  ;;  %v9882_v17 = vld [vmem:[#allocation66_spill] sm:$0xff] }
0x177e   :  { %v3523_v53 = vmul.f32 %v6058_v54, %v3506_v40  ;;  %vm3514_vm12 = vmor %vm3512_vm10, %vm3513_vm11  ;;  %vm3528_vm14 = vweird.f32 %v6058_v54 }
0x177f   :  { %v3509_v16 = vsub.f32 1.0, %v3508_v57  ;;  %vm3529_vm0 = vmor %vm3527_vm13, %vm3528_vm14 }
0x1780   :  { %v3524_v42 = vsub.f32 1.0, %v3523_v53 }
0x1781   :  { %v3510_v0 = vmul.f32 %v6056_v11, %v3509_v16  ;;  %v3534_v16 = vor.u32 1.1754944e-38, %v3533_v19 }
0x1782   :  { %v3525_v8 = vmul.f32 %v6058_v54, %v3524_v42  ;;  %v3541_v42 = vmul.f32 0.3125, %v9882_v17 }
0x1783   :  { %v3511_v9 = vadd.f32 %v6056_v11, %v3510_v0 }
0x1784   :  { %v3526_v50 = vadd.f32 %v6058_v54, %v3525_v8 }
0x1785   :  { %v3515_v39 = vsel %vm3514_vm12, %v6056_v11, %v3511_v9  ;;  %v3543_v11 = vperm.slane %v3541_v42, 0 }
0x1786   :  { %v8777_v57 = vsel %vm3517_vm15, %v3519_v56, %v3515_v39  ;;  %v3530_v53 = vsel %vm3529_vm0, %v6058_v54, %v3526_v50  ;;  %v9884_v54 = vld [vmem:[#allocation48_spill] sm:$0xff] }
0x1787   :  { %v3537_v0 = vmul.f32 %v9881_v13, %v8777_v57  ;;  %v8782_v31 = vsel %vm3532_vm1, %v3534_v16, %v3530_v53 }
0x1788   :  { %v3538_v40 = vmul.f32 %v9881_v13, %v8782_v31 }
0x1789   :  { %v3539_v3 = vadd.f32 %v3537_v0, %v9883_v26 }
0x178a   :  { %v3540_v25 = vadd.f32 %v3538_v40, %v9884_v54 }
0x178b   :  { %v8788_v37 = vadd.f32 %v3543_v11, %v3539_v3 }
0x178c   :  { %v8794_v19 = vadd.f32 %v3543_v11, %v3540_v25 }
0x17cf   :  { %v3674_v35 = vpop.f32.mrf.mxu1 }
0x17d0   :  { %v3694_v9 = vmul.f32 %v3674_v35, %v8777_v57 }
0x17d2   :  { %v8792_v8 = vadd.f32 %v3694_v9, %v8788_v37 }
0x17d4   :  { %v3706_v50 = vmul.f32 0.0625, %v8792_v8 }
0x17d6   :  { %v3708_v53 = vadd.f32 %v3706_v50, %v8493_v6 }
0x17d7   :  { %v3676_v56 = vpop.f32.mrf.mxu1 }
0x17d8   :  { %v3695_v39 = vmul.f32 %v3676_v56, %v8782_v31 }
0x17da   :  { %v8799_v16 = vadd.f32 %v3695_v39, %v8794_v19 }
0x17db   :  { %v3689_v13 = vpop.f32.mrf.mxu2 }
0x17dc   :  { %v3707_v35 = vmul.f32 0.0625, %v8799_v16  ;;  %v3698_v3 = vmul.f32 %v3689_v13, %v8777_v57 }
0x17de   :  { %v3709_v0 = vadd.f32 %v3707_v35, %v8496_v4  ;;  %v3700_v17 = vmul.f32 %v8476_v46, %v3698_v3 }
0x17e0   :  { %v3710_v42 = vpack.c.bf16 %v3709_v0, %v3708_v53  ;;  %3702 = vadd.xlane.f32.xlu2 %v3700_v17 }
0x17e2   :  { %3719 = vmatmul.bf16.vlgmr.msrb.gmra.mxu3 %v3710_v42 }
0x17e3   :  { %v3691_v11 = vpop.f32.mrf.mxu2  ;;  %4117 = vmatpush.bf16.msrb.mxu3 %v8590_v34 }
0x17e4   :  { %v3699_v40 = vmul.f32 %v3691_v11, %v8782_v31 }
0x17e6   :  { %v3701_v9 = vmul.f32 %v8488_v23, %v3699_v40 }
0x17e7   :  { %4118 = vmatpush.bf16.msrb.mxu3 %v8593_v49 }
0x17e8   :  { %3704 = vadd.xlane.f32.xlu0 %v3701_v9 }
0x17eb   :  { %4119 = vmatpush.bf16.msrb.mxu3 %v8596_v20 }
0x17ef   :  { %4120 = vmatpush.bf16.msrb.mxu3 %v8599_v38 }
0x17f3   :  { %4121 = vmatpush.bf16.msrb.mxu3 %v8602_v43 }
0x17f7   :  { %4122 = vmatpush.bf16.msrb.mxu3 %v8605_v21 }
0x17fb   :  { %4123 = vmatpush.bf16.msrb.mxu3 %v8608_v7 }
0x17ff   :  { %4124 = vmatpush.bf16.msrb.mxu3 %v8611_v12 }
0x1865   :  { %v3720_v46 = vpop.f32.mrf.mxu3 }
0x1866   :  { %v3725_v25 = vmul.f32 %v3720_v46, %v8617_v2 }
0x1868   :  { %v3727_v23 = vadd.f32 %v3725_v25, %v8625_v58 }
0x186a   :  { %6059 = vtanh.f32 %v3727_v23 }
0x186d   :  { %v3722_v56 = vpop.f32.mrf.mxu3 }
0x186e   :  { %v3726_v39 = vmul.f32 %v3722_v56, %v8623_v36 }
0x1870   :  { %v3728_v50 = vadd.f32 %v3726_v39, %v8632_v24  ;;  %v6060_v13 = vpop.eup %6059 }
0x1871   :  { %v3731_v35 = vmul.f32 %v6060_v13, %v6060_v13 }
0x1872   :  { %6061 = vtanh.f32 %v3728_v50 }
0x1873   :  { %v3733_v53 = vsub.f32 1.0, %v3731_v35 }
0x1875   :  { %v3735_v2 = vmul.f32 %v3733_v53, %v8638_v10 }
0x1878   :  { %v6062_v3 = vpop.eup %6061 }
0x1879   :  { %v3732_v0 = vmul.f32 %v6062_v3, %v6062_v3  ;;  %v3737_v17 = vpack.c.bf16 %v6062_v3, %v6060_v13 }
0x187b   :  { %v3734_v42 = vsub.f32 1.0, %v3732_v0  ;;  %3746 = vmatmul.bf16.vlgmr.msrb.gmra.mxu0 %v3737_v17 }
0x187c   :  { %4132 = vmatpush.bf16.msrb.mxu0 %v8590_v34 }
0x187d   :  { %v3736_v58 = vmul.f32 %v3734_v42, %v8642_v59 }
0x187f   :  { %v3752_v11 = vpack.c.bf16 %v3736_v58, %v3735_v2 }
0x1880   :  { %4133 = vmatpush.bf16.msrb.mxu0 %v8593_v49 }
0x1881   :  { %3761 = vmatmul.bf16.vlgmr.msrb.gmra.mxu1 %v3752_v11 }
0x1882   :  { %4161 = vmatpush.bf16.msrb.mxu1 %v8648_v27 }
0x1884   :  { %4134 = vmatpush.bf16.msrb.mxu0 %v8596_v20 }
0x1886   :  { %4162 = vmatpush.bf16.msrb.mxu1 %v8652_v48 }
0x1888   :  { %4135 = vmatpush.bf16.msrb.mxu0 %v8599_v38 }
0x188a   :  { %4163 = vmatpush.bf16.msrb.mxu1 %v8656_v47 }
0x188c   :  { %4136 = vmatpush.bf16.msrb.mxu0 %v8602_v43 }
0x188e   :  { %4164 = vmatpush.bf16.msrb.mxu1 %v8701_v61 }
0x1890   :  { %4137 = vmatpush.bf16.msrb.mxu0 %v8605_v21 }
0x1892   :  { %4165 = vmatpush.bf16.msrb.mxu1 %v8707_v52 }
0x1894   :  { %4138 = vmatpush.bf16.msrb.mxu0 %v8608_v7 }
0x1896   :  { %4166 = vmatpush.bf16.msrb.mxu1 %v8711_v14 }
0x1898   :  { %4139 = vmatpush.bf16.msrb.mxu0 %v8611_v12 }
0x189a   :  { %4167 = vmatpush.bf16.msrb.mxu1 %v8715_v51 }
0x189e   :  { %4168 = vmatpush.bf16.msrb.mxu1 %v8719_v28 }
0x18f8   :  { %v3747_v36 = vpop.f32.mrf.mxu0 }
0x18f9   :  { %v3767_v24 = vmul.f32 %v3747_v36, %v8671_v33 }
0x18fb   :  { %v3769_v10 = vadd.f32 %v3767_v24, %v8679_v62 }
0x18fd   :  { %6063 = vtanh.f32 %v3769_v10 }
0x18fe   :  { %v3762_v40 = vpop.f32.mrf.mxu1 }
0x18ff   :  { %v3771_v3 = vmul.f32 %v3762_v40, %v8671_v33 }
0x1900   :  { %v3749_v59 = vpop.f32.mrf.mxu0 }
0x1901   :  { %v3768_v9 = vmul.f32 %v3749_v59, %v8677_v41 }
0x1903   :  { %v3770_v46 = vadd.f32 %v3768_v9, %v8686_v1  ;;  %v6064_v25 = vpop.eup %6063 }
0x1904   :  { %v3775_v23 = vmul.f32 %v6064_v25, %v6064_v25 }
0x1905   :  { %6065 = vtanh.f32 %v3770_v46 }
0x1906   :  { %v3764_v39 = vpop.f32.mrf.mxu1  ;;  %v3777_v50 = vsub.f32 1.0, %v3775_v23 }
0x1907   :  { %v3772_v53 = vmul.f32 %v3764_v39, %v8677_v41 }
0x1908   :  { %v3779_v0 = vmul.f32 %v3777_v50, %v3771_v3  ;;  %v8884_v3 = vld [vmem:[#allocation2 + $0x18] sm:$0xff] }
0x190b   :  { %v6066_v56 = vpop.eup %6065 }
0x190c   :  { %v3781_v13 = vpack.c.bf16 %v6066_v56, %v6064_v25  ;;  %v3776_v35 = vmul.f32 %v6066_v56, %v6066_v56 }
0x190e   :  { %v3778_v62 = vsub.f32 1.0, %v3776_v35  ;;  %3790 = vmatmul.bf16.vlgmr.msra.gmra.mxu2 %v3781_v13  ;;  %v8872_v35 = vld [vmem:[#allocation2 + $0x30] sm:$0xff] }
0x190f   :  { %4176 = vmatpush.bf16.msra.mxu2 %v8648_v27 }
0x1910   :  { %v3780_v17 = vmul.f32 %v3778_v62, %v3772_v53  ;;  %v8888_v53 = vld [vmem:[#allocation2 + $0x10] sm:$0xff]  ;;  %v8892_v62 = vld [vmem:[#allocation2 + $0x8] sm:$0xff] }
0x1912   :  { %v3796_v42 = vpack.c.bf16 %v3780_v17, %v3779_v0  ;;  %v8895_v0 = vld [vmem:[#allocation2] sm:$0xff] }
0x1913   :  { %4177 = vmatpush.bf16.msra.mxu2 %v8652_v48 }
0x1914   :  { %3805 = vmatmul.bf16.vlgmr.msra.gmra.mxu3 %v3796_v42 }
0x1915   :  { %4205 = vmatpush.bf16.msra.mxu3 %v8694_v30 }
0x1917   :  { %4178 = vmatpush.bf16.msra.mxu2 %v8656_v47 }
0x1919   :  { %4206 = vmatpush.bf16.msra.mxu3 %v8698_v29 }
0x191b   :  { %4179 = vmatpush.bf16.msra.mxu2 %v8701_v61 }
0x191d   :  { %4207 = vmatpush.bf16.msra.mxu3 %v8704_v45 }
0x191f   :  { %4180 = vmatpush.bf16.msra.mxu2 %v8707_v52 }
0x1921   :  { %4208 = vmatpush.bf16.msra.mxu3 %v8753_v60 }
0x1923   :  { %4181 = vmatpush.bf16.msra.mxu2 %v8711_v14 }
0x1925   :  { %4209 = vmatpush.bf16.msra.mxu3 %v8757_v63 }
0x1927   :  { %4182 = vmatpush.bf16.msra.mxu2 %v8715_v51 }
0x1929   :  { %4210 = vmatpush.bf16.msra.mxu3 %v8761_v5 }
0x192b   :  { %4183 = vmatpush.bf16.msra.mxu2 %v8719_v28 }
0x192d   :  { %4211 = vmatpush.bf16.msra.mxu3 %v8765_v55 }
0x1931   :  { %4212 = vmatpush.bf16.msra.mxu3 %v8769_v32 }
0x1991   :  { %v3791_v33 = vpop.f32.mrf.mxu2 }
0x1992   :  { %v3811_v41 = vmul.f32 %v3791_v33, %v8727_v44 }
0x1994   :  { %v3813_v1 = vadd.f32 %v3811_v41, %v8735_v18 }
0x1996   :  { %6067 = vtanh.f32 %v3813_v1 }
0x1997   :  { %v3806_v58 = vpop.f32.mrf.mxu3 }
0x1998   :  { %v3815_v23 = vmul.f32 %v3806_v58, %v8727_v44  ;;  %v8876_v44 = vld [vmem:[#allocation2 + $0x28] sm:$0xff] }
0x1999   :  { %v3793_v2 = vpop.f32.mrf.mxu2 }
0x199a   :  { %v3812_v11 = vmul.f32 %v3793_v2, %v8733_v15 }
0x199c   :  { %v3814_v36 = vadd.f32 %v3812_v11, %v8742_v22  ;;  %v6068_v24 = vpop.eup %6067  ;;  %v8868_v22 = vld [vmem:[#allocation2 + $0x38] sm:$0xff]  ;;  %v8905_v11 = vld [vmem:[%s6654_s9] sm:$0xff] }
0x199d   :  { %v3819_v10 = vmul.f32 %v6068_v24, %v6068_v24 }
0x199e   :  { %6069 = vtanh.f32 %v3814_v36 }
0x199f   :  { %v3808_v40 = vpop.f32.mrf.mxu3  ;;  %v3821_v9 = vsub.f32 1.0, %v3819_v10 }
0x19a0   :  { %v3816_v56 = vmul.f32 %v3808_v40, %v8733_v15  ;;  %v8880_v15 = vld [vmem:[#allocation2 + $0x20] sm:$0xff] }
0x19a1   :  { %v3823_v39 = vmul.f32 %v3821_v9, %v3815_v23 }
0x19a4   :  { %v6070_v59 = vpop.eup %6069 }
0x19a5   :  { %v3825_v46 = vpack.c.bf16 %v6070_v59, %v6068_v24  ;;  %v3820_v25 = vmul.f32 %v6070_v59, %v6070_v59 }
0x19a7   :  { %v3822_v18 = vsub.f32 1.0, %v3820_v25  ;;  %3834 = vmatmul.bf16.vlgmr.msra.gmra.mxu0 %v3825_v46  ;;  %v8917_v25 = vld [vmem:[%s6654_s9 + $0x8] sm:$0xff] }
0x19a8   :  { %4220 = vmatpush.bf16.msra.mxu0 %v8694_v30 }
0x19a9   :  { %v3824_v50 = vmul.f32 %v3822_v18, %v3816_v56 }
0x19ab   :  { %v3840_v13 = vpack.c.bf16 %v3824_v50, %v3823_v39 }
0x19ac   :  { %4221 = vmatpush.bf16.msra.mxu0 %v8698_v29 }
0x19ad   :  { %3849 = vmatmul.bf16.vlgmr.msra.gmra.mxu1 %v3840_v13 }
0x19ae   :  { %4275 = vmatpush.bf16.msra.mxu1 %v8868_v22 }
0x19b0   :  { %4222 = vmatpush.bf16.msra.mxu0 %v8704_v45 }
0x19b2   :  { %4276 = vmatpush.bf16.msra.mxu1 %v8872_v35 }
0x19b4   :  { %4223 = vmatpush.bf16.msra.mxu0 %v8753_v60 }
0x19b6   :  { %4277 = vmatpush.bf16.msra.mxu1 %v8876_v44 }
0x19b8   :  { %4224 = vmatpush.bf16.msra.mxu0 %v8757_v63 }
0x19ba   :  { %4278 = vmatpush.bf16.msra.mxu1 %v8880_v15 }
0x19bc   :  { %4225 = vmatpush.bf16.msra.mxu0 %v8761_v5 }
0x19be   :  { %4279 = vmatpush.bf16.msra.mxu1 %v8884_v3 }
0x19c0   :  { %4226 = vmatpush.bf16.msra.mxu0 %v8765_v55 }
0x19c2   :  { %4280 = vmatpush.bf16.msra.mxu1 %v8888_v53 }
0x19c4   :  { %4227 = vmatpush.bf16.msra.mxu0 %v8769_v32 }
0x19c6   :  { %4281 = vmatpush.bf16.msra.mxu1 %v8892_v62 }
0x19ca   :  { %4282 = vmatpush.bf16.msra.mxu1 %v8895_v0 }
0x1a24   :  { %v3835_v17 = vpop.f32.mrf.mxu0 }
0x1a25   :  { %v3855_v42 = vmul.f32 %v3835_v17, %v8777_v57 }
0x1a27   :  { %v8900_v41 = vadd.f32 %v3855_v42, %v8788_v37 }
0x1a29   :  { %v3867_v24 = vmul.f32 0.125, %v8900_v41 }
0x1a2a   :  { %v3850_v33 = vpop.f32.mrf.mxu1 }
0x1a2b   :  { %v3859_v1 = vmul.f32 %v3850_v33, %v8777_v57  ;;  %v3869_v37 = vadd.f32 %v3867_v24, %v8493_v6 }
0x1a2c   :  { %v3837_v2 = vpop.f32.mrf.mxu0 }
0x1a2d   :  { %v3856_v58 = vmul.f32 %v3837_v2, %v8782_v31  ;;  %v3861_v36 = vmul.f32 %v8905_v11, %v3859_v1 }
0x1a2f   :  { %v8910_v10 = vadd.f32 %v3856_v58, %v8794_v19  ;;  %3863 = vadd.xlane.f32.xlu0 %v3861_v36 }
0x1a31   :  { %v3868_v59 = vmul.f32 0.125, %v8910_v10 }
0x1a32   :  { %v3852_v40 = vpop.f32.mrf.mxu1 }
0x1a33   :  { %v3870_v57 = vadd.f32 %v3868_v59, %v8496_v4  ;;  %v3860_v9 = vmul.f32 %v3852_v40, %v8782_v31  ;;  %v8929_v31 = vld [vmem:[%s6679_s29] sm:$0x1] }
0x1a34   :  { %9885 = vst [vmem:[#allocation47_spill] sm:$0xff] %v8929_v31  ;;  %v3871_v19 = vmul.f32 0.375, %v8929_v31  ;;  %v9902_v31 = vld [vmem:[#allocation44_spill] sm:$0xff] }
0x1a35   :  { %v4087_v46 = vpack.c.bf16 %v3870_v57, %v3869_v37  ;;  %v3862_v23 = vmul.f32 %v8917_v25, %v3860_v9 }
0x1a36   :  { %v3873_v56 = vperm.slane %v3871_v19, 0 }
0x1a37   :  { %4096 = vmatmul.bf16.vlgmr.msrb.gmra.mxu2 %v4087_v46  ;;  %3865 = vadd.xlane.f32.xlu1 %v3862_v23  ;;  %v8937_v23 = vld [vmem:[%s9698_s14] ss:$0 sm:$0xff] }
0x1a38   :  { %4302 = vmatpush.bf16.msrb.mxu2 %v8590_v34  ;;  %v9886_v34 = vld [vmem:[#allocation31_spill] sm:$0xff]  ;;  %9888 = vst [vmem:[#allocation55_spill] sm:$0xff] %v8937_v23 }
0x1a39   :  { %v3875_v18 = vadd.f32 %v3873_v56, %v9886_v34 }
0x1a3c   :  { %4303 = vmatpush.bf16.msrb.mxu2 %v8593_v49  ;;  %v5641_v49 = vmul.f32 -1.442695, %v3875_v18 }
0x1a3e   :  { %6071 = vpow2.f32 %v5641_v49 }
0x1a40   :  { %4304 = vmatpush.bf16.msrb.mxu2 %v8596_v20  ;;  %v9887_v20 = vld [vmem:[#allocation32_spill] sm:$0xff] }
0x1a41   :  { %v3876_v39 = vadd.f32 %v3873_v56, %v9887_v20  ;;  %v8942_v56 = vld [vmem:[%s9697_s3] sm:$0x1] }
0x1a42   :  { %9889 = vst [vmem:[#allocation56_spill] sm:$0xff] %v8942_v56  ;;  %v3919_v18 = vmul.f32 0.375, %v8942_v56 }
0x1a44   :  { %4305 = vmatpush.bf16.msrb.mxu2 %v8599_v38  ;;  %v5642_v38 = vmul.f32 -1.442695, %v3876_v39  ;;  %v6072_v50 = vpop.eup %6071 }
0x1a46   :  { %6073 = vpow2.f32 %v5642_v38 }
0x1a48   :  { %4306 = vmatpush.bf16.msrb.mxu2 %v8602_v43  ;;  %v3883_v43 = vadd.f32 1.0, %v6072_v50  ;;  %v9890_v50 = vld [vmem:[#allocation33_spill] sm:$0xff] }
0x1a4a   :  { %6075 = vrcp.f32 %v3883_v43  ;;  %v3896_v36 = vand.u32 2147483648, %v3883_v43  ;;  %vm3890_vm3 = vweird.f32 %v3883_v43  ;;  %v3894_v24 = vand.u32 2147483647, %v3883_v43 }
0x1a4c   :  { %4307 = vmatpush.bf16.msrb.mxu2 %v8605_v21  ;;  %v6074_v21 = vpop.eup %6073  ;;  %v3897_v37 = vor.u32 1.1754944e-38, %v3896_v36  ;;  %vm3895_vm5 = vcmp.eq.f32.partialorder %v3894_v24, 8.507059e+37 }
0x1a50   :  { %4308 = vmatpush.bf16.msrb.mxu2 %v8608_v7  ;;  %v3884_v7 = vadd.f32 1.0, %v6074_v21  ;;  %v6076_v13 = vpop.eup %6075  ;;  %v3921_v21 = vperm.slane %v3919_v18, 0 }
0x1a51   :  { %vm3891_vm2 = vweird.f32 %v6076_v13 }
0x1a52   :  { %6077 = vrcp.f32 %v3884_v7  ;;  %vm3892_vm4 = vmor %vm3890_vm3, %vm3891_vm2  ;;  %v3911_v46 = vand.u32 2147483648, %v3884_v7  ;;  %vm3905_vm7 = vweird.f32 %v3884_v7  ;;  %v3909_v49 = vand.u32 2147483647, %v3884_v7 }
0x1a54   :  { %4309 = vmatpush.bf16.msrb.mxu2 %v8611_v12  ;;  %v3886_v12 = vmul.f32 %v6076_v13, %v3883_v43  ;;  %v3912_v38 = vor.u32 1.1754944e-38, %v3911_v46  ;;  %vm3910_vm9 = vcmp.eq.f32.partialorder %v3909_v49, 8.507059e+37  ;;  %v9892_v49 = vld [vmem:[#allocation37_spill] sm:$0xff] }
0x1a56   :  { %v3887_v17 = vsub.f32 1.0, %v3886_v12 }
0x1a58   :  { %v6078_v42 = vpop.eup %6077  ;;  %v3888_v33 = vmul.f32 %v6076_v13, %v3887_v17 }
0x1a59   :  { %v3901_v1 = vmul.f32 %v6078_v42, %v3884_v7  ;;  %vm3906_vm6 = vweird.f32 %v6078_v42  ;;  %v9891_v7 = vld [vmem:[#allocation34_spill] sm:$0xff] }
0x1a5a   :  { %v3889_v2 = vadd.f32 %v6076_v13, %v3888_v33  ;;  %vm3907_vm8 = vmor %vm3905_vm7, %vm3906_vm6 }
0x1a5b   :  { %v3902_v58 = vsub.f32 1.0, %v3901_v1 }
0x1a5c   :  { %v3893_v59 = vsel %vm3892_vm4, %v6076_v13, %v3889_v2 }
0x1a5d   :  { %v3903_v40 = vmul.f32 %v6078_v42, %v3902_v58  ;;  %v8934_v57 = vsel %vm3895_vm5, %v3897_v37, %v3893_v59 }
0x1a5e   :  { %v3915_v19 = vmul.f32 %v8937_v23, %v8934_v57 }
0x1a5f   :  { %v3904_v9 = vadd.f32 %v6078_v42, %v3903_v40 }
0x1a60   :  { %v3917_v43 = vadd.f32 %v3915_v19, %v9890_v50 }
0x1a61   :  { %v3908_v39 = vsel %vm3907_vm8, %v6078_v42, %v3904_v9 }
0x1a62   :  { %v8946_v13 = vsel %vm3910_vm9, %v3912_v38, %v3908_v39  ;;  %v8948_v17 = vadd.f32 %v3921_v21, %v3917_v43  ;;  %v8961_v39 = vmul.f32 %v8934_v57, %v9892_v49  ;;  %v9893_v38 = vld [vmem:[#allocation38_spill] sm:$0xff] }
0x1a63   :  { %v3916_v1 = vmul.f32 %v8937_v23, %v8946_v13  ;;  %v8965_v43 = vmul.f32 %v8946_v13, %v9893_v38  ;;  %v9020_v23 = vld [vmem:[%s9712_s12] ss:$0 sm:$0xff] }
0x1a64   :  { %9899 = vst [vmem:[#allocation49_spill] sm:$0xff] %v9020_v23 }
0x1a65   :  { %v3918_v58 = vadd.f32 %v3916_v1, %v9891_v7 }
0x1a67   :  { %v8955_v36 = vadd.f32 %v3921_v21, %v3918_v58  ;;  %v8972_v58 = vld [vmem:[#allocation5 + $0x30] sm:$0xff] }
0x1aba   :  { %v4097_v12 = vpop.f32.mrf.mxu2 }
0x1abb   :  { %v4102_v33 = vmul.f32 %v4097_v12, %v8934_v57  ;;  %v8967_v12 = vld [vmem:[#allocation5 + $0x38] sm:$0xff] }
0x1abd   :  { %v4104_v2 = vadd.f32 %v4102_v33, %v8948_v17 }
0x1abf   :  { %6079 = vtanh.f32 %v4104_v2 }
0x1ac2   :  { %v4099_v42 = vpop.f32.mrf.mxu2 }
0x1ac3   :  { %v4103_v24 = vmul.f32 %v4099_v42, %v8946_v13  ;;  %v8976_v42 = vld [vmem:[#allocation5 + $0x28] sm:$0xff] }
0x1ac5   :  { %v4105_v59 = vadd.f32 %v4103_v24, %v8955_v36  ;;  %v6080_v40 = vpop.eup %6079  ;;  %v8980_v24 = vld [vmem:[#allocation5 + $0x20] sm:$0xff] }
0x1ac6   :  { %v4110_v37 = vmul.f32 %v6080_v40, %v6080_v40 }
0x1ac7   :  { %6081 = vtanh.f32 %v4105_v59  ;;  %v8984_v59 = vld [vmem:[#allocation5 + $0x18] sm:$0xff] }
0x1ac8   :  { %v4112_v46 = vsub.f32 1.0, %v4110_v37  ;;  %v4250_v37 = vmul.f32 2.0, %v8900_v41 }
0x1aca   :  { %v4114_v33 = vmul.f32 %v4112_v46, %v8961_v39 }
0x1acd   :  { %v6082_v9 = vpop.eup %6081 }
0x1ace   :  { %v4111_v19 = vmul.f32 %v6082_v9, %v6082_v9  ;;  %v4116_v18 = vpack.c.bf16 %v6082_v9, %v6080_v40  ;;  %v8988_v40 = vld [vmem:[#allocation5 + $0x10] sm:$0xff]  ;;  %v9894_v9 = vld [vmem:[#allocation46_spill] sm:$0xff] }
0x1ad0   :  { %v4113_v21 = vsub.f32 1.0, %v4111_v19  ;;  %4125 = vmatmul.bf16.vlgmr.msrb.gmra.mxu3 %v4116_v18  ;;  %v4247_v18 = vmul.f32 2.0, %v8799_v16 }
0x1ad1   :  { %4317 = vmatpush.bf16.msrb.mxu3 %v8967_v12 }
0x1ad2   :  { %v4115_v1 = vmul.f32 %v4113_v21, %v8965_v43  ;;  %v4251_v21 = vmul.f32 2.0, %v8910_v10 }
0x1ad4   :  { %v4131_v2 = vpack.c.bf16 %v4115_v1, %v4114_v33  ;;  %v9895_v33 = vld [vmem:[#allocation40_spill] sm:$0xff] }
0x1ad5   :  { %4318 = vmatpush.bf16.msrb.mxu3 %v8972_v58  ;;  %v4249_v1 = vadd.f32 %v4247_v18, %v9895_v33 }
0x1ad6   :  { %4140 = vmatmul.bf16.vlgmr.msrb.gmra.mxu0 %v4131_v2  ;;  %v9010_v2 = vld [vmem:[%s9704_s19] sm:$0x1] }
0x1ad7   :  { %4346 = vmatpush.bf16.msrb.mxu0 %v8648_v27  ;;  %v8992_v27 = vld [vmem:[#allocation5 + $0x8] sm:$0xff]  ;;  %9896 = vst [vmem:[#allocation63_spill] sm:$0xff] %v9010_v2  ;;  %v3925_v38 = vmul.f32 0.375, %v9010_v2  ;;  %v9013_v49 = vadd.f32 %v4251_v21, %v4249_v1 }
0x1ad9   :  { %4319 = vmatpush.bf16.msrb.mxu3 %v8976_v42  ;;  %v3927_v7 = vperm.slane %v3925_v38, 0 }
0x1adb   :  { %4347 = vmatpush.bf16.msrb.mxu0 %v8652_v48  ;;  %v8996_v48 = vld [vmem:[#allocation5] sm:$0xff] }
0x1add   :  { %4320 = vmatpush.bf16.msrb.mxu3 %v8980_v24 }
0x1adf   :  { %4348 = vmatpush.bf16.msrb.mxu0 %v8656_v47  ;;  %v4246_v47 = vmul.f32 2.0, %v8792_v8  ;;  %v9897_v8 = vld [vmem:[#allocation41_spill] sm:$0xff] }
0x1ae0   :  { %v3929_v50 = vadd.f32 %v3927_v7, %v9897_v8 }
0x1ae1   :  { %4321 = vmatpush.bf16.msrb.mxu3 %v8984_v59  ;;  %v4248_v46 = vadd.f32 %v4246_v47, %v9894_v9  ;;  %v9898_v47 = vld [vmem:[#allocation42_spill] sm:$0xff] }
0x1ae2   :  { %v5643_v41 = vmul.f32 -1.442695, %v3929_v50 }
0x1ae3   :  { %4349 = vmatpush.bf16.msrb.mxu0 %v8701_v61  ;;  %v9004_v19 = vadd.f32 %v4250_v37, %v4248_v46  ;;  %v3930_v37 = vadd.f32 %v3927_v7, %v9898_v47 }
0x1ae4   :  { %6083 = vpow2.f32 %v5643_v41 }
0x1ae5   :  { %4322 = vmatpush.bf16.msrb.mxu3 %v8988_v40  ;;  %v5644_v9 = vmul.f32 -1.442695, %v3930_v37 }
0x1ae7   :  { %4350 = vmatpush.bf16.msrb.mxu0 %v8707_v52  ;;  %6085 = vpow2.f32 %v5644_v9 }
0x1ae9   :  { %4323 = vmatpush.bf16.msrb.mxu3 %v8992_v27 }
0x1aea   :  { %v6084_v46 = vpop.eup %6083 }
0x1aeb   :  { %4351 = vmatpush.bf16.msrb.mxu0 %v8711_v14  ;;  %v3937_v16 = vadd.f32 1.0, %v6084_v46 }
0x1aed   :  { %4324 = vmatpush.bf16.msrb.mxu3 %v8996_v48  ;;  %6087 = vrcp.f32 %v3937_v16  ;;  %v6086_v10 = vpop.eup %6085  ;;  %vm3944_vm10 = vweird.f32 %v3937_v16  ;;  %v3950_v50 = vand.u32 2147483648, %v3937_v16  ;;  %v3948_v7 = vand.u32 2147483647, %v3937_v16 }
0x1aee   :  { %v3938_v18 = vadd.f32 1.0, %v6086_v10 }
0x1aef   :  { %4352 = vmatpush.bf16.msrb.mxu0 %v8715_v51  ;;  %v3951_v9 = vor.u32 1.1754944e-38, %v3950_v50  ;;  %vm3949_vm13 = vcmp.eq.f32.partialorder %v3948_v7, 8.507059e+37 }
0x1af0   :  { %6089 = vrcp.f32 %v3938_v18  ;;  %vm3959_vm14 = vweird.f32 %v3938_v18  ;;  %v3963_v8 = vand.u32 2147483647, %v3938_v18 }
0x1af2   :  { %vm3964_vm1 = vcmp.eq.f32.partialorder %v3963_v8, 8.507059e+37 }
0x1af3   :  { %4353 = vmatpush.bf16.msrb.mxu0 %v8719_v28  ;;  %v6088_v33 = vpop.eup %6087 }
0x1af4   :  { %v3940_v56 = vmul.f32 %v6088_v33, %v3937_v16  ;;  %vm3945_vm11 = vweird.f32 %v6088_v33 }
0x1af5   :  { %vm3946_vm12 = vmor %vm3944_vm10, %vm3945_vm11 }
0x1af6   :  { %v3941_v2 = vsub.f32 1.0, %v3940_v56  ;;  %v6090_v21 = vpop.eup %6089  ;;  %v3965_v56 = vand.u32 2147483648, %v3938_v18 }
0x1af7   :  { %v3955_v38 = vmul.f32 %v6090_v21, %v3938_v18  ;;  %vm3960_vm15 = vweird.f32 %v6090_v21 }
0x1af8   :  { %v3942_v1 = vmul.f32 %v6088_v33, %v3941_v2  ;;  %vm3961_vm0 = vmor %vm3959_vm14, %vm3960_vm15 }
0x1af9   :  { %v3956_v37 = vsub.f32 1.0, %v3955_v38 }
0x1afa   :  { %v3943_v41 = vadd.f32 %v6088_v33, %v3942_v1  ;;  %v9025_v1 = vld [vmem:[%s9715_s20] sm:$0x1] }
0x1afb   :  { %v3957_v10 = vmul.f32 %v6090_v21, %v3956_v37  ;;  %9900 = vst [vmem:[#allocation52_spill] sm:$0xff] %v9025_v1  ;;  %v3973_v38 = vmul.f32 0.375, %v9025_v1 }
0x1afc   :  { %v3947_v46 = vsel %vm3946_vm12, %v6088_v33, %v3943_v41  ;;  %v3966_v33 = vor.u32 1.1754944e-38, %v3965_v56  ;;  %v9901_v41 = vld [vmem:[#allocation43_spill] sm:$0xff] }
0x1afd   :  { %v9017_v47 = vsel %vm3949_vm13, %v3951_v9, %v3947_v46  ;;  %v3958_v2 = vadd.f32 %v6090_v21, %v3957_v10  ;;  %v3975_v37 = vperm.slane %v3973_v38, 0 }
0x1afe   :  { %v3969_v16 = vmul.f32 %v9020_v23, %v9017_v47 }
0x1aff   :  { %v3962_v50 = vsel %vm3961_vm0, %v6090_v21, %v3958_v2 }
0x1b00   :  { %v3971_v7 = vadd.f32 %v3969_v16, %v9901_v41  ;;  %v9029_v9 = vsel %vm3964_vm1, %v3966_v33, %v3962_v50 }
0x1b01   :  { %v3970_v20 = vmul.f32 %v9020_v23, %v9029_v9 }
0x1b02   :  { %v9031_v18 = vadd.f32 %v3975_v37, %v3971_v7 }
0x1b03   :  { %v3972_v1 = vadd.f32 %v3970_v20, %v9902_v31 }
0x1b05   :  { %v9038_v56 = vadd.f32 %v3975_v37, %v3972_v1  ;;  %v9044_v1 = vld [vmem:[#allocation7 + $0x38] sm:$0xff] }
0x1b53   :  { %v4126_v46 = vpop.f32.mrf.mxu3  ;;  %v4141_v8 = vpop.f32.mrf.mxu0 }
0x1b54   :  { %v4146_v10 = vmul.f32 %v4126_v46, %v9017_v47 }
0x1b56   :  { %v4148_v34 = vadd.f32 %v4146_v10, %v9031_v18  ;;  %v4150_v10 = vmul.f32 %v4141_v8, %v9017_v47  ;;  %v9051_v8 = vld [vmem:[#allocation7 + $0x28] sm:$0xff] }
0x1b58   :  { %6091 = vtanh.f32 %v4148_v34 }
0x1b5b   :  { %v4128_v21 = vpop.f32.mrf.mxu3  ;;  %v4143_v7 = vpop.f32.mrf.mxu0 }
0x1b5c   :  { %v4147_v2 = vmul.f32 %v4128_v21, %v9029_v9  ;;  %v4151_v34 = vmul.f32 %v4143_v7, %v9029_v9 }
0x1b5e   :  { %v4149_v16 = vadd.f32 %v4147_v2, %v9038_v56  ;;  %v6092_v38 = vpop.eup %6091 }
0x1b5f   :  { %v4154_v33 = vmul.f32 %v6092_v38, %v6092_v38 }
0x1b60   :  { %6093 = vtanh.f32 %v4149_v16  ;;  %v9047_v16 = vld [vmem:[#allocation7 + $0x30] sm:$0xff] }
0x1b61   :  { %v4156_v46 = vsub.f32 1.0, %v4154_v33 }
0x1b63   :  { %v4158_v37 = vmul.f32 %v4156_v46, %v4150_v10 }
0x1b66   :  { %v6094_v50 = vpop.eup %6093 }
0x1b67   :  { %v4160_v41 = vpack.c.bf16 %v6094_v50, %v6092_v38  ;;  %v4155_v23 = vmul.f32 %v6094_v50, %v6094_v50 }
0x1b69   :  { %v4157_v20 = vsub.f32 1.0, %v4155_v23  ;;  %4169 = vmatmul.bf16.vlgmr.msrb.gmra.mxu1 %v4160_v41  ;;  %v9905_v23 = vld [vmem:[#allocation51_spill] sm:$0xff] }
0x1b6a   :  { %4361 = vmatpush.bf16.msrb.mxu1 %v9044_v1 }
0x1b6b   :  { %v4159_v21 = vmul.f32 %v4157_v20, %v4151_v34 }
0x1b6d   :  { %v4175_v2 = vpack.c.bf16 %v4159_v21, %v4158_v37 }
0x1b6e   :  { %4362 = vmatpush.bf16.msrb.mxu1 %v9047_v16 }
0x1b6f   :  { %4184 = vmatmul.bf16.vlgmr.msra.gmra.mxu2 %v4175_v2 }
0x1b70   :  { %4390 = vmatpush.bf16.msra.mxu2 %v8694_v30  ;;  %v9067_v30 = vld [vmem:[%s9720_s27] sm:$0x1] }
0x1b71   :  { %9903 = vst [vmem:[#allocation39_spill] sm:$0xff] %v9067_v30 }
0x1b72   :  { %4363 = vmatpush.bf16.msrb.mxu1 %v9051_v8 }
0x1b74   :  { %4391 = vmatpush.bf16.msra.mxu2 %v8698_v29  ;;  %v3979_v29 = vmul.f32 0.375, %v9067_v30  ;;  %v9909_v30 = vld [vmem:[#allocation36_spill] sm:$0xff] }
0x1b76   :  { %4364 = vmatpush.bf16.msrb.mxu1 %v8701_v61  ;;  %v3981_v61 = vperm.slane %v3979_v29, 0 }
0x1b78   :  { %4392 = vmatpush.bf16.msra.mxu2 %v8704_v45  ;;  %v9904_v45 = vld [vmem:[#allocation50_spill] sm:$0xff]  ;;  %v3984_v41 = vadd.f32 %v3981_v61, %v9905_v23 }
0x1b7a   :  { %4365 = vmatpush.bf16.msrb.mxu1 %v8707_v52  ;;  %v3983_v52 = vadd.f32 %v3981_v61, %v9904_v45 }
0x1b7c   :  { %4393 = vmatpush.bf16.msra.mxu2 %v8753_v60 }
0x1b7e   :  { %4366 = vmatpush.bf16.msrb.mxu1 %v8711_v14  ;;  %v5645_v14 = vmul.f32 -1.442695, %v3983_v52 }
0x1b80   :  { %4394 = vmatpush.bf16.msra.mxu2 %v8757_v63  ;;  %6095 = vpow2.f32 %v5645_v14 }
0x1b82   :  { %4367 = vmatpush.bf16.msrb.mxu1 %v8715_v51  ;;  %v5646_v51 = vmul.f32 -1.442695, %v3984_v41 }
0x1b84   :  { %4395 = vmatpush.bf16.msra.mxu2 %v8761_v5  ;;  %6097 = vpow2.f32 %v5646_v51 }
0x1b86   :  { %4368 = vmatpush.bf16.msrb.mxu1 %v8719_v28  ;;  %v6096_v38 = vpop.eup %6095 }
0x1b87   :  { %v3991_v33 = vadd.f32 1.0, %v6096_v38 }
0x1b88   :  { %4396 = vmatpush.bf16.msra.mxu2 %v8765_v55 }
0x1b89   :  { %6099 = vrcp.f32 %v3991_v33  ;;  %vm3998_vm2 = vweird.f32 %v3991_v33  ;;  %v4004_v21 = vand.u32 2147483648, %v3991_v33  ;;  %v4002_v29 = vand.u32 2147483647, %v3991_v33 }
0x1b8a   :  { %v6098_v28 = vpop.eup %6097 }
0x1b8b   :  { %v3992_v50 = vadd.f32 1.0, %v6098_v28  ;;  %v4005_v52 = vor.u32 1.1754944e-38, %v4004_v21  ;;  %vm4003_vm5 = vcmp.eq.f32.partialorder %v4002_v29, 8.507059e+37 }
0x1b8c   :  { %4397 = vmatpush.bf16.msra.mxu2 %v8769_v32 }
0x1b8d   :  { %6101 = vrcp.f32 %v3992_v50  ;;  %vm4013_vm6 = vweird.f32 %v3992_v50  ;;  %v4019_v38 = vand.u32 2147483648, %v3992_v50 }
0x1b8f   :  { %v6100_v7 = vpop.eup %6099 }
0x1b90   :  { %v3994_v46 = vmul.f32 %v6100_v7, %v3991_v33  ;;  %vm3999_vm3 = vweird.f32 %v6100_v7 }
0x1b91   :  { %vm4000_vm4 = vmor %vm3998_vm2, %vm3999_vm3 }
0x1b92   :  { %v3995_v10 = vsub.f32 1.0, %v3994_v46  ;;  %v4017_v46 = vand.u32 2147483647, %v3992_v50 }
0x1b93   :  { %v6102_v34 = vpop.eup %6101 }
0x1b94   :  { %v3996_v20 = vmul.f32 %v6100_v7, %v3995_v10  ;;  %v4009_v37 = vmul.f32 %v6102_v34, %v3992_v50  ;;  %vm4014_vm7 = vweird.f32 %v6102_v34  ;;  %v9075_v10 = vld [vmem:[%s9725_s23] ss:$0 sm:$0xff]  ;;  %vm4018_vm9 = vcmp.eq.f32.partialorder %v4017_v46, 8.507059e+37 }
0x1b95   :  { %vm4015_vm8 = vmor %vm4013_vm6, %vm4014_vm7  ;;  %9906 = vst [vmem:[#allocation57_spill] sm:$0xff] %v9075_v10 }
0x1b96   :  { %v3997_v2 = vadd.f32 %v6100_v7, %v3996_v20  ;;  %v4010_v61 = vsub.f32 1.0, %v4009_v37  ;;  %v9080_v20 = vld [vmem:[%s9728_s1] sm:$0x1] }
0x1b97   :  { %9907 = vst [vmem:[#allocation59_spill] sm:$0xff] %v9080_v20  ;;  %v4027_v37 = vmul.f32 0.375, %v9080_v20 }
0x1b98   :  { %v4001_v14 = vsel %vm4000_vm4, %v6100_v7, %v3997_v2  ;;  %v4011_v41 = vmul.f32 %v6102_v34, %v4010_v61  ;;  %v4020_v7 = vor.u32 1.1754944e-38, %v4019_v38  ;;  %v9908_v2 = vld [vmem:[#allocation35_spill] sm:$0xff] }
0x1b99   :  { %v9072_v51 = vsel %vm4003_vm5, %v4005_v52, %v4001_v14  ;;  %v4029_v61 = vperm.slane %v4027_v37, 0 }
0x1b9a   :  { %v4012_v28 = vadd.f32 %v6102_v34, %v4011_v41  ;;  %v4023_v33 = vmul.f32 %v9075_v10, %v9072_v51 }
0x1b9c   :  { %v4016_v21 = vsel %vm4015_vm8, %v6102_v34, %v4012_v28  ;;  %v4025_v29 = vadd.f32 %v4023_v33, %v9908_v2 }
0x1b9d   :  { %v9084_v52 = vsel %vm4018_vm9, %v4020_v7, %v4016_v21 }
0x1b9e   :  { %v9086_v50 = vadd.f32 %v4029_v61, %v4025_v29  ;;  %v4024_v23 = vmul.f32 %v9075_v10, %v9084_v52 }
0x1ba0   :  { %v4026_v20 = vadd.f32 %v4024_v23, %v9909_v30 }
0x1ba2   :  { %v9093_v38 = vadd.f32 %v4029_v61, %v4026_v20  ;;  %v9099_v20 = vld [vmem:[#allocation8 + $0x38] sm:$0xff] }
0x1be6   :  { %v4170_v14 = vpop.f32.mrf.mxu1 }
0x1be7   :  { %v4190_v41 = vmul.f32 %v4170_v14, %v9072_v51 }
0x1be9   :  { %v4192_v45 = vadd.f32 %v4190_v41, %v9086_v50 }
0x1beb   :  { %6103 = vtanh.f32 %v4192_v45 }
0x1bee   :  { %v4172_v34 = vpop.f32.mrf.mxu1 }
0x1bef   :  { %v4191_v28 = vmul.f32 %v4172_v34, %v9084_v52 }
0x1bf1   :  { %v4193_v46 = vadd.f32 %v4191_v28, %v9093_v38  ;;  %v6104_v37 = vpop.eup %6103 }
0x1bf2   :  { %v4185_v33 = vpop.f32.mrf.mxu2  ;;  %v4198_v7 = vmul.f32 %v6104_v37, %v6104_v37 }
0x1bf3   :  { %6105 = vtanh.f32 %v4193_v46  ;;  %v4194_v14 = vmul.f32 %v4185_v33, %v9072_v51  ;;  %v9102_v46 = vld [vmem:[#allocation8 + $0x30] sm:$0xff]  ;;  %v9106_v33 = vld [vmem:[#allocation8 + $0x28] sm:$0xff] }
0x1bf4   :  { %v4200_v2 = vsub.f32 1.0, %v4198_v7  ;;  %v9912_v7 = vld [vmem:[#allocation54_spill] sm:$0xff] }
0x1bf6   :  { %v4202_v61 = vmul.f32 %v4200_v2, %v4194_v14  ;;  %v9911_v2 = vld [vmem:[#allocation53_spill] sm:$0xff] }
0x1bf9   :  { %v6106_v21 = vpop.eup %6105 }
0x1bfa   :  { %v4204_v29 = vpack.c.bf16 %v6106_v21, %v6104_v37  ;;  %v4187_v41 = vpop.f32.mrf.mxu2  ;;  %v4199_v10 = vmul.f32 %v6106_v21, %v6106_v21 }
0x1bfb   :  { %v4195_v45 = vmul.f32 %v4187_v41, %v9084_v52 }
0x1bfc   :  { %v4201_v23 = vsub.f32 1.0, %v4199_v10  ;;  %4213 = vmatmul.bf16.vlgmr.msra.gmra.mxu3 %v4204_v29 }
0x1bfd   :  { %4405 = vmatpush.bf16.msra.mxu3 %v9099_v20 }
0x1bfe   :  { %v4203_v34 = vmul.f32 %v4201_v23, %v4195_v45 }
0x1c00   :  { %v4219_v28 = vpack.c.bf16 %v4203_v34, %v4202_v61 }
0x1c01   :  { %4406 = vmatpush.bf16.msra.mxu3 %v9102_v46 }
0x1c02   :  { %4228 = vmatmul.bf16.vlgmr.msra.gmra.mxu0 %v4219_v28 }
0x1c03   :  { %4652 = vmatpush.bf16.msra.mxu0 %v8868_v22 }
0x1c05   :  { %4407 = vmatpush.bf16.msra.mxu3 %v9106_v33 }
0x1c07   :  { %4653 = vmatpush.bf16.msra.mxu0 %v8872_v35 }
0x1c09   :  { %4408 = vmatpush.bf16.msra.mxu3 %v8753_v60  ;;  %v9122_v60 = vld [vmem:[%s9730_s2] sm:$0x1] }
0x1c0a   :  { %9910 = vst [vmem:[#allocation58_spill] sm:$0xff] %v9122_v60 }
0x1c0b   :  { %4654 = vmatpush.bf16.msra.mxu0 %v8876_v44 }
0x1c0d   :  { %4409 = vmatpush.bf16.msra.mxu3 %v8757_v63  ;;  %v4033_v63 = vmul.f32 0.375, %v9122_v60 }
0x1c0f   :  { %4655 = vmatpush.bf16.msra.mxu0 %v8880_v15  ;;  %v4035_v10 = vperm.slane %v4033_v63, 0 }
0x1c11   :  { %4410 = vmatpush.bf16.msra.mxu3 %v8761_v5  ;;  %v4037_v37 = vadd.f32 %v4035_v10, %v9911_v2  ;;  %v4038_v21 = vadd.f32 %v4035_v10, %v9912_v7 }
0x1c13   :  { %4656 = vmatpush.bf16.msra.mxu0 %v8884_v3  ;;  %v5647_v5 = vmul.f32 -1.442695, %v4037_v37 }
0x1c15   :  { %4411 = vmatpush.bf16.msra.mxu3 %v8765_v55  ;;  %6107 = vpow2.f32 %v5647_v5  ;;  %v5648_v55 = vmul.f32 -1.442695, %v4038_v21 }
0x1c17   :  { %4657 = vmatpush.bf16.msra.mxu0 %v8888_v53  ;;  %6109 = vpow2.f32 %v5648_v55 }
0x1c19   :  { %4412 = vmatpush.bf16.msra.mxu3 %v8769_v32 }
0x1c1b   :  { %4658 = vmatpush.bf16.msra.mxu0 %v8892_v62  ;;  %v6108_v29 = vpop.eup %6107 }
0x1c1c   :  { %v4045_v14 = vadd.f32 1.0, %v6108_v29 }
0x1c1d   :  { %v6110_v32 = vpop.eup %6109 }
0x1c1e   :  { %6111 = vrcp.f32 %v4045_v14  ;;  %v4046_v41 = vadd.f32 1.0, %v6110_v32  ;;  %vm4052_vm10 = vweird.f32 %v4045_v14  ;;  %v4058_v2 = vand.u32 2147483648, %v4045_v14 }
0x1c1f   :  { %4659 = vmatpush.bf16.msra.mxu0 %v8895_v0  ;;  %v4056_v5 = vand.u32 2147483647, %v4045_v14 }
0x1c20   :  { %6113 = vrcp.f32 %v4046_v41  ;;  %v4059_v55 = vor.u32 1.1754944e-38, %v4058_v2  ;;  %vm4067_vm14 = vweird.f32 %v4046_v41  ;;  %v4073_v32 = vand.u32 2147483648, %v4046_v41 }
0x1c21   :  { %vm4057_vm13 = vcmp.eq.f32.partialorder %v4056_v5, 8.507059e+37 }
0x1c24   :  { %v6112_v45 = vpop.eup %6111 }
0x1c25   :  { %v4048_v23 = vmul.f32 %v6112_v45, %v4045_v14  ;;  %vm4053_vm11 = vweird.f32 %v6112_v45 }
0x1c26   :  { %v6114_v61 = vpop.eup %6113  ;;  %vm4054_vm12 = vmor %vm4052_vm10, %vm4053_vm11 }
0x1c27   :  { %v4049_v34 = vsub.f32 1.0, %v4048_v23  ;;  %v4063_v28 = vmul.f32 %v6114_v61, %v4046_v41  ;;  %vm4068_vm15 = vweird.f32 %v6114_v61  ;;  %v4071_v23 = vand.u32 2147483647, %v4046_v41 }
0x1c28   :  { %vm4069_vm0 = vmor %vm4067_vm14, %vm4068_vm15 }
0x1c29   :  { %v4050_v63 = vmul.f32 %v6112_v45, %v4049_v34  ;;  %v4064_v37 = vsub.f32 1.0, %v4063_v28  ;;  %v4074_v34 = vor.u32 1.1754944e-38, %v4073_v32  ;;  %v9130_v28 = vld [vmem:[%s9734_s7] ss:$0 sm:$0xff]  ;;  %vm4072_vm1 = vcmp.eq.f32.partialorder %v4071_v23, 8.507059e+37 }
0x1c2b   :  { %v4051_v10 = vadd.f32 %v6112_v45, %v4050_v63  ;;  %v4065_v21 = vmul.f32 %v6114_v61, %v4064_v37  ;;  %v9135_v63 = vld [vmem:[%s6799_s6] sm:$0x1] }
0x1c2c   :  { %9913 = vst [vmem:[#allocation60_spill] sm:$0xff] %v9135_v63  ;;  %v4081_v2 = vmul.f32 0.375, %v9135_v63 }
0x1c2d   :  { %v4055_v29 = vsel %vm4054_vm12, %v6112_v45, %v4051_v10  ;;  %v4066_v7 = vadd.f32 %v6114_v61, %v4065_v21 }
0x1c2e   :  { %v9127_v60 = vsel %vm4057_vm13, %v4059_v55, %v4055_v29  ;;  %v4083_v41 = vperm.slane %v4081_v2, 0 }
0x1c2f   :  { %v4077_v14 = vmul.f32 %v9130_v28, %v9127_v60  ;;  %v4070_v45 = vsel %vm4069_vm0, %v6114_v61, %v4066_v7 }
0x1c30   :  { %v9138_v37 = vsel %vm4072_vm1, %v4074_v34, %v4070_v45 }
0x1c31   :  { %v4079_v10 = vadd.f32 %v4077_v14, %v9883_v26  ;;  %v4078_v32 = vmul.f32 %v9130_v28, %v9138_v37 }
0x1c33   :  { %v9145_v30 = vadd.f32 %v4083_v41, %v4079_v10  ;;  %v4080_v61 = vadd.f32 %v4078_v32, %v9884_v54 }
0x1c35   :  { %v9151_v14 = vadd.f32 %v4083_v41, %v4080_v61 }
0x1c7f   :  { %v4214_v5 = vpop.f32.mrf.mxu3  ;;  %v4229_v21 = vpop.f32.mrf.mxu0 }
0x1c80   :  { %v4234_v55 = vmul.f32 %v4214_v5, %v9127_v60  ;;  %v4238_v29 = vmul.f32 %v4229_v21, %v9127_v60 }
0x1c82   :  { %v4240_v63 = vmul.f32 %v8905_v11, %v4238_v29  ;;  %v4236_v7 = vadd.f32 %v4234_v55, %v9145_v30 }
0x1c84   :  { %4242 = vadd.xlane.f32.xlu1 %v4240_v63  ;;  %v4254_v34 = vadd.f32 %v9004_v19, %v4236_v7 }
0x1c86   :  { %v4256_v5 = vmul.f32 0.020833334, %v4254_v34 }
0x1c87   :  { %v4216_v23 = vpop.f32.mrf.mxu3 }
0x1c88   :  { %v4235_v2 = vmul.f32 %v4216_v23, %v9138_v37  ;;  %v9157_v29 = vadd.f32 %v4256_v5, %v8493_v6 }
0x1c8a   :  { %v4237_v45 = vadd.f32 %v4235_v2, %v9151_v14 }
0x1c8c   :  { %v4255_v10 = vadd.f32 %v9013_v49, %v4237_v45 }
0x1c8e   :  { %v4257_v21 = vmul.f32 0.020833334, %v4255_v10 }
0x1c90   :  { %v9160_v63 = vadd.f32 %v4257_v21, %v8496_v4  ;;  %v9201_v21 = vld [vmem:[#allocation7] sm:$0xff] }
0x1c92   :  { %v4274_v55 = vpack.c.bf16 %v9160_v63, %v9157_v29 }
0x1c94   :  { %4283 = vmatmul.bf16.vlgmr.msra.gmra.mxu1 %v4274_v55 }
0x1c95   :  { %4681 = vmatpush.bf16.msra.mxu1 %v8967_v12 }
0x1c99   :  { %4682 = vmatpush.bf16.msra.mxu1 %v8972_v58 }
0x1c9d   :  { %4683 = vmatpush.bf16.msra.mxu1 %v8976_v42 }
0x1ca1   :  { %4684 = vmatpush.bf16.msra.mxu1 %v8980_v24 }
0x1ca5   :  { %4685 = vmatpush.bf16.msra.mxu1 %v8984_v59 }
0x1ca9   :  { %4686 = vmatpush.bf16.msra.mxu1 %v8988_v40 }
0x1cad   :  { %4687 = vmatpush.bf16.msra.mxu1 %v8992_v27 }
0x1cb1   :  { %4688 = vmatpush.bf16.msra.mxu1 %v8996_v48 }
0x1d11   :  { %v4284_v6 = vpop.f32.mrf.mxu1 }
0x1d12   :  { %v4289_v4 = vmul.f32 %v4284_v6, %v8934_v57 }
0x1d14   :  { %v4291_v49 = vadd.f32 %v4289_v4, %v8948_v17 }
0x1d16   :  { %6115 = vtanh.f32 %v4291_v49 }
0x1d19   :  { %v4286_v19 = vpop.f32.mrf.mxu1 }
0x1d1a   :  { %v4290_v41 = vmul.f32 %v4286_v19, %v8946_v13  ;;  %v9186_v13 = vld [vmem:[#allocation7 + $0x20] sm:$0xff] }
0x1d1c   :  { %v4292_v32 = vadd.f32 %v4290_v41, %v8955_v36  ;;  %v6116_v7 = vpop.eup %6115  ;;  %v9190_v36 = vld [vmem:[#allocation7 + $0x18] sm:$0xff] }
0x1d1d   :  { %v4295_v61 = vmul.f32 %v6116_v7, %v6116_v7 }
0x1d1e   :  { %6117 = vtanh.f32 %v4292_v32 }
0x1d1f   :  { %v4297_v34 = vsub.f32 1.0, %v4295_v61 }
0x1d21   :  { %v4299_v57 = vmul.f32 %v4297_v34, %v8961_v39  ;;  %v9194_v39 = vld [vmem:[#allocation7 + $0x10] sm:$0xff] }
0x1d24   :  { %v6118_v23 = vpop.eup %6117 }
0x1d25   :  { %v4296_v2 = vmul.f32 %v6118_v23, %v6118_v23  ;;  %v4301_v45 = vpack.c.bf16 %v6118_v23, %v6116_v7 }
0x1d27   :  { %v4298_v5 = vsub.f32 1.0, %v4296_v2  ;;  %4310 = vmatmul.bf16.vlgmr.msrb.gmra.mxu2 %v4301_v45 }
0x1d28   :  { %4696 = vmatpush.bf16.msrb.mxu2 %v8967_v12 }
0x1d29   :  { %v4300_v17 = vmul.f32 %v4298_v5, %v8965_v43  ;;  %v9198_v43 = vld [vmem:[#allocation7 + $0x8] sm:$0xff] }
0x1d2b   :  { %v4316_v10 = vpack.c.bf16 %v4300_v17, %v4299_v57 }
0x1d2c   :  { %4697 = vmatpush.bf16.msrb.mxu2 %v8972_v58 }
0x1d2d   :  { %4325 = vmatmul.bf16.vlgmr.msrb.gmra.mxu3 %v4316_v10 }
0x1d2e   :  { %4725 = vmatpush.bf16.msrb.mxu3 %v9044_v1 }
0x1d30   :  { %4698 = vmatpush.bf16.msrb.mxu2 %v8976_v42 }
0x1d32   :  { %4726 = vmatpush.bf16.msrb.mxu3 %v9047_v16 }
0x1d34   :  { %4699 = vmatpush.bf16.msrb.mxu2 %v8980_v24 }
0x1d36   :  { %4727 = vmatpush.bf16.msrb.mxu3 %v9051_v8 }
0x1d38   :  { %4700 = vmatpush.bf16.msrb.mxu2 %v8984_v59 }
0x1d3a   :  { %4728 = vmatpush.bf16.msrb.mxu3 %v9186_v13 }
0x1d3c   :  { %4701 = vmatpush.bf16.msrb.mxu2 %v8988_v40 }
0x1d3e   :  { %4729 = vmatpush.bf16.msrb.mxu3 %v9190_v36 }
0x1d40   :  { %4702 = vmatpush.bf16.msrb.mxu2 %v8992_v27 }
0x1d42   :  { %4730 = vmatpush.bf16.msrb.mxu3 %v9194_v39 }
0x1d44   :  { %4703 = vmatpush.bf16.msrb.mxu2 %v8996_v48 }
0x1d46   :  { %4731 = vmatpush.bf16.msrb.mxu3 %v9198_v43 }
0x1d4a   :  { %4732 = vmatpush.bf16.msrb.mxu3 %v9201_v21 }
0x1daa   :  { %v4311_v55 = vpop.f32.mrf.mxu2 }
0x1dab   :  { %v4331_v6 = vmul.f32 %v4311_v55, %v9017_v47 }
0x1dad   :  { %v4333_v4 = vadd.f32 %v4331_v6, %v9031_v18 }
0x1daf   :  { %6119 = vtanh.f32 %v4333_v4  ;;  %v9230_v4 = vld [vmem:[#allocation8 + $0x8] sm:$0xff] }
0x1db0   :  { %v4326_v19 = vpop.f32.mrf.mxu3 }
0x1db1   :  { %v4335_v57 = vmul.f32 %v4326_v19, %v9017_v47  ;;  %v9218_v47 = vld [vmem:[#allocation8 + $0x20] sm:$0xff]  ;;  %v9236_v19 = vpop.f32.mrf.mxu0 }
0x1db2   :  { %v4313_v49 = vpop.f32.mrf.mxu2 }
0x1db3   :  { %v4332_v41 = vmul.f32 %v4313_v49, %v9029_v9  ;;  %v9233_v49 = vld [vmem:[#allocation8] sm:$0xff] }
0x1db5   :  { %v4334_v32 = vadd.f32 %v4332_v41, %v9038_v56  ;;  %v6120_v7 = vpop.eup %6119  ;;  %v9226_v56 = vld [vmem:[#allocation8 + $0x10] sm:$0xff] }
0x1db6   :  { %v4339_v61 = vmul.f32 %v6120_v7, %v6120_v7 }
0x1db7   :  { %6121 = vtanh.f32 %v4334_v32 }
0x1db8   :  { %v4328_v34 = vpop.f32.mrf.mxu3  ;;  %v4341_v2 = vsub.f32 1.0, %v4339_v61 }
0x1db9   :  { %v4336_v17 = vmul.f32 %v4328_v34, %v9029_v9  ;;  %v9222_v9 = vld [vmem:[#allocation8 + $0x18] sm:$0xff] }
0x1dba   :  { %v4343_v10 = vmul.f32 %v4341_v2, %v4335_v57 }
0x1dbd   :  { %v6122_v23 = vpop.eup %6121 }
0x1dbe   :  { %v4345_v45 = vpack.c.bf16 %v6122_v23, %v6120_v7  ;;  %v4340_v5 = vmul.f32 %v6122_v23, %v6122_v23 }
0x1dc0   :  { %v4342_v18 = vsub.f32 1.0, %v4340_v5  ;;  %4354 = vmatmul.bf16.vlgmr.msrb.gmra.mxu0 %v4345_v45 }
0x1dc1   :  { %4740 = vmatpush.bf16.msrb.mxu0 %v9044_v1 }
0x1dc2   :  { %v4344_v55 = vmul.f32 %v4342_v18, %v4336_v17 }
0x1dc4   :  { %v4360_v6 = vpack.c.bf16 %v4344_v55, %v4343_v10 }
0x1dc5   :  { %4741 = vmatpush.bf16.msrb.mxu0 %v9047_v16 }
0x1dc6   :  { %4369 = vmatmul.bf16.vlgmr.msrb.gmra.mxu1 %v4360_v6 }
0x1dc7   :  { %4769 = vmatpush.bf16.msrb.mxu1 %v9099_v20 }
0x1dc9   :  { %4742 = vmatpush.bf16.msrb.mxu0 %v9051_v8 }
0x1dcb   :  { %4770 = vmatpush.bf16.msrb.mxu1 %v9102_v46 }
0x1dcd   :  { %4743 = vmatpush.bf16.msrb.mxu0 %v9186_v13 }
0x1dcf   :  { %4771 = vmatpush.bf16.msrb.mxu1 %v9106_v33 }
0x1dd1   :  { %4744 = vmatpush.bf16.msrb.mxu0 %v9190_v36 }
0x1dd3   :  { %4772 = vmatpush.bf16.msrb.mxu1 %v9218_v47 }
0x1dd5   :  { %4745 = vmatpush.bf16.msrb.mxu0 %v9194_v39 }
0x1dd7   :  { %4773 = vmatpush.bf16.msrb.mxu1 %v9222_v9 }
0x1dd9   :  { %4746 = vmatpush.bf16.msrb.mxu0 %v9198_v43 }
0x1ddb   :  { %4774 = vmatpush.bf16.msrb.mxu1 %v9226_v56 }
0x1ddd   :  { %4747 = vmatpush.bf16.msrb.mxu0 %v9201_v21 }
0x1ddf   :  { %4775 = vmatpush.bf16.msrb.mxu1 %v9230_v4 }
0x1de3   :  { %4776 = vmatpush.bf16.msrb.mxu1 %v9233_v49 }
0x1e3d   :  { %v4355_v41 = vpop.f32.mrf.mxu0 }
0x1e3e   :  { %v4375_v32 = vmul.f32 %v4355_v41, %v9072_v51 }
0x1e40   :  { %v4377_v7 = vadd.f32 %v4375_v32, %v9086_v50 }
0x1e42   :  { %6123 = vtanh.f32 %v4377_v7 }
0x1e43   :  { %v4370_v23 = vpop.f32.mrf.mxu1 }
0x1e44   :  { %v4379_v6 = vmul.f32 %v4370_v23, %v9072_v51 }
0x1e45   :  { %v4357_v61 = vpop.f32.mrf.mxu0 }
0x1e46   :  { %v4376_v34 = vmul.f32 %v4357_v61, %v9084_v52 }
0x1e48   :  { %v4378_v2 = vadd.f32 %v4376_v34, %v9093_v38  ;;  %v6124_v45 = vpop.eup %6123 }
0x1e49   :  { %v4383_v5 = vmul.f32 %v6124_v45, %v6124_v45 }
0x1e4a   :  { %6125 = vtanh.f32 %v4378_v2 }
0x1e4b   :  { %v4372_v17 = vpop.f32.mrf.mxu1  ;;  %v4385_v18 = vsub.f32 1.0, %v4383_v5  ;;  %v9917_v5 = vld [vmem:[#allocation31_spill] sm:$0xff] }
0x1e4c   :  { %v4380_v41 = vmul.f32 %v4372_v17, %v9084_v52 }
0x1e4d   :  { %v4387_v32 = vmul.f32 %v4385_v18, %v4379_v6  ;;  %v9918_v18 = vld [vmem:[#allocation32_spill] sm:$0xff] }
0x1e50   :  { %v6126_v57 = vpop.eup %6125 }
0x1e51   :  { %v4389_v10 = vpack.c.bf16 %v6126_v57, %v6124_v45  ;;  %v4384_v55 = vmul.f32 %v6126_v57, %v6126_v57 }
0x1e53   :  { %v4386_v50 = vsub.f32 1.0, %v4384_v55  ;;  %4398 = vmatmul.bf16.vlgmr.msra.gmra.mxu2 %v4389_v10 }
0x1e54   :  { %4784 = vmatpush.bf16.msra.mxu2 %v9099_v20 }
0x1e55   :  { %v4388_v7 = vmul.f32 %v4386_v50, %v4380_v41 }
0x1e57   :  { %v4404_v61 = vpack.c.bf16 %v4388_v7, %v4387_v32 }
0x1e58   :  { %4785 = vmatpush.bf16.msra.mxu2 %v9102_v46 }
0x1e59   :  { %4413 = vmatmul.bf16.vlgmr.msra.gmra.mxu3 %v4404_v61 }
0x1e5a   :  { %4815 = vmatpush.bf16.msra.mxu3 %v8868_v22 }
0x1e5c   :  { %4786 = vmatpush.bf16.msra.mxu2 %v9106_v33 }
0x1e5e   :  { %4816 = vmatpush.bf16.msra.mxu3 %v8872_v35 }
0x1e60   :  { %4787 = vmatpush.bf16.msra.mxu2 %v9218_v47 }
0x1e62   :  { %4817 = vmatpush.bf16.msra.mxu3 %v8876_v44 }
0x1e64   :  { %4788 = vmatpush.bf16.msra.mxu2 %v9222_v9 }
0x1e66   :  { %4818 = vmatpush.bf16.msra.mxu3 %v8880_v15 }
0x1e68   :  { %4789 = vmatpush.bf16.msra.mxu2 %v9226_v56 }
0x1e6a   :  { %4819 = vmatpush.bf16.msra.mxu3 %v8884_v3 }
0x1e6c   :  { %4790 = vmatpush.bf16.msra.mxu2 %v9230_v4 }
0x1e6e   :  { %4820 = vmatpush.bf16.msra.mxu3 %v8888_v53 }
0x1e70   :  { %4791 = vmatpush.bf16.msra.mxu2 %v9233_v49 }
0x1e72   :  { %4821 = vmatpush.bf16.msra.mxu3 %v8892_v62 }
0x1e76   :  { %4822 = vmatpush.bf16.msra.mxu3 %v8895_v0 }
0x1ed6   :  { %v4399_v22 = vpop.f32.mrf.mxu2 }
0x1ed7   :  { %v4419_v35 = vmul.f32 %v4399_v22, %v9127_v60 }
0x1ed9   :  { %v9262_v15 = vadd.f32 %v4419_v35, %v9145_v30 }
0x1edb   :  { %9914 = vst [vmem:[#allocation61_spill] sm:$0xff] %v9262_v15  ;;  %v4431_v38 = vmul.f32 0.0625, %v9262_v15 }
0x1edc   :  { %v4414_v44 = vpop.f32.mrf.mxu3 }
0x1edd   :  { %v4423_v51 = vmul.f32 %v4414_v44, %v9127_v60  ;;  %v4433_v34 = vadd.f32 %v4431_v38, %v9157_v29 }
0x1ede   :  { %v4401_v3 = vpop.f32.mrf.mxu2 }
0x1edf   :  { %v4420_v52 = vmul.f32 %v4401_v3, %v9138_v37  ;;  %v4425_v53 = vmul.f32 %v8905_v11, %v4423_v51  ;;  %v9916_v11 = vld [vmem:[#allocation47_spill] sm:$0xff] }
0x1ee1   :  { %v9269_v62 = vadd.f32 %v4420_v52, %v9151_v14  ;;  %4427 = vadd.xlane.f32.xlu0 %v4425_v53 }
0x1ee3   :  { %9915 = vst [vmem:[#allocation62_spill] sm:$0xff] %v9269_v62  ;;  %v4432_v0 = vmul.f32 0.0625, %v9269_v62 }
0x1ee4   :  { %v4416_v23 = vpop.f32.mrf.mxu3 }
0x1ee5   :  { %v4434_v30 = vadd.f32 %v4432_v0, %v9160_v63  ;;  %v4424_v60 = vmul.f32 %v4416_v23, %v9138_v37 }
0x1ee7   :  { %v4651_v2 = vpack.c.bf16 %v4434_v30, %v4433_v34  ;;  %v4426_v45 = vmul.f32 %v8917_v25, %v4424_v60  ;;  %v4435_v25 = vmul.f32 0.4375, %v9916_v11 }
0x1ee9   :  { %4660 = vmatmul.bf16.vlgmr.msra.gmra.mxu0 %v4651_v2  ;;  %4429 = vadd.xlane.f32.xlu1 %v4426_v45  ;;  %v4437_v14 = vperm.slane %v4435_v25, 0  ;;  %v9919_v45 = vld [vmem:[#allocation55_spill] sm:$0xff]  ;;  %v9920_v25 = vld [vmem:[#allocation56_spill] sm:$0xff] }
0x1eea   :  { %4842 = vmatpush.bf16.msra.mxu0 %v8967_v12 }
0x1eeb   :  { %v4439_v57 = vadd.f32 %v4437_v14, %v9917_v5  ;;  %v4440_v10 = vadd.f32 %v4437_v14, %v9918_v18  ;;  %v4483_v14 = vmul.f32 0.4375, %v9920_v25 }
0x1eed   :  { %v5649_v17 = vmul.f32 -1.442695, %v4439_v57  ;;  %v5650_v55 = vmul.f32 -1.442695, %v4440_v10 }
0x1eee   :  { %4843 = vmatpush.bf16.msra.mxu0 %v8972_v58 }
0x1eef   :  { %6127 = vpow2.f32 %v5649_v17 }
0x1ef0   :  { %6129 = vpow2.f32 %v5650_v55  ;;  %v9921_v55 = vld [vmem:[#allocation33_spill] sm:$0xff] }
0x1ef2   :  { %4844 = vmatpush.bf16.msra.mxu0 %v8976_v42 }
0x1ef5   :  { %v6128_v6 = vpop.eup %6127 }
0x1ef6   :  { %4845 = vmatpush.bf16.msra.mxu0 %v8980_v24  ;;  %v4447_v41 = vadd.f32 1.0, %v6128_v6  ;;  %v6130_v50 = vpop.eup %6129 }
0x1ef7   :  { %v4448_v32 = vadd.f32 1.0, %v6130_v50 }
0x1ef8   :  { %6131 = vrcp.f32 %v4447_v41  ;;  %v4460_v53 = vand.u32 2147483648, %v4447_v41  ;;  %vm4454_vm3 = vweird.f32 %v4447_v41  ;;  %v4458_v38 = vand.u32 2147483647, %v4447_v41 }
0x1ef9   :  { %6133 = vrcp.f32 %v4448_v32  ;;  %v4475_v2 = vand.u32 2147483648, %v4448_v32  ;;  %vm4469_vm7 = vweird.f32 %v4448_v32  ;;  %v4473_v57 = vand.u32 2147483647, %v4448_v32 }
0x1efa   :  { %4846 = vmatpush.bf16.msra.mxu0 %v8984_v59  ;;  %v4461_v34 = vor.u32 1.1754944e-38, %v4460_v53  ;;  %vm4459_vm5 = vcmp.eq.f32.partialorder %v4458_v38, 8.507059e+37 }
0x1efb   :  { %v4476_v10 = vor.u32 1.1754944e-38, %v4475_v2  ;;  %vm4474_vm9 = vcmp.eq.f32.partialorder %v4473_v57, 8.507059e+37 }
0x1efe   :  { %4847 = vmatpush.bf16.msra.mxu0 %v8988_v40  ;;  %v6132_v7 = vpop.eup %6131 }
0x1eff   :  { %v4450_v61 = vmul.f32 %v6132_v7, %v4447_v41  ;;  %v6134_v35 = vpop.eup %6133  ;;  %vm4455_vm2 = vweird.f32 %v6132_v7  ;;  %v4485_v41 = vperm.slane %v4483_v14, 0  ;;  %v9924_v14 = vld [vmem:[#allocation38_spill] sm:$0xff] }
0x1f00   :  { %v4465_v51 = vmul.f32 %v6134_v35, %v4448_v32  ;;  %vm4456_vm4 = vmor %vm4454_vm3, %vm4455_vm2  ;;  %vm4470_vm6 = vweird.f32 %v6134_v35  ;;  %v9922_v32 = vld [vmem:[#allocation34_spill] sm:$0xff] }
0x1f01   :  { %v4451_v22 = vsub.f32 1.0, %v4450_v61  ;;  %vm4471_vm8 = vmor %vm4469_vm7, %vm4470_vm6 }
0x1f02   :  { %4848 = vmatpush.bf16.msra.mxu0 %v8992_v27  ;;  %v4466_v52 = vsub.f32 1.0, %v4465_v51 }
0x1f03   :  { %v4452_v44 = vmul.f32 %v6132_v7, %v4451_v22 }
0x1f04   :  { %v4467_v23 = vmul.f32 %v6134_v35, %v4466_v52 }
0x1f05   :  { %v4453_v3 = vadd.f32 %v6132_v7, %v4452_v44 }
0x1f06   :  { %4849 = vmatpush.bf16.msra.mxu0 %v8996_v48  ;;  %v4468_v60 = vadd.f32 %v6134_v35, %v4467_v23 }
0x1f07   :  { %v4457_v0 = vsel %vm4456_vm4, %v6132_v7, %v4453_v3 }
0x1f08   :  { %v9287_v30 = vsel %vm4459_vm5, %v4461_v34, %v4457_v0  ;;  %v4472_v17 = vsel %vm4471_vm8, %v6134_v35, %v4468_v60 }
0x1f09   :  { %v4479_v11 = vmul.f32 %v9919_v45, %v9287_v30  ;;  %v9293_v50 = vsel %vm4474_vm9, %v4476_v10, %v4472_v17 }
0x1f0a   :  { %v4480_v44 = vmul.f32 %v9919_v45, %v9293_v50  ;;  %v9923_v45 = vld [vmem:[#allocation37_spill] sm:$0xff]  ;;  %v9312_v57 = vmul.f32 %v9293_v50, %v9924_v14 }
0x1f0b   :  { %v4481_v6 = vadd.f32 %v4479_v11, %v9921_v55  ;;  %v9308_v25 = vmul.f32 %v9287_v30, %v9923_v45 }
0x1f0c   :  { %v4482_v3 = vadd.f32 %v4480_v44, %v9922_v32 }
0x1f0d   :  { %v9295_v61 = vadd.f32 %v4485_v41, %v4481_v6 }
0x1f0e   :  { %v9302_v52 = vadd.f32 %v4485_v41, %v4482_v3 }
0x1f66   :  { %v4661_v7 = vpop.f32.mrf.mxu0 }
0x1f67   :  { %v4666_v22 = vmul.f32 %v4661_v7, %v9287_v30 }
0x1f69   :  { %v4668_v51 = vadd.f32 %v4666_v22, %v9295_v61 }
0x1f6b   :  { %6135 = vtanh.f32 %v4668_v51 }
0x1f6e   :  { %v4663_v35 = vpop.f32.mrf.mxu0 }
0x1f6f   :  { %v4667_v53 = vmul.f32 %v4663_v35, %v9293_v50 }
0x1f71   :  { %v4669_v38 = vadd.f32 %v4667_v53, %v9302_v52  ;;  %v6136_v0 = vpop.eup %6135 }
0x1f72   :  { %v4674_v23 = vmul.f32 %v6136_v0, %v6136_v0 }
0x1f73   :  { %6137 = vtanh.f32 %v4669_v38 }
0x1f74   :  { %v4676_v60 = vsub.f32 1.0, %v4674_v23 }
0x1f76   :  { %v4678_v10 = vmul.f32 %v4676_v60, %v9308_v25 }
0x1f79   :  { %v6138_v34 = vpop.eup %6137 }
0x1f7a   :  { %v4675_v2 = vmul.f32 %v6138_v34, %v6138_v34  ;;  %v4680_v11 = vpack.c.bf16 %v6138_v34, %v6136_v0 }
0x1f7c   :  { %v4677_v17 = vsub.f32 1.0, %v4675_v2  ;;  %4689 = vmatmul.bf16.vlgmr.msra.gmra.mxu1 %v4680_v11 }
0x1f7d   :  { %4857 = vmatpush.bf16.msra.mxu1 %v8967_v12  ;;  %v9925_v12 = vld [vmem:[#allocation63_spill] sm:$0xff] }
0x1f7e   :  { %v4679_v6 = vmul.f32 %v4677_v17, %v9312_v57 }
0x1f80   :  { %v4695_v41 = vpack.c.bf16 %v4679_v6, %v4678_v10 }
0x1f81   :  { %4858 = vmatpush.bf16.msra.mxu1 %v8972_v58  ;;  %v4489_v58 = vmul.f32 0.4375, %v9925_v12 }
0x1f82   :  { %4704 = vmatmul.bf16.vlgmr.msrb.gmra.mxu2 %v4695_v41 }
0x1f83   :  { %4886 = vmatpush.bf16.msrb.mxu2 %v9044_v1 }
0x1f85   :  { %4859 = vmatpush.bf16.msra.mxu1 %v8976_v42  ;;  %v4491_v42 = vperm.slane %v4489_v58, 0 }
0x1f87   :  { %4887 = vmatpush.bf16.msrb.mxu2 %v9047_v16 }
0x1f89   :  { %4860 = vmatpush.bf16.msra.mxu1 %v8980_v24  ;;  %v9926_v24 = vld [vmem:[#allocation41_spill] sm:$0xff] }
0x1f8b   :  { %4888 = vmatpush.bf16.msrb.mxu2 %v9051_v8 }
0x1f8d   :  { %4861 = vmatpush.bf16.msra.mxu1 %v8984_v59  ;;  %v4493_v59 = vadd.f32 %v4491_v42, %v9926_v24 }
0x1f8f   :  { %4889 = vmatpush.bf16.msrb.mxu2 %v9186_v13  ;;  %v5651_v7 = vmul.f32 -1.442695, %v4493_v59 }
0x1f91   :  { %4862 = vmatpush.bf16.msra.mxu1 %v8988_v40  ;;  %6139 = vpow2.f32 %v5651_v7  ;;  %v9927_v40 = vld [vmem:[#allocation42_spill] sm:$0xff]  ;;  %v9928_v7 = vld [vmem:[#allocation49_spill] sm:$0xff] }
0x1f92   :  { %v4494_v22 = vadd.f32 %v4491_v42, %v9927_v40 }
0x1f93   :  { %4890 = vmatpush.bf16.msrb.mxu2 %v9190_v36 }
0x1f94   :  { %v5652_v44 = vmul.f32 -1.442695, %v4494_v22 }
0x1f95   :  { %4863 = vmatpush.bf16.msra.mxu1 %v8992_v27 }
0x1f96   :  { %6141 = vpow2.f32 %v5652_v44  ;;  %v9929_v44 = vld [vmem:[#allocation52_spill] sm:$0xff] }
0x1f97   :  { %4891 = vmatpush.bf16.msrb.mxu2 %v9194_v39  ;;  %v6140_v51 = vpop.eup %6139 }
0x1f98   :  { %v4501_v27 = vadd.f32 1.0, %v6140_v51  ;;  %v4537_v51 = vmul.f32 0.4375, %v9929_v44 }
0x1f99   :  { %4864 = vmatpush.bf16.msra.mxu1 %v8996_v48 }
0x1f9a   :  { %6143 = vrcp.f32 %v4501_v27  ;;  %vm4508_vm10 = vweird.f32 %v4501_v27  ;;  %v4514_v60 = vand.u32 2147483648, %v4501_v27  ;;  %v4512_v11 = vand.u32 2147483647, %v4501_v27 }
0x1f9b   :  { %4892 = vmatpush.bf16.msrb.mxu2 %v9198_v43 }
0x1f9c   :  { %v6142_v3 = vpop.eup %6141  ;;  %v4515_v10 = vor.u32 1.1754944e-38, %v4514_v60  ;;  %vm4513_vm13 = vcmp.eq.f32.partialorder %v4512_v11, 8.507059e+37 }
0x1f9d   :  { %v4502_v48 = vadd.f32 1.0, %v6142_v3 }
0x1f9f   :  { %4893 = vmatpush.bf16.msrb.mxu2 %v9201_v21  ;;  %6145 = vrcp.f32 %v4502_v48  ;;  %vm4523_vm14 = vweird.f32 %v4502_v48  ;;  %v4529_v58 = vand.u32 2147483648, %v4502_v48  ;;  %v4527_v59 = vand.u32 2147483647, %v4502_v48 }
0x1fa0   :  { %v6144_v35 = vpop.eup %6143 }
0x1fa1   :  { %v4504_v53 = vmul.f32 %v6144_v35, %v4501_v27  ;;  %vm4509_vm11 = vweird.f32 %v6144_v35  ;;  %v4530_v27 = vor.u32 1.1754944e-38, %v4529_v58  ;;  %vm4528_vm1 = vcmp.eq.f32.partialorder %v4527_v59, 8.507059e+37 }
0x1fa2   :  { %vm4510_vm12 = vmor %vm4508_vm10, %vm4509_vm11 }
0x1fa3   :  { %v4505_v38 = vsub.f32 1.0, %v4504_v53  ;;  %v9930_v53 = vld [vmem:[#allocation43_spill] sm:$0xff] }
0x1fa5   :  { %v6146_v0 = vpop.eup %6145  ;;  %v4506_v23 = vmul.f32 %v6144_v35, %v4505_v38  ;;  %v4539_v38 = vperm.slane %v4537_v51, 0 }
0x1fa6   :  { %v4519_v34 = vmul.f32 %v6146_v0, %v4502_v48  ;;  %vm4524_vm15 = vweird.f32 %v6146_v0 }
0x1fa7   :  { %v4507_v2 = vadd.f32 %v6144_v35, %v4506_v23  ;;  %vm4525_vm0 = vmor %vm4523_vm14, %vm4524_vm15 }
0x1fa8   :  { %v4520_v17 = vsub.f32 1.0, %v4519_v34 }
0x1fa9   :  { %v4511_v6 = vsel %vm4510_vm12, %v6144_v35, %v4507_v2 }
0x1faa   :  { %v4521_v41 = vmul.f32 %v6146_v0, %v4520_v17  ;;  %v9335_v12 = vsel %vm4513_vm13, %v4515_v10, %v4511_v6 }
0x1fab   :  { %v4533_v22 = vmul.f32 %v9928_v7, %v9335_v12 }
0x1fac   :  { %v4522_v42 = vadd.f32 %v6146_v0, %v4521_v41 }
0x1fad   :  { %v4535_v35 = vadd.f32 %v4533_v22, %v9930_v53 }
0x1fae   :  { %v4526_v3 = vsel %vm4525_vm0, %v6146_v0, %v4522_v42 }
0x1faf   :  { %v9341_v23 = vsel %vm4528_vm1, %v4530_v27, %v4526_v3  ;;  %v9343_v60 = vadd.f32 %v4539_v38, %v4535_v35 }
0x1fb0   :  { %v4534_v48 = vmul.f32 %v9928_v7, %v9341_v23 }
0x1fb2   :  { %v4536_v17 = vadd.f32 %v4534_v48, %v9902_v31 }
0x1fb4   :  { %v9350_v10 = vadd.f32 %v4539_v38, %v4536_v17 }
0x1ff9   :  { %v4690_v34 = vpop.f32.mrf.mxu1 }
0x1ffa   :  { %v4710_v2 = vmul.f32 %v4690_v34, %v9335_v12 }
0x1ffc   :  { %v4712_v11 = vadd.f32 %v4710_v2, %v9343_v60 }
0x1ffe   :  { %6147 = vtanh.f32 %v4712_v11  ;;  %v9932_v11 = vld [vmem:[#allocation50_spill] sm:$0xff] }
0x2001   :  { %v4692_v0 = vpop.f32.mrf.mxu1 }
0x2002   :  { %v4711_v6 = vmul.f32 %v4692_v0, %v9341_v23 }
0x2004   :  { %v4713_v41 = vadd.f32 %v4711_v6, %v9350_v10  ;;  %v6148_v42 = vpop.eup %6147  ;;  %v9933_v6 = vld [vmem:[#allocation51_spill] sm:$0xff] }
0x2005   :  { %v4705_v58 = vpop.f32.mrf.mxu2  ;;  %v4718_v59 = vmul.f32 %v6148_v42, %v6148_v42 }
0x2006   :  { %6149 = vtanh.f32 %v4713_v41  ;;  %v4714_v7 = vmul.f32 %v4705_v58, %v9335_v12 }
0x2007   :  { %v4720_v51 = vsub.f32 1.0, %v4718_v59 }
0x2009   :  { %v4722_v38 = vmul.f32 %v4720_v51, %v4714_v7 }
0x200c   :  { %v6150_v22 = vpop.eup %6149 }
0x200d   :  { %v4724_v44 = vpack.c.bf16 %v6150_v22, %v6148_v42  ;;  %v4707_v27 = vpop.f32.mrf.mxu2  ;;  %v4719_v3 = vmul.f32 %v6150_v22, %v6150_v22 }
0x200e   :  { %v4715_v35 = vmul.f32 %v4707_v27, %v9341_v23 }
0x200f   :  { %v4721_v34 = vsub.f32 1.0, %v4719_v3  ;;  %4733 = vmatmul.bf16.vlgmr.msrb.gmra.mxu3 %v4724_v44 }
0x2010   :  { %4901 = vmatpush.bf16.msrb.mxu3 %v9044_v1  ;;  %v9931_v1 = vld [vmem:[#allocation39_spill] sm:$0xff] }
0x2011   :  { %v4723_v2 = vmul.f32 %v4721_v34, %v4715_v35 }
0x2013   :  { %v4739_v48 = vpack.c.bf16 %v4723_v2, %v4722_v38 }
0x2014   :  { %4902 = vmatpush.bf16.msrb.mxu3 %v9047_v16  ;;  %v4543_v16 = vmul.f32 0.4375, %v9931_v1 }
0x2015   :  { %4748 = vmatmul.bf16.vlgmr.msrb.gmra.mxu0 %v4739_v48 }
0x2016   :  { %4930 = vmatpush.bf16.msrb.mxu0 %v9099_v20 }
0x2018   :  { %4903 = vmatpush.bf16.msrb.mxu3 %v9051_v8  ;;  %v4545_v8 = vperm.slane %v4543_v16, 0 }
0x201a   :  { %4931 = vmatpush.bf16.msrb.mxu0 %v9102_v46  ;;  %v4547_v17 = vadd.f32 %v4545_v8, %v9932_v11  ;;  %v4548_v41 = vadd.f32 %v4545_v8, %v9933_v6  ;;  %v9937_v6 = vld [vmem:[#allocation36_spill] sm:$0xff] }
0x201c   :  { %4904 = vmatpush.bf16.msrb.mxu3 %v9186_v13  ;;  %v5653_v0 = vmul.f32 -1.442695, %v4547_v17  ;;  %v5654_v58 = vmul.f32 -1.442695, %v4548_v41 }
0x201e   :  { %4932 = vmatpush.bf16.msrb.mxu0 %v9106_v33  ;;  %6151 = vpow2.f32 %v5653_v0 }
0x201f   :  { %6153 = vpow2.f32 %v5654_v58 }
0x2020   :  { %4905 = vmatpush.bf16.msrb.mxu3 %v9190_v36 }
0x2022   :  { %4933 = vmatpush.bf16.msrb.mxu0 %v9218_v47 }
0x2024   :  { %4906 = vmatpush.bf16.msrb.mxu3 %v9194_v39  ;;  %v6152_v42 = vpop.eup %6151 }
0x2025   :  { %v4555_v59 = vadd.f32 1.0, %v6152_v42  ;;  %v6154_v22 = vpop.eup %6153 }
0x2026   :  { %4934 = vmatpush.bf16.msrb.mxu0 %v9222_v9  ;;  %v4556_v44 = vadd.f32 1.0, %v6154_v22  ;;  %v9934_v22 = vld [vmem:[#allocation57_spill] sm:$0xff] }
0x2027   :  { %6155 = vrcp.f32 %v4555_v59  ;;  %vm4562_vm2 = vweird.f32 %v4555_v59  ;;  %v4568_v38 = vand.u32 2147483648, %v4555_v59  ;;  %v4566_v48 = vand.u32 2147483647, %v4555_v59 }
0x2028   :  { %4907 = vmatpush.bf16.msrb.mxu3 %v9198_v43  ;;  %6157 = vrcp.f32 %v4556_v44  ;;  %vm4577_vm6 = vweird.f32 %v4556_v44  ;;  %v4583_v41 = vand.u32 2147483648, %v4556_v44  ;;  %v4581_v42 = vand.u32 2147483647, %v4556_v44 }
0x2029   :  { %v4569_v16 = vor.u32 1.1754944e-38, %v4568_v38  ;;  %vm4567_vm5 = vcmp.eq.f32.partialorder %v4566_v48, 8.507059e+37  ;;  %v9936_v38 = vld [vmem:[#allocation35_spill] sm:$0xff] }
0x202a   :  { %4935 = vmatpush.bf16.msrb.mxu0 %v9226_v56  ;;  %vm4582_vm9 = vcmp.eq.f32.partialorder %v4581_v42, 8.507059e+37 }
0x202c   :  { %4908 = vmatpush.bf16.msrb.mxu3 %v9201_v21 }
0x202d   :  { %v6156_v7 = vpop.eup %6155 }
0x202e   :  { %4936 = vmatpush.bf16.msrb.mxu0 %v9230_v4  ;;  %v4558_v51 = vmul.f32 %v6156_v7, %v4555_v59  ;;  %v6158_v3 = vpop.eup %6157  ;;  %vm4563_vm3 = vweird.f32 %v6156_v7  ;;  %v4584_v59 = vor.u32 1.1754944e-38, %v4583_v41 }
0x202f   :  { %v4573_v34 = vmul.f32 %v6158_v3, %v4556_v44  ;;  %vm4564_vm4 = vmor %vm4562_vm2, %vm4563_vm3  ;;  %vm4578_vm7 = vweird.f32 %v6158_v3 }
0x2030   :  { %v4559_v27 = vsub.f32 1.0, %v4558_v51  ;;  %vm4579_vm8 = vmor %vm4577_vm6, %vm4578_vm7 }
0x2031   :  { %v4574_v1 = vsub.f32 1.0, %v4573_v34 }
0x2032   :  { %4937 = vmatpush.bf16.msrb.mxu0 %v9233_v49  ;;  %v4560_v35 = vmul.f32 %v6156_v7, %v4559_v27  ;;  %v9935_v27 = vld [vmem:[#allocation59_spill] sm:$0xff] }
0x2033   :  { %v4575_v17 = vmul.f32 %v6158_v3, %v4574_v1 }
0x2034   :  { %v4561_v2 = vadd.f32 %v6156_v7, %v4560_v35  ;;  %v4591_v35 = vmul.f32 0.4375, %v9935_v27 }
0x2035   :  { %v4576_v58 = vadd.f32 %v6158_v3, %v4575_v17 }
0x2036   :  { %v4565_v8 = vsel %vm4564_vm4, %v6156_v7, %v4561_v2  ;;  %v4593_v2 = vperm.slane %v4591_v35, 0 }
0x2037   :  { %v9375_v0 = vsel %vm4567_vm5, %v4569_v16, %v4565_v8  ;;  %v4580_v34 = vsel %vm4579_vm8, %v6158_v3, %v4576_v58 }
0x2038   :  { %v4587_v51 = vmul.f32 %v9934_v22, %v9375_v0  ;;  %v9381_v48 = vsel %vm4582_vm9, %v4584_v59, %v4580_v34 }
0x2039   :  { %v4588_v44 = vmul.f32 %v9934_v22, %v9381_v48 }
0x203a   :  { %v4589_v7 = vadd.f32 %v4587_v51, %v9936_v38 }
0x203b   :  { %v4590_v27 = vadd.f32 %v4588_v44, %v9937_v6 }
0x203c   :  { %v9383_v16 = vadd.f32 %v4593_v2, %v4589_v7 }
0x203d   :  { %v9390_v58 = vadd.f32 %v4593_v2, %v4590_v27 }
0x2092   :  { %v4734_v1 = vpop.f32.mrf.mxu3  ;;  %v4749_v41 = vpop.f32.mrf.mxu0 }
0x2093   :  { %v4754_v8 = vmul.f32 %v4734_v1, %v9375_v0 }
0x2095   :  { %v4756_v17 = vadd.f32 %v4754_v8, %v9383_v16  ;;  %v4758_v8 = vmul.f32 %v4749_v41, %v9375_v0  ;;  %v6427_v41 = vld [vmem:[#allocation2 + $0x28] sm:$0xff] }
0x2097   :  { %6159 = vtanh.f32 %v4756_v17 }
0x209a   :  { %v4736_v3 = vpop.f32.mrf.mxu3  ;;  %v4751_v7 = vpop.f32.mrf.mxu0 }
0x209b   :  { %v4755_v42 = vmul.f32 %v4736_v3, %v9381_v48  ;;  %v4759_v44 = vmul.f32 %v4751_v7, %v9381_v48 }
0x209d   :  { %v4757_v51 = vadd.f32 %v4755_v42, %v9390_v58  ;;  %v6160_v35 = vpop.eup %6159  ;;  %v6425_v42 = vld [vmem:[#allocation2 + $0x38] sm:$0xff] }
0x209e   :  { %v4762_v59 = vmul.f32 %v6160_v35, %v6160_v35 }
0x209f   :  { %6161 = vtanh.f32 %v4757_v51  ;;  %v6426_v51 = vld [vmem:[#allocation2 + $0x30] sm:$0xff] }
0x20a0   :  { %v4764_v1 = vsub.f32 1.0, %v4762_v59  ;;  %v9938_v59 = vld [vmem:[#allocation58_spill] sm:$0xff] }
0x20a2   :  { %v4766_v2 = vmul.f32 %v4764_v1, %v4758_v8  ;;  %v9939_v1 = vld [vmem:[#allocation53_spill] sm:$0xff] }
0x20a5   :  { %v6162_v34 = vpop.eup %6161 }
0x20a6   :  { %v4768_v22 = vpack.c.bf16 %v6162_v34, %v6160_v35  ;;  %v4763_v38 = vmul.f32 %v6162_v34, %v6162_v34  ;;  %v6432_v35 = vld [vmem:[#allocation2] sm:$0xff]  ;;  %v4597_v34 = vmul.f32 0.4375, %v9938_v59 }
0x20a8   :  { %v4765_v17 = vsub.f32 1.0, %v4763_v38  ;;  %4777 = vmatmul.bf16.vlgmr.msrb.gmra.mxu1 %v4768_v22  ;;  %v6428_v38 = vld [vmem:[#allocation2 + $0x20] sm:$0xff]  ;;  %v4599_v7 = vperm.slane %v4597_v34, 0 }
0x20a9   :  { %4945 = vmatpush.bf16.msrb.mxu1 %v9099_v20  ;;  %v6429_v20 = vld [vmem:[#allocation2 + $0x18] sm:$0xff] }
0x20aa   :  { %v4767_v27 = vmul.f32 %v4765_v17, %v4759_v44  ;;  %v4601_v22 = vadd.f32 %v4599_v7, %v9939_v1  ;;  %v9940_v44 = vld [vmem:[#allocation54_spill] sm:$0xff] }
0x20ab   :  { %v4602_v17 = vadd.f32 %v4599_v7, %v9940_v44 }
0x20ac   :  { %v4783_v3 = vpack.c.bf16 %v4767_v27, %v4766_v2  ;;  %v5655_v8 = vmul.f32 -1.442695, %v4601_v22 }
0x20ad   :  { %4946 = vmatpush.bf16.msrb.mxu1 %v9102_v46  ;;  %v6430_v46 = vld [vmem:[#allocation2 + $0x10] sm:$0xff]  ;;  %v5656_v2 = vmul.f32 -1.442695, %v4602_v17 }
0x20ae   :  { %4792 = vmatmul.bf16.vlgmr.msra.gmra.mxu2 %v4783_v3  ;;  %6163 = vpow2.f32 %v5655_v8 }
0x20af   :  { %5192 = vmatpush.bf16.msra.mxu2 %v6425_v42  ;;  %6165 = vpow2.f32 %v5656_v2 }
0x20b1   :  { %4947 = vmatpush.bf16.msrb.mxu1 %v9106_v33  ;;  %v6431_v33 = vld [vmem:[#allocation2 + $0x8] sm:$0xff] }
0x20b3   :  { %5193 = vmatpush.bf16.msra.mxu2 %v6426_v51 }
0x20b4   :  { %v6164_v27 = vpop.eup %6163 }
0x20b5   :  { %4948 = vmatpush.bf16.msrb.mxu1 %v9218_v47  ;;  %v4609_v3 = vadd.f32 1.0, %v6164_v27  ;;  %v6166_v42 = vpop.eup %6165 }
0x20b6   :  { %v4610_v51 = vadd.f32 1.0, %v6166_v42 }
0x20b7   :  { %5194 = vmatpush.bf16.msra.mxu2 %v6427_v41  ;;  %6167 = vrcp.f32 %v4609_v3  ;;  %vm4616_vm10 = vweird.f32 %v4609_v3  ;;  %v4622_v34 = vand.u32 2147483648, %v4609_v3  ;;  %v4620_v22 = vand.u32 2147483647, %v4609_v3 }
0x20b8   :  { %6169 = vrcp.f32 %v4610_v51  ;;  %vm4631_vm13 = vweird.f32 %v4610_v51  ;;  %v4637_v2 = vand.u32 2147483648, %v4610_v51  ;;  %v4635_v44 = vand.u32 2147483647, %v4610_v51 }
0x20b9   :  { %4949 = vmatpush.bf16.msrb.mxu1 %v9222_v9  ;;  %v4623_v17 = vor.u32 1.1754944e-38, %v4622_v34  ;;  %vm4621_vm15 = vcmp.eq.f32.partialorder %v4620_v22, 8.507059e+37 }
0x20ba   :  { %vm4636_vm1 = vcmp.eq.f32.partialorder %v4635_v44, 8.507059e+37 }
0x20bb   :  { %5195 = vmatpush.bf16.msra.mxu2 %v6428_v38 }
0x20bd   :  { %4950 = vmatpush.bf16.msrb.mxu1 %v9226_v56  ;;  %v6168_v41 = vpop.eup %6167 }
0x20be   :  { %v4612_v38 = vmul.f32 %v6168_v41, %v4609_v3  ;;  %vm4617_vm11 = vweird.f32 %v6168_v41  ;;  %v9941_v3 = vld [vmem:[#allocation60_spill] sm:$0xff] }
0x20bf   :  { %5196 = vmatpush.bf16.msra.mxu2 %v6429_v20  ;;  %v6170_v20 = vpop.eup %6169  ;;  %vm4618_vm12 = vmor %vm4616_vm10, %vm4617_vm11 }
0x20c0   :  { %vm4632_vm14 = vweird.f32 %v6170_v20 }
0x20c1   :  { %4951 = vmatpush.bf16.msrb.mxu1 %v9230_v4  ;;  %vm4633_vm0 = vmor %vm4631_vm13, %vm4632_vm14 }
0x20c3   :  { %5197 = vmatpush.bf16.msra.mxu2 %v6430_v46  ;;  %v4613_v46 = vsub.f32 1.0, %v4612_v38 }
0x20c5   :  { %4952 = vmatpush.bf16.msrb.mxu1 %v9233_v49 }
0x20c7   :  { %5198 = vmatpush.bf16.msra.mxu2 %v6431_v33  ;;  %v4627_v33 = vmul.f32 %v6170_v20, %v4610_v51 }
0x20c9   :  { %v4628_v59 = vsub.f32 1.0, %v4627_v33 }
0x20cb   :  { %5199 = vmatpush.bf16.msra.mxu2 %v6432_v35  ;;  %v4614_v35 = vmul.f32 %v6168_v41, %v4613_v46  ;;  %v4629_v8 = vmul.f32 %v6170_v20, %v4628_v59  ;;  %v4638_v46 = vor.u32 1.1754944e-38, %v4637_v2  ;;  %v4645_v59 = vmul.f32 0.4375, %v9941_v3  ;;  %v9436_v3 = vld [vmem:[%s6654_s9] sm:$0xff] }
0x20cd   :  { %v4615_v7 = vadd.f32 %v6168_v41, %v4614_v35  ;;  %v4630_v42 = vadd.f32 %v6170_v20, %v4629_v8 }
0x20cf   :  { %v4619_v27 = vsel %vm4618_vm12, %v6168_v41, %v4615_v7  ;;  %v4634_v33 = vsel %vm4633_vm0, %v6170_v20, %v4630_v42  ;;  %v4647_v41 = vperm.slane %v4645_v59, 0 }
0x20d0   :  { %v9407_v38 = vsel %vm4621_vm15, %v4623_v17, %v4619_v27  ;;  %v9412_v1 = vsel %vm4636_vm1, %v4638_v46, %v4634_v33 }
0x20d1   :  { %v4641_v35 = vmul.f32 %v9130_v28, %v9407_v38  ;;  %v4642_v51 = vmul.f32 %v9130_v28, %v9412_v1 }
0x20d3   :  { %v4643_v34 = vadd.f32 %v4641_v35, %v9883_v26  ;;  %v4644_v44 = vadd.f32 %v4642_v51, %v9884_v54  ;;  %v6434_v51 = vld [vmem:[#allocation5 + $0x38] sm:$0xff] }
0x20d5   :  { %v9418_v22 = vadd.f32 %v4647_v41, %v4643_v34  ;;  %v9424_v17 = vadd.f32 %v4647_v41, %v4644_v44  ;;  %v9441_v44 = vld [vmem:[%s6654_s9 + $0x8] sm:$0xff]  ;;  %s5387_s9 = sshll.u32 %s6638_s5, 4  ;;  %s5388_s9 = int_to_ptr.vmem [resolvable:$true] %s5387_s9 }
0x2125   :  { %v4778_v6 = vpop.f32.mrf.mxu1 }
0x2126   :  { %v4798_v7 = vmul.f32 %v4778_v6, %v9407_v38 }
0x2128   :  { %v9422_v20 = vadd.f32 %v4798_v7, %v9418_v22 }
0x212a   :  { %v4810_v27 = vmul.f32 0.0625, %v9422_v20 }
0x212c   :  { %v4812_v33 = vadd.f32 %v4810_v27, %v9157_v29  ;;  %v6437_v27 = vld [vmem:[#allocation5 + $0x28] sm:$0xff] }
0x212d   :  { %v4780_v8 = vpop.f32.mrf.mxu1 }
0x212e   :  { %v4799_v2 = vmul.f32 %v4780_v8, %v9412_v1 }
0x2130   :  { %v9429_v42 = vadd.f32 %v4799_v2, %v9424_v17  ;;  %v6436_v2 = vld [vmem:[#allocation5 + $0x30] sm:$0xff] }
0x2131   :  { %v4793_v28 = vpop.f32.mrf.mxu2 }
0x2132   :  { %9942 = vst [vmem:[#allocation64_spill] sm:$0xff] %v9429_v42  ;;  %v4811_v6 = vmul.f32 0.0625, %v9429_v42  ;;  %v4802_v46 = vmul.f32 %v4793_v28, %v9407_v38  ;;  %v6438_v28 = vld [vmem:[#allocation5 + $0x20] sm:$0xff] }
0x2134   :  { %v4813_v35 = vadd.f32 %v4811_v6, %v9160_v63  ;;  %v4804_v59 = vmul.f32 %v9436_v3, %v4802_v46  ;;  %v6439_v6 = vld [vmem:[#allocation5 + $0x18] sm:$0xff]  ;;  %v6440_v46 = vld [vmem:[#allocation5 + $0x10] sm:$0xff] }
0x2136   :  { %v4814_v34 = vpack.c.bf16 %v4813_v35, %v4812_v33  ;;  %4806 = vadd.xlane.f32.xlu2 %v4804_v59  ;;  %v6441_v33 = vld [vmem:[#allocation5 + $0x8] sm:$0xff]  ;;  %v6442_v35 = vld [vmem:[#allocation5] sm:$0xff] }
0x2138   :  { %4823 = vmatmul.bf16.vlgmr.msra.gmra.mxu3 %v4814_v34 }
0x2139   :  { %v4795_v41 = vpop.f32.mrf.mxu2  ;;  %5221 = vmatpush.bf16.msra.mxu3 %v6434_v51 }
0x213a   :  { %v4803_v7 = vmul.f32 %v4795_v41, %v9412_v1 }
0x213c   :  { %v4805_v8 = vmul.f32 %v9441_v44, %v4803_v7 }
0x213d   :  { %5222 = vmatpush.bf16.msra.mxu3 %v6436_v2 }
0x213e   :  { %4808 = vadd.xlane.f32.xlu0 %v4805_v8 }
0x2141   :  { %5223 = vmatpush.bf16.msra.mxu3 %v6437_v27 }
0x2145   :  { %5224 = vmatpush.bf16.msra.mxu3 %v6438_v28 }
0x2149   :  { %5225 = vmatpush.bf16.msra.mxu3 %v6439_v6 }
0x214d   :  { %5226 = vmatpush.bf16.msra.mxu3 %v6440_v46 }
0x2151   :  { %5227 = vmatpush.bf16.msra.mxu3 %v6441_v33 }
0x2155   :  { %5228 = vmatpush.bf16.msra.mxu3 %v6442_v35 }
0x21bb   :  { %v4824_v59 = vpop.f32.mrf.mxu3 }
0x21bc   :  { %v4829_v34 = vmul.f32 %v4824_v59, %v9287_v30 }
0x21be   :  { %v4831_v41 = vadd.f32 %v4829_v34, %v9295_v61  ;;  %v6452_v34 = vld [vmem:[#allocation7 + $0x8] sm:$0xff] }
0x21c0   :  { %6171 = vtanh.f32 %v4831_v41  ;;  %v6453_v41 = vld [vmem:[#allocation7] sm:$0xff] }
0x21c3   :  { %v4826_v7 = vpop.f32.mrf.mxu3 }
0x21c4   :  { %v4830_v8 = vmul.f32 %v4826_v7, %v9293_v50  ;;  %v6443_v50 = vld [vmem:[#allocation7 + $0x38] sm:$0xff] }
0x21c6   :  { %v4832_v54 = vadd.f32 %v4830_v8, %v9302_v52  ;;  %v6172_v26 = vpop.eup %6171  ;;  %v6444_v52 = vld [vmem:[#allocation7 + $0x30] sm:$0xff] }
0x21c7   :  { %v4835_v11 = vmul.f32 %v6172_v26, %v6172_v26 }
0x21c8   :  { %6173 = vtanh.f32 %v4832_v54  ;;  %v6445_v54 = vld [vmem:[#allocation7 + $0x28] sm:$0xff] }
0x21c9   :  { %v4837_v53 = vsub.f32 1.0, %v4835_v11 }
0x21cb   :  { %v4839_v30 = vmul.f32 %v4837_v53, %v9308_v25 }
0x21ce   :  { %v6174_v31 = vpop.eup %6173 }
0x21cf   :  { %v4836_v62 = vmul.f32 %v6174_v31, %v6174_v31  ;;  %v4841_v42 = vpack.c.bf16 %v6174_v31, %v6172_v26 }
0x21d1   :  { %v4838_v15 = vsub.f32 1.0, %v4836_v62  ;;  %4850 = vmatmul.bf16.vlgmr.msra.gmra.mxu0 %v4841_v42 }
0x21d2   :  { %5236 = vmatpush.bf16.msra.mxu0 %v6434_v51 }
0x21d3   :  { %v4840_v61 = vmul.f32 %v4838_v15, %v9312_v57 }
0x21d5   :  { %v4856_v59 = vpack.c.bf16 %v4840_v61, %v4839_v30 }
0x21d6   :  { %5237 = vmatpush.bf16.msra.mxu0 %v6436_v2 }
0x21d7   :  { %4865 = vmatmul.bf16.vlgmr.msra.gmra.mxu1 %v4856_v59 }
0x21d8   :  { %5265 = vmatpush.bf16.msra.mxu1 %v6443_v50 }
0x21da   :  { %5238 = vmatpush.bf16.msra.mxu0 %v6437_v27 }
0x21dc   :  { %5266 = vmatpush.bf16.msra.mxu1 %v6444_v52 }
0x21de   :  { %5239 = vmatpush.bf16.msra.mxu0 %v6438_v28 }
0x21e0   :  { %5267 = vmatpush.bf16.msra.mxu1 %v6445_v54 }
0x21e2   :  { %5240 = vmatpush.bf16.msra.mxu0 %v6439_v6 }
0x21e4   :  { %5268 = vmatpush.bf16.msra.mxu1 %v9186_v13 }
0x21e6   :  { %5241 = vmatpush.bf16.msra.mxu0 %v6440_v46  ;;  %v6447_v46 = vld [vmem:[#allocation8 + $0x30] sm:$0xff] }
0x21e8   :  { %5269 = vmatpush.bf16.msra.mxu1 %v9190_v36 }
0x21ea   :  { %5242 = vmatpush.bf16.msra.mxu0 %v6441_v33  ;;  %v6448_v33 = vld [vmem:[#allocation7 + $0x20] sm:$0xff] }
0x21ec   :  { %5270 = vmatpush.bf16.msra.mxu1 %v9194_v39 }
0x21ee   :  { %5243 = vmatpush.bf16.msra.mxu0 %v6442_v35  ;;  %v6449_v35 = vld [vmem:[#allocation8 + $0x28] sm:$0xff] }
0x21f0   :  { %5271 = vmatpush.bf16.msra.mxu1 %v9198_v43 }
0x21f4   :  { %5272 = vmatpush.bf16.msra.mxu1 %v9201_v21 }
0x224e   :  { %v4851_v26 = vpop.f32.mrf.mxu0 }
0x224f   :  { %v4871_v31 = vmul.f32 %v4851_v26, %v9335_v12 }
0x2251   :  { %v4873_v15 = vadd.f32 %v4871_v31, %v9343_v60 }
0x2253   :  { %6175 = vtanh.f32 %v4873_v15 }
0x2254   :  { %v4866_v25 = vpop.f32.mrf.mxu1 }
0x2255   :  { %v4875_v51 = vmul.f32 %v4866_v25, %v9335_v12  ;;  %v6450_v12 = vld [vmem:[#allocation7 + $0x18] sm:$0xff] }
0x2256   :  { %v4853_v62 = vpop.f32.mrf.mxu0 }
0x2257   :  { %v4872_v13 = vmul.f32 %v4853_v62, %v9341_v23 }
0x2259   :  { %v4874_v36 = vadd.f32 %v4872_v13, %v9350_v10  ;;  %v6176_v57 = vpop.eup %6175  ;;  %v6446_v10 = vld [vmem:[#allocation8 + $0x38] sm:$0xff] }
0x225a   :  { %v4879_v39 = vmul.f32 %v6176_v57, %v6176_v57 }
0x225b   :  { %6177 = vtanh.f32 %v4874_v36  ;;  %v6455_v36 = vld [vmem:[#allocation8 + $0x18] sm:$0xff] }
0x225c   :  { %v4868_v11 = vpop.f32.mrf.mxu1  ;;  %v4881_v43 = vsub.f32 1.0, %v4879_v39  ;;  %v6457_v39 = vld [vmem:[#allocation8 + $0x8] sm:$0xff] }
0x225d   :  { %v4876_v2 = vmul.f32 %v4868_v11, %v9341_v23  ;;  %v6451_v23 = vld [vmem:[#allocation7 + $0x10] sm:$0xff] }
0x225e   :  { %v4883_v27 = vmul.f32 %v4881_v43, %v4875_v51 }
0x2261   :  { %v6178_v53 = vpop.eup %6177 }
0x2262   :  { %v4885_v42 = vpack.c.bf16 %v6178_v53, %v6176_v57  ;;  %v4880_v21 = vmul.f32 %v6178_v53, %v6178_v53  ;;  %v6456_v57 = vld [vmem:[#allocation8 + $0x10] sm:$0xff] }
0x2264   :  { %v4882_v60 = vsub.f32 1.0, %v4880_v21  ;;  %4894 = vmatmul.bf16.vlgmr.msrb.gmra.mxu2 %v4885_v42 }
0x2265   :  { %5280 = vmatpush.bf16.msrb.mxu2 %v6443_v50 }
0x2266   :  { %v4884_v28 = vmul.f32 %v4882_v60, %v4876_v2 }
0x2268   :  { %v4900_v6 = vpack.c.bf16 %v4884_v28, %v4883_v27  ;;  %v4239_v28 = vmul.f32 %v9236_v19, %v9138_v37 }
0x2269   :  { %5281 = vmatpush.bf16.msrb.mxu2 %v6444_v52 }
0x226a   :  { %4909 = vmatmul.bf16.vlgmr.msrb.gmra.mxu3 %v4900_v6 }
0x226b   :  { %5309 = vmatpush.bf16.msrb.mxu3 %v6446_v10 }
0x226d   :  { %5282 = vmatpush.bf16.msrb.mxu2 %v6445_v54 }
0x226f   :  { %5310 = vmatpush.bf16.msrb.mxu3 %v6447_v46 }
0x2271   :  { %5283 = vmatpush.bf16.msrb.mxu2 %v6448_v33 }
0x2273   :  { %5311 = vmatpush.bf16.msrb.mxu3 %v6449_v35 }
0x2275   :  { %5284 = vmatpush.bf16.msrb.mxu2 %v6450_v12 }
0x2277   :  { %5312 = vmatpush.bf16.msrb.mxu3 %v9218_v47 }
0x2279   :  { %5285 = vmatpush.bf16.msrb.mxu2 %v6451_v23 }
0x227b   :  { %5313 = vmatpush.bf16.msrb.mxu3 %v9222_v9 }
0x227d   :  { %5286 = vmatpush.bf16.msrb.mxu2 %v6452_v34 }
0x227f   :  { %5314 = vmatpush.bf16.msrb.mxu3 %v9226_v56 }
0x2281   :  { %5287 = vmatpush.bf16.msrb.mxu2 %v6453_v41 }
0x2283   :  { %5315 = vmatpush.bf16.msrb.mxu3 %v9230_v4 }
0x2287   :  { %5316 = vmatpush.bf16.msrb.mxu3 %v9233_v49 }
0x22e7   :  { %v4895_v7 = vpop.f32.mrf.mxu2 }
0x22e8   :  { %v4915_v8 = vmul.f32 %v4895_v7, %v9375_v0 }
0x22ea   :  { %v4917_v30 = vadd.f32 %v4915_v8, %v9383_v16 }
0x22ec   :  { %6179 = vtanh.f32 %v4917_v30 }
0x22ed   :  { %v4910_v61 = vpop.f32.mrf.mxu3 }
0x22ee   :  { %v4919_v31 = vmul.f32 %v4910_v61, %v9375_v0  ;;  %v6458_v0 = vld [vmem:[#allocation8] sm:$0xff] }
0x22ef   :  { %v4897_v47 = vpop.f32.mrf.mxu2 }
0x22f0   :  { %v4916_v9 = vmul.f32 %v4897_v47, %v9381_v48 }
0x22f2   :  { %v4918_v59 = vadd.f32 %v4916_v9, %v9390_v58  ;;  %v6180_v50 = vpop.eup %6179  ;;  %v6454_v58 = vld [vmem:[#allocation8 + $0x20] sm:$0xff] }
0x22f3   :  { %v4923_v56 = vmul.f32 %v6180_v50, %v6180_v50 }
0x22f4   :  { %6181 = vtanh.f32 %v4918_v59 }
0x22f5   :  { %v4912_v54 = vpop.f32.mrf.mxu3  ;;  %v4925_v4 = vsub.f32 1.0, %v4923_v56 }
0x22f6   :  { %v4920_v15 = vmul.f32 %v4912_v54, %v9381_v48 }
0x22f7   :  { %v4927_v62 = vmul.f32 %v4925_v4, %v4919_v31 }
0x22fa   :  { %v6182_v52 = vpop.eup %6181 }
0x22fb   :  { %v4929_v26 = vpack.c.bf16 %v6182_v52, %v6180_v50  ;;  %v4924_v49 = vmul.f32 %v6182_v52, %v6182_v52 }
0x22fd   :  { %v4926_v16 = vsub.f32 1.0, %v4924_v49  ;;  %4938 = vmatmul.bf16.vlgmr.msrb.gmra.mxu0 %v4929_v26 }
0x22fe   :  { %5324 = vmatpush.bf16.msrb.mxu0 %v6446_v10 }
0x22ff   :  { %v4928_v25 = vmul.f32 %v4926_v16, %v4920_v15 }
0x2301   :  { %v4944_v13 = vpack.c.bf16 %v4928_v25, %v4927_v62  ;;  %v6460_v25 = vld [vmem:[%s9698_s14] ss:$0 sm:$0xff] }
0x2302   :  { %5325 = vmatpush.bf16.msrb.mxu0 %v6447_v46 }
0x2303   :  { %4953 = vmatmul.bf16.vlgmr.msrb.gmra.mxu1 %v4944_v13 }
0x2306   :  { %5326 = vmatpush.bf16.msrb.mxu0 %v6449_v35  ;;  %v4241_v35 = vmul.f32 %v9441_v44, %v4239_v28 }
0x230a   :  { %5327 = vmatpush.bf16.msrb.mxu0 %v6454_v58  ;;  %v6461_v58 = vld [vmem:[%s9697_s3] sm:$0x1] }
0x230e   :  { %5328 = vmatpush.bf16.msrb.mxu0 %v6455_v36  ;;  %v5023_v36 = vmul.f32 0.5, %v6461_v58 }
0x2312   :  { %5329 = vmatpush.bf16.msrb.mxu0 %v6456_v57 }
0x2316   :  { %5330 = vmatpush.bf16.msrb.mxu0 %v6457_v39 }
0x231a   :  { %5331 = vmatpush.bf16.msrb.mxu0 %v6458_v0 }
0x237a   :  { %v4939_v48 = vpop.f32.mrf.mxu0 }
0x237b   :  { %v4959_v53 = vmul.f32 %v4939_v48, %v9407_v38 }
0x237d   :  { %v9474_v43 = vadd.f32 %v4959_v53, %v9418_v22  ;;  %v5025_v53 = vperm.slane %v5023_v36, 0 }
0x237f   :  { %v4971_v60 = vmul.f32 0.125, %v9474_v43 }
0x2380   :  { %v4954_v11 = vpop.f32.mrf.mxu1 }
0x2381   :  { %v4963_v42 = vmul.f32 %v4954_v11, %v9407_v38  ;;  %v4973_v38 = vadd.f32 %v4971_v60, %v9157_v29 }
0x2382   :  { %v4941_v21 = vpop.f32.mrf.mxu0 }
0x2383   :  { %v4960_v51 = vmul.f32 %v4941_v21, %v9412_v1  ;;  %v4965_v2 = vmul.f32 %v9436_v3, %v4963_v42 }
0x2385   :  { %v9481_v27 = vadd.f32 %v4960_v51, %v9424_v17  ;;  %4967 = vadd.xlane.f32.xlu2 %v4965_v2  ;;  %v6459_v17 = vld [vmem:[%s6679_s29] sm:$0x1]  ;;  %s5389_s29 = sshll.u32 %s6809_s4, 4  ;;  %s5390_s29 = int_to_ptr.hbm [resolvable:$true] %s5389_s29 }
0x2386   :  { %v4975_v23 = vmul.f32 0.5, %v6459_v17 }
0x2387   :  { %v4972_v22 = vmul.f32 0.125, %v9481_v27 }
0x2388   :  { %v4956_v6 = vpop.f32.mrf.mxu1  ;;  %v4977_v37 = vperm.slane %v4975_v23, 0 }
0x2389   :  { %v4974_v10 = vadd.f32 %v4972_v22, %v9160_v63  ;;  %v4964_v46 = vmul.f32 %v4956_v6, %v9412_v1 }
0x238a   :  { %v4979_v19 = vadd.f32 %v4977_v37, %v9917_v5  ;;  %v4980_v41 = vadd.f32 %v4977_v37, %v9918_v18 }
0x238b   :  { %v5191_v33 = vpack.c.bf16 %v4974_v10, %v4973_v38  ;;  %v4966_v12 = vmul.f32 %v9441_v44, %v4964_v46 }
0x238c   :  { %v5657_v34 = vmul.f32 -1.442695, %v4979_v19  ;;  %v5658_v7 = vmul.f32 -1.442695, %v4980_v41 }
0x238d   :  { %5200 = vmatmul.bf16.vlgmr.msra.gmra.mxu2 %v5191_v33  ;;  %4244 = vadd.xlane.f32.xlu2 %v4241_v35 }
0x238e   :  { %4969 = vadd.xlane.f32.xlu0 %v4966_v12  ;;  %6183 = vpow2.f32 %v5657_v34 }
0x238f   :  { %6185 = vpow2.f32 %v5658_v7  ;;  %v6462_v7 = vld [vmem:[%s9704_s19] sm:$0x1] }
0x2394   :  { %v6184_v8 = vpop.eup %6183 }
0x2395   :  { %v4987_v1 = vadd.f32 1.0, %v6184_v8  ;;  %v6186_v30 = vpop.eup %6185  ;;  %v5029_v8 = vmul.f32 0.5, %v6462_v7 }
0x2396   :  { %v4988_v47 = vadd.f32 1.0, %v6186_v30 }
0x2397   :  { %6187 = vrcp.f32 %v4987_v1  ;;  %v5000_v18 = vand.u32 2147483648, %v4987_v1  ;;  %vm4994_vm3 = vweird.f32 %v4987_v1  ;;  %v4998_v4 = vand.u32 2147483647, %v4987_v1 }
0x2398   :  { %6189 = vrcp.f32 %v4988_v47  ;;  %v5015_v62 = vand.u32 2147483648, %v4988_v47  ;;  %vm5009_vm7 = vweird.f32 %v4988_v47  ;;  %v5013_v57 = vand.u32 2147483647, %v4988_v47 }
0x2399   :  { %v5001_v31 = vor.u32 1.1754944e-38, %v5000_v18  ;;  %vm4999_vm5 = vcmp.eq.f32.partialorder %v4998_v4, 8.507059e+37  ;;  %v9943_v18 = vld [vmem:[#allocation61_spill] sm:$0xff] }
0x239a   :  { %v5016_v0 = vor.u32 1.1754944e-38, %v5015_v62  ;;  %vm5014_vm9 = vcmp.eq.f32.partialorder %v5013_v57, 8.507059e+37  ;;  %v5355_v62 = vmul.f32 2.0, %v9481_v27 }
0x239d   :  { %v6188_v61 = vpop.eup %6187 }
0x239e   :  { %v4990_v9 = vmul.f32 %v6188_v61, %v4987_v1  ;;  %v6190_v50 = vpop.eup %6189  ;;  %vm4995_vm2 = vweird.f32 %v6188_v61  ;;  %v5031_v1 = vperm.slane %v5029_v8, 0 }
0x239f   :  { %v5005_v52 = vmul.f32 %v6190_v50, %v4988_v47  ;;  %vm4996_vm4 = vmor %vm4994_vm3, %vm4995_vm2  ;;  %vm5010_vm6 = vweird.f32 %v6190_v50 }
0x23a0   :  { %v4991_v59 = vsub.f32 1.0, %v4990_v9  ;;  %vm5011_vm8 = vmor %vm5009_vm7, %vm5010_vm6  ;;  %v5033_v30 = vadd.f32 %v5031_v1, %v9926_v24 }
0x23a1   :  { %v5006_v54 = vsub.f32 1.0, %v5005_v52  ;;  %v5350_v52 = vmul.f32 2.0, %v9422_v20 }
0x23a2   :  { %v4992_v56 = vmul.f32 %v6188_v61, %v4991_v59  ;;  %v5659_v47 = vmul.f32 -1.442695, %v5033_v30 }
0x23a3   :  { %v5007_v49 = vmul.f32 %v6190_v50, %v5006_v54  ;;  %v5354_v54 = vmul.f32 2.0, %v9474_v43  ;;  %v5352_v24 = vadd.f32 %v5350_v52, %v9943_v18 }
0x23a4   :  { %v4993_v5 = vadd.f32 %v6188_v61, %v4992_v56 }
0x23a5   :  { %v5008_v16 = vadd.f32 %v6190_v50, %v5007_v49  ;;  %v9506_v49 = vadd.f32 %v5354_v54, %v5352_v24  ;;  %v6465_v54 = vld [vmem:[%s9720_s27] sm:$0x1] }
0x23a6   :  { %v4997_v26 = vsel %vm4996_vm4, %v6188_v61, %v4993_v5  ;;  %v5034_v61 = vadd.f32 %v5031_v1, %v9927_v40  ;;  %v9944_v40 = vld [vmem:[#allocation64_spill] sm:$0xff]  ;;  %v5083_v18 = vmul.f32 0.5, %v6465_v54 }
0x23a7   :  { %v5002_v15 = vsel %vm4999_vm5, %v5001_v31, %v4997_v26  ;;  %v5012_v39 = vsel %vm5011_vm8, %v6190_v50, %v5008_v16  ;;  %v5351_v31 = vmul.f32 2.0, %v9944_v40 }
0x23a8   :  { %v5019_v13 = vmul.f32 %v6460_v25, %v5002_v15  ;;  %v5017_v11 = vsel %vm5014_vm9, %v5016_v0, %v5012_v39  ;;  %v5210_v23 = vmul.f32 %v5002_v15, %v9923_v45  ;;  %v5660_v9 = vmul.f32 -1.442695, %v5034_v61 }
0x23a9   :  { %v5020_v2 = vmul.f32 %v6460_v25, %v5017_v11  ;;  %v5211_v37 = vmul.f32 %v5017_v11, %v9924_v14  ;;  %v9945_v25 = vld [vmem:[#allocation62_spill] sm:$0xff]  ;;  %v5085_v24 = vperm.slane %v5083_v18, 0 }
0x23aa   :  { %v5021_v48 = vadd.f32 %v5019_v13, %v9921_v55  ;;  %v5353_v20 = vadd.f32 %v5351_v31, %v9945_v25  ;;  %v9949_v31 = vld [vmem:[#allocation51_spill] sm:$0xff] }
0x23ab   :  { %v5022_v28 = vadd.f32 %v5020_v2, %v9922_v32  ;;  %v6464_v2 = vld [vmem:[%s9715_s20] sm:$0x1] }
0x23ac   :  { %v5027_v21 = vadd.f32 %v5025_v53, %v5021_v48  ;;  %v9511_v57 = vadd.f32 %v5355_v62, %v5353_v20 }
0x23ad   :  { %v5028_v6 = vadd.f32 %v5025_v53, %v5022_v28 }
0x2410   :  { %v5201_v42 = vpop.f32.mrf.mxu2 }
0x2411   :  { %v5206_v51 = vmul.f32 %v5201_v42, %v5002_v15 }
0x2413   :  { %v5208_v60 = vadd.f32 %v5206_v51, %v5027_v21  ;;  %v6463_v21 = vld [vmem:[%s9712_s12] ss:$0 sm:$0xff] }
0x2415   :  { %6191 = vtanh.f32 %v5208_v60  ;;  %v5077_v60 = vmul.f32 0.5, %v6464_v2 }
0x2418   :  { %v5203_v22 = vpop.f32.mrf.mxu2 }
0x2419   :  { %v5207_v38 = vmul.f32 %v5203_v22, %v5017_v11 }
0x241b   :  { %v5209_v10 = vadd.f32 %v5207_v38, %v5028_v6  ;;  %v6192_v46 = vpop.eup %6191  ;;  %v9946_v6 = vld [vmem:[#allocation43_spill] sm:$0xff] }
0x241c   :  { %v5214_v33 = vmul.f32 %v6192_v46, %v6192_v46 }
0x241d   :  { %6193 = vtanh.f32 %v5209_v10  ;;  %v5079_v10 = vperm.slane %v5077_v60, 0 }
0x241e   :  { %v5216_v35 = vsub.f32 1.0, %v5214_v33  ;;  %6195 = vpow2.f32 %v5659_v47 }
0x241f   :  { %6197 = vpow2.f32 %v5660_v9 }
0x2420   :  { %v5218_v32 = vmul.f32 %v5216_v35, %v5210_v23  ;;  %v9947_v23 = vld [vmem:[#allocation44_spill] sm:$0xff] }
0x2423   :  { %v6194_v55 = vpop.eup %6193 }
0x2424   :  { %v5215_v12 = vmul.f32 %v6194_v55, %v6194_v55  ;;  %v5220_v17 = vpack.c.bf16 %v6194_v55, %v6192_v46  ;;  %v6196_v59 = vpop.eup %6195 }
0x2425   :  { %v5041_v45 = vadd.f32 1.0, %v6196_v59  ;;  %v6198_v14 = vpop.eup %6197 }
0x2426   :  { %v5217_v19 = vsub.f32 1.0, %v5215_v12  ;;  %5229 = vmatmul.bf16.vlgmr.msra.gmra.mxu3 %v5220_v17  ;;  %v5042_v50 = vadd.f32 1.0, %v6198_v14 }
0x2427   :  { %6199 = vrcp.f32 %v5041_v45  ;;  %vm5048_vm10 = vweird.f32 %v5041_v45  ;;  %v5054_v13 = vand.u32 2147483648, %v5041_v45  ;;  %v5052_v43 = vand.u32 2147483647, %v5041_v45 }
0x2428   :  { %v5219_v34 = vmul.f32 %v5217_v19, %v5211_v37  ;;  %6201 = vrcp.f32 %v5042_v50  ;;  %vm5063_vm14 = vweird.f32 %v5042_v50  ;;  %v5069_v53 = vand.u32 2147483648, %v5042_v50 }
0x2429   :  { %v5055_v39 = vor.u32 1.1754944e-38, %v5054_v13  ;;  %vm5053_vm13 = vcmp.eq.f32.partialorder %v5052_v43, 8.507059e+37  ;;  %v5067_v42 = vand.u32 2147483647, %v5042_v50 }
0x242a   :  { %v5235_v41 = vpack.c.bf16 %v5219_v34, %v5218_v32  ;;  %v5070_v28 = vor.u32 1.1754944e-38, %v5069_v53 }
0x242b   :  { %vm5068_vm1 = vcmp.eq.f32.partialorder %v5067_v42, 8.507059e+37 }
0x242c   :  { %5244 = vmatmul.bf16.vlgmr.msra.gmra.mxu0 %v5235_v41 }
0x242d   :  { %v6200_v56 = vpop.eup %6199 }
0x242e   :  { %v5044_v5 = vmul.f32 %v6200_v56, %v5041_v45  ;;  %v6202_v26 = vpop.eup %6201  ;;  %vm5049_vm11 = vweird.f32 %v6200_v56 }
0x242f   :  { %v5059_v16 = vmul.f32 %v6202_v26, %v5042_v50  ;;  %vm5050_vm12 = vmor %vm5048_vm10, %vm5049_vm11  ;;  %vm5064_vm15 = vweird.f32 %v6202_v26 }
0x2430   :  { %v5045_v4 = vsub.f32 1.0, %v5044_v5  ;;  %vm5065_vm0 = vmor %vm5063_vm14, %vm5064_vm15 }
0x2431   :  { %v5060_v36 = vsub.f32 1.0, %v5059_v16 }
0x2432   :  { %v5046_v15 = vmul.f32 %v6200_v56, %v5045_v4  ;;  %v9948_v4 = vld [vmem:[#allocation50_spill] sm:$0xff] }
0x2433   :  { %v5061_v48 = vmul.f32 %v6202_v26, %v5060_v36 }
0x2434   :  { %v5047_v58 = vadd.f32 %v6200_v56, %v5046_v15  ;;  %v5088_v15 = vadd.f32 %v5085_v24, %v9949_v31 }
0x2435   :  { %v5062_v11 = vadd.f32 %v6202_v26, %v5061_v48 }
0x2436   :  { %v5051_v0 = vsel %vm5050_vm12, %v6200_v56, %v5047_v58  ;;  %v5662_v16 = vmul.f32 -1.442695, %v5088_v15  ;;  %v6468_v15 = vld [vmem:[%s9730_s2] sm:$0x1] }
0x2437   :  { %v5056_v27 = vsel %vm5053_vm13, %v5055_v39, %v5051_v0  ;;  %v5066_v22 = vsel %vm5065_vm0, %v6202_v26, %v5062_v11  ;;  %v5087_v26 = vadd.f32 %v5085_v24, %v9948_v4 }
0x2438   :  { %v5073_v51 = vmul.f32 %v6463_v21, %v5056_v27  ;;  %v5071_v46 = vsel %vm5068_vm1, %v5070_v28, %v5066_v22 }
0x2439   :  { %v5074_v12 = vmul.f32 %v6463_v21, %v5071_v46  ;;  %v5661_v40 = vmul.f32 -1.442695, %v5087_v26 }
0x243a   :  { %v5075_v38 = vadd.f32 %v5073_v51, %v9946_v6 }
0x243b   :  { %v5076_v37 = vadd.f32 %v5074_v12, %v9947_v23  ;;  %v9950_v12 = vld [vmem:[#allocation35_spill] sm:$0xff] }
0x243c   :  { %v5081_v55 = vadd.f32 %v5079_v10, %v5075_v38  ;;  %v6466_v38 = vld [vmem:[%s9725_s23] ss:$0 sm:$0xff] }
0x243d   :  { %v5082_v34 = vadd.f32 %v5079_v10, %v5076_v37 }
0x24a9   :  { %v5230_v33 = vpop.f32.mrf.mxu3  ;;  %v5245_v32 = vpop.f32.mrf.mxu0 }
0x24aa   :  { %v5250_v35 = vmul.f32 %v5230_v33, %v5056_v27  ;;  %v5254_v45 = vmul.f32 %v5245_v32, %v5056_v27 }
0x24ac   :  { %v5252_v17 = vadd.f32 %v5250_v35, %v5081_v55 }
0x24ae   :  { %6203 = vtanh.f32 %v5252_v17 }
0x24b1   :  { %v5232_v19 = vpop.f32.mrf.mxu3  ;;  %v5247_v47 = vpop.f32.mrf.mxu0 }
0x24b2   :  { %v5251_v41 = vmul.f32 %v5232_v19, %v5071_v46  ;;  %v5255_v14 = vmul.f32 %v5247_v47, %v5071_v46  ;;  %v6467_v46 = vld [vmem:[%s9728_s1] sm:$0x1] }
0x24b3   :  { %v5131_v33 = vmul.f32 0.5, %v6467_v46 }
0x24b4   :  { %v5253_v7 = vadd.f32 %v5251_v41, %v5082_v34  ;;  %v6204_v8 = vpop.eup %6203 }
0x24b5   :  { %v5258_v1 = vmul.f32 %v6204_v8, %v6204_v8  ;;  %v5133_v23 = vperm.slane %v5131_v33, 0 }
0x24b6   :  { %6205 = vtanh.f32 %v5253_v7 }
0x24b7   :  { %v5260_v61 = vsub.f32 1.0, %v5258_v1  ;;  %6207 = vpow2.f32 %v5661_v40 }
0x24b8   :  { %6209 = vpow2.f32 %v5662_v16  ;;  %v5137_v16 = vmul.f32 0.5, %v6468_v15 }
0x24b9   :  { %v5262_v56 = vmul.f32 %v5260_v61, %v5254_v45 }
0x24bc   :  { %v6206_v30 = vpop.eup %6205 }
0x24bd   :  { %v5264_v9 = vpack.c.bf16 %v6206_v30, %v6204_v8  ;;  %v5259_v59 = vmul.f32 %v6206_v30, %v6206_v30  ;;  %v6208_v62 = vpop.eup %6207  ;;  %v9951_v8 = vld [vmem:[#allocation36_spill] sm:$0xff] }
0x24be   :  { %v5095_v25 = vadd.f32 1.0, %v6208_v62  ;;  %v6210_v20 = vpop.eup %6209  ;;  %v5139_v62 = vperm.slane %v5137_v16, 0 }
0x24bf   :  { %v5261_v50 = vsub.f32 1.0, %v5259_v59  ;;  %5273 = vmatmul.bf16.vlgmr.msra.gmra.mxu1 %v5264_v9  ;;  %v5096_v13 = vadd.f32 1.0, %v6210_v20 }
0x24c0   :  { %6211 = vrcp.f32 %v5095_v25  ;;  %vm5102_vm2 = vweird.f32 %v5095_v25  ;;  %v5108_v27 = vand.u32 2147483648, %v5095_v25  ;;  %v5106_v11 = vand.u32 2147483647, %v5095_v25 }
0x24c1   :  { %v5263_v52 = vmul.f32 %v5261_v50, %v5255_v14  ;;  %6213 = vrcp.f32 %v5096_v13  ;;  %vm5117_vm6 = vweird.f32 %v5096_v13  ;;  %v5123_v28 = vand.u32 2147483648, %v5096_v13 }
0x24c2   :  { %v5109_v21 = vor.u32 1.1754944e-38, %v5108_v27  ;;  %vm5107_vm5 = vcmp.eq.f32.partialorder %v5106_v11, 8.507059e+37  ;;  %v5121_v6 = vand.u32 2147483647, %v5096_v13 }
0x24c3   :  { %v5279_v5 = vpack.c.bf16 %v5263_v52, %v5262_v56  ;;  %v5124_v55 = vor.u32 1.1754944e-38, %v5123_v28 }
0x24c4   :  { %vm5122_vm9 = vcmp.eq.f32.partialorder %v5121_v6, 8.507059e+37 }
0x24c5   :  { %5288 = vmatmul.bf16.vlgmr.msrb.gmra.mxu2 %v5279_v5 }
0x24c6   :  { %v6212_v58 = vpop.eup %6211 }
0x24c7   :  { %v5098_v43 = vmul.f32 %v6212_v58, %v5095_v25  ;;  %v6214_v39 = vpop.eup %6213  ;;  %vm5103_vm3 = vweird.f32 %v6212_v58  ;;  %v9952_v25 = vld [vmem:[#allocation53_spill] sm:$0xff] }
0x24c8   :  { %v5113_v48 = vmul.f32 %v6214_v39, %v5096_v13  ;;  %vm5104_vm4 = vmor %vm5102_vm2, %vm5103_vm3  ;;  %vm5118_vm7 = vweird.f32 %v6214_v39  ;;  %v5141_v20 = vadd.f32 %v5139_v62, %v9952_v25 }
0x24c9   :  { %v5099_v36 = vsub.f32 1.0, %v5098_v43  ;;  %vm5119_vm8 = vmor %vm5117_vm6, %vm5118_vm7 }
0x24ca   :  { %v5114_v42 = vsub.f32 1.0, %v5113_v48  ;;  %v5663_v13 = vmul.f32 -1.442695, %v5141_v20 }
0x24cb   :  { %v5100_v0 = vmul.f32 %v6212_v58, %v5099_v36 }
0x24cc   :  { %v5115_v2 = vmul.f32 %v6214_v39, %v5114_v42 }
0x24cd   :  { %v5101_v53 = vadd.f32 %v6212_v58, %v5100_v0 }
0x24ce   :  { %v5116_v22 = vadd.f32 %v6214_v39, %v5115_v2 }
0x24cf   :  { %v5105_v51 = vsel %vm5104_vm4, %v6212_v58, %v5101_v53  ;;  %v9953_v58 = vld [vmem:[#allocation54_spill] sm:$0xff] }
0x24d0   :  { %v5110_v60 = vsel %vm5107_vm5, %v5109_v21, %v5105_v51  ;;  %v5120_v35 = vsel %vm5119_vm8, %v6214_v39, %v5116_v22  ;;  %v5142_v43 = vadd.f32 %v5139_v62, %v9953_v58 }
0x24d1   :  { %v5127_v10 = vmul.f32 %v6466_v38, %v5110_v60  ;;  %v5125_v37 = vsel %vm5122_vm9, %v5124_v55, %v5120_v35 }
0x24d2   :  { %v5128_v41 = vmul.f32 %v6466_v38, %v5125_v37  ;;  %v5664_v36 = vmul.f32 -1.442695, %v5142_v43 }
0x24d3   :  { %v5129_v17 = vadd.f32 %v5127_v10, %v9950_v12 }
0x24d4   :  { %v5130_v1 = vadd.f32 %v5128_v41, %v9951_v8  ;;  %v9954_v41 = vld [vmem:[#allocation45_spill] sm:$0xff] }
0x24d5   :  { %v5135_v32 = vadd.f32 %v5133_v23, %v5129_v17  ;;  %v6469_v17 = vld [vmem:[%s9734_s7] ss:$0 sm:$0xff] }
0x24d6   :  { %v5136_v47 = vadd.f32 %v5133_v23, %v5130_v1 }
0x253c   :  { %v5274_v19 = vpop.f32.mrf.mxu1 }
0x253d   :  { %v5294_v34 = vmul.f32 %v5274_v19, %v5110_v60 }
0x253f   :  { %v5296_v7 = vadd.f32 %v5294_v34, %v5135_v32 }
0x2541   :  { %6215 = vtanh.f32 %v5296_v7 }
0x2544   :  { %v5276_v30 = vpop.f32.mrf.mxu1 }
0x2545   :  { %v5295_v61 = vmul.f32 %v5276_v30, %v5125_v37 }
0x2547   :  { %v5297_v9 = vadd.f32 %v5295_v61, %v5136_v47  ;;  %v6216_v45 = vpop.eup %6215 }
0x2548   :  { %v5289_v59 = vpop.f32.mrf.mxu2  ;;  %v5302_v14 = vmul.f32 %v6216_v45, %v6216_v45 }
0x2549   :  { %6217 = vtanh.f32 %v5297_v9  ;;  %v5298_v52 = vmul.f32 %v5289_v59, %v5110_v60 }
0x254a   :  { %v5304_v5 = vsub.f32 1.0, %v5302_v14  ;;  %6219 = vpow2.f32 %v5663_v13 }
0x254b   :  { %6221 = vpow2.f32 %v5664_v36 }
0x254c   :  { %v5306_v26 = vmul.f32 %v5304_v5, %v5298_v52  ;;  %v9955_v52 = vld [vmem:[#allocation48_spill] sm:$0xff] }
0x254f   :  { %v6218_v50 = vpop.eup %6217 }
0x2550   :  { %v5308_v56 = vpack.c.bf16 %v6218_v50, %v6216_v45  ;;  %v5291_v54 = vpop.f32.mrf.mxu2  ;;  %v5303_v18 = vmul.f32 %v6218_v50, %v6218_v50  ;;  %v6220_v39 = vpop.eup %6219 }
0x2551   :  { %v5299_v24 = vmul.f32 %v5291_v54, %v5125_v37  ;;  %v5149_v0 = vadd.f32 1.0, %v6220_v39  ;;  %v6222_v48 = vpop.eup %6221  ;;  %v6470_v37 = vld [vmem:[%s6799_s6] sm:$0x1]  ;;  %s6579_s6 = sshra.s32 %s5390_s29, 4  ;;  %s6580_s6 = int_to_ptr.hbm [resolvable:$true] %s6579_s6 }
0x2552   :  { %v5305_v4 = vsub.f32 1.0, %v5303_v18  ;;  %5317 = vmatmul.bf16.vlgmr.msrb.gmra.mxu3 %v5308_v56  ;;  %v5150_v27 = vadd.f32 1.0, %v6222_v48  ;;  %v5185_v19 = vmul.f32 0.5, %v6470_v37  ;;  %s6581_s11 = scalar_lea.hbm %s6580_s6, 16  ;;  %p6584_p7 = scmp.lt.s32.totalorder %s6580_s6, %s6809_s4 }
0x2553   :  { %6223 = vrcp.f32 %v5149_v0  ;;  %vm5156_vm10 = vweird.f32 %v5149_v0  ;;  %v5162_v60 = vand.u32 2147483648, %v5149_v0  ;;  %v5160_v22 = vand.u32 2147483647, %v5149_v0  ;;  %p6582_p6 = scmp.ne.s32.totalorder %s6580_s6, %s6581_s11  ;;  %p6585_p8 = scmp.lt.s32.totalorder %s6583_s16, %s6581_s11 }
0x2554   :  { %v5307_v40 = vmul.f32 %v5305_v4, %v5299_v24  ;;  %6225 = vrcp.f32 %v5150_v27  ;;  %vm5171_vm14 = vweird.f32 %v5150_v27  ;;  %v5177_v55 = vand.u32 2147483648, %v5150_v27 }
0x2555   :  { %v5163_v38 = vor.u32 1.1754944e-38, %v5162_v60  ;;  %vm5161_vm13 = vcmp.eq.f32.partialorder %v5160_v22, 8.507059e+37  ;;  %v5175_v12 = vand.u32 2147483647, %v5150_v27  ;;  %v5187_v8 = vperm.slane %v5185_v19, 0  ;;  %p6586_p9 = por %p6585_p8, %p6584_p7 }
0x2556   :  { %v5323_v31 = vpack.c.bf16 %v5307_v40, %v5306_v26  ;;  %v5178_v32 = vor.u32 1.1754944e-38, %v5177_v55 }
0x2557   :  { %vm5176_vm1 = vcmp.eq.f32.partialorder %v5175_v12, 8.507059e+37  ;;  %p6587_p10 = pnand %p6586_p9, %p6582_p6 }
0x2558   :  { %5332 = vmatmul.bf16.vlgmr.msrb.gmra.mxu0 %v5323_v31 }
0x2559   :  { %v6224_v53 = vpop.eup %6223 }
0x255a   :  { %v5152_v11 = vmul.f32 %v6224_v53, %v5149_v0  ;;  %v6226_v21 = vpop.eup %6225  ;;  %vm5157_vm11 = vweird.f32 %v6224_v53 }
0x255b   :  { %v5167_v2 = vmul.f32 %v6226_v21, %v5150_v27  ;;  %vm5158_vm12 = vmor %vm5156_vm10, %vm5157_vm11  ;;  %vm5172_vm15 = vweird.f32 %v6226_v21 }
0x255c   :  { %v5153_v42 = vsub.f32 1.0, %v5152_v11  ;;  %vm5173_vm0 = vmor %vm5171_vm14, %vm5172_vm15 }
0x255d   :  { %v5168_v6 = vsub.f32 1.0, %v5167_v2 }
0x255e   :  { %v5154_v51 = vmul.f32 %v6224_v53, %v5153_v42 }
0x255f   :  { %v5169_v46 = vmul.f32 %v6226_v21, %v5168_v6 }
0x2560   :  { %v5155_v28 = vadd.f32 %v6224_v53, %v5154_v51 }
0x2561   :  { %v5170_v35 = vadd.f32 %v6226_v21, %v5169_v46 }
0x2562   :  { %v5159_v10 = vsel %vm5158_vm12, %v6224_v53, %v5155_v28 }
0x2563   :  { %v5164_v33 = vsel %vm5161_vm13, %v5163_v38, %v5159_v10  ;;  %v5174_v34 = vsel %vm5173_vm0, %v6226_v21, %v5170_v35 }
0x2564   :  { %v5181_v23 = vmul.f32 %v6469_v17, %v5164_v33  ;;  %v5179_v1 = vsel %vm5176_vm1, %v5178_v32, %v5174_v34 }
0x2565   :  { %v5182_v45 = vmul.f32 %v6469_v17, %v5179_v1 }
0x2566   :  { %v5183_v7 = vadd.f32 %v5181_v23, %v9954_v41 }
0x2567   :  { %v5184_v5 = vadd.f32 %v5182_v45, %v9955_v52 }
0x2568   :  { %v5189_v61 = vadd.f32 %v5187_v8, %v5183_v7 }
0x2569   :  { %v5190_v26 = vadd.f32 %v5187_v8, %v5184_v5 }
0x25d5   :  { %v5318_v30 = vpop.f32.mrf.mxu3  ;;  %v5333_v47 = vpop.f32.mrf.mxu0 }
0x25d6   :  { %v5338_v9 = vmul.f32 %v5318_v30, %v5164_v33  ;;  %v5342_v59 = vmul.f32 %v5333_v47, %v5164_v33 }
0x25d8   :  { %v5340_v14 = vadd.f32 %v5338_v9, %v5189_v61  ;;  %v5344_v50 = vmul.f32 %v9436_v3, %v5342_v59 }
0x25da   :  { %v5358_v56 = vadd.f32 %v9506_v49, %v5340_v14  ;;  %5346 = vadd.xlane.f32.xlu0 %v5344_v50 }
0x25dc   :  { %v5360_v54 = vmul.f32 0.020833334, %v5358_v56 }
0x25dd   :  { %v5320_v18 = vpop.f32.mrf.mxu3  ;;  %v5335_v24 = vpop.f32.mrf.mxu0 }
0x25de   :  { %v5362_v4 = vadd.f32 %v5360_v54, %v9157_v29  ;;  %v5339_v40 = vmul.f32 %v5320_v18, %v5179_v1  ;;  %v5343_v31 = vmul.f32 %v5335_v24, %v5179_v1 }
0x25e0   :  { %5378 = vst [vmem:[#allocation10] sm:$0xff] %v5362_v4  ;;  %v5341_v15 = vadd.f32 %v5339_v40, %v5190_v26  ;;  %v5345_v16 = vmul.f32 %v9441_v44, %v5343_v31 }
0x25e2   :  { %v5359_v3 = vadd.f32 %v9511_v57, %v5341_v15  ;;  %5348 = vadd.xlane.f32.xlu1 %v5345_v16 }
0x25e4   :  { %v5361_v49 = vmul.f32 0.020833334, %v5359_v3 }
0x25e6   :  { %v5363_v29 = vadd.f32 %v5361_v49, %v9160_v63 }
0x25e8   :  { %5379 = vst [vmem:[#allocation10 + $0x8] sm:$0xff] %v5363_v29 }
0x25e9   :  { %6590 = shalt.err (!%p6587_p10)
}
0x25ea   :  { %s6639_s18 = smov 128   ;;  %s6640_s21 = smov 8   ;;  %v1116_v44 = vpop.xlane.xlu0 %1115  ;;  %v1656_v57 = vpop.xlane.xlu2 %1655  ;;  %vm5380_vm2 = vcmask 7168  }
0x25eb   :  { %5395 = dma.vmem_to_hbm [thread:$0]  %s5388_s9, 256, %s5390_s29, [#allocation4], %s6639_s18, %s6639_s18, %s6640_s21   ;;  %v1495_v62 = vpop.xlane.xlu1 %1494  ;;  %v2056_v10 = vmul.f32 2.0, %v1656_v57 }
0x25ec   :  { %v2052_v22 = vmul.f32 2.0, %v1495_v62  ;;  %s9956_s4 = sld [smem:[#allocation15_spill]] }
0x25ee   :  { %v2054_v55 = vadd.f32 %v2052_v22, %v1116_v44 }
0x25f0   :  { %v2058_v17 = vadd.f32 %v2056_v10, %v2054_v55 }
0x25f2   :  { %v1118_v25 = vpop.xlane.xlu0 %1117  ;;  %v1658_v20 = vpop.xlane.xlu2 %1657  ;;  %v524_v50 = vld [vmem:[%s9956_s4] sm:$0xff] }
0x25f3   :  { %v1497_v63 = vpop.xlane.xlu1 %1496  ;;  %v2057_v1 = vmul.f32 2.0, %v1658_v20 }
0x25f4   :  { %v2053_v19 = vmul.f32 2.0, %v1497_v63 }
0x25f6   :  { %v2055_v45 = vadd.f32 %v2053_v19, %v1118_v25 }
0x25f8   :  { %v2059_v18 = vadd.f32 %v2057_v1, %v2055_v45 }
0x25fa   :  { %v2035_v13 = vpop.xlane.xlu0 %2034  ;;  %v2220_v58 = vpop.xlane.xlu2 %2219 }
0x25fb   :  { %v2037_v43 = vpop.xlane.xlu1 %2036  ;;  %v2060_v32 = vadd.f32 %v2058_v17, %v2035_v13 }
0x25fc   :  { %v2061_v15 = vadd.f32 %v2059_v18, %v2037_v43  ;;  %v525_v43 = vld [vmem:[%s9956_s4 + $0x8] sm:$0xff] }
0x25fd   :  { %v2062_v14 = vmul.f32 0.020833334, %v2060_v32 }
0x25ff   :  { %v2064_v31 = vsub.f32 %v524_v50, %v2062_v14 }
0x2602   :  { %v2222_v36 = vpop.xlane.xlu0 %2221  ;;  %v2601_v39 = vpop.xlane.xlu2 %2600 }
0x2603   :  { %v2599_v0 = vpop.xlane.xlu1 %2598  ;;  %v3157_v61 = vmul.f32 2.0, %v2601_v39  ;;  %v2063_v39 = vmul.f32 0.020833334, %v2061_v15 }
0x2604   :  { %v3156_v46 = vmul.f32 2.0, %v2599_v0 }
0x2605   :  { %v3159_v4 = vadd.f32 %v3157_v61, %v2222_v36 }
0x2606   :  { %v3158_v23 = vadd.f32 %v3156_v46, %v2220_v58 }
0x260a   :  { %v2760_v48 = vpop.xlane.xlu0 %2759  ;;  %v3141_v27 = vpop.xlane.xlu2 %3140 }
0x260b   :  { %v2762_v53 = vpop.xlane.xlu1 %2761  ;;  %v3160_v35 = vmul.f32 2.0, %v2760_v48 }
0x260c   :  { %v3161_v56 = vmul.f32 2.0, %v2762_v53 }
0x260d   :  { %v3162_v34 = vadd.f32 %v3160_v35, %v3158_v23 }
0x260e   :  { %v3163_v16 = vadd.f32 %v3161_v56, %v3159_v4 }
0x2610   :  { %v3165_v20 = vadd.f32 %v3163_v16, %v3141_v27 }
0x2612   :  { %v3705_v11 = vpop.xlane.xlu0 %3704  ;;  %v3326_v42 = vpop.xlane.xlu2 %3325 }
0x2613   :  { %v3139_v21 = vpop.xlane.xlu1 %3138  ;;  %v4261_v52 = vmul.f32 2.0, %v3705_v11  ;;  %v3167_v11 = vmul.f32 0.020833334, %v3165_v20 }
0x2614   :  { %v3164_v30 = vadd.f32 %v3162_v34, %v3139_v21 }
0x2615   :  { %v4263_v3 = vadd.f32 %v4261_v52, %v3326_v42 }
0x2616   :  { %v3166_v24 = vmul.f32 0.020833334, %v3164_v30 }
0x2618   :  { %v3168_v57 = vsub.f32 %v2064_v31, %v3166_v24 }
0x261a   :  { %v3864_v51 = vpop.xlane.xlu0 %3863  ;;  %v3703_v2 = vpop.xlane.xlu2 %3702 }
0x261b   :  { %v3324_v60 = vpop.xlane.xlu1 %3323  ;;  %v4260_v12 = vmul.f32 2.0, %v3703_v2  ;;  %v4264_v37 = vmul.f32 2.0, %v3864_v51  ;;  %v2065_v51 = vsub.f32 %v525_v43, %v2063_v39 }
0x261d   :  { %v4262_v7 = vadd.f32 %v4260_v12, %v3324_v60 }
0x261f   :  { %v4266_v9 = vadd.f32 %v4264_v37, %v4262_v7 }
0x2622   :  { %v4428_v28 = vpop.xlane.xlu0 %4427  ;;  %v4807_v6 = vpop.xlane.xlu2 %4806 }
0x2623   :  { %v3866_v38 = vpop.xlane.xlu1 %3865  ;;  %v5364_v59 = vmul.f32 2.0, %v4807_v6 }
0x2624   :  { %v4265_v26 = vmul.f32 2.0, %v3866_v38 }
0x2625   :  { %v5366_v40 = vadd.f32 %v5364_v59, %v4428_v28  ;;  %v3169_v28 = vsub.f32 %v2065_v51, %v3167_v11 }
0x2626   :  { %v4267_v13 = vadd.f32 %v4265_v26, %v4263_v3 }
0x262a   :  { %v4809_v33 = vpop.xlane.xlu0 %4808  ;;  %v4968_v41 = vpop.xlane.xlu2 %4967 }
0x262b   :  { %v4243_v8 = vpop.xlane.xlu1 %4242  ;;  %v5368_v54 = vmul.f32 2.0, %v4968_v41  ;;  %v5365_v63 = vmul.f32 2.0, %v4809_v33 }
0x262c   :  { %v4268_v5 = vadd.f32 %v4266_v9, %v4243_v8 }
0x262d   :  { %v5370_v44 = vadd.f32 %v5368_v54, %v5366_v40 }
0x262e   :  { %v4270_v49 = vmul.f32 0.020833334, %v4268_v5 }
0x2630   :  { %v4272_v36 = vsub.f32 %v3168_v57, %v4270_v49 }
0x2632   :  { %v4970_v47 = vpop.xlane.xlu0 %4969  ;;  %v4245_v62 = vpop.xlane.xlu2 %4244 }
0x2633   :  { %v4430_v29 = vpop.xlane.xlu1 %4429  ;;  %v4269_v0 = vadd.f32 %v4267_v13, %v4245_v62  ;;  %v5369_v48 = vmul.f32 2.0, %v4970_v47 }
0x2634   :  { %v5367_v42 = vadd.f32 %v5365_v63, %v4430_v29 }
0x2635   :  { %v4271_v2 = vmul.f32 0.020833334, %v4269_v0 }
0x2636   :  { %v5371_v60 = vadd.f32 %v5369_v48, %v5367_v42 }
0x2637   :  { %v4273_v6 = vsub.f32 %v3169_v28, %v4271_v2 }
0x264d   :  { %v5347_v25 = vpop.xlane.xlu0 %5346 }
0x264e   :  { %v5372_v58 = vadd.f32 %v5370_v44, %v5347_v25 }
0x2650   :  { %v5374_v53 = vmul.f32 0.020833334, %v5372_v58 }
0x2652   :  { %v5376_v21 = vsub.f32 %v4272_v36, %v5374_v53 }
0x2654   :  { %5381 = vst.msk [vmem:[%s6814_s8] sm:$0xff] %vm5380_vm2, %v5376_v21 }
0x2655   :  { %v5349_v27 = vpop.xlane.xlu1 %5348 }
0x2656   :  { %v5373_v22 = vadd.f32 %v5371_v60, %v5349_v27 }
0x2658   :  { %v5375_v38 = vmul.f32 0.020833334, %v5373_v22 }
0x265a   :  { %v5377_v10 = vsub.f32 %v4273_v6, %v5375_v38 }
0x265c   :  { %5382 = vst.msk [vmem:[%s6814_s8 + $0x8] sm:$0xff] %vm5380_vm2, %v5377_v10 }
0x265d   :  { %6597 = dma.done.wait [#allocation4], 256  }
0x265e   :  { %6598 = vsyncadd [#allocation4], 4294967040 }
0x265f   :  { %5404 = vsyncpa [#allocation3], 1 }
0x2660   :  { %5405 = vsyncpa [#allocation6], 1 }
0x2661   :  { %5406 = vsyncpa [#allocation9], 1 }
0x2662   :  { %5407 = vsyncpa [#allocation4], 1 }

</bundles_post_ra>
